<compile_context>
chip_gen: v7x
topology: tpu7x:2x2x1
jax: 0.10.0
libtpu: 0.0.40
codegen_flags: <defaults>
</compile_context>

<pallas_src>
import functools

import jax
import jax.numpy as jnp
from jax.experimental import pallas as pl
from jax.experimental.pallas import tpu as pltpu

LEAKY_SLOPE = 0.2
BN_EPS = 1e-5
COMPUTE_DTYPE = jnp.bfloat16


# ----------------------------------------------------------------------------
# Pallas kernel: K-tiled matmul with f32 accumulator + shift + activation
# ----------------------------------------------------------------------------
def _fused_matmul_kernel(x_ref, w_ref, t_ref, o_ref, acc_ref, *, act):
    # x_ref: (tm, tk) bf16 patches        w_ref: (tk, tn) bf16 (BN scale folded)
    # t_ref: (1, tn)  f32 per-channel shift (conv bias + BN beta/mean folded)
    # o_ref: (tm, tn) output block        acc_ref: (tm, tn) f32 scratch
    @pl.when(pl.program_id(2) == 0)
    def _init():
        acc_ref[...] = jnp.zeros_like(acc_ref)

    acc_ref[...] += jnp.dot(
        x_ref[...], w_ref[...], preferred_element_type=jnp.float32
    )

    @pl.when(pl.program_id(2) == pl.num_programs(2) - 1)
    def _finalize():
        y = acc_ref[...] + t_ref[...]
        if act == "leaky":
            y = jnp.where(y >= 0.0, y, LEAKY_SLOPE * y)
        elif act == "sigmoid":
            y = 1.0 / (1.0 + jnp.exp(-y))
        o_ref[...] = y.astype(o_ref.dtype)


def _choose_tiles(m, n, k):
    # K: tile large reductions so weight-tile DMA pipelines against the MXU and
    # per-block VMEM stays small (v5e scoped-VMEM default is only 16 MiB).
    tk = k if k <= 512 else 512
    # N: stay lane-dense (>=128 where the layer allows it) but split big Cout so
    # v7x's two TensorCores each get a parallel block.
    if n >= 512:
        tn = 256
    elif n == 256:
        tn = 128
    else:
        tn = n
    # M: big blocks to amortize per-grid-step overhead; keep >=2 parallel steps
    # for layers whose Cout does not split.
    if m >= 2048:
        tm = 1024
    elif m >= 512:
        tm = m // 2
    else:
        tm = m
    assert m % tm == 0 and n % tn == 0 and k % tk == 0, (m, n, k, tm, tn, tk)
    return tm, tn, tk


def fused_matmul_bias_act(patches, w2d, shift, *, act, out_dtype):
    m, k = patches.shape
    k2, n = w2d.shape
    assert k == k2
    tm, tn, tk = _choose_tiles(m, n, k)
    grid = (m // tm, n // tn, k // tk)

    return pl.pallas_call(
        functools.partial(_fused_matmul_kernel, act=act),
        out_shape=jax.ShapeDtypeStruct((m, n), out_dtype),
        grid_spec=pltpu.PrefetchScalarGridSpec(
            num_scalar_prefetch=0,
            grid=grid,
            in_specs=[
                pl.BlockSpec((tm, tk), lambda i, j, kk: (i, kk)),
                pl.BlockSpec((tk, tn), lambda i, j, kk: (kk, j)),
                pl.BlockSpec((1, tn), lambda i, j, kk: (0, j)),
            ],
            out_specs=pl.BlockSpec((tm, tn), lambda i, j, kk: (i, j)),
            scratch_shapes=[pltpu.VMEM((tm, tn), jnp.float32)],
        ),
        compiler_params=pltpu.CompilerParams(
            dimension_semantics=("parallel", "parallel", "arbitrary")
        ),
    )(patches, w2d, shift)


# ----------------------------------------------------------------------------
# Glue: im2col patch extraction (NHWC, bf16)
# ----------------------------------------------------------------------------
def im2col(x, kh, kw, stride, pad):
    # x: (N, H, W, C) -> patches (N*Ho*Wo, kh*kw*C), ordered (kh, kw, C)
    n, h, w, c = x.shape
    if pad > 0:
        x = jnp.pad(x, ((0, 0), (pad, pad), (pad, pad), (0, 0)))
    hp, wp = x.shape[1], x.shape[2]
    ho = (hp - kh) // stride + 1
    wo = (wp - kw) // stride + 1
    patches = []
    for i in range(kh):
        for j in range(kw):
            patches.append(
                x[:, i : i + stride * ho : stride, j : j + stride * wo : stride, :]
            )
    p = jnp.concatenate(patches, axis=-1)  # (N, Ho, Wo, kh*kw*C)
    return p.reshape(n * ho * wo, kh * kw * c), (n, ho, wo)


def fused_conv(x_nhwc, w2d, shift, *, kh, kw, stride, pad, act, out_dtype):
    patches, (n, ho, wo) = im2col(x_nhwc, kh, kw, stride, pad)
    cout = w2d.shape[1]
    out = fused_matmul_bias_act(patches, w2d, shift, act=act, out_dtype=out_dtype)
    return out.reshape(n, ho, wo, cout)


# ----------------------------------------------------------------------------
# Parameter construction (deterministic, DCGAN-style init, BN folded)
# ----------------------------------------------------------------------------
def make_params(key):
    # conv weights ~ N(0, 0.02); conv bias = 0; BN gamma=1, beta=0,
    # running_mean=0, running_var=1 (eval-mode stats).
    # Returns per-layer (w2d[K, Cout] bf16 with BN scale folded, shift[1, Cout] f32).
    dims = [(3, 64), (64, 128), (128, 256), (256, 512), (512, 1)]
    has_bn = [False, True, True, True, False]
    params = []
    keys = jax.random.split(key, len(dims))
    for (cin, cout), bn, kk in zip(dims, has_bn, keys):
        w = 0.02 * jax.random.normal(kk, (4, 4, cin, cout), dtype=jnp.float32)
        b = jnp.zeros((cout,), jnp.float32)
        if bn:
            gamma = jnp.ones((cout,), jnp.float32)
            beta = jnp.zeros((cout,), jnp.float32)
            run_mean = jnp.zeros((cout,), jnp.float32)
            run_var = jnp.ones((cout,), jnp.float32)
            scale = gamma / jnp.sqrt(run_var + BN_EPS)
            shift = (b - run_mean) * scale + beta
        else:
            scale = jnp.ones((cout,), jnp.float32)
            shift = b
        w2d = (w.reshape(4 * 4 * cin, cout) * scale[None, :]).astype(COMPUTE_DTYPE)
        params.append((w2d, shift.reshape(1, cout).astype(jnp.float32)))
    return params


# ----------------------------------------------------------------------------
# Discriminator forward
# ----------------------------------------------------------------------------
def discriminator_forward(x_nchw, params):
    # x_nchw: (N, 3, 64, 64) float32
    x = jnp.transpose(x_nchw, (0, 2, 3, 1)).astype(COMPUTE_DTYPE)  # NCHW -> NHWC
    layer_specs = [
        dict(stride=2, pad=1, act="leaky", out_dtype=COMPUTE_DTYPE),    # 3 -> 64
        dict(stride=2, pad=1, act="leaky", out_dtype=COMPUTE_DTYPE),    # 64 -> 128 (+BN)
        dict(stride=2, pad=1, act="leaky", out_dtype=COMPUTE_DTYPE),    # 128 -> 256 (+BN)
        dict(stride=2, pad=1, act="leaky", out_dtype=COMPUTE_DTYPE),    # 256 -> 512 (+BN)
        dict(stride=1, pad=0, act="sigmoid", out_dtype=jnp.float32),    # 512 -> 1
    ]
    for (w2d, shift), sp in zip(params, layer_specs):
        x = fused_conv(x, w2d, shift, kh=4, kw=4, **sp)
    # NHWC -> NCHW for the final (N, 1, 1, 1) output, matching PyTorch.
    return jnp.transpose(x, (0, 3, 1, 2))


if __name__ == "__main__":
    key = jax.random.PRNGKey(0)
    k_param, k_input = jax.random.split(key)

    params = make_params(k_param)
    x = jax.random.normal(k_input, (2, 3, 64, 64), dtype=jnp.float32)  # NCHW

    fwd = jax.jit(discriminator_forward)
    out = fwd(x, params)
    out = jax.block_until_ready(out)

    assert out.shape == (2, 1, 1, 1), out.shape
    assert bool(jnp.all(jnp.isfinite(out)))
    assert bool(jnp.all((out >= 0.0) & (out <= 1.0)))  # sigmoid range
    print("KERNEL_OK")
</pallas_src>

<mosaic_0001>
module attributes {stable_mosaic.version = 11 : i64} {
  func.func @_fused_matmul_kernel(%arg0: i32, %arg1: i32, %arg2: i32, %arg3: memref<1024x48xbf16, #tpu.memory_space<vmem>>, %arg4: memref<48x64xbf16, #tpu.memory_space<vmem>>, %arg5: memref<1x64xf32, #tpu.memory_space<vmem>>, %arg6: memref<1024x64xbf16, #tpu.memory_space<vmem>>, %arg7: memref<1024x64xf32, #tpu.memory_space<vmem>>) attributes {dimension_semantics = [#tpu.dimension_semantics<parallel>, #tpu.dimension_semantics<parallel>, #tpu.dimension_semantics<arbitrary>], iteration_bounds = array<i64: 2, 1, 1>, scalar_prefetch = 0 : i64, scratch_operands = 1 : i64, tpu.core_type = #tpu.core_type<tc>, window_params = [{transform_indices = @transform_0, window_bounds = array<i64: 1024, 48>}, {transform_indices = @transform_1, window_bounds = array<i64: 48, 64>}, {transform_indices = @transform_2, window_bounds = array<i64: 1, 64>}, {transform_indices = @transform_3, window_bounds = array<i64: 1024, 64>}]} {
    %c0_i32 = arith.constant 0 : i32
    %0 = arith.cmpi eq, %arg2, %c0_i32 : i32
    %1 = arith.extui %0 : i1 to i32
    %c0_i32_0 = arith.constant 0 : i32
    %2 = arith.cmpi ne, %1, %c0_i32_0 : i32
    scf.if %2 {
      %cst_10 = arith.constant 0.000000e+00 : f32
      %12 = vector.broadcast %cst_10 : f32 to vector<1024x64xf32>
      %c0_11 = arith.constant 0 : index
      %c0_12 = arith.constant 0 : index
      %13 = vector.load %arg7[%c0_11, %c0_12] : memref<1024x64xf32, #tpu.memory_space<vmem>>, vector<1024x64xf32>
      tpu.vector_store %arg7[%c0_11, %c0_12], %12 {strides = array<i32>} : memref<1024x64xf32, #tpu.memory_space<vmem>>, vector<1024x64xf32>,
    } else {
    }
    %c0 = arith.constant 0 : index
    %c0_1 = arith.constant 0 : index
    %3 = vector.load %arg7[%c0, %c0_1] : memref<1024x64xf32, #tpu.memory_space<vmem>>, vector<1024x64xf32>
    %c0_2 = arith.constant 0 : index
    %c0_3 = arith.constant 0 : index
    %4 = vector.load %arg3[%c0_2, %c0_3] : memref<1024x48xbf16, #tpu.memory_space<vmem>>, vector<1024x48xbf16>
    %c0_4 = arith.constant 0 : index
    %c0_5 = arith.constant 0 : index
    %5 = vector.load %arg4[%c0_4, %c0_5] : memref<48x64xbf16, #tpu.memory_space<vmem>>, vector<48x64xbf16>
    %cst = arith.constant dense<0.000000e+00> : vector<1024x64xf32>
    %6 = tpu.matmul %4, %5, %cst {dimension_numbers = #tpu.dot_dimension_numbers<[1], [0], [0], [1], [0, 0, 1, 1], [], []>} : vector<1024x48xbf16>, vector<48x64xbf16>, vector<1024x64xf32> -> vector<1024x64xf32>
    %7 = arith.addf %3, %6 : vector<1024x64xf32>
    %c0_6 = arith.constant 0 : index
    %c0_7 = arith.constant 0 : index
    %8 = vector.load %arg7[%c0_6, %c0_7] : memref<1024x64xf32, #tpu.memory_space<vmem>>, vector<1024x64xf32>
    tpu.vector_store %arg7[%c0_6, %c0_7], %7 {strides = array<i32>} : memref<1024x64xf32, #tpu.memory_space<vmem>>, vector<1024x64xf32>,
    %c0_i32_8 = arith.constant 0 : i32
    %9 = arith.cmpi eq, %arg2, %c0_i32_8 : i32
    %10 = arith.extui %9 : i1 to i32
    %c0_i32_9 = arith.constant 0 : i32
    %11 = arith.cmpi ne, %10, %c0_i32_9 : i32
    scf.if %11 {
      %c0_10 = arith.constant 0 : index
      %c0_11 = arith.constant 0 : index
      %12 = vector.load %arg7[%c0_10, %c0_11] : memref<1024x64xf32, #tpu.memory_space<vmem>>, vector<1024x64xf32>
      %c0_12 = arith.constant 0 : index
      %c0_13 = arith.constant 0 : index
      %13 = vector.load %arg5[%c0_12, %c0_13] : memref<1x64xf32, #tpu.memory_space<vmem>>, vector<1x64xf32>
      %14 = vector.broadcast %13 : vector<1x64xf32> to vector<1024x64xf32>
      %15 = arith.addf %12, %14 : vector<1024x64xf32>
      %cst_14 = arith.constant 0.000000e+00 : f32
      %16 = vector.broadcast %cst_14 : f32 to vector<1024x64xf32>
      %17 = arith.cmpf oge, %15, %16 : vector<1024x64xf32>
      %cst_15 = arith.constant 2.000000e-01 : f32
      %18 = vector.broadcast %cst_15 : f32 to vector<1024x64xf32>
      %19 = arith.mulf %18, %15 : vector<1024x64xf32>
      %20 = arith.select %17, %15, %19 : vector<1024x64xi1>, vector<1024x64xf32>
      %21 = arith.truncf %20 : vector<1024x64xf32> to vector<1024x64xbf16>
      %c0_16 = arith.constant 0 : index
      %c0_17 = arith.constant 0 : index
      %22 = vector.load %arg6[%c0_16, %c0_17] : memref<1024x64xbf16, #tpu.memory_space<vmem>>, vector<1024x64xbf16>
      tpu.vector_store %arg6[%c0_16, %c0_17], %21 {strides = array<i32>} : memref<1024x64xbf16, #tpu.memory_space<vmem>>, vector<1024x64xbf16>,
    } else {
    }
    return
  }
  func.func @transform_0(%arg0: i32, %arg1: i32, %arg2: i32) -> (i32, i32) {
    %c0_i32 = arith.constant 0 : i32
    return %arg0, %arg2 : i32, i32
  }
  func.func @transform_1(%arg0: i32, %arg1: i32, %arg2: i32) -> (i32, i32) {
    %c0_i32 = arith.constant 0 : i32
    return %arg2, %arg1 : i32, i32
  }
  func.func @transform_2(%arg0: i32, %arg1: i32, %arg2: i32) -> (i32, i32) {
    %c0_i32 = arith.constant 0 : i32
    %c0_i32_0 = arith.constant 0 : i32
    return %c0_i32, %arg1 : i32, i32
  }
  func.func @transform_3(%arg0: i32, %arg1: i32, %arg2: i32) -> (i32, i32) {
    %c0_i32 = arith.constant 0 : i32
    return %arg0, %arg1 : i32, i32
  }
}

module attributes {stable_mosaic.version = 11 : i64} {
  func.func @_fused_matmul_kernel(%arg0: i32, %arg1: i32, %arg2: i32, %arg3: memref<256x512xbf16, #tpu.memory_space<vmem>>, %arg4: memref<512x128xbf16, #tpu.memory_space<vmem>>, %arg5: memref<1x128xf32, #tpu.memory_space<vmem>>, %arg6: memref<256x128xbf16, #tpu.memory_space<vmem>>, %arg7: memref<256x128xf32, #tpu.memory_space<vmem>>) attributes {dimension_semantics = [#tpu.dimension_semantics<parallel>, #tpu.dimension_semantics<parallel>, #tpu.dimension_semantics<arbitrary>], iteration_bounds = array<i64: 2, 1, 2>, scalar_prefetch = 0 : i64, scratch_operands = 1 : i64, tpu.core_type = #tpu.core_type<tc>, window_params = [{transform_indices = @transform_0, window_bounds = array<i64: 256, 512>}, {transform_indices = @transform_1, window_bounds = array<i64: 512, 128>}, {transform_indices = @transform_2, window_bounds = array<i64: 1, 128>}, {transform_indices = @transform_3, window_bounds = array<i64: 256, 128>}]} {
    %c0_i32 = arith.constant 0 : i32
    %0 = arith.cmpi eq, %arg2, %c0_i32 : i32
    %1 = arith.extui %0 : i1 to i32
    %c0_i32_0 = arith.constant 0 : i32
    %2 = arith.cmpi ne, %1, %c0_i32_0 : i32
    scf.if %2 {
      %cst_9 = arith.constant 0.000000e+00 : f32
      %12 = vector.broadcast %cst_9 : f32 to vector<256x128xf32>
      %c0_10 = arith.constant 0 : index
      %c0_11 = arith.constant 0 : index
      %13 = vector.load %arg7[%c0_10, %c0_11] : memref<256x128xf32, #tpu.memory_space<vmem>>, vector<256x128xf32>
      tpu.vector_store %arg7[%c0_10, %c0_11], %12 {strides = array<i32>} : memref<256x128xf32, #tpu.memory_space<vmem>>, vector<256x128xf32>,
    } else {
    }
    %c0 = arith.constant 0 : index
    %c0_1 = arith.constant 0 : index
    %3 = vector.load %arg7[%c0, %c0_1] : memref<256x128xf32, #tpu.memory_space<vmem>>, vector<256x128xf32>
    %c0_2 = arith.constant 0 : index
    %c0_3 = arith.constant 0 : index
    %4 = vector.load %arg3[%c0_2, %c0_3] : memref<256x512xbf16, #tpu.memory_space<vmem>>, vector<256x512xbf16>
    %c0_4 = arith.constant 0 : index
    %c0_5 = arith.constant 0 : index
    %5 = vector.load %arg4[%c0_4, %c0_5] : memref<512x128xbf16, #tpu.memory_space<vmem>>, vector<512x128xbf16>
    %cst = arith.constant dense<0.000000e+00> : vector<256x128xf32>
    %6 = tpu.matmul %4, %5, %cst {dimension_numbers = #tpu.dot_dimension_numbers<[1], [0], [0], [1], [0, 0, 1, 1], [], []>} : vector<256x512xbf16>, vector<512x128xbf16>, vector<256x128xf32> -> vector<256x128xf32>
    %7 = arith.addf %3, %6 : vector<256x128xf32>
    %c0_6 = arith.constant 0 : index
    %c0_7 = arith.constant 0 : index
    %8 = vector.load %arg7[%c0_6, %c0_7] : memref<256x128xf32, #tpu.memory_space<vmem>>, vector<256x128xf32>
    tpu.vector_store %arg7[%c0_6, %c0_7], %7 {strides = array<i32>} : memref<256x128xf32, #tpu.memory_space<vmem>>, vector<256x128xf32>,
    %c1_i32 = arith.constant 1 : i32
    %9 = arith.cmpi eq, %arg2, %c1_i32 : i32
    %10 = arith.extui %9 : i1 to i32
    %c0_i32_8 = arith.constant 0 : i32
    %11 = arith.cmpi ne, %10, %c0_i32_8 : i32
    scf.if %11 {
      %c0_9 = arith.constant 0 : index
      %c0_10 = arith.constant 0 : index
      %12 = vector.load %arg7[%c0_9, %c0_10] : memref<256x128xf32, #tpu.memory_space<vmem>>, vector<256x128xf32>
      %c0_11 = arith.constant 0 : index
      %c0_12 = arith.constant 0 : index
      %13 = vector.load %arg5[%c0_11, %c0_12] : memref<1x128xf32, #tpu.memory_space<vmem>>, vector<1x128xf32>
      %14 = vector.broadcast %13 : vector<1x128xf32> to vector<256x128xf32>
      %15 = arith.addf %12, %14 : vector<256x128xf32>
      %cst_13 = arith.constant 0.000000e+00 : f32
      %16 = vector.broadcast %cst_13 : f32 to vector<256x128xf32>
      %17 = arith.cmpf oge, %15, %16 : vector<256x128xf32>
      %cst_14 = arith.constant 2.000000e-01 : f32
      %18 = vector.broadcast %cst_14 : f32 to vector<256x128xf32>
      %19 = arith.mulf %18, %15 : vector<256x128xf32>
      %20 = arith.select %17, %15, %19 : vector<256x128xi1>, vector<256x128xf32>
      %21 = arith.truncf %20 : vector<256x128xf32> to vector<256x128xbf16>
      %c0_15 = arith.constant 0 : index
      %c0_16 = arith.constant 0 : index
      %22 = vector.load %arg6[%c0_15, %c0_16] : memref<256x128xbf16, #tpu.memory_space<vmem>>, vector<256x128xbf16>
      tpu.vector_store %arg6[%c0_15, %c0_16], %21 {strides = array<i32>} : memref<256x128xbf16, #tpu.memory_space<vmem>>, vector<256x128xbf16>,
    } else {
    }
    return
  }
  func.func @transform_0(%arg0: i32, %arg1: i32, %arg2: i32) -> (i32, i32) {
    %c0_i32 = arith.constant 0 : i32
    return %arg0, %arg2 : i32, i32
  }
  func.func @transform_1(%arg0: i32, %arg1: i32, %arg2: i32) -> (i32, i32) {
    %c0_i32 = arith.constant 0 : i32
    return %arg2, %arg1 : i32, i32
  }
  func.func @transform_2(%arg0: i32, %arg1: i32, %arg2: i32) -> (i32, i32) {
    %c0_i32 = arith.constant 0 : i32
    %c0_i32_0 = arith.constant 0 : i32
    return %c0_i32, %arg1 : i32, i32
  }
  func.func @transform_3(%arg0: i32, %arg1: i32, %arg2: i32) -> (i32, i32) {
    %c0_i32 = arith.constant 0 : i32
    return %arg0, %arg1 : i32, i32
  }
}

module attributes {stable_mosaic.version = 11 : i64} {
  func.func @_fused_matmul_kernel(%arg0: i32, %arg1: i32, %arg2: i32, %arg3: memref<128x512xbf16, #tpu.memory_space<vmem>>, %arg4: memref<512x128xbf16, #tpu.memory_space<vmem>>, %arg5: memref<1x128xf32, #tpu.memory_space<vmem>>, %arg6: memref<128x128xbf16, #tpu.memory_space<vmem>>, %arg7: memref<128x128xf32, #tpu.memory_space<vmem>>) attributes {dimension_semantics = [#tpu.dimension_semantics<parallel>, #tpu.dimension_semantics<parallel>, #tpu.dimension_semantics<arbitrary>], iteration_bounds = array<i64: 1, 2, 4>, scalar_prefetch = 0 : i64, scratch_operands = 1 : i64, tpu.core_type = #tpu.core_type<tc>, window_params = [{transform_indices = @transform_0, window_bounds = array<i64: 128, 512>}, {transform_indices = @transform_1, window_bounds = array<i64: 512, 128>}, {transform_indices = @transform_2, window_bounds = array<i64: 1, 128>}, {transform_indices = @transform_3, window_bounds = array<i64: 128, 128>}]} {
    %c0_i32 = arith.constant 0 : i32
    %0 = arith.cmpi eq, %arg2, %c0_i32 : i32
    %1 = arith.extui %0 : i1 to i32
    %c0_i32_0 = arith.constant 0 : i32
    %2 = arith.cmpi ne, %1, %c0_i32_0 : i32
    scf.if %2 {
      %cst_9 = arith.constant 0.000000e+00 : f32
      %12 = vector.broadcast %cst_9 : f32 to vector<128x128xf32>
      %c0_10 = arith.constant 0 : index
      %c0_11 = arith.constant 0 : index
      %13 = vector.load %arg7[%c0_10, %c0_11] : memref<128x128xf32, #tpu.memory_space<vmem>>, vector<128x128xf32>
      tpu.vector_store %arg7[%c0_10, %c0_11], %12 {strides = array<i32>} : memref<128x128xf32, #tpu.memory_space<vmem>>, vector<128x128xf32>,
    } else {
    }
    %c0 = arith.constant 0 : index
    %c0_1 = arith.constant 0 : index
    %3 = vector.load %arg7[%c0, %c0_1] : memref<128x128xf32, #tpu.memory_space<vmem>>, vector<128x128xf32>
    %c0_2 = arith.constant 0 : index
    %c0_3 = arith.constant 0 : index
    %4 = vector.load %arg3[%c0_2, %c0_3] : memref<128x512xbf16, #tpu.memory_space<vmem>>, vector<128x512xbf16>
    %c0_4 = arith.constant 0 : index
    %c0_5 = arith.constant 0 : index
    %5 = vector.load %arg4[%c0_4, %c0_5] : memref<512x128xbf16, #tpu.memory_space<vmem>>, vector<512x128xbf16>
    %cst = arith.constant dense<0.000000e+00> : vector<128x128xf32>
    %6 = tpu.matmul %4, %5, %cst {dimension_numbers = #tpu.dot_dimension_numbers<[1], [0], [0], [1], [0, 0, 1, 1], [], []>} : vector<128x512xbf16>, vector<512x128xbf16>, vector<128x128xf32> -> vector<128x128xf32>
    %7 = arith.addf %3, %6 : vector<128x128xf32>
    %c0_6 = arith.constant 0 : index
    %c0_7 = arith.constant 0 : index
    %8 = vector.load %arg7[%c0_6, %c0_7] : memref<128x128xf32, #tpu.memory_space<vmem>>, vector<128x128xf32>
    tpu.vector_store %arg7[%c0_6, %c0_7], %7 {strides = array<i32>} : memref<128x128xf32, #tpu.memory_space<vmem>>, vector<128x128xf32>,
    %c3_i32 = arith.constant 3 : i32
    %9 = arith.cmpi eq, %arg2, %c3_i32 : i32
    %10 = arith.extui %9 : i1 to i32
    %c0_i32_8 = arith.constant 0 : i32
    %11 = arith.cmpi ne, %10, %c0_i32_8 : i32
    scf.if %11 {
      %c0_9 = arith.constant 0 : index
      %c0_10 = arith.constant 0 : index
      %12 = vector.load %arg7[%c0_9, %c0_10] : memref<128x128xf32, #tpu.memory_space<vmem>>, vector<128x128xf32>
      %c0_11 = arith.constant 0 : index
      %c0_12 = arith.constant 0 : index
      %13 = vector.load %arg5[%c0_11, %c0_12] : memref<1x128xf32, #tpu.memory_space<vmem>>, vector<1x128xf32>
      %14 = vector.broadcast %13 : vector<1x128xf32> to vector<128x128xf32>
      %15 = arith.addf %12, %14 : vector<128x128xf32>
      %cst_13 = arith.constant 0.000000e+00 : f32
      %16 = vector.broadcast %cst_13 : f32 to vector<128x128xf32>
      %17 = arith.cmpf oge, %15, %16 : vector<128x128xf32>
      %cst_14 = arith.constant 2.000000e-01 : f32
      %18 = vector.broadcast %cst_14 : f32 to vector<128x128xf32>
      %19 = arith.mulf %18, %15 : vector<128x128xf32>
      %20 = arith.select %17, %15, %19 : vector<128x128xi1>, vector<128x128xf32>
      %21 = arith.truncf %20 : vector<128x128xf32> to vector<128x128xbf16>
      %c0_15 = arith.constant 0 : index
      %c0_16 = arith.constant 0 : index
      %22 = vector.load %arg6[%c0_15, %c0_16] : memref<128x128xbf16, #tpu.memory_space<vmem>>, vector<128x128xbf16>
      tpu.vector_store %arg6[%c0_15, %c0_16], %21 {strides = array<i32>} : memref<128x128xbf16, #tpu.memory_space<vmem>>, vector<128x128xbf16>,
    } else {
    }
    return
  }
  func.func @transform_0(%arg0: i32, %arg1: i32, %arg2: i32) -> (i32, i32) {
    %c0_i32 = arith.constant 0 : i32
    return %arg0, %arg2 : i32, i32
  }
  func.func @transform_1(%arg0: i32, %arg1: i32, %arg2: i32) -> (i32, i32) {
    %c0_i32 = arith.constant 0 : i32
    return %arg2, %arg1 : i32, i32
  }
  func.func @transform_2(%arg0: i32, %arg1: i32, %arg2: i32) -> (i32, i32) {
    %c0_i32 = arith.constant 0 : i32
    %c0_i32_0 = arith.constant 0 : i32
    return %c0_i32, %arg1 : i32, i32
  }
  func.func @transform_3(%arg0: i32, %arg1: i32, %arg2: i32) -> (i32, i32) {
    %c0_i32 = arith.constant 0 : i32
    return %arg0, %arg1 : i32, i32
  }
}

module attributes {stable_mosaic.version = 11 : i64} {
  func.func @_fused_matmul_kernel(%arg0: i32, %arg1: i32, %arg2: i32, %arg3: memref<32x512xbf16, #tpu.memory_space<vmem>>, %arg4: memref<512x256xbf16, #tpu.memory_space<vmem>>, %arg5: memref<1x256xf32, #tpu.memory_space<vmem>>, %arg6: memref<32x256xbf16, #tpu.memory_space<vmem>>, %arg7: memref<32x256xf32, #tpu.memory_space<vmem>>) attributes {dimension_semantics = [#tpu.dimension_semantics<parallel>, #tpu.dimension_semantics<parallel>, #tpu.dimension_semantics<arbitrary>], iteration_bounds = array<i64: 1, 2, 8>, scalar_prefetch = 0 : i64, scratch_operands = 1 : i64, tpu.core_type = #tpu.core_type<tc>, window_params = [{transform_indices = @transform_0, window_bounds = array<i64: 32, 512>}, {transform_indices = @transform_1, window_bounds = array<i64: 512, 256>}, {transform_indices = @transform_2, window_bounds = array<i64: 1, 256>}, {transform_indices = @transform_3, window_bounds = array<i64: 32, 256>}]} {
    %c0_i32 = arith.constant 0 : i32
    %0 = arith.cmpi eq, %arg2, %c0_i32 : i32
    %1 = arith.extui %0 : i1 to i32
    %c0_i32_0 = arith.constant 0 : i32
    %2 = arith.cmpi ne, %1, %c0_i32_0 : i32
    scf.if %2 {
      %cst_9 = arith.constant 0.000000e+00 : f32
      %12 = vector.broadcast %cst_9 : f32 to vector<32x256xf32>
      %c0_10 = arith.constant 0 : index
      %c0_11 = arith.constant 0 : index
      %13 = vector.load %arg7[%c0_10, %c0_11] : memref<32x256xf32, #tpu.memory_space<vmem>>, vector<32x256xf32>
      tpu.vector_store %arg7[%c0_10, %c0_11], %12 {strides = array<i32>} : memref<32x256xf32, #tpu.memory_space<vmem>>, vector<32x256xf32>,
    } else {
    }
    %c0 = arith.constant 0 : index
    %c0_1 = arith.constant 0 : index
    %3 = vector.load %arg7[%c0, %c0_1] : memref<32x256xf32, #tpu.memory_space<vmem>>, vector<32x256xf32>
    %c0_2 = arith.constant 0 : index
    %c0_3 = arith.constant 0 : index
    %4 = vector.load %arg3[%c0_2, %c0_3] : memref<32x512xbf16, #tpu.memory_space<vmem>>, vector<32x512xbf16>
    %c0_4 = arith.constant 0 : index
    %c0_5 = arith.constant 0 : index
    %5 = vector.load %arg4[%c0_4, %c0_5] : memref<512x256xbf16, #tpu.memory_space<vmem>>, vector<512x256xbf16>
    %cst = arith.constant dense<0.000000e+00> : vector<32x256xf32>
    %6 = tpu.matmul %4, %5, %cst {dimension_numbers = #tpu.dot_dimension_numbers<[1], [0], [0], [1], [0, 0, 1, 1], [], []>} : vector<32x512xbf16>, vector<512x256xbf16>, vector<32x256xf32> -> vector<32x256xf32>
    %7 = arith.addf %3, %6 : vector<32x256xf32>
    %c0_6 = arith.constant 0 : index
    %c0_7 = arith.constant 0 : index
    %8 = vector.load %arg7[%c0_6, %c0_7] : memref<32x256xf32, #tpu.memory_space<vmem>>, vector<32x256xf32>
    tpu.vector_store %arg7[%c0_6, %c0_7], %7 {strides = array<i32>} : memref<32x256xf32, #tpu.memory_space<vmem>>, vector<32x256xf32>,
    %c7_i32 = arith.constant 7 : i32
    %9 = arith.cmpi eq, %arg2, %c7_i32 : i32
    %10 = arith.extui %9 : i1 to i32
    %c0_i32_8 = arith.constant 0 : i32
    %11 = arith.cmpi ne, %10, %c0_i32_8 : i32
    scf.if %11 {
      %c0_9 = arith.constant 0 : index
      %c0_10 = arith.constant 0 : index
      %12 = vector.load %arg7[%c0_9, %c0_10] : memref<32x256xf32, #tpu.memory_space<vmem>>, vector<32x256xf32>
      %c0_11 = arith.constant 0 : index
      %c0_12 = arith.constant 0 : index
      %13 = vector.load %arg5[%c0_11, %c0_12] : memref<1x256xf32, #tpu.memory_space<vmem>>, vector<1x256xf32>
      %14 = vector.broadcast %13 : vector<1x256xf32> to vector<32x256xf32>
      %15 = arith.addf %12, %14 : vector<32x256xf32>
      %cst_13 = arith.constant 0.000000e+00 : f32
      %16 = vector.broadcast %cst_13 : f32 to vector<32x256xf32>
      %17 = arith.cmpf oge, %15, %16 : vector<32x256xf32>
      %cst_14 = arith.constant 2.000000e-01 : f32
      %18 = vector.broadcast %cst_14 : f32 to vector<32x256xf32>
      %19 = arith.mulf %18, %15 : vector<32x256xf32>
      %20 = arith.select %17, %15, %19 : vector<32x256xi1>, vector<32x256xf32>
      %21 = arith.truncf %20 : vector<32x256xf32> to vector<32x256xbf16>
      %c0_15 = arith.constant 0 : index
      %c0_16 = arith.constant 0 : index
      %22 = vector.load %arg6[%c0_15, %c0_16] : memref<32x256xbf16, #tpu.memory_space<vmem>>, vector<32x256xbf16>
      tpu.vector_store %arg6[%c0_15, %c0_16], %21 {strides = array<i32>} : memref<32x256xbf16, #tpu.memory_space<vmem>>, vector<32x256xbf16>,
    } else {
    }
    return
  }
  func.func @transform_0(%arg0: i32, %arg1: i32, %arg2: i32) -> (i32, i32) {
    %c0_i32 = arith.constant 0 : i32
    return %arg0, %arg2 : i32, i32
  }
  func.func @transform_1(%arg0: i32, %arg1: i32, %arg2: i32) -> (i32, i32) {
    %c0_i32 = arith.constant 0 : i32
    return %arg2, %arg1 : i32, i32
  }
  func.func @transform_2(%arg0: i32, %arg1: i32, %arg2: i32) -> (i32, i32) {
    %c0_i32 = arith.constant 0 : i32
    %c0_i32_0 = arith.constant 0 : i32
    return %c0_i32, %arg1 : i32, i32
  }
  func.func @transform_3(%arg0: i32, %arg1: i32, %arg2: i32) -> (i32, i32) {
    %c0_i32 = arith.constant 0 : i32
    return %arg0, %arg1 : i32, i32
  }
}

module attributes {stable_mosaic.version = 11 : i64} {
  func.func @_fused_matmul_kernel(%arg0: i32, %arg1: i32, %arg2: i32, %arg3: memref<2x512xbf16, #tpu.memory_space<vmem>>, %arg4: memref<512x1xbf16, #tpu.memory_space<vmem>>, %arg5: memref<1x1xf32, #tpu.memory_space<vmem>>, %arg6: memref<2x1xf32, #tpu.memory_space<vmem>>, %arg7: memref<2x1xf32, #tpu.memory_space<vmem>>) attributes {dimension_semantics = [#tpu.dimension_semantics<parallel>, #tpu.dimension_semantics<parallel>, #tpu.dimension_semantics<arbitrary>], iteration_bounds = array<i64: 1, 1, 16>, scalar_prefetch = 0 : i64, scratch_operands = 1 : i64, tpu.core_type = #tpu.core_type<tc>, window_params = [{transform_indices = @transform_0, window_bounds = array<i64: 2, 512>}, {transform_indices = @transform_1, window_bounds = array<i64: 512, 1>}, {transform_indices = @transform_2, window_bounds = array<i64: 1, 1>}, {transform_indices = @transform_3, window_bounds = array<i64: 2, 1>}]} {
    %c0_i32 = arith.constant 0 : i32
    %0 = arith.cmpi eq, %arg2, %c0_i32 : i32
    %1 = arith.extui %0 : i1 to i32
    %c0_i32_0 = arith.constant 0 : i32
    %2 = arith.cmpi ne, %1, %c0_i32_0 : i32
    scf.if %2 {
      %cst_9 = arith.constant 0.000000e+00 : f32
      %12 = vector.broadcast %cst_9 : f32 to vector<2x1xf32>
      %c0_10 = arith.constant 0 : index
      %c0_11 = arith.constant 0 : index
      %13 = vector.load %arg7[%c0_10, %c0_11] : memref<2x1xf32, #tpu.memory_space<vmem>>, vector<2x1xf32>
      tpu.vector_store %arg7[%c0_10, %c0_11], %12 {strides = array<i32>} : memref<2x1xf32, #tpu.memory_space<vmem>>, vector<2x1xf32>,
    } else {
    }
    %c0 = arith.constant 0 : index
    %c0_1 = arith.constant 0 : index
    %3 = vector.load %arg7[%c0, %c0_1] : memref<2x1xf32, #tpu.memory_space<vmem>>, vector<2x1xf32>
    %c0_2 = arith.constant 0 : index
    %c0_3 = arith.constant 0 : index
    %4 = vector.load %arg3[%c0_2, %c0_3] : memref<2x512xbf16, #tpu.memory_space<vmem>>, vector<2x512xbf16>
    %c0_4 = arith.constant 0 : index
    %c0_5 = arith.constant 0 : index
    %5 = vector.load %arg4[%c0_4, %c0_5] : memref<512x1xbf16, #tpu.memory_space<vmem>>, vector<512x1xbf16>
    %cst = arith.constant dense<0.000000e+00> : vector<2x1xf32>
    %6 = tpu.matmul %4, %5, %cst {dimension_numbers = #tpu.dot_dimension_numbers<[1], [0], [0], [1], [0, 0, 1, 1], [], []>} : vector<2x512xbf16>, vector<512x1xbf16>, vector<2x1xf32> -> vector<2x1xf32>
    %7 = arith.addf %3, %6 : vector<2x1xf32>
    %c0_6 = arith.constant 0 : index
    %c0_7 = arith.constant 0 : index
    %8 = vector.load %arg7[%c0_6, %c0_7] : memref<2x1xf32, #tpu.memory_space<vmem>>, vector<2x1xf32>
    tpu.vector_store %arg7[%c0_6, %c0_7], %7 {strides = array<i32>} : memref<2x1xf32, #tpu.memory_space<vmem>>, vector<2x1xf32>,
    %c15_i32 = arith.constant 15 : i32
    %9 = arith.cmpi eq, %arg2, %c15_i32 : i32
    %10 = arith.extui %9 : i1 to i32
    %c0_i32_8 = arith.constant 0 : i32
    %11 = arith.cmpi ne, %10, %c0_i32_8 : i32
    scf.if %11 {
      %c0_9 = arith.constant 0 : index
      %c0_10 = arith.constant 0 : index
      %12 = vector.load %arg7[%c0_9, %c0_10] : memref<2x1xf32, #tpu.memory_space<vmem>>, vector<2x1xf32>
      %c0_11 = arith.constant 0 : index
      %c0_12 = arith.constant 0 : index
      %13 = vector.load %arg5[%c0_11, %c0_12] : memref<1x1xf32, #tpu.memory_space<vmem>>, vector<1x1xf32>
      %14 = vector.broadcast %13 : vector<1x1xf32> to vector<2x1xf32>
      %15 = arith.addf %12, %14 : vector<2x1xf32>
      %cst_13 = arith.constant 0.000000e+00 : f32
      %16 = vector.broadcast %cst_13 : f32 to vector<2x1xf32>
      %17 = arith.subf %16, %15 : vector<2x1xf32>
      %18 = math.exp %17 : vector<2x1xf32>
      %cst_14 = arith.constant 1.000000e+00 : f32
      %19 = vector.broadcast %cst_14 : f32 to vector<2x1xf32>
      %20 = arith.addf %19, %18 : vector<2x1xf32>
      %cst_15 = arith.constant 1.000000e+00 : f32
      %21 = vector.broadcast %cst_15 : f32 to vector<2x1xf32>
      %22 = arith.divf %21, %20 : vector<2x1xf32>
      %c0_16 = arith.constant 0 : index
      %c0_17 = arith.constant 0 : index
      %23 = vector.load %arg6[%c0_16, %c0_17] : memref<2x1xf32, #tpu.memory_space<vmem>>, vector<2x1xf32>
      tpu.vector_store %arg6[%c0_16, %c0_17], %22 {strides = array<i32>} : memref<2x1xf32, #tpu.memory_space<vmem>>, vector<2x1xf32>,
    } else {
    }
    return
  }
  func.func @transform_0(%arg0: i32, %arg1: i32, %arg2: i32) -> (i32, i32) {
    %c0_i32 = arith.constant 0 : i32
    return %arg0, %arg2 : i32, i32
  }
  func.func @transform_1(%arg0: i32, %arg1: i32, %arg2: i32) -> (i32, i32) {
    %c0_i32 = arith.constant 0 : i32
    return %arg2, %arg1 : i32, i32
  }
  func.func @transform_2(%arg0: i32, %arg1: i32, %arg2: i32) -> (i32, i32) {
    %c0_i32 = arith.constant 0 : i32
    %c0_i32_0 = arith.constant 0 : i32
    return %c0_i32, %arg1 : i32, i32
  }
  func.func @transform_3(%arg0: i32, %arg1: i32, %arg2: i32) -> (i32, i32) {
    %c0_i32 = arith.constant 0 : i32
    return %arg0, %arg1 : i32, i32
  }
}

</mosaic_0001>

<bundles_post_ra>
// kernel: discriminator_forward.5
= control target key start
LH: loop header
LB: loop body
LE: loop exit
PB: predicated region body
PF: predicated region fallthrough
CT: control target
= control target key end

     0   :  { %s4137_s12 = smov 0   ;;  %s4139_s13 = smov 0   ;;  %s5436_s0 = inlined_call_operand.vmem [shape: bf16[2048,48], index: 0, kind: input, shape index: {}]   ;;  %s5437_s1 = inlined_call_operand.vmem [shape: bf16[48,64], index: 1, kind: input, shape index: {}]   ;;  %s5438_s2 = inlined_call_operand.vmem [shape: f32[1,64], index: 2, kind: input, shape index: {}]   ;;  %s5439_s3 = inlined_call_operand.vmem [shape: bf16[2048,64], index: 3, kind: output, shape index: {}]  }
   0x1   :  { %s4141_s14 = smov 0  }
   0x2 LB: > { %s32_s15 = sadd.s32 1, %s4110_s13  ;;  %p3396_p0 = scmp.ge.s32.totalorder %s4114_s14, 1  ;;  %s4114_s14 = sphi %s4141_s14, %s13_s14   ;;  %s4110_s13 = sphi %s4139_s13, %s5467_s13   ;;  %s4106_s12 = sphi %s4137_s12, %s5466_s12  }
   0x3   : > { %p34_p1 = scmp.ge.s32.totalorder %s32_s15, 2  ;;  %p188_p2 = scmp.lt.s32.totalorder %s4114_s14, 3 }
   0x5   : > { %s5469_s15 = smov (%p34_p1, %s32_s15), 0  ;;  %p189_p3 = pnand %p3396_p0, %p188_p2 }
   0x7   : > { %192 = sbr.rel (%p189_p3) target bundleno = 462 (0x1ce), region = 32 }
   0xe   : > { %v4023_v0 = vld [vmem:[%s5437_s1] sm:$0xff]   ;;  %s3397_s18 = sshll.u32 %s4106_s12, 7  ;;  %v4024_v1 = vld [vmem:[%s5437_s1 + $0x8] sm:$0xff]   ;;  %v4166_v2 = vld [vmem:[%s5437_s1 + $0x10] sm:$0xff]   ;;  %vm993_vm0 = vcmask 392192   ;;  %vm264_vm1 = vcmask 523264  }
   0xf   : > { %p230_p4 = scmp.lt.s32.totalorder %s3397_s18, 255  ;;  %3858 = vmatprep.subr.bf16.mxu0 %v4023_v0  ;;  %3992 = vmatprep.subr.bf16.mxu1 %v4023_v0  ;;  %v4116_v4 = vmov 0.0   ;;  %vm3150_vm2 = vcmask 519168  }
  0x10   : > { %3859 = vmatpush3.bf16.msra.mxu0 %v4023_v0  ;;  %3995 = vmatpush3.bf16.msra.mxu1 %v4023_v0  ;;  %267 = vst.msk [vmem:[#allocation2 + $0x10] sm:$0xff] %vm264_vm1, %v4116_v4  ;;  %265 = vst.msk [vmem:[#allocation2] sm:$0xff] %vm264_vm1, %v4116_v4 }
  0x11   : > { %s5471_s18 = smov (!%p230_p4, %s3397_s18), 255  ;;  %3860 = vmatprep.subr.bf16.mxu0 %v4024_v1  ;;  %3993 = vmatprep.subr.bf16.mxu1 %v4024_v1  ;;  %266 = vst.msk [vmem:[#allocation2 + $0x8] sm:$0xff] %vm264_vm1, %v4116_v4  ;;  %268 = vst.msk [vmem:[#allocation2 + $0x18] sm:$0xff] %vm264_vm1, %v4116_v4 }
  0x12   : > { %s3398_s23 = sshll.u32 %s5471_s18, 2  ;;  %269 = vst.msk [vmem:[#allocation2 + $0x20] sm:$0xff] %vm264_vm1, %v4116_v4  ;;  %270 = vst.msk [vmem:[#allocation2 + $0x28] sm:$0xff] %vm264_vm1, %v4116_v4 }
  0x13   : > { %s4174_s26 = scalar_lea.vmem %s5436_s0, %s3398_s23  ;;  %271 = vst.msk [vmem:[#allocation2 + $0x30] sm:$0xff] %vm264_vm1, %v4116_v4  ;;  %272 = vst.msk [vmem:[#allocation2 + $0x38] sm:$0xff] %vm264_vm1, %v4116_v4  ;;  %s4597_s4 = scalar_lea.vmem %s5439_s3, %s3398_s23 }
  0x14   : > { %3861 = vmatpush3.bf16.msra.mxu0 %v4024_v1  ;;  %3996 = vmatpush3.bf16.msra.mxu1 %v4024_v1  ;;  %v4177_v3 = vld [vmem:[%s4174_s26] sm:$0xff]   ;;  %273 = vst.msk [vmem:[#allocation2 + $0x40] sm:$0xff] %vm264_vm1, %v4116_v4  ;;  %274 = vst.msk [vmem:[#allocation2 + $0x48] sm:$0xff] %vm264_vm1, %v4116_v4  ;;  %v4028_v6 = vld [vmem:[%s4174_s26 + $0x8] sm:$0xff]  }
  0x15   : > { %275 = vst.msk [vmem:[#allocation2 + $0x50] sm:$0xff] %vm264_vm1, %v4116_v4  ;;  %276 = vst.msk [vmem:[#allocation2 + $0x58] sm:$0xff] %vm264_vm1, %v4116_v4  ;;  %3862 = vmatprep.subr.bf16.mxu0 %v4166_v2  ;;  %3994 = vmatprep.subr.bf16.mxu1 %v4166_v2  ;;  %v4027_v5 = vld [vmem:[%s4174_s26 + $0x100] sm:$0xff]   ;;  %v4029_v7 = vld [vmem:[%s4174_s26 + $0x108] sm:$0xff]  }
  0x16   : > { %277 = vst.msk [vmem:[#allocation2 + $0x60] sm:$0xff] %vm264_vm1, %v4116_v4  ;;  %278 = vst.msk [vmem:[#allocation2 + $0x68] sm:$0xff] %vm264_vm1, %v4116_v4  ;;  %3864 = vmatprep.mubr.msk.bf16.mxu0 %vm993_vm0, %v4177_v3  ;;  %3928 = vmatprep.mubr.msk.bf16.mxu1 %vm993_vm0, %v4027_v5  ;;  %v4030_v8 = vld [vmem:[%s4174_s26 + $0x10] sm:$0xff]   ;;  %v4032_v10 = vld [vmem:[%s4174_s26 + $0x18] sm:$0xff]  }
  0x17   : > { %279 = vst.msk [vmem:[#allocation2 + $0x70] sm:$0xff] %vm264_vm1, %v4116_v4  ;;  %280 = vst.msk [vmem:[#allocation2 + $0x78] sm:$0xff] %vm264_vm1, %v4116_v4  ;;  %v4031_v9 = vld [vmem:[%s4174_s26 + $0x110] sm:$0xff]   ;;  %v4033_v11 = vld [vmem:[%s4174_s26 + $0x118] sm:$0xff]  }
  0x18   : > { %281 = vst.msk [vmem:[#allocation2 + $0x80] sm:$0xff] %vm264_vm1, %v4116_v4  ;;  %282 = vst.msk [vmem:[#allocation2 + $0x88] sm:$0xff] %vm264_vm1, %v4116_v4  ;;  %3863 = vmatpush3.bf16.msra.mxu0 %v4166_v2  ;;  %3997 = vmatpush3.bf16.msra.mxu1 %v4166_v2  ;;  %v4034_v12 = vld [vmem:[%s4174_s26 + $0x20] sm:$0xff]   ;;  %v4036_v14 = vld [vmem:[%s4174_s26 + $0x28] sm:$0xff]  }
  0x19   : > { %283 = vst.msk [vmem:[#allocation2 + $0x90] sm:$0xff] %vm264_vm1, %v4116_v4  ;;  %284 = vst.msk [vmem:[#allocation2 + $0x98] sm:$0xff] %vm264_vm1, %v4116_v4  ;;  %v4035_v13 = vld [vmem:[%s4174_s26 + $0x120] sm:$0xff]   ;;  %v4037_v15 = vld [vmem:[%s4174_s26 + $0x128] sm:$0xff]  }
  0x1a   : > { %285 = vst.msk [vmem:[#allocation2 + $0xa0] sm:$0xff] %vm264_vm1, %v4116_v4  ;;  %286 = vst.msk [vmem:[#allocation2 + $0xa8] sm:$0xff] %vm264_vm1, %v4116_v4  ;;  %v4038_v16 = vld [vmem:[%s4174_s26 + $0x30] sm:$0xff]   ;;  %v4040_v18 = vld [vmem:[%s4174_s26 + $0x38] sm:$0xff]  }
  0x1b   : > { %287 = vst.msk [vmem:[#allocation2 + $0xb0] sm:$0xff] %vm264_vm1, %v4116_v4  ;;  %288 = vst.msk [vmem:[#allocation2 + $0xb8] sm:$0xff] %vm264_vm1, %v4116_v4  ;;  %3865 = vmatmul.mubr.msk.bf16.vlgmr.msra.gmra.mrb[0].mxu0 %vm993_vm0, %v4028_v6  ;;  %3929 = vmatmul.mubr.msk.bf16.vlgmr.msra.gmra.mrb[0].mxu1 %vm993_vm0, %v4029_v7  ;;  %v4039_v17 = vld [vmem:[%s4174_s26 + $0x130] sm:$0xff]   ;;  %v4041_v19 = vld [vmem:[%s4174_s26 + $0x138] sm:$0xff]  }
  0x1c   : > { %289 = vst.msk [vmem:[#allocation2 + $0xc0] sm:$0xff] %vm264_vm1, %v4116_v4  ;;  %290 = vst.msk [vmem:[#allocation2 + $0xc8] sm:$0xff] %vm264_vm1, %v4116_v4  ;;  %3868 = vmatprep.mubr.msk.bf16.mxu0 %vm993_vm0, %v4030_v8  ;;  %3932 = vmatprep.mubr.msk.bf16.mxu1 %vm993_vm0, %v4031_v9  ;;  %v4042_v20 = vld [vmem:[%s4174_s26 + $0x40] sm:$0xff]   ;;  %v4044_v22 = vld [vmem:[%s4174_s26 + $0x48] sm:$0xff]  }
  0x1d   : > { %291 = vst.msk [vmem:[#allocation2 + $0xd0] sm:$0xff] %vm264_vm1, %v4116_v4  ;;  %292 = vst.msk [vmem:[#allocation2 + $0xd8] sm:$0xff] %vm264_vm1, %v4116_v4  ;;  %v4043_v21 = vld [vmem:[%s4174_s26 + $0x140] sm:$0xff]   ;;  %v4045_v23 = vld [vmem:[%s4174_s26 + $0x148] sm:$0xff]  }
  0x1e   : > { %293 = vst.msk [vmem:[#allocation2 + $0xe0] sm:$0xff] %vm264_vm1, %v4116_v4  ;;  %294 = vst.msk [vmem:[#allocation2 + $0xe8] sm:$0xff] %vm264_vm1, %v4116_v4  ;;  %v4046_v24 = vld [vmem:[%s4174_s26 + $0x50] sm:$0xff]   ;;  %v4048_v26 = vld [vmem:[%s4174_s26 + $0x58] sm:$0xff]  }
  0x1f   : > { %295 = vst.msk [vmem:[#allocation2 + $0xf0] sm:$0xff] %vm264_vm1, %v4116_v4  ;;  %296 = vst.msk [vmem:[#allocation2 + $0xf8] sm:$0xff] %vm264_vm1, %v4116_v4  ;;  %v4047_v25 = vld [vmem:[%s4174_s26 + $0x150] sm:$0xff]   ;;  %v4049_v27 = vld [vmem:[%s4174_s26 + $0x158] sm:$0xff]  }
  0x20   : > { %297 = vst.msk [vmem:[#allocation2 + $0x100] sm:$0xff] %vm264_vm1, %v4116_v4  ;;  %298 = vst.msk [vmem:[#allocation2 + $0x108] sm:$0xff] %vm264_vm1, %v4116_v4  ;;  %v4050_v28 = vld [vmem:[%s4174_s26 + $0x60] sm:$0xff]   ;;  %v4052_v30 = vld [vmem:[%s4174_s26 + $0x68] sm:$0xff]  }
  0x21   : > { %299 = vst.msk [vmem:[#allocation2 + $0x110] sm:$0xff] %vm264_vm1, %v4116_v4  ;;  %300 = vst.msk [vmem:[#allocation2 + $0x118] sm:$0xff] %vm264_vm1, %v4116_v4  ;;  %v4051_v29 = vld [vmem:[%s4174_s26 + $0x160] sm:$0xff]   ;;  %v4053_v31 = vld [vmem:[%s4174_s26 + $0x168] sm:$0xff]  }
  0x22   : > { %301 = vst.msk [vmem:[#allocation2 + $0x120] sm:$0xff] %vm264_vm1, %v4116_v4  ;;  %302 = vst.msk [vmem:[#allocation2 + $0x128] sm:$0xff] %vm264_vm1, %v4116_v4  ;;  %v4054_v32 = vld [vmem:[%s4174_s26 + $0x70] sm:$0xff]   ;;  %v4056_v34 = vld [vmem:[%s4174_s26 + $0x78] sm:$0xff]  }
  0x23   : > { %303 = vst.msk [vmem:[#allocation2 + $0x130] sm:$0xff] %vm264_vm1, %v4116_v4  ;;  %304 = vst.msk [vmem:[#allocation2 + $0x138] sm:$0xff] %vm264_vm1, %v4116_v4  ;;  %3869 = vmatmul.mubr.msk.bf16.gmra.mrb[4].mxu0 %vm993_vm0, %v4032_v10  ;;  %3933 = vmatmul.mubr.msk.bf16.gmra.mrb[4].mxu1 %vm993_vm0, %v4033_v11  ;;  %v4055_v33 = vld [vmem:[%s4174_s26 + $0x170] sm:$0xff]   ;;  %v4057_v35 = vld [vmem:[%s4174_s26 + $0x178] sm:$0xff]  }
  0x24   : > { %305 = vst.msk [vmem:[#allocation2 + $0x140] sm:$0xff] %vm264_vm1, %v4116_v4  ;;  %306 = vst.msk [vmem:[#allocation2 + $0x148] sm:$0xff] %vm264_vm1, %v4116_v4  ;;  %3872 = vmatprep.mubr.msk.bf16.mxu0 %vm993_vm0, %v4034_v12  ;;  %3936 = vmatprep.mubr.msk.bf16.mxu1 %vm993_vm0, %v4035_v13  ;;  %v4058_v36 = vld [vmem:[%s4174_s26 + $0x80] sm:$0xff]   ;;  %v4060_v38 = vld [vmem:[%s4174_s26 + $0x88] sm:$0xff]  }
  0x25   : > { %307 = vst.msk [vmem:[#allocation2 + $0x150] sm:$0xff] %vm264_vm1, %v4116_v4  ;;  %308 = vst.msk [vmem:[#allocation2 + $0x158] sm:$0xff] %vm264_vm1, %v4116_v4  ;;  %v4059_v37 = vld [vmem:[%s4174_s26 + $0x180] sm:$0xff]   ;;  %v4061_v39 = vld [vmem:[%s4174_s26 + $0x188] sm:$0xff]  }
  0x26   : > { %309 = vst.msk [vmem:[#allocation2 + $0x160] sm:$0xff] %vm264_vm1, %v4116_v4  ;;  %310 = vst.msk [vmem:[#allocation2 + $0x168] sm:$0xff] %vm264_vm1, %v4116_v4  ;;  %v4062_v40 = vld [vmem:[%s4174_s26 + $0x90] sm:$0xff]   ;;  %v4064_v42 = vld [vmem:[%s4174_s26 + $0x98] sm:$0xff]  }
  0x27   : > { %311 = vst.msk [vmem:[#allocation2 + $0x170] sm:$0xff] %vm264_vm1, %v4116_v4  ;;  %312 = vst.msk [vmem:[#allocation2 + $0x178] sm:$0xff] %vm264_vm1, %v4116_v4  ;;  %v4063_v41 = vld [vmem:[%s4174_s26 + $0x190] sm:$0xff]   ;;  %v4065_v43 = vld [vmem:[%s4174_s26 + $0x198] sm:$0xff]  }
  0x28   : > { %313 = vst.msk [vmem:[#allocation2 + $0x180] sm:$0xff] %vm264_vm1, %v4116_v4  ;;  %314 = vst.msk [vmem:[#allocation2 + $0x188] sm:$0xff] %vm264_vm1, %v4116_v4  ;;  %v4066_v44 = vld [vmem:[%s4174_s26 + $0xa0] sm:$0xff]   ;;  %v4068_v46 = vld [vmem:[%s4174_s26 + $0xa8] sm:$0xff]  }
  0x29   : > { %315 = vst.msk [vmem:[#allocation2 + $0x190] sm:$0xff] %vm264_vm1, %v4116_v4  ;;  %316 = vst.msk [vmem:[#allocation2 + $0x198] sm:$0xff] %vm264_vm1, %v4116_v4  ;;  %v4067_v45 = vld [vmem:[%s4174_s26 + $0x1a0] sm:$0xff]   ;;  %v4069_v47 = vld [vmem:[%s4174_s26 + $0x1a8] sm:$0xff]  }
  0x2a   : > { %317 = vst.msk [vmem:[#allocation2 + $0x1a0] sm:$0xff] %vm264_vm1, %v4116_v4  ;;  %318 = vst.msk [vmem:[#allocation2 + $0x1a8] sm:$0xff] %vm264_vm1, %v4116_v4  ;;  %v4070_v48 = vld [vmem:[%s4174_s26 + $0xb0] sm:$0xff]   ;;  %v4072_v50 = vld [vmem:[%s4174_s26 + $0xb8] sm:$0xff]  }
  0x2b   : > { %319 = vst.msk [vmem:[#allocation2 + $0x1b0] sm:$0xff] %vm264_vm1, %v4116_v4  ;;  %320 = vst.msk [vmem:[#allocation2 + $0x1b8] sm:$0xff] %vm264_vm1, %v4116_v4  ;;  %3873 = vmatmul.mubr.msk.bf16.gmra.mrb[8].mxu0 %vm993_vm0, %v4036_v14  ;;  %3937 = vmatmul.mubr.msk.bf16.gmra.mrb[8].mxu1 %vm993_vm0, %v4037_v15  ;;  %v4071_v49 = vld [vmem:[%s4174_s26 + $0x1b0] sm:$0xff]   ;;  %v4073_v51 = vld [vmem:[%s4174_s26 + $0x1b8] sm:$0xff]  }
  0x2c   : > { %321 = vst.msk [vmem:[#allocation2 + $0x1c0] sm:$0xff] %vm264_vm1, %v4116_v4  ;;  %322 = vst.msk [vmem:[#allocation2 + $0x1c8] sm:$0xff] %vm264_vm1, %v4116_v4  ;;  %3876 = vmatprep.mubr.msk.bf16.mxu0 %vm993_vm0, %v4038_v16  ;;  %3940 = vmatprep.mubr.msk.bf16.mxu1 %vm993_vm0, %v4039_v17  ;;  %v4074_v52 = vld [vmem:[%s4174_s26 + $0xc0] sm:$0xff]   ;;  %v4076_v54 = vld [vmem:[%s4174_s26 + $0xc8] sm:$0xff]  }
  0x2d   : > { %323 = vst.msk [vmem:[#allocation2 + $0x1d0] sm:$0xff] %vm264_vm1, %v4116_v4  ;;  %324 = vst.msk [vmem:[#allocation2 + $0x1d8] sm:$0xff] %vm264_vm1, %v4116_v4  ;;  %v4075_v53 = vld [vmem:[%s4174_s26 + $0x1c0] sm:$0xff]   ;;  %v4077_v55 = vld [vmem:[%s4174_s26 + $0x1c8] sm:$0xff]  }
  0x2e   : > { %325 = vst.msk [vmem:[#allocation2 + $0x1e0] sm:$0xff] %vm264_vm1, %v4116_v4  ;;  %326 = vst.msk [vmem:[#allocation2 + $0x1e8] sm:$0xff] %vm264_vm1, %v4116_v4  ;;  %v4078_v56 = vld [vmem:[%s4174_s26 + $0xd0] sm:$0xff]   ;;  %v4080_v58 = vld [vmem:[%s4174_s26 + $0xd8] sm:$0xff]  }
  0x2f   : > { %327 = vst.msk [vmem:[#allocation2 + $0x1f0] sm:$0xff] %vm264_vm1, %v4116_v4  ;;  %328 = vst.msk [vmem:[#allocation2 + $0x1f8] sm:$0xff] %vm264_vm1, %v4116_v4  ;;  %v4079_v57 = vld [vmem:[%s4174_s26 + $0x1d0] sm:$0xff]   ;;  %v4081_v59 = vld [vmem:[%s4174_s26 + $0x1d8] sm:$0xff]  }
  0x30   : > { %329 = vst.msk [vmem:[#allocation2 + $0x200] sm:$0xff] %vm264_vm1, %v4116_v4  ;;  %330 = vst.msk [vmem:[#allocation2 + $0x208] sm:$0xff] %vm264_vm1, %v4116_v4  ;;  %v4082_v60 = vld [vmem:[%s4174_s26 + $0xe0] sm:$0xff]   ;;  %v4084_v62 = vld [vmem:[%s4174_s26 + $0xe8] sm:$0xff]  }
  0x31   : > { %331 = vst.msk [vmem:[#allocation2 + $0x210] sm:$0xff] %vm264_vm1, %v4116_v4  ;;  %332 = vst.msk [vmem:[#allocation2 + $0x218] sm:$0xff] %vm264_vm1, %v4116_v4  ;;  %v4083_v61 = vld [vmem:[%s4174_s26 + $0x1e0] sm:$0xff]   ;;  %v4085_v63 = vld [vmem:[%s4174_s26 + $0x1e8] sm:$0xff]  }
  0x32   : > { %333 = vst.msk [vmem:[#allocation2 + $0x220] sm:$0xff] %vm264_vm1, %v4116_v4  ;;  %334 = vst.msk [vmem:[#allocation2 + $0x228] sm:$0xff] %vm264_vm1, %v4116_v4  ;;  %v4086_v0 = vld [vmem:[%s4174_s26 + $0xf0] sm:$0xff]   ;;  %v4088_v2 = vld [vmem:[%s4174_s26 + $0xf8] sm:$0xff]  }
  0x33   : > { %335 = vst.msk [vmem:[#allocation2 + $0x230] sm:$0xff] %vm264_vm1, %v4116_v4  ;;  %336 = vst.msk [vmem:[#allocation2 + $0x238] sm:$0xff] %vm264_vm1, %v4116_v4  ;;  %3877 = vmatmul.mubr.msk.bf16.gmra.mrb[12].mxu0 %vm993_vm0, %v4040_v18  ;;  %3941 = vmatmul.mubr.msk.bf16.gmra.mrb[12].mxu1 %vm993_vm0, %v4041_v19  ;;  %v4087_v1 = vld [vmem:[%s4174_s26 + $0x1f0] sm:$0xff]   ;;  %v4089_v3 = vld [vmem:[%s4174_s26 + $0x1f8] sm:$0xff]  }
  0x34   : > { %337 = vst.msk [vmem:[#allocation2 + $0x240] sm:$0xff] %vm264_vm1, %v4116_v4  ;;  %338 = vst.msk [vmem:[#allocation2 + $0x248] sm:$0xff] %vm264_vm1, %v4116_v4  ;;  %3880 = vmatprep.mubr.msk.bf16.mxu0 %vm993_vm0, %v4042_v20  ;;  %3944 = vmatprep.mubr.msk.bf16.mxu1 %vm993_vm0, %v4043_v21  ;;  %v393_v6 = vld [vmem:[#allocation2] sm:$0xff]  ;;  %v396_v10 = vld [vmem:[#allocation2 + $0x18] sm:$0xff] }
  0x35   : > { %339 = vst.msk [vmem:[#allocation2 + $0x250] sm:$0xff] %vm264_vm1, %v4116_v4  ;;  %340 = vst.msk [vmem:[#allocation2 + $0x258] sm:$0xff] %vm264_vm1, %v4116_v4  ;;  %v394_v16 = vld [vmem:[#allocation2 + $0x8] sm:$0xff] }
  0x36   : > { %341 = vst.msk [vmem:[#allocation2 + $0x260] sm:$0xff] %vm264_vm1, %v4116_v4  ;;  %342 = vst.msk [vmem:[#allocation2 + $0x268] sm:$0xff] %vm264_vm1, %v4116_v4 }
  0x37   : > { %343 = vst.msk [vmem:[#allocation2 + $0x270] sm:$0xff] %vm264_vm1, %v4116_v4  ;;  %344 = vst.msk [vmem:[#allocation2 + $0x278] sm:$0xff] %vm264_vm1, %v4116_v4  ;;  %v457_v7 = vld [vmem:[#allocation2 + $0x200] sm:$0xff]  ;;  %v458_v17 = vld [vmem:[#allocation2 + $0x208] sm:$0xff] }
  0x38   : > { %345 = vst.msk [vmem:[#allocation2 + $0x280] sm:$0xff] %vm264_vm1, %v4116_v4  ;;  %346 = vst.msk [vmem:[#allocation2 + $0x288] sm:$0xff] %vm264_vm1, %v4116_v4  ;;  %v459_v5 = vld [vmem:[#allocation2 + $0x210] sm:$0xff]  ;;  %v460_v11 = vld [vmem:[#allocation2 + $0x218] sm:$0xff] }
  0x39   : > { %347 = vst.msk [vmem:[#allocation2 + $0x290] sm:$0xff] %vm264_vm1, %v4116_v4  ;;  %348 = vst.msk [vmem:[#allocation2 + $0x298] sm:$0xff] %vm264_vm1, %v4116_v4 }
  0x3a   : > { %349 = vst.msk [vmem:[#allocation2 + $0x2a0] sm:$0xff] %vm264_vm1, %v4116_v4  ;;  %350 = vst.msk [vmem:[#allocation2 + $0x2a8] sm:$0xff] %vm264_vm1, %v4116_v4 }
  0x3b   : > { %351 = vst.msk [vmem:[#allocation2 + $0x2b0] sm:$0xff] %vm264_vm1, %v4116_v4  ;;  %352 = vst.msk [vmem:[#allocation2 + $0x2b8] sm:$0xff] %vm264_vm1, %v4116_v4  ;;  %3881 = vmatmul.mubr.msk.bf16.gmra.mrb[16].mxu0 %vm993_vm0, %v4044_v22  ;;  %3945 = vmatmul.mubr.msk.bf16.gmra.mrb[16].mxu1 %vm993_vm0, %v4045_v23 }
  0x3c   : > { %353 = vst.msk [vmem:[#allocation2 + $0x2c0] sm:$0xff] %vm264_vm1, %v4116_v4  ;;  %354 = vst.msk [vmem:[#allocation2 + $0x2c8] sm:$0xff] %vm264_vm1, %v4116_v4  ;;  %3884 = vmatprep.mubr.msk.bf16.mxu0 %vm993_vm0, %v4046_v24  ;;  %3948 = vmatprep.mubr.msk.bf16.mxu1 %vm993_vm0, %v4047_v25 }
  0x3d   : > { %355 = vst.msk [vmem:[#allocation2 + $0x2d0] sm:$0xff] %vm264_vm1, %v4116_v4  ;;  %356 = vst.msk [vmem:[#allocation2 + $0x2d8] sm:$0xff] %vm264_vm1, %v4116_v4 }
  0x3e   : > { %357 = vst.msk [vmem:[#allocation2 + $0x2e0] sm:$0xff] %vm264_vm1, %v4116_v4  ;;  %358 = vst.msk [vmem:[#allocation2 + $0x2e8] sm:$0xff] %vm264_vm1, %v4116_v4 }
  0x3f   : > { %359 = vst.msk [vmem:[#allocation2 + $0x2f0] sm:$0xff] %vm264_vm1, %v4116_v4  ;;  %360 = vst.msk [vmem:[#allocation2 + $0x2f8] sm:$0xff] %vm264_vm1, %v4116_v4 }
  0x40   : > { %361 = vst.msk [vmem:[#allocation2 + $0x300] sm:$0xff] %vm264_vm1, %v4116_v4  ;;  %362 = vst.msk [vmem:[#allocation2 + $0x308] sm:$0xff] %vm264_vm1, %v4116_v4 }
  0x41   : > { %363 = vst.msk [vmem:[#allocation2 + $0x310] sm:$0xff] %vm264_vm1, %v4116_v4  ;;  %364 = vst.msk [vmem:[#allocation2 + $0x318] sm:$0xff] %vm264_vm1, %v4116_v4 }
  0x42   : > { %365 = vst.msk [vmem:[#allocation2 + $0x320] sm:$0xff] %vm264_vm1, %v4116_v4  ;;  %366 = vst.msk [vmem:[#allocation2 + $0x328] sm:$0xff] %vm264_vm1, %v4116_v4 }
  0x43   : > { %367 = vst.msk [vmem:[#allocation2 + $0x330] sm:$0xff] %vm264_vm1, %v4116_v4  ;;  %368 = vst.msk [vmem:[#allocation2 + $0x338] sm:$0xff] %vm264_vm1, %v4116_v4  ;;  %3885 = vmatmul.mubr.msk.bf16.gmra.mrb[20].mxu0 %vm993_vm0, %v4048_v26  ;;  %3949 = vmatmul.mubr.msk.bf16.gmra.mrb[20].mxu1 %vm993_vm0, %v4049_v27 }
  0x44   : > { %369 = vst.msk [vmem:[#allocation2 + $0x340] sm:$0xff] %vm264_vm1, %v4116_v4  ;;  %370 = vst.msk [vmem:[#allocation2 + $0x348] sm:$0xff] %vm264_vm1, %v4116_v4  ;;  %3888 = vmatprep.mubr.msk.bf16.mxu0 %vm993_vm0, %v4050_v28  ;;  %3952 = vmatprep.mubr.msk.bf16.mxu1 %vm993_vm0, %v4051_v29  ;;  %v399_v28 = vld [vmem:[#allocation2 + $0x30] sm:$0xff] }
  0x45   : > { %371 = vst.msk [vmem:[#allocation2 + $0x350] sm:$0xff] %vm264_vm1, %v4116_v4  ;;  %372 = vst.msk [vmem:[#allocation2 + $0x358] sm:$0xff] %vm264_vm1, %v4116_v4  ;;  %v463_v29 = vld [vmem:[#allocation2 + $0x230] sm:$0xff] }
  0x46   : > { %373 = vst.msk [vmem:[#allocation2 + $0x360] sm:$0xff] %vm264_vm1, %v4116_v4  ;;  %374 = vst.msk [vmem:[#allocation2 + $0x368] sm:$0xff] %vm264_vm1, %v4116_v4 }
  0x47   : > { %375 = vst.msk [vmem:[#allocation2 + $0x370] sm:$0xff] %vm264_vm1, %v4116_v4  ;;  %376 = vst.msk [vmem:[#allocation2 + $0x378] sm:$0xff] %vm264_vm1, %v4116_v4 }
  0x48   : > { %377 = vst.msk [vmem:[#allocation2 + $0x380] sm:$0xff] %vm264_vm1, %v4116_v4  ;;  %378 = vst.msk [vmem:[#allocation2 + $0x388] sm:$0xff] %vm264_vm1, %v4116_v4 }
  0x49   : > { %379 = vst.msk [vmem:[#allocation2 + $0x390] sm:$0xff] %vm264_vm1, %v4116_v4  ;;  %380 = vst.msk [vmem:[#allocation2 + $0x398] sm:$0xff] %vm264_vm1, %v4116_v4 }
  0x4a   : > { %381 = vst.msk [vmem:[#allocation2 + $0x3a0] sm:$0xff] %vm264_vm1, %v4116_v4  ;;  %382 = vst.msk [vmem:[#allocation2 + $0x3a8] sm:$0xff] %vm264_vm1, %v4116_v4 }
  0x4b   : > { %383 = vst.msk [vmem:[#allocation2 + $0x3b0] sm:$0xff] %vm264_vm1, %v4116_v4  ;;  %384 = vst.msk [vmem:[#allocation2 + $0x3b8] sm:$0xff] %vm264_vm1, %v4116_v4  ;;  %3889 = vmatmul.mubr.msk.bf16.gmra.mrb[24].mxu0 %vm993_vm0, %v4052_v30  ;;  %3953 = vmatmul.mubr.msk.bf16.gmra.mrb[24].mxu1 %vm993_vm0, %v4053_v31  ;;  %v397_v30 = vld [vmem:[#allocation2 + $0x20] sm:$0xff] }
  0x4c   : > { %385 = vst.msk [vmem:[#allocation2 + $0x3c0] sm:$0xff] %vm264_vm1, %v4116_v4  ;;  %386 = vst.msk [vmem:[#allocation2 + $0x3c8] sm:$0xff] %vm264_vm1, %v4116_v4  ;;  %3892 = vmatprep.mubr.msk.bf16.mxu0 %vm993_vm0, %v4054_v32  ;;  %3956 = vmatprep.mubr.msk.bf16.mxu1 %vm993_vm0, %v4055_v33  ;;  %v461_v31 = vld [vmem:[#allocation2 + $0x220] sm:$0xff] }
  0x4d   : > { %387 = vst.msk [vmem:[#allocation2 + $0x3d0] sm:$0xff] %vm264_vm1, %v4116_v4  ;;  %388 = vst.msk [vmem:[#allocation2 + $0x3d8] sm:$0xff] %vm264_vm1, %v4116_v4  ;;  %v4578_v32 = vld [vmem:[%s5438_s2] ss:$0 sm:$0xff] }
  0x4e   : > { %389 = vst.msk [vmem:[#allocation2 + $0x3e0] sm:$0xff] %vm264_vm1, %v4116_v4  ;;  %390 = vst.msk [vmem:[#allocation2 + $0x3e8] sm:$0xff] %vm264_vm1, %v4116_v4 }
  0x4f   : > { %391 = vst.msk [vmem:[#allocation2 + $0x3f0] sm:$0xff] %vm264_vm1, %v4116_v4  ;;  %392 = vst.msk [vmem:[#allocation2 + $0x3f8] sm:$0xff] %vm264_vm1, %v4116_v4  ;;  %v395_v4 = vld [vmem:[#allocation2 + $0x10] sm:$0xff] }
  0x53   : > { %3893 = vmatmul.mubr.msk.bf16.gmra.mrb[28].mxu0 %vm993_vm0, %v4056_v34  ;;  %3957 = vmatmul.mubr.msk.bf16.gmra.mrb[28].mxu1 %vm993_vm0, %v4057_v35  ;;  %v400_v35 = vld [vmem:[#allocation2 + $0x38] sm:$0xff] }
  0x54   : > { %3896 = vmatprep.mubr.msk.bf16.mxu0 %vm993_vm0, %v4058_v36  ;;  %3960 = vmatprep.mubr.msk.bf16.mxu1 %vm993_vm0, %v4059_v37  ;;  %v464_v36 = vld [vmem:[#allocation2 + $0x238] sm:$0xff] }
  0x5b   : > { %3897 = vmatmul.mubr.msk.bf16.gmra.mrb[32].mxu0 %vm993_vm0, %v4060_v38  ;;  %3961 = vmatmul.mubr.msk.bf16.gmra.mrb[32].mxu1 %vm993_vm0, %v4061_v39 }
  0x5c   : > { %3900 = vmatprep.mubr.msk.bf16.mxu0 %vm993_vm0, %v4062_v40  ;;  %3964 = vmatprep.mubr.msk.bf16.mxu1 %vm993_vm0, %v4063_v41  ;;  %v398_v41 = vld [vmem:[#allocation2 + $0x28] sm:$0xff] }
  0x63   : > { %3901 = vmatmul.mubr.msk.bf16.gmra.mrb[36].mxu0 %vm993_vm0, %v4064_v42  ;;  %3965 = vmatmul.mubr.msk.bf16.gmra.mrb[36].mxu1 %vm993_vm0, %v4065_v43  ;;  %v462_v42 = vld [vmem:[#allocation2 + $0x228] sm:$0xff] }
  0x64   : > { %3904 = vmatprep.mubr.msk.bf16.mxu0 %vm993_vm0, %v4066_v44  ;;  %3968 = vmatprep.mubr.msk.bf16.mxu1 %vm993_vm0, %v4067_v45 }
  0x6b   : > { %3905 = vmatmul.mubr.msk.bf16.gmra.mrb[40].mxu0 %vm993_vm0, %v4068_v46  ;;  %3969 = vmatmul.mubr.msk.bf16.gmra.mrb[40].mxu1 %vm993_vm0, %v4069_v47 }
  0x6c   : > { %3908 = vmatprep.mubr.msk.bf16.mxu0 %vm993_vm0, %v4070_v48  ;;  %3972 = vmatprep.mubr.msk.bf16.mxu1 %vm993_vm0, %v4071_v49 }
  0x73   : > { %3909 = vmatmul.mubr.msk.bf16.gmra.mrb[44].mxu0 %vm993_vm0, %v4072_v50  ;;  %3973 = vmatmul.mubr.msk.bf16.gmra.mrb[44].mxu1 %vm993_vm0, %v4073_v51 }
  0x74   : > { %3912 = vmatprep.mubr.msk.bf16.mxu0 %vm993_vm0, %v4074_v52  ;;  %3976 = vmatprep.mubr.msk.bf16.mxu1 %vm993_vm0, %v4075_v53 }
  0x7b   : > { %3913 = vmatmul.mubr.msk.bf16.gmra.mrb[48].mxu0 %vm993_vm0, %v4076_v54  ;;  %3977 = vmatmul.mubr.msk.bf16.gmra.mrb[48].mxu1 %vm993_vm0, %v4077_v55 }
  0x7c   : > { %3916 = vmatprep.mubr.msk.bf16.mxu0 %vm993_vm0, %v4078_v56  ;;  %3980 = vmatprep.mubr.msk.bf16.mxu1 %vm993_vm0, %v4079_v57 }
  0x83   : > { %3917 = vmatmul.mubr.msk.bf16.gmra.mrb[52].mxu0 %vm993_vm0, %v4080_v58  ;;  %3981 = vmatmul.mubr.msk.bf16.gmra.mrb[52].mxu1 %vm993_vm0, %v4081_v59 }
  0x84   : > { %3920 = vmatprep.mubr.msk.bf16.mxu0 %vm993_vm0, %v4082_v60  ;;  %3984 = vmatprep.mubr.msk.bf16.mxu1 %vm993_vm0, %v4083_v61 }
  0x8b   : > { %3921 = vmatmul.mubr.msk.bf16.gmra.mrb[56].mxu0 %vm993_vm0, %v4084_v62  ;;  %3985 = vmatmul.mubr.msk.bf16.gmra.mrb[56].mxu1 %vm993_vm0, %v4085_v63 }
  0x8c   : > { %3924 = vmatprep.mubr.msk.bf16.mxu0 %vm993_vm0, %v4086_v0  ;;  %3988 = vmatprep.mubr.msk.bf16.mxu1 %vm993_vm0, %v4087_v1 }
  0x93   : > { %3925 = vmatmul.mubr.msk.bf16.gmra.mrb[60].mxu0 %vm993_vm0, %v4088_v2  ;;  %3989 = vmatmul.mubr.msk.bf16.gmra.mrb[60].mxu1 %vm993_vm0, %v4089_v3 }
  0xee   : > { %v3866_v8 = vpop.f32.mrb[0].mxu0  ;;  %v3930_v9 = vpop.f32.mrb[0].mxu1 }
  0xef   : > { %v1733_v12 = vadd.f32 %v3866_v8, %v395_v4  ;;  %v1797_v13 = vadd.f32 %v3930_v9, %v459_v5  ;;  %v1220_v14 = vpop.f32.mrb[1].mxu0  ;;  %v1476_v15 = vpop.f32.mrb[1].mxu1 }
  0xf0   : > { %v1731_v18 = vadd.f32 %v1220_v14, %v393_v6  ;;  %v1795_v19 = vadd.f32 %v1476_v15, %v457_v7  ;;  %v3867_v20 = vpop.f32.mrb[2].mxu0  ;;  %v3931_v21 = vpop.f32.mrb[2].mxu1 }
  0xf1   : > { %1862 = vst.msk [vmem:[#allocation2 + $0x10] sm:$0xff] %vm264_vm1, %v1733_v12  ;;  %1926 = vst.msk [vmem:[#allocation2 + $0x210] sm:$0xff] %vm264_vm1, %v1797_v13  ;;  %v1734_v22 = vadd.f32 %v3867_v20, %v396_v10  ;;  %v1798_v23 = vadd.f32 %v3931_v21, %v460_v11  ;;  %v1223_v24 = vpop.f32.mrb[3].mxu0  ;;  %v1479_v25 = vpop.f32.mrb[3].mxu1  ;;  %v403_v13 = vld [vmem:[#allocation2 + $0x50] sm:$0xff] }
  0xf2   : > { %1860 = vst.msk [vmem:[#allocation2] sm:$0xff] %vm264_vm1, %v1731_v18  ;;  %1924 = vst.msk [vmem:[#allocation2 + $0x200] sm:$0xff] %vm264_vm1, %v1795_v19  ;;  %v1732_v26 = vadd.f32 %v1223_v24, %v394_v16  ;;  %v1796_v27 = vadd.f32 %v1479_v25, %v458_v17 }
  0xf3   : > { %1863 = vst.msk [vmem:[#allocation2 + $0x18] sm:$0xff] %vm264_vm1, %v1734_v22  ;;  %1927 = vst.msk [vmem:[#allocation2 + $0x218] sm:$0xff] %vm264_vm1, %v1798_v23 }
  0xf4   : > { %1861 = vst.msk [vmem:[#allocation2 + $0x8] sm:$0xff] %vm264_vm1, %v1732_v26  ;;  %1925 = vst.msk [vmem:[#allocation2 + $0x208] sm:$0xff] %vm264_vm1, %v1796_v27 }
  0xf6   : > { %v3870_v33 = vpop.f32.mrb[4].mxu0  ;;  %v3934_v34 = vpop.f32.mrb[4].mxu1 }
  0xf7   : > { %v1737_v37 = vadd.f32 %v3870_v33, %v399_v28  ;;  %v1801_v38 = vadd.f32 %v3934_v34, %v463_v29  ;;  %v1236_v39 = vpop.f32.mrb[5].mxu0  ;;  %v1492_v40 = vpop.f32.mrb[5].mxu1 }
  0xf8   : > { %v1993_v43 = vld [vmem:[#allocation2 + $0x10] sm:$0xff]  ;;  %v1735_v45 = vadd.f32 %v1236_v39, %v397_v30  ;;  %v1799_v46 = vadd.f32 %v1492_v40, %v461_v31  ;;  %v3871_v47 = vpop.f32.mrb[6].mxu0  ;;  %v3935_v48 = vpop.f32.mrb[6].mxu1 }
  0xf9   : > { %v2057_v44 = vld [vmem:[#allocation2 + $0x210] sm:$0xff]  ;;  %v2128_v49 = vadd.f32 %v4578_v32, %v1993_v43  ;;  %v1991_v51 = vld [vmem:[#allocation2] sm:$0xff]  ;;  %1866 = vst.msk [vmem:[#allocation2 + $0x30] sm:$0xff] %vm264_vm1, %v1737_v37  ;;  %1930 = vst.msk [vmem:[#allocation2 + $0x230] sm:$0xff] %vm264_vm1, %v1801_v38  ;;  %v1738_v53 = vadd.f32 %v3871_v47, %v400_v35  ;;  %v1802_v54 = vadd.f32 %v3935_v48, %v464_v36  ;;  %v1239_v55 = vpop.f32.mrb[7].mxu0  ;;  %v1495_v56 = vpop.f32.mrb[7].mxu1 }
  0xfa   : > { %v2192_v50 = vadd.f32 %v4578_v32, %v2057_v44  ;;  %v2055_v52 = vld [vmem:[#allocation2 + $0x200] sm:$0xff]  ;;  %v2126_v57 = vadd.f32 %v4578_v32, %v1991_v51  ;;  %v1994_v59 = vld [vmem:[#allocation2 + $0x18] sm:$0xff]  ;;  %1864 = vst.msk [vmem:[#allocation2 + $0x20] sm:$0xff] %vm264_vm1, %v1735_v45  ;;  %1928 = vst.msk [vmem:[#allocation2 + $0x220] sm:$0xff] %vm264_vm1, %v1799_v46  ;;  %v1736_v61 = vadd.f32 %v1239_v55, %v398_v41 }
  0xfb   : > { %v2190_v58 = vadd.f32 %v4578_v32, %v2055_v52  ;;  %v2058_v60 = vld [vmem:[#allocation2 + $0x218] sm:$0xff]  ;;  %v1800_v62 = vadd.f32 %v1495_v56, %v462_v42  ;;  %vm2256_vm3 = vcmp.ge.f32.partialorder %v2128_v49, 0.0  ;;  %v2384_v63 = vmul.f32 0.2, %v2128_v49  ;;  %1867 = vst.msk [vmem:[#allocation2 + $0x38] sm:$0xff] %vm264_vm1, %v1738_v53  ;;  %1931 = vst.msk [vmem:[#allocation2 + $0x238] sm:$0xff] %vm264_vm1, %v1802_v54 }
  0xfc   : > { %vm2320_vm4 = vcmp.ge.f32.partialorder %v2192_v50, 0.0  ;;  %v2448_v0 = vmul.f32 0.2, %v2192_v50  ;;  %vm2254_vm5 = vcmp.ge.f32.partialorder %v2126_v57, 0.0  ;;  %v2382_v1 = vmul.f32 0.2, %v2126_v57 }
  0xfd   : > { %vm2318_vm6 = vcmp.ge.f32.partialorder %v2190_v58, 0.0  ;;  %v2446_v2 = vmul.f32 0.2, %v2190_v58  ;;  %1865 = vst.msk [vmem:[#allocation2 + $0x28] sm:$0xff] %vm264_vm1, %v1736_v61  ;;  %1929 = vst.msk [vmem:[#allocation2 + $0x228] sm:$0xff] %vm264_vm1, %v1800_v62  ;;  %v2512_v3 = vsel %vm2256_vm3, %v2128_v49, %v2384_v63  ;;  %v2129_v5 = vadd.f32 %v4578_v32, %v1994_v59  ;;  %v1992_v7 = vld [vmem:[#allocation2 + $0x8] sm:$0xff] }
  0xfe   : > { %v2576_v4 = vsel %vm2320_vm4, %v2192_v50, %v2448_v0  ;;  %v2193_v6 = vadd.f32 %v4578_v32, %v2058_v60  ;;  %v2056_v8 = vld [vmem:[#allocation2 + $0x208] sm:$0xff]  ;;  %v3665_v9 = vpack.c.bf16 %v2512_v3, %v2512_v3  ;;  %v2510_v11 = vsel %vm2254_vm5, %v2126_v57, %v2382_v1  ;;  %v3874_v14 = vpop.f32.mrb[8].mxu0  ;;  %v4601_v15 = vpop.f32.mrb[8].mxu1  ;;  %v467_v62 = vld [vmem:[#allocation2 + $0x250] sm:$0xff] }
  0xff   : > { %v3729_v10 = vpack.c.bf16 %v2576_v4, %v2576_v4  ;;  %v2574_v12 = vsel %vm2318_vm6, %v2190_v58, %v2446_v2  ;;  %v3663_v16 = vpack.c.bf16 %v2510_v11, %v2510_v11  ;;  %vm2257_vm7 = vcmp.ge.f32.partialorder %v2129_v5, 0.0  ;;  %v4603_v19 = vpop.f32.mrb[9].mxu0  ;;  %v4605_v20 = vpop.f32.mrb[9].mxu1 }
 0x100   : > { %v3727_v17 = vpack.c.bf16 %v2574_v12, %v2574_v12  ;;  %v2385_v18 = vmul.f32 0.2, %v2129_v5  ;;  %3153 = vst.msk [vmem:[%s4597_s4 + $0x8] sm:$0xf] %vm3150_vm2, %v3665_v9  ;;  %vm2321_vm8 = vcmp.ge.f32.partialorder %v2193_v6, 0.0  ;;  %v2127_v22 = vadd.f32 %v4578_v32, %v1992_v7  ;;  %v1997_v24 = vld [vmem:[#allocation2 + $0x30] sm:$0xff] }
 0x101   : > { %3217 = vst.msk [vmem:[%s4597_s4 + $0x108] sm:$0xf] %vm3150_vm2, %v3729_v10  ;;  %v2449_v21 = vmul.f32 0.2, %v2193_v6  ;;  %v2191_v23 = vadd.f32 %v4578_v32, %v2056_v8  ;;  %v2061_v25 = vld [vmem:[#allocation2 + $0x230] sm:$0xff]  ;;  %v4613_v26 = vpop.f32.mrb[10].mxu0  ;;  %v2132_v28 = vadd.f32 %v4578_v32, %v1997_v24  ;;  %v1741_v30 = vadd.f32 %v3874_v14, %v403_v13 }
 0x102   : > { %3151 = vst.msk [vmem:[%s4597_s4] sm:$0xf] %vm3150_vm2, %v3663_v16  ;;  %3215 = vst.msk [vmem:[%s4597_s4 + $0x100] sm:$0xf] %vm3150_vm2, %v3727_v17  ;;  %v2513_v27 = vsel %vm2257_vm7, %v2129_v5, %v2385_v18  ;;  %v2196_v29 = vadd.f32 %v4578_v32, %v2061_v25  ;;  %v4621_v31 = vpop.f32.mrb[10].mxu1  ;;  %v4623_v33 = vpop.f32.mrb[11].mxu0  ;;  %v1805_v14 = vadd.f32 %v4601_v15, %v467_v62 }
 0x103   : > { %v3666_v34 = vpack.c.bf16 %v2513_v27, %v2513_v27  ;;  %v2577_v35 = vsel %vm2321_vm8, %v2193_v6, %v2449_v21  ;;  %vm2255_vm9 = vcmp.ge.f32.partialorder %v2127_v22, 0.0  ;;  %v2383_v36 = vmul.f32 0.2, %v2127_v22  ;;  %v1995_v37 = vld [vmem:[#allocation2 + $0x20] sm:$0xff]  ;;  %v4626_v39 = vpop.f32.mrb[11].mxu1  ;;  %v1998_v42 = vld [vmem:[#allocation2 + $0x38] sm:$0xff] }
 0x104   : > { %v2059_v38 = vld [vmem:[#allocation2 + $0x220] sm:$0xff]  ;;  %v3730_v40 = vpack.c.bf16 %v2577_v35, %v2577_v35  ;;  %vm2319_vm10 = vcmp.ge.f32.partialorder %v2191_v23, 0.0  ;;  %v2447_v41 = vmul.f32 0.2, %v2191_v23  ;;  %vm2260_vm11 = vcmp.ge.f32.partialorder %v2132_v28, 0.0  ;;  %1870 = vst.msk [vmem:[#allocation2 + $0x50] sm:$0xff] %vm264_vm1, %v1741_v30 }
 0x105   : > { %3154 = vst.msk [vmem:[%s4597_s4 + $0xc] sm:$0xf] %vm3150_vm2, %v3666_v34  ;;  %v2511_v43 = vsel %vm2255_vm9, %v2127_v22, %v2383_v36  ;;  %v2388_v44 = vmul.f32 0.2, %v2132_v28  ;;  %vm2324_vm12 = vcmp.ge.f32.partialorder %v2196_v29, 0.0  ;;  %v2130_v48 = vadd.f32 %v4578_v32, %v1995_v37  ;;  %v2062_v54 = vld [vmem:[#allocation2 + $0x238] sm:$0xff] }
 0x106   : > { %v2452_v45 = vmul.f32 0.2, %v2196_v29  ;;  %3218 = vst.msk [vmem:[%s4597_s4 + $0x10c] sm:$0xf] %vm3150_vm2, %v3730_v40  ;;  %v3664_v46 = vpack.c.bf16 %v2511_v43, %v2511_v43  ;;  %v2575_v47 = vsel %vm2319_vm10, %v2191_v23, %v2447_v41  ;;  %v2194_v49 = vadd.f32 %v4578_v32, %v2059_v38  ;;  %v1996_v55 = vld [vmem:[#allocation2 + $0x28] sm:$0xff]  ;;  %v4636_v57 = vpop.f32.mrb[12].mxu0 }
 0x107   : > { %v3728_v50 = vpack.c.bf16 %v2575_v47, %v2575_v47  ;;  %v2516_v51 = vsel %vm2260_vm11, %v2132_v28, %v2388_v44  ;;  %v2133_v53 = vadd.f32 %v4578_v32, %v1998_v42  ;;  %v2060_v56 = vld [vmem:[#allocation2 + $0x228] sm:$0xff]  ;;  %v4638_v58 = vpop.f32.mrb[12].mxu1  ;;  %vm2258_vm13 = vcmp.ge.f32.partialorder %v2130_v48, 0.0  ;;  %v4642_v63 = vpop.f32.mrb[13].mxu0  ;;  %v401_v7 = vld [vmem:[#allocation2 + $0x40] sm:$0xff]  ;;  %v404_v17 = vld [vmem:[#allocation2 + $0x58] sm:$0xff] }
 0x108   : > { %v2580_v52 = vsel %vm2324_vm12, %v2196_v29, %v2452_v45  ;;  %3152 = vst.msk [vmem:[%s4597_s4 + $0x4] sm:$0xf] %vm3150_vm2, %v3664_v46  ;;  %v3669_v59 = vpack.c.bf16 %v2516_v51, %v2516_v51  ;;  %v2386_v61 = vmul.f32 0.2, %v2130_v48  ;;  %v4644_v0 = vpop.f32.mrb[13].mxu1  ;;  %vm2322_vm14 = vcmp.ge.f32.partialorder %v2194_v49, 0.0 }
 0x109   : > { %v3733_v60 = vpack.c.bf16 %v2580_v52, %v2580_v52  ;;  %3216 = vst.msk [vmem:[%s4597_s4 + $0x104] sm:$0xf] %vm3150_vm2, %v3728_v50  ;;  %v2450_v1 = vmul.f32 0.2, %v2194_v49  ;;  %vm2261_vm15 = vcmp.ge.f32.partialorder %v2133_v53, 0.0  ;;  %v2197_v4 = vadd.f32 %v4578_v32, %v2062_v54  ;;  %v4655_v8 = vpop.f32.mrb[14].mxu0 }
 0x10a   : > { %v2389_v2 = vmul.f32 0.2, %v2133_v53  ;;  %3157 = vst.msk [vmem:[%s4597_s4 + $0x18] sm:$0xf] %vm3150_vm2, %v3669_v59  ;;  %v2514_v3 = vsel %vm2258_vm13, %v2130_v48, %v2386_v61  ;;  %v2131_v5 = vadd.f32 %v4578_v32, %v1996_v55  ;;  %v2195_v6 = vadd.f32 %v4578_v32, %v2060_v56  ;;  %v4657_v9 = vpop.f32.mrb[14].mxu1  ;;  %v465_v16 = vld [vmem:[#allocation2 + $0x240] sm:$0xff] }
 0x10b   : > { %3221 = vst.msk [vmem:[%s4597_s4 + $0x118] sm:$0xf] %vm3150_vm2, %v3733_v60  ;;  %v3667_v10 = vpack.c.bf16 %v2514_v3, %v2514_v3  ;;  %v2578_v11 = vsel %vm2322_vm14, %v2194_v49, %v2450_v1  ;;  %v2001_v13 = vld [vmem:[#allocation2 + $0x50] sm:$0xff]  ;;  %v4660_v18 = vpop.f32.mrb[15].mxu0  ;;  %v4662_v21 = vpop.f32.mrb[15].mxu1  ;;  %vm2325_vm0 = vcmp.ge.f32.partialorder %v2197_v4, 0.0  ;;  %v1739_v36 = vadd.f32 %v4603_v19, %v401_v7 }
 0x10c   : > { %v2517_v12 = vsel %vm2261_vm15, %v2133_v53, %v2389_v2  ;;  %v3731_v22 = vpack.c.bf16 %v2578_v11, %v2578_v11  ;;  %v2453_v24 = vmul.f32 0.2, %v2197_v4  ;;  %v468_v25 = vld [vmem:[#allocation2 + $0x258] sm:$0xff]  ;;  %v402_v27 = vld [vmem:[#allocation2 + $0x48] sm:$0xff]  ;;  %v407_v29 = vld [vmem:[#allocation2 + $0x70] sm:$0xff]  ;;  %vm2259_vm3 = vcmp.ge.f32.partialorder %v2131_v5, 0.0 }
 0x10d   : > { %v3670_v23 = vpack.c.bf16 %v2517_v12, %v2517_v12  ;;  %v466_v28 = vld [vmem:[#allocation2 + $0x248] sm:$0xff]  ;;  %3155 = vst.msk [vmem:[%s4597_s4 + $0x10] sm:$0xf] %vm3150_vm2, %v3667_v10  ;;  %v2387_v15 = vmul.f32 0.2, %v2131_v5  ;;  %vm2323_vm4 = vcmp.ge.f32.partialorder %v2195_v6, 0.0  ;;  %v2136_v35 = vadd.f32 %v4578_v32, %v2001_v13 }
 0x10e   : > { %v2451_v30 = vmul.f32 0.2, %v2195_v6  ;;  %1934 = vst.msk [vmem:[#allocation2 + $0x250] sm:$0xff] %vm264_vm1, %v1805_v14  ;;  %v2581_v34 = vsel %vm2325_vm0, %v2197_v4, %v2453_v24  ;;  %v1803_v37 = vadd.f32 %v4605_v20, %v465_v16  ;;  %v471_v38 = vld [vmem:[#allocation2 + $0x270] sm:$0xff]  ;;  %v405_v40 = vld [vmem:[#allocation2 + $0x60] sm:$0xff]  ;;  %v1742_v45 = vadd.f32 %v4613_v26, %v404_v17  ;;  %v408_v46 = vld [vmem:[#allocation2 + $0x78] sm:$0xff] }
 0x10f   : > { %3219 = vst.msk [vmem:[%s4597_s4 + $0x110] sm:$0xf] %vm3150_vm2, %v3731_v22  ;;  %3158 = vst.msk [vmem:[%s4597_s4 + $0x1c] sm:$0xf] %vm3150_vm2, %v3670_v23  ;;  %v469_v41 = vld [vmem:[#allocation2 + $0x260] sm:$0xff]  ;;  %v3734_v42 = vpack.c.bf16 %v2581_v34, %v2581_v34  ;;  %v2515_v43 = vsel %vm2259_vm3, %v2131_v5, %v2387_v15  ;;  %v472_v47 = vld [vmem:[#allocation2 + $0x278] sm:$0xff]  ;;  %v1806_v26 = vadd.f32 %v4621_v31, %v468_v25 }
 0x110   : > { %v2579_v44 = vsel %vm2323_vm4, %v2195_v6, %v2451_v30  ;;  %v406_v48 = vld [vmem:[#allocation2 + $0x68] sm:$0xff]  ;;  %v3882_v49 = vpop.f32.mrb[16].mxu0  ;;  %v3946_v50 = vpop.f32.mrb[16].mxu1  ;;  %v3668_v51 = vpack.c.bf16 %v2515_v43, %v2515_v43  ;;  %vm2264_vm5 = vcmp.ge.f32.partialorder %v2136_v35, 0.0  ;;  %v2392_v19 = vmul.f32 0.2, %v2136_v35 }
 0x111   : > { %v3732_v52 = vpack.c.bf16 %v2579_v44, %v2579_v44  ;;  %1868 = vst.msk [vmem:[#allocation2 + $0x40] sm:$0xff] %vm264_vm1, %v1739_v36  ;;  %1932 = vst.msk [vmem:[#allocation2 + $0x240] sm:$0xff] %vm264_vm1, %v1803_v37  ;;  %v470_v20 = vld [vmem:[#allocation2 + $0x268] sm:$0xff]  ;;  %v1284_v53 = vpop.f32.mrb[17].mxu0  ;;  %v1540_v54 = vpop.f32.mrb[17].mxu1  ;;  %v1740_v55 = vadd.f32 %v4623_v33, %v402_v27  ;;  %v1804_v56 = vadd.f32 %v4626_v39, %v466_v28  ;;  %v411_v60 = vld [vmem:[#allocation2 + $0x90] sm:$0xff] }
 0x112   : > { %3222 = vst.msk [vmem:[%s4597_s4 + $0x11c] sm:$0xf] %vm3150_vm2, %v3734_v42  ;;  %v1745_v59 = vadd.f32 %v4636_v57, %v407_v29  ;;  %v475_v61 = vld [vmem:[#allocation2 + $0x290] sm:$0xff]  ;;  %v409_v62 = vld [vmem:[#allocation2 + $0x80] sm:$0xff]  ;;  %v3883_v1 = vpop.f32.mrb[18].mxu0  ;;  %v3947_v2 = vpop.f32.mrb[18].mxu1  ;;  %v2520_v3 = vsel %vm2264_vm5, %v2136_v35, %v2392_v19  ;;  %v1809_v4 = vadd.f32 %v4638_v58, %v471_v38  ;;  %v1743_v31 = vadd.f32 %v4642_v63, %v405_v40 }
 0x113   : > { %1871 = vst.msk [vmem:[#allocation2 + $0x58] sm:$0xff] %vm264_vm1, %v1742_v45  ;;  %v1807_v33 = vadd.f32 %v4644_v0, %v469_v41  ;;  %v473_v39 = vld [vmem:[#allocation2 + $0x280] sm:$0xff]  ;;  %v412_v5 = vld [vmem:[#allocation2 + $0x98] sm:$0xff]  ;;  %v1287_v6 = vpop.f32.mrb[19].mxu0  ;;  %v1543_v7 = vpop.f32.mrb[19].mxu1  ;;  %v3673_v10 = vpack.c.bf16 %v2520_v3, %v2520_v3  ;;  %1935 = vst.msk [vmem:[#allocation2 + $0x258] sm:$0xff] %vm264_vm1, %v1806_v26  ;;  %v1746_v58 = vadd.f32 %v4655_v8, %v408_v46 }
 0x114   : > { %3156 = vst.msk [vmem:[%s4597_s4 + $0x14] sm:$0xf] %vm3150_vm2, %v3668_v51  ;;  %3220 = vst.msk [vmem:[%s4597_s4 + $0x114] sm:$0xf] %vm3150_vm2, %v3732_v52  ;;  %v476_v57 = vld [vmem:[#allocation2 + $0x298] sm:$0xff]  ;;  %v1810_v63 = vadd.f32 %v4657_v9, %v472_v47  ;;  %v1744_v0 = vadd.f32 %v4660_v18, %v406_v48  ;;  %v410_v11 = vld [vmem:[#allocation2 + $0x88] sm:$0xff]  ;;  %v1808_v14 = vadd.f32 %v4662_v21, %v470_v20 }
 0x115   : > { %1869 = vst.msk [vmem:[#allocation2 + $0x48] sm:$0xff] %vm264_vm1, %v1740_v55  ;;  %1933 = vst.msk [vmem:[#allocation2 + $0x248] sm:$0xff] %vm264_vm1, %v1804_v56  ;;  %v474_v12 = vld [vmem:[#allocation2 + $0x288] sm:$0xff]  ;;  %v2065_v13 = vld [vmem:[#allocation2 + $0x250] sm:$0xff]  ;;  %v1749_v16 = vadd.f32 %v3882_v49, %v411_v60  ;;  %v1813_v17 = vadd.f32 %v3946_v50, %v475_v61  ;;  %v1747_v22 = vadd.f32 %v1284_v53, %v409_v62 }
 0x116   : > { %1874 = vst.msk [vmem:[#allocation2 + $0x70] sm:$0xff] %vm264_vm1, %v1745_v59  ;;  %1938 = vst.msk [vmem:[#allocation2 + $0x270] sm:$0xff] %vm264_vm1, %v1809_v4  ;;  %v2200_v8 = vadd.f32 %v4578_v32, %v2065_v13  ;;  %v1811_v9 = vadd.f32 %v1540_v54, %v473_v39  ;;  %v1750_v18 = vadd.f32 %v3883_v1, %v412_v5  ;;  %v415_v24 = vld [vmem:[#allocation2 + $0xb0] sm:$0xff]  ;;  %v413_v28 = vld [vmem:[#allocation2 + $0xa0] sm:$0xff]  ;;  %v3886_v34 = vpop.f32.mrb[20].mxu0  ;;  %v3950_v40 = vpop.f32.mrb[20].mxu1 }
 0x117   : > { %1872 = vst.msk [vmem:[#allocation2 + $0x60] sm:$0xff] %vm264_vm1, %v1743_v31  ;;  %1936 = vst.msk [vmem:[#allocation2 + $0x260] sm:$0xff] %vm264_vm1, %v1807_v33  ;;  %v1814_v23 = vadd.f32 %v3947_v2, %v476_v57  ;;  %v1748_v21 = vadd.f32 %v1287_v6, %v410_v11  ;;  %v1812_v25 = vadd.f32 %v1543_v7, %v474_v12  ;;  %v479_v27 = vld [vmem:[#allocation2 + $0x2b0] sm:$0xff]  ;;  %v1300_v41 = vpop.f32.mrb[21].mxu0  ;;  %v477_v46 = vld [vmem:[#allocation2 + $0x2a0] sm:$0xff]  ;;  %v1556_v47 = vpop.f32.mrb[21].mxu1 }
 0x118   : > { %3161 = vst.msk [vmem:[%s4597_s4 + $0x28] sm:$0xf] %vm3150_vm2, %v3673_v10  ;;  %vm2328_vm6 = vcmp.ge.f32.partialorder %v2200_v8, 0.0  ;;  %v2456_v29 = vmul.f32 0.2, %v2200_v8  ;;  %v1999_v15 = vld [vmem:[#allocation2 + $0x40] sm:$0xff]  ;;  %v1753_v38 = vadd.f32 %v3886_v34, %v415_v24  ;;  %v1817_v44 = vadd.f32 %v3950_v40, %v479_v27 }
 0x119   : > { %1875 = vst.msk [vmem:[#allocation2 + $0x78] sm:$0xff] %vm264_vm1, %v1746_v58  ;;  %1939 = vst.msk [vmem:[#allocation2 + $0x278] sm:$0xff] %vm264_vm1, %v1810_v63  ;;  %v2063_v30 = vld [vmem:[#allocation2 + $0x240] sm:$0xff]  ;;  %v2134_v35 = vadd.f32 %v4578_v32, %v1999_v15  ;;  %v1751_v45 = vadd.f32 %v1300_v41, %v413_v28  ;;  %v4722_v48 = vpop.f32.mrb[22].mxu0  ;;  %v1815_v60 = vadd.f32 %v1556_v47, %v477_v46  ;;  %v4732_v61 = vpop.f32.mrb[22].mxu1 }
 0x11a   : > { %1873 = vst.msk [vmem:[#allocation2 + $0x68] sm:$0xff] %vm264_vm1, %v1744_v0  ;;  %1937 = vst.msk [vmem:[#allocation2 + $0x268] sm:$0xff] %vm264_vm1, %v1808_v14  ;;  %v2198_v36 = vadd.f32 %v4578_v32, %v2063_v30  ;;  %v2002_v37 = vld [vmem:[#allocation2 + $0x58] sm:$0xff]  ;;  %v2584_v42 = vsel %vm2328_vm6, %v2200_v8, %v2456_v29  ;;  %v4734_v62 = vpop.f32.mrb[23].mxu0  ;;  %v4738_v39 = vpop.f32.mrb[23].mxu1 }
 0x11b   : > { %1878 = vst.msk [vmem:[#allocation2 + $0x90] sm:$0xff] %vm264_vm1, %v1749_v16  ;;  %1942 = vst.msk [vmem:[#allocation2 + $0x290] sm:$0xff] %vm264_vm1, %v1813_v17  ;;  %v2137_v43 = vadd.f32 %v4578_v32, %v2002_v37  ;;  %v3737_v49 = vpack.c.bf16 %v2584_v42, %v2584_v42  ;;  %vm2262_vm7 = vcmp.ge.f32.partialorder %v2134_v35, 0.0  ;;  %v2390_v50 = vmul.f32 0.2, %v2134_v35  ;;  %v2066_v51 = vld [vmem:[#allocation2 + $0x258] sm:$0xff] }
 0x11c   : > { %1876 = vst.msk [vmem:[#allocation2 + $0x80] sm:$0xff] %vm264_vm1, %v1747_v22  ;;  %1940 = vst.msk [vmem:[#allocation2 + $0x280] sm:$0xff] %vm264_vm1, %v1811_v9  ;;  %vm2326_vm8 = vcmp.ge.f32.partialorder %v2198_v36, 0.0  ;;  %v2000_v52 = vld [vmem:[#allocation2 + $0x48] sm:$0xff]  ;;  %v2454_v19 = vmul.f32 0.2, %v2198_v36  ;;  %v2201_v53 = vadd.f32 %v4578_v32, %v2066_v51 }
 0x11d   : > { %1879 = vst.msk [vmem:[#allocation2 + $0x98] sm:$0xff] %vm264_vm1, %v1750_v18  ;;  %1943 = vst.msk [vmem:[#allocation2 + $0x298] sm:$0xff] %vm264_vm1, %v1814_v23  ;;  %vm2265_vm9 = vcmp.ge.f32.partialorder %v2137_v43, 0.0  ;;  %v2393_v20 = vmul.f32 0.2, %v2137_v43  ;;  %v2064_v54 = vld [vmem:[#allocation2 + $0x248] sm:$0xff]  ;;  %v2518_v26 = vsel %vm2262_vm7, %v2134_v35, %v2390_v50  ;;  %v2135_v55 = vadd.f32 %v4578_v32, %v2000_v52 }
 0x11e   : > { %1877 = vst.msk [vmem:[#allocation2 + $0x88] sm:$0xff] %vm264_vm1, %v1748_v21  ;;  %1941 = vst.msk [vmem:[#allocation2 + $0x288] sm:$0xff] %vm264_vm1, %v1812_v25  ;;  %v2199_v56 = vadd.f32 %v4578_v32, %v2064_v54  ;;  %v2005_v59 = vld [vmem:[#allocation2 + $0x70] sm:$0xff]  ;;  %v3671_v1 = vpack.c.bf16 %v2518_v26, %v2518_v26  ;;  %v2582_v2 = vsel %vm2326_vm8, %v2198_v36, %v2454_v19  ;;  %vm2329_vm10 = vcmp.ge.f32.partialorder %v2201_v53, 0.0  ;;  %v2003_v31 = vld [vmem:[#allocation2 + $0x60] sm:$0xff]  ;;  %v4752_v13 = vpop.f32.mrb[24].mxu0 }
 0x11f   : > { %1882 = vst.msk [vmem:[#allocation2 + $0xb0] sm:$0xff] %vm264_vm1, %v1753_v38  ;;  %1946 = vst.msk [vmem:[#allocation2 + $0x2b0] sm:$0xff] %vm264_vm1, %v1817_v44  ;;  %v2521_v3 = vsel %vm2265_vm9, %v2137_v43, %v2393_v20  ;;  %v2069_v4 = vld [vmem:[#allocation2 + $0x270] sm:$0xff]  ;;  %v2067_v33 = vld [vmem:[#allocation2 + $0x260] sm:$0xff]  ;;  %v3735_v5 = vpack.c.bf16 %v2582_v2, %v2582_v2  ;;  %v2457_v6 = vmul.f32 0.2, %v2201_v53  ;;  %v2140_v58 = vadd.f32 %v4578_v32, %v2005_v59 }
 0x120   : > { %1880 = vst.msk [vmem:[#allocation2 + $0xa0] sm:$0xff] %vm264_vm1, %v1751_v45  ;;  %v3674_v57 = vpack.c.bf16 %v2521_v3, %v2521_v3  ;;  %vm2263_vm11 = vcmp.ge.f32.partialorder %v2135_v55, 0.0  ;;  %1944 = vst.msk [vmem:[#allocation2 + $0x2a0] sm:$0xff] %vm264_vm1, %v1815_v60  ;;  %v2391_v7 = vmul.f32 0.2, %v2135_v55  ;;  %vm2327_vm12 = vcmp.ge.f32.partialorder %v2199_v56, 0.0 }
 0x121   : > { %3225 = vst.msk [vmem:[%s4597_s4 + $0x128] sm:$0xf] %vm3150_vm2, %v3737_v49  ;;  %3159 = vst.msk [vmem:[%s4597_s4 + $0x20] sm:$0xf] %vm3150_vm2, %v3671_v1  ;;  %v2455_v10 = vmul.f32 0.2, %v2199_v56  ;;  %v2585_v63 = vsel %vm2329_vm10, %v2201_v53, %v2457_v6  ;;  %v2204_v0 = vadd.f32 %v4578_v32, %v2069_v4  ;;  %v2138_v11 = vadd.f32 %v4578_v32, %v2003_v31 }
 0x122   : > { %3223 = vst.msk [vmem:[%s4597_s4 + $0x120] sm:$0xf] %vm3150_vm2, %v3735_v5  ;;  %3162 = vst.msk [vmem:[%s4597_s4 + $0x2c] sm:$0xf] %vm3150_vm2, %v3674_v57  ;;  %v2202_v12 = vadd.f32 %v4578_v32, %v2067_v33  ;;  %v4754_v14 = vpop.f32.mrb[24].mxu1  ;;  %v3738_v16 = vpack.c.bf16 %v2585_v63, %v2585_v63  ;;  %v2519_v17 = vsel %vm2263_vm11, %v2135_v55, %v2391_v7  ;;  %vm2268_vm13 = vcmp.ge.f32.partialorder %v2140_v58, 0.0 }
 0x123   : > { %v2583_v22 = vsel %vm2327_vm12, %v2199_v56, %v2455_v10  ;;  %v2006_v8 = vld [vmem:[#allocation2 + $0x78] sm:$0xff]  ;;  %v4757_v18 = vpop.f32.mrb[25].mxu0  ;;  %v4759_v23 = vpop.f32.mrb[25].mxu1  ;;  %v3672_v24 = vpack.c.bf16 %v2519_v17, %v2519_v17  ;;  %v2396_v25 = vmul.f32 0.2, %v2140_v58  ;;  %vm2332_vm14 = vcmp.ge.f32.partialorder %v2204_v0, 0.0 }
 0x124   : > { %v2070_v9 = vld [vmem:[#allocation2 + $0x278] sm:$0xff]  ;;  %v3736_v21 = vpack.c.bf16 %v2583_v22, %v2583_v22  ;;  %v2004_v27 = vld [vmem:[#allocation2 + $0x68] sm:$0xff]  ;;  %3226 = vst.msk [vmem:[%s4597_s4 + $0x12c] sm:$0xf] %vm3150_vm2, %v3738_v16  ;;  %v2460_v28 = vmul.f32 0.2, %v2204_v0  ;;  %v2141_v34 = vadd.f32 %v4578_v32, %v2006_v8 }
 0x125   : > { %vm2266_vm15 = vcmp.ge.f32.partialorder %v2138_v11, 0.0  ;;  %v2394_v29 = vmul.f32 0.2, %v2138_v11  ;;  %vm2330_vm0 = vcmp.ge.f32.partialorder %v2202_v12, 0.0  ;;  %3160 = vst.msk [vmem:[%s4597_s4 + $0x24] sm:$0xf] %vm3150_vm2, %v3672_v24  ;;  %v2524_v15 = vsel %vm2268_vm13, %v2140_v58, %v2396_v25 }
 0x126   : > { %3224 = vst.msk [vmem:[%s4597_s4 + $0x124] sm:$0xf] %vm3150_vm2, %v3736_v21  ;;  %v2458_v30 = vmul.f32 0.2, %v2202_v12  ;;  %v2205_v35 = vadd.f32 %v4578_v32, %v2070_v9  ;;  %v4770_v36 = vpop.f32.mrb[26].mxu0  ;;  %v4772_v37 = vpop.f32.mrb[26].mxu1  ;;  %v3677_v38 = vpack.c.bf16 %v2524_v15, %v2524_v15  ;;  %v2588_v40 = vsel %vm2332_vm14, %v2204_v0, %v2460_v28 }
 0x127   : > { %v2522_v41 = vsel %vm2266_vm15, %v2138_v11, %v2394_v29  ;;  %v2139_v42 = vadd.f32 %v4578_v32, %v2004_v27  ;;  %v2068_v43 = vld [vmem:[#allocation2 + $0x268] sm:$0xff]  ;;  %v2009_v44 = vld [vmem:[#allocation2 + $0x90] sm:$0xff]  ;;  %v4776_v45 = vpop.f32.mrb[27].mxu0  ;;  %v4778_v46 = vpop.f32.mrb[27].mxu1  ;;  %v3741_v47 = vpack.c.bf16 %v2588_v40, %v2588_v40  ;;  %vm2269_vm3 = vcmp.ge.f32.partialorder %v2141_v34, 0.0  ;;  %v2007_v52 = vld [vmem:[#allocation2 + $0x80] sm:$0xff] }
 0x128   : > { %v3675_v49 = vpack.c.bf16 %v2522_v41, %v2522_v41  ;;  %v2586_v50 = vsel %vm2330_vm0, %v2202_v12, %v2458_v30  ;;  %v2073_v51 = vld [vmem:[#allocation2 + $0x290] sm:$0xff]  ;;  %3165 = vst.msk [vmem:[%s4597_s4 + $0x38] sm:$0xf] %vm3150_vm2, %v3677_v38  ;;  %v2397_v20 = vmul.f32 0.2, %v2141_v34  ;;  %vm2333_vm4 = vcmp.ge.f32.partialorder %v2205_v35, 0.0 }
 0x129   : > { %v3739_v19 = vpack.c.bf16 %v2586_v50, %v2586_v50  ;;  %v2461_v53 = vmul.f32 0.2, %v2205_v35  ;;  %v4783_v54 = vpop.f32.mrb[28].mxu0  ;;  %3229 = vst.msk [vmem:[%s4597_s4 + $0x138] sm:$0xf] %vm3150_vm2, %v3741_v47  ;;  %vm2267_vm5 = vcmp.ge.f32.partialorder %v2139_v42, 0.0  ;;  %v2203_v55 = vadd.f32 %v4578_v32, %v2068_v43 }
 0x12a   : > { %3163 = vst.msk [vmem:[%s4597_s4 + $0x30] sm:$0xf] %vm3150_vm2, %v3675_v49  ;;  %v2395_v26 = vmul.f32 0.2, %v2139_v42  ;;  %v2144_v56 = vadd.f32 %v4578_v32, %v2009_v44  ;;  %v4791_v59 = vpop.f32.mrb[28].mxu1  ;;  %v4793_v60 = vpop.f32.mrb[29].mxu0  ;;  %v2525_v1 = vsel %vm2269_vm3, %v2141_v34, %v2397_v20  ;;  %v2208_v3 = vadd.f32 %v4578_v32, %v2073_v51 }
 0x12b   : > { %3227 = vst.msk [vmem:[%s4597_s4 + $0x130] sm:$0xf] %vm3150_vm2, %v3739_v19  ;;  %v2589_v2 = vsel %vm2333_vm4, %v2205_v35, %v2461_v53  ;;  %v2142_v4 = vadd.f32 %v4578_v32, %v2007_v52  ;;  %v4800_v31 = vpop.f32.mrb[29].mxu1  ;;  %v4802_v33 = vpop.f32.mrb[30].mxu0  ;;  %v3678_v5 = vpack.c.bf16 %v2525_v1, %v2525_v1  ;;  %vm2331_vm6 = vcmp.ge.f32.partialorder %v2203_v55, 0.0  ;;  %v2071_v7 = vld [vmem:[#allocation2 + $0x280] sm:$0xff] }
 0x12c   : > { %v3742_v57 = vpack.c.bf16 %v2589_v2, %v2589_v2  ;;  %v2523_v6 = vsel %vm2267_vm5, %v2139_v42, %v2395_v26  ;;  %v2010_v10 = vld [vmem:[#allocation2 + $0x98] sm:$0xff]  ;;  %v4804_v58 = vpop.f32.mrb[30].mxu1  ;;  %v4806_v63 = vpop.f32.mrb[31].mxu0  ;;  %v2459_v11 = vmul.f32 0.2, %v2203_v55  ;;  %vm2272_vm7 = vcmp.ge.f32.partialorder %v2144_v56, 0.0 }
 0x12d   : > { %v3676_v0 = vpack.c.bf16 %v2523_v6, %v2523_v6  ;;  %v2400_v12 = vmul.f32 0.2, %v2144_v56  ;;  %v4808_v16 = vpop.f32.mrb[31].mxu1  ;;  %3166 = vst.msk [vmem:[%s4597_s4 + $0x3c] sm:$0xf] %vm3150_vm2, %v3678_v5  ;;  %vm2336_vm8 = vcmp.ge.f32.partialorder %v2208_v3, 0.0  ;;  %v2206_v24 = vadd.f32 %v4578_v32, %v2071_v7 }
 0x12e   : > { %3230 = vst.msk [vmem:[%s4597_s4 + $0x13c] sm:$0xf] %vm3150_vm2, %v3742_v57  ;;  %v2464_v17 = vmul.f32 0.2, %v2208_v3  ;;  %vm2270_vm9 = vcmp.ge.f32.partialorder %v2142_v4, 0.0  ;;  %v2587_v8 = vsel %vm2331_vm6, %v2203_v55, %v2459_v11  ;;  %v2145_v21 = vadd.f32 %v4578_v32, %v2010_v10  ;;  %v2074_v25 = vld [vmem:[#allocation2 + $0x298] sm:$0xff] }
 0x12f   : > { %v2398_v22 = vmul.f32 0.2, %v2142_v4  ;;  %3164 = vst.msk [vmem:[%s4597_s4 + $0x34] sm:$0xf] %vm3150_vm2, %v3676_v0  ;;  %v2528_v9 = vsel %vm2272_vm7, %v2144_v56, %v2400_v12  ;;  %v2008_v27 = vld [vmem:[#allocation2 + $0x88] sm:$0xff]  ;;  %v3740_v28 = vpack.c.bf16 %v2587_v8, %v2587_v8  ;;  %v2013_v35 = vld [vmem:[#allocation2 + $0xb0] sm:$0xff]  ;;  %v2209_v49 = vadd.f32 %v4578_v32, %v2074_v25 }
 0x130   : > { %v3681_v29 = vpack.c.bf16 %v2528_v9, %v2528_v9  ;;  %v2592_v15 = vsel %vm2336_vm8, %v2208_v3, %v2464_v17  ;;  %v2072_v34 = vld [vmem:[#allocation2 + $0x288] sm:$0xff]  ;;  %v2077_v38 = vld [vmem:[#allocation2 + $0x2b0] sm:$0xff]  ;;  %vm2334_vm10 = vcmp.ge.f32.partialorder %v2206_v24, 0.0  ;;  %v2462_v42 = vmul.f32 0.2, %v2206_v24  ;;  %v4819_v43 = vpop.f32.mrb[32].mxu0 }
 0x131   : > { %v2526_v30 = vsel %vm2270_vm9, %v2142_v4, %v2398_v22  ;;  %v3745_v40 = vpack.c.bf16 %v2592_v15, %v2592_v15  ;;  %v4821_v44 = vpop.f32.mrb[32].mxu1  ;;  %3228 = vst.msk [vmem:[%s4597_s4 + $0x134] sm:$0xf] %vm3150_vm2, %v3740_v28  ;;  %vm2273_vm11 = vcmp.ge.f32.partialorder %v2145_v21, 0.0  ;;  %v2401_v47 = vmul.f32 0.2, %v2145_v21 }
 0x132   : > { %v3679_v41 = vpack.c.bf16 %v2526_v30, %v2526_v30  ;;  %3169 = vst.msk [vmem:[%s4597_s4 + $0x48] sm:$0xf] %vm3150_vm2, %v3681_v29  ;;  %v2143_v50 = vadd.f32 %v4578_v32, %v2008_v27  ;;  %v4829_v51 = vpop.f32.mrb[33].mxu0  ;;  %v4831_v52 = vpop.f32.mrb[33].mxu1  ;;  %v2590_v19 = vsel %vm2334_vm10, %v2206_v24, %v2462_v42  ;;  %v2207_v20 = vadd.f32 %v4578_v32, %v2072_v34  ;;  %v2011_v7 = vld [vmem:[#allocation2 + $0xa0] sm:$0xff]  ;;  %v416_v10 = vld [vmem:[#allocation2 + $0xb8] sm:$0xff] }
 0x133   : > { %3233 = vst.msk [vmem:[%s4597_s4 + $0x148] sm:$0xf] %vm3150_vm2, %v3745_v40  ;;  %v2148_v53 = vadd.f32 %v4578_v32, %v2013_v35  ;;  %v2212_v26 = vadd.f32 %v4578_v32, %v2077_v38  ;;  %v4840_v55 = vpop.f32.mrb[34].mxu0  ;;  %v4842_v56 = vpop.f32.mrb[34].mxu1  ;;  %v3743_v1 = vpack.c.bf16 %v2590_v19, %v2590_v19  ;;  %v2529_v2 = vsel %vm2273_vm11, %v2145_v21, %v2401_v47  ;;  %v2075_v17 = vld [vmem:[#allocation2 + $0x2a0] sm:$0xff]  ;;  %v480_v22 = vld [vmem:[#allocation2 + $0x2b8] sm:$0xff] }
 0x134   : > { %3167 = vst.msk [vmem:[%s4597_s4 + $0x40] sm:$0xf] %vm3150_vm2, %v3679_v41  ;;  %vm2337_vm12 = vcmp.ge.f32.partialorder %v2209_v49, 0.0  ;;  %v2465_v3 = vmul.f32 0.2, %v2209_v49  ;;  %v4844_v4 = vpop.f32.mrb[35].mxu0  ;;  %v3682_v57 = vpack.c.bf16 %v2529_v2, %v2529_v2  ;;  %v2146_v30 = vadd.f32 %v4578_v32, %v2011_v7 }
 0x135   : > { %v4846_v5 = vpop.f32.mrb[35].mxu1  ;;  %vm2271_vm13 = vcmp.ge.f32.partialorder %v2143_v50, 0.0  ;;  %v2399_v6 = vmul.f32 0.2, %v2143_v50  ;;  %vm2335_vm14 = vcmp.ge.f32.partialorder %v2207_v20, 0.0  ;;  %vm2276_vm15 = vcmp.ge.f32.partialorder %v2148_v53, 0.0 }
 0x136   : > { %3231 = vst.msk [vmem:[%s4597_s4 + $0x140] sm:$0xf] %vm3150_vm2, %v3743_v1  ;;  %v2593_v0 = vsel %vm2337_vm12, %v2209_v49, %v2465_v3  ;;  %v2463_v11 = vmul.f32 0.2, %v2207_v20  ;;  %v2404_v12 = vmul.f32 0.2, %v2148_v53  ;;  %v2210_v47 = vadd.f32 %v4578_v32, %v2075_v17 }
 0x137   : > { %3170 = vst.msk [vmem:[%s4597_s4 + $0x4c] sm:$0xf] %vm3150_vm2, %v3682_v57  ;;  %v3746_v8 = vpack.c.bf16 %v2593_v0, %v2593_v0  ;;  %v2527_v9 = vsel %vm2271_vm13, %v2143_v50, %v2399_v6  ;;  %vm2340_vm0 = vcmp.ge.f32.partialorder %v2212_v26, 0.0  ;;  %v2468_v24 = vmul.f32 0.2, %v2212_v26  ;;  %v414_v21 = vld [vmem:[#allocation2 + $0xa8] sm:$0xff] }
 0x138   : > { %v478_v25 = vld [vmem:[#allocation2 + $0x2a8] sm:$0xff]  ;;  %v419_v27 = vld [vmem:[#allocation2 + $0xd0] sm:$0xff]  ;;  %v3680_v28 = vpack.c.bf16 %v2527_v9, %v2527_v9  ;;  %v2591_v29 = vsel %vm2335_vm14, %v2207_v20, %v2463_v11  ;;  %v2532_v15 = vsel %vm2276_vm15, %v2148_v53, %v2404_v12  ;;  %v417_v35 = vld [vmem:[#allocation2 + $0xc0] sm:$0xff]  ;;  %v4857_v20 = vpop.f32.mrb[36].mxu0  ;;  %v4859_v53 = vpop.f32.mrb[36].mxu1  ;;  %vm2274_vm3 = vcmp.ge.f32.partialorder %v2146_v30, 0.0 }
 0x139   : > { %v483_v34 = vld [vmem:[#allocation2 + $0x2d0] sm:$0xff]  ;;  %v481_v38 = vld [vmem:[#allocation2 + $0x2c0] sm:$0xff]  ;;  %3234 = vst.msk [vmem:[%s4597_s4 + $0x14c] sm:$0xf] %vm3150_vm2, %v3746_v8  ;;  %v3744_v40 = vpack.c.bf16 %v2591_v29, %v2591_v29  ;;  %v3685_v41 = vpack.c.bf16 %v2532_v15, %v2532_v15  ;;  %v2596_v42 = vsel %vm2340_vm0, %v2212_v26, %v2468_v24  ;;  %v420_v49 = vld [vmem:[#allocation2 + $0xd8] sm:$0xff]  ;;  %v1754_v3 = vadd.f32 %v4722_v48, %v416_v10  ;;  %v4864_v7 = vpop.f32.mrb[37].mxu0 }
 0x13a   : > { %v484_v50 = vld [vmem:[#allocation2 + $0x2d8] sm:$0xff]  ;;  %v418_v19 = vld [vmem:[#allocation2 + $0xc8] sm:$0xff]  ;;  %3168 = vst.msk [vmem:[%s4597_s4 + $0x44] sm:$0xf] %vm3150_vm2, %v3680_v28  ;;  %v3749_v1 = vpack.c.bf16 %v2596_v42, %v2596_v42  ;;  %v2402_v2 = vmul.f32 0.2, %v2146_v30  ;;  %v1818_v12 = vadd.f32 %v4732_v61, %v480_v22  ;;  %v1752_v17 = vadd.f32 %v4734_v62, %v414_v21 }
 0x13b   : > { %v482_v26 = vld [vmem:[#allocation2 + $0x2c8] sm:$0xff]  ;;  %v423_v57 = vld [vmem:[#allocation2 + $0xf0] sm:$0xff]  ;;  %v421_v6 = vld [vmem:[#allocation2 + $0xe0] sm:$0xff]  ;;  %v4866_v0 = vpop.f32.mrb[37].mxu1  ;;  %3232 = vst.msk [vmem:[%s4597_s4 + $0x144] sm:$0xf] %vm3150_vm2, %v3744_v40  ;;  %v1816_v24 = vadd.f32 %v4738_v39, %v478_v25  ;;  %v1757_v28 = vadd.f32 %v4752_v13, %v419_v27  ;;  %v1821_v29 = vadd.f32 %v4754_v14, %v483_v34  ;;  %v1755_v39 = vadd.f32 %v4757_v18, %v417_v35 }
 0x13c   : > { %v487_v32 = vld [vmem:[#allocation2 + $0x2f0] sm:$0xff]  ;;  %3173 = vst.msk [vmem:[%s4597_s4 + $0x58] sm:$0xf] %vm3150_vm2, %v3685_v41  ;;  %vm2338_vm4 = vcmp.ge.f32.partialorder %v2210_v47, 0.0  ;;  %v2466_v11 = vmul.f32 0.2, %v2210_v47  ;;  %v2530_v9 = vsel %vm2274_vm3, %v2146_v30, %v2402_v2  ;;  %v1819_v13 = vadd.f32 %v4759_v23, %v481_v38 }
 0x13d   : > { %v485_v48 = vld [vmem:[#allocation2 + $0x2e0] sm:$0xff]  ;;  %v4874_v10 = vpop.f32.mrb[38].mxu0  ;;  %v4876_v8 = vpop.f32.mrb[38].mxu1  ;;  %3237 = vst.msk [vmem:[%s4597_s4 + $0x158] sm:$0xf] %vm3150_vm2, %v3749_v1  ;;  %v424_v61 = vld [vmem:[#allocation2 + $0xf8] sm:$0xff]  ;;  %v3683_v40 = vpack.c.bf16 %v2530_v9, %v2530_v9  ;;  %v1758_v34 = vadd.f32 %v4770_v36, %v420_v49  ;;  %v1822_v42 = vadd.f32 %v4772_v37, %v484_v50  ;;  %v1820_v38 = vadd.f32 %v4778_v46, %v482_v26 }
 0x13e   : > { %1883 = vst.msk [vmem:[#allocation2 + $0xb8] sm:$0xff] %vm264_vm1, %v1754_v3  ;;  %v488_v22 = vld [vmem:[#allocation2 + $0x2f8] sm:$0xff]  ;;  %v422_v62 = vld [vmem:[#allocation2 + $0xe8] sm:$0xff]  ;;  %v4885_v21 = vpop.f32.mrb[39].mxu0  ;;  %v4887_v15 = vpop.f32.mrb[39].mxu1  ;;  %v2594_v41 = vsel %vm2338_vm4, %v2210_v47, %v2466_v11  ;;  %1947 = vst.msk [vmem:[#allocation2 + $0x2b8] sm:$0xff] %vm264_vm1, %v1818_v12  ;;  %v1756_v47 = vadd.f32 %v4776_v45, %v418_v19  ;;  %v1761_v1 = vadd.f32 %v4783_v54, %v423_v57 }
 0x13f   : > { %1881 = vst.msk [vmem:[#allocation2 + $0xa8] sm:$0xff] %vm264_vm1, %v1752_v17  ;;  %v486_v14 = vld [vmem:[#allocation2 + $0x2e8] sm:$0xff]  ;;  %v427_v25 = vld [vmem:[#allocation2 + $0x110] sm:$0xff]  ;;  %v3747_v30 = vpack.c.bf16 %v2594_v41, %v2594_v41  ;;  %1945 = vst.msk [vmem:[#allocation2 + $0x2a8] sm:$0xff] %vm264_vm1, %v1816_v24  ;;  %v1825_v36 = vadd.f32 %v4791_v59, %v487_v32  ;;  %v1759_v49 = vadd.f32 %v4793_v60, %v421_v6  ;;  %v4925_v6 = vpop.f32.mrb[40].mxu0  ;;  %v4927_v11 = vpop.f32.mrb[40].mxu1 }
 0x140   : > { %v491_v27 = vld [vmem:[#allocation2 + $0x310] sm:$0xff]  ;;  %1886 = vst.msk [vmem:[#allocation2 + $0xd0] sm:$0xff] %vm264_vm1, %v1757_v28  ;;  %1950 = vst.msk [vmem:[#allocation2 + $0x2d0] sm:$0xff] %vm264_vm1, %v1821_v29  ;;  %v425_v18 = vld [vmem:[#allocation2 + $0x100] sm:$0xff]  ;;  %v1823_v19 = vadd.f32 %v4800_v31, %v485_v48  ;;  %v1762_v46 = vadd.f32 %v4802_v33, %v424_v61  ;;  %v1826_v54 = vadd.f32 %v4804_v58, %v488_v22  ;;  %v4937_v48 = vpop.f32.mrb[41].mxu0  ;;  %v4939_v9 = vpop.f32.mrb[41].mxu1 }
 0x141   : > { %v489_v35 = vld [vmem:[#allocation2 + $0x300] sm:$0xff]  ;;  %v428_v23 = vld [vmem:[#allocation2 + $0x118] sm:$0xff]  ;;  %3171 = vst.msk [vmem:[%s4597_s4 + $0x50] sm:$0xf] %vm3150_vm2, %v3683_v40  ;;  %v426_v50 = vld [vmem:[#allocation2 + $0x108] sm:$0xff]  ;;  %v1760_v59 = vadd.f32 %v4806_v63, %v422_v62  ;;  %v1824_v26 = vadd.f32 %v4808_v16, %v486_v14  ;;  %v1765_v31 = vadd.f32 %v4819_v43, %v427_v25  ;;  %v1829_v33 = vadd.f32 %v4821_v44, %v491_v27  ;;  %v4949_v28 = vpop.f32.mrb[42].mxu0 }
 0x142   : > { %1884 = vst.msk [vmem:[#allocation2 + $0xc0] sm:$0xff] %vm264_vm1, %v1755_v39  ;;  %1948 = vst.msk [vmem:[#allocation2 + $0x2c0] sm:$0xff] %vm264_vm1, %v1819_v13  ;;  %v492_v37 = vld [vmem:[#allocation2 + $0x318] sm:$0xff]  ;;  %v490_v45 = vld [vmem:[#allocation2 + $0x308] sm:$0xff]  ;;  %v1763_v58 = vadd.f32 %v4829_v51, %v425_v18  ;;  %v1827_v16 = vadd.f32 %v4831_v52, %v489_v35  ;;  %v1766_v43 = vadd.f32 %v4840_v55, %v428_v23  ;;  %v4951_v29 = vpop.f32.mrb[42].mxu1 }
 0x143   : > { %3235 = vst.msk [vmem:[%s4597_s4 + $0x150] sm:$0xf] %vm3150_vm2, %v3747_v30  ;;  %v431_v60 = vld [vmem:[#allocation2 + $0x130] sm:$0xff]  ;;  %v429_v3 = vld [vmem:[#allocation2 + $0x120] sm:$0xff]  ;;  %v432_v57 = vld [vmem:[#allocation2 + $0x138] sm:$0xff]  ;;  %v1830_v44 = vadd.f32 %v4842_v56, %v492_v37  ;;  %v1764_v51 = vadd.f32 %v4844_v4, %v426_v50  ;;  %v1828_v52 = vadd.f32 %v4846_v5, %v490_v45  ;;  %v4968_v41 = vpop.f32.mrb[43].mxu1 }
 0x144   : > { %1887 = vst.msk [vmem:[#allocation2 + $0xd8] sm:$0xff] %vm264_vm1, %v1758_v34  ;;  %1951 = vst.msk [vmem:[#allocation2 + $0x2d8] sm:$0xff] %vm264_vm1, %v1822_v42  ;;  %v495_v2 = vld [vmem:[#allocation2 + $0x330] sm:$0xff]  ;;  %v493_v63 = vld [vmem:[#allocation2 + $0x320] sm:$0xff]  ;;  %v1769_v55 = vadd.f32 %v4857_v20, %v431_v60  ;;  %v1767_v4 = vadd.f32 %v4864_v7, %v429_v3  ;;  %v1770_v20 = vadd.f32 %v4874_v10, %v432_v57  ;;  %v4966_v7 = vpop.f32.mrb[43].mxu0 }
 0x145   : > { %1885 = vst.msk [vmem:[#allocation2 + $0xc8] sm:$0xff] %vm264_vm1, %v1756_v47  ;;  %1949 = vst.msk [vmem:[#allocation2 + $0x2c8] sm:$0xff] %vm264_vm1, %v1820_v38  ;;  %v496_v32 = vld [vmem:[#allocation2 + $0x338] sm:$0xff]  ;;  %v430_v12 = vld [vmem:[#allocation2 + $0x128] sm:$0xff]  ;;  %v1833_v56 = vadd.f32 %v4859_v53, %v495_v2  ;;  %v1831_v5 = vadd.f32 %v4866_v0, %v493_v63 }
 0x146   : > { %1890 = vst.msk [vmem:[#allocation2 + $0xf0] sm:$0xff] %vm264_vm1, %v1761_v1  ;;  %1954 = vst.msk [vmem:[#allocation2 + $0x2f0] sm:$0xff] %vm264_vm1, %v1825_v36  ;;  %v494_v17 = vld [vmem:[#allocation2 + $0x328] sm:$0xff]  ;;  %v2014_v24 = vld [vmem:[#allocation2 + $0xb8] sm:$0xff]  ;;  %v1834_v53 = vadd.f32 %v4876_v8, %v496_v32  ;;  %v1768_v0 = vadd.f32 %v4885_v21, %v430_v12  ;;  %v4985_v37 = vpop.f32.mrb[44].mxu0 }
 0x147   : > { %1888 = vst.msk [vmem:[#allocation2 + $0xe0] sm:$0xff] %vm264_vm1, %v1759_v49  ;;  %1952 = vst.msk [vmem:[#allocation2 + $0x2e0] sm:$0xff] %vm264_vm1, %v1823_v19  ;;  %v4956_v61 = vld [vmem:[%s5438_s2] ss:$0 sm:$0xff]  ;;  %v2078_v62 = vld [vmem:[#allocation2 + $0x2b8] sm:$0xff]  ;;  %v1832_v10 = vadd.f32 %v4887_v15, %v494_v17 }
 0x148   : > { %1891 = vst.msk [vmem:[#allocation2 + $0xf8] sm:$0xff] %vm264_vm1, %v1762_v46  ;;  %1955 = vst.msk [vmem:[#allocation2 + $0x2f8] sm:$0xff] %vm264_vm1, %v1826_v54  ;;  %v2149_v22 = vadd.f32 %v4956_v61, %v2014_v24  ;;  %v2012_v40 = vld [vmem:[#allocation2 + $0xa8] sm:$0xff]  ;;  %v2213_v39 = vadd.f32 %v4956_v61, %v2078_v62  ;;  %v2017_v25 = vld [vmem:[#allocation2 + $0xd0] sm:$0xff]  ;;  %v4988_v54 = vpop.f32.mrb[44].mxu1 }
 0x149   : > { %1889 = vst.msk [vmem:[#allocation2 + $0xe8] sm:$0xff] %vm264_vm1, %v1760_v59  ;;  %1953 = vst.msk [vmem:[#allocation2 + $0x2e8] sm:$0xff] %vm264_vm1, %v1824_v26  ;;  %v2147_v13 = vadd.f32 %v4956_v61, %v2012_v40  ;;  %v2076_v14 = vld [vmem:[#allocation2 + $0x2a8] sm:$0xff]  ;;  %v2152_v30 = vadd.f32 %v4956_v61, %v2017_v25  ;;  %v2081_v34 = vld [vmem:[#allocation2 + $0x2d0] sm:$0xff]  ;;  %v4990_v59 = vpop.f32.mrb[45].mxu0 }
 0x14a   : > { %1894 = vst.msk [vmem:[#allocation2 + $0x110] sm:$0xff] %vm264_vm1, %v1765_v31  ;;  %1958 = vst.msk [vmem:[#allocation2 + $0x310] sm:$0xff] %vm264_vm1, %v1829_v33  ;;  %vm2277_vm5 = vcmp.ge.f32.partialorder %v2149_v22, 0.0  ;;  %v2405_v8 = vmul.f32 0.2, %v2149_v22  ;;  %v2211_v27 = vadd.f32 %v4956_v61, %v2076_v14  ;;  %vm2341_vm6 = vcmp.ge.f32.partialorder %v2213_v39, 0.0 }
 0x14b   : > { %1892 = vst.msk [vmem:[#allocation2 + $0x100] sm:$0xff] %vm264_vm1, %v1763_v58  ;;  %1956 = vst.msk [vmem:[#allocation2 + $0x300] sm:$0xff] %vm264_vm1, %v1827_v16  ;;  %v2469_v42 = vmul.f32 0.2, %v2213_v39  ;;  %vm2275_vm7 = vcmp.ge.f32.partialorder %v2147_v13, 0.0  ;;  %vm2280_vm9 = vcmp.ge.f32.partialorder %v2152_v30, 0.0  ;;  %v2216_v46 = vadd.f32 %v4956_v61, %v2081_v34 }
 0x14c   : > { %1895 = vst.msk [vmem:[#allocation2 + $0x118] sm:$0xff] %vm264_vm1, %v1766_v43  ;;  %1959 = vst.msk [vmem:[#allocation2 + $0x318] sm:$0xff] %vm264_vm1, %v1830_v44  ;;  %v2403_v47 = vmul.f32 0.2, %v2147_v13  ;;  %v2533_v21 = vsel %vm2277_vm5, %v2149_v22, %v2405_v8  ;;  %vm2339_vm8 = vcmp.ge.f32.partialorder %v2211_v27, 0.0  ;;  %v2015_v18 = vld [vmem:[#allocation2 + $0xc0] sm:$0xff] }
 0x14d   : > { %1893 = vst.msk [vmem:[#allocation2 + $0x108] sm:$0xff] %vm264_vm1, %v1764_v51  ;;  %1957 = vst.msk [vmem:[#allocation2 + $0x308] sm:$0xff] %vm264_vm1, %v1828_v52  ;;  %v2467_v15 = vmul.f32 0.2, %v2211_v27  ;;  %v2079_v35 = vld [vmem:[#allocation2 + $0x2c0] sm:$0xff]  ;;  %v3686_v23 = vpack.c.bf16 %v2533_v21, %v2533_v21  ;;  %v2597_v38 = vsel %vm2341_vm6, %v2213_v39, %v2469_v42  ;;  %v2018_v49 = vld [vmem:[#allocation2 + $0xd8] sm:$0xff]  ;;  %v2150_v3 = vadd.f32 %v4956_v61, %v2015_v18 }
 0x14e   : > { %1898 = vst.msk [vmem:[#allocation2 + $0x130] sm:$0xff] %vm264_vm1, %v1769_v55  ;;  %1962 = vst.msk [vmem:[#allocation2 + $0x330] sm:$0xff] %vm264_vm1, %v1833_v56  ;;  %v2531_v1 = vsel %vm2275_vm7, %v2147_v13, %v2403_v47  ;;  %v2408_v36 = vmul.f32 0.2, %v2152_v30  ;;  %v3750_v50 = vpack.c.bf16 %v2597_v38, %v2597_v38  ;;  %v2214_v26 = vadd.f32 %v4956_v61, %v2079_v35  ;;  %v2082_v31 = vld [vmem:[#allocation2 + $0x2d8] sm:$0xff]  ;;  %v4997_v33 = vpop.f32.mrb[45].mxu1 }
 0x14f   : > { %1896 = vst.msk [vmem:[#allocation2 + $0x120] sm:$0xff] %vm264_vm1, %v1767_v4  ;;  %1960 = vst.msk [vmem:[#allocation2 + $0x320] sm:$0xff] %vm264_vm1, %v1831_v5  ;;  %v3684_v45 = vpack.c.bf16 %v2531_v1, %v2531_v1  ;;  %v2595_v19 = vsel %vm2339_vm8, %v2211_v27, %v2467_v15  ;;  %v4999_v58 = vpop.f32.mrb[46].mxu0  ;;  %vm2344_vm10 = vcmp.ge.f32.partialorder %v2216_v46, 0.0  ;;  %v2472_v57 = vmul.f32 0.2, %v2216_v46 }
 0x150   : > { %1899 = vst.msk [vmem:[#allocation2 + $0x138] sm:$0xff] %vm264_vm1, %v1770_v20  ;;  %1963 = vst.msk [vmem:[#allocation2 + $0x338] sm:$0xff] %vm264_vm1, %v1834_v53  ;;  %v3748_v60 = vpack.c.bf16 %v2595_v19, %v2595_v19  ;;  %v2536_v2 = vsel %vm2280_vm9, %v2152_v30, %v2408_v36  ;;  %v2153_v32 = vadd.f32 %v4956_v61, %v2018_v49  ;;  %v2016_v16 = vld [vmem:[#allocation2 + $0xc8] sm:$0xff]  ;;  %vm2278_vm11 = vcmp.ge.f32.partialorder %v2150_v3, 0.0  ;;  %v2021_v22 = vld [vmem:[#allocation2 + $0xf0] sm:$0xff]  ;;  %v5012_v5 = vpop.f32.mrb[46].mxu1 }
 0x151   : > { %1897 = vst.msk [vmem:[#allocation2 + $0x128] sm:$0xff] %vm264_vm1, %v1768_v0  ;;  %1961 = vst.msk [vmem:[#allocation2 + $0x328] sm:$0xff] %vm264_vm1, %v1832_v10  ;;  %v3689_v63 = vpack.c.bf16 %v2536_v2, %v2536_v2  ;;  %v2406_v43 = vmul.f32 0.2, %v2150_v3  ;;  %vm2342_vm12 = vcmp.ge.f32.partialorder %v2214_v26, 0.0  ;;  %v2600_v51 = vsel %vm2344_vm10, %v2216_v46, %v2472_v57  ;;  %v2080_v24 = vld [vmem:[#allocation2 + $0x2c8] sm:$0xff] }
 0x152   : > { %3174 = vst.msk [vmem:[%s4597_s4 + $0x5c] sm:$0xf] %vm3150_vm2, %v3686_v23  ;;  %3238 = vst.msk [vmem:[%s4597_s4 + $0x15c] sm:$0xf] %vm3150_vm2, %v3750_v50  ;;  %v2470_v44 = vmul.f32 0.2, %v2214_v26  ;;  %v2217_v17 = vadd.f32 %v4956_v61, %v2082_v31  ;;  %v3753_v52 = vpack.c.bf16 %v2600_v51, %v2600_v51  ;;  %v2151_v4 = vadd.f32 %v4956_v61, %v2016_v16 }
 0x153   : > { %3172 = vst.msk [vmem:[%s4597_s4 + $0x54] sm:$0xf] %vm3150_vm2, %v3684_v45  ;;  %3236 = vst.msk [vmem:[%s4597_s4 + $0x154] sm:$0xf] %vm3150_vm2, %v3748_v60  ;;  %vm2281_vm13 = vcmp.ge.f32.partialorder %v2153_v32, 0.0  ;;  %v2534_v55 = vsel %vm2278_vm11, %v2150_v3, %v2406_v43  ;;  %v2085_v62 = vld [vmem:[#allocation2 + $0x2f0] sm:$0xff]  ;;  %v2215_v30 = vadd.f32 %v4956_v61, %v2080_v24  ;;  %v2156_v34 = vadd.f32 %v4956_v61, %v2021_v22 }
 0x154   : > { %3177 = vst.msk [vmem:[%s4597_s4 + $0x68] sm:$0xf] %vm3150_vm2, %v3689_v63  ;;  %v2409_v12 = vmul.f32 0.2, %v2153_v32  ;;  %v2598_v56 = vsel %vm2342_vm12, %v2214_v26, %v2470_v44  ;;  %v2019_v40 = vld [vmem:[#allocation2 + $0xe0] sm:$0xff]  ;;  %v5014_v20 = vpop.f32.mrb[47].mxu0  ;;  %v3687_v53 = vpack.c.bf16 %v2534_v55, %v2534_v55  ;;  %v2220_v42 = vadd.f32 %v4956_v61, %v2085_v62 }
 0x155   : > { %v3751_v39 = vpack.c.bf16 %v2598_v56, %v2598_v56  ;;  %vm2345_vm14 = vcmp.ge.f32.partialorder %v2217_v17, 0.0  ;;  %v2083_v14 = vld [vmem:[#allocation2 + $0x2e0] sm:$0xff]  ;;  %v2022_v25 = vld [vmem:[#allocation2 + $0xf8] sm:$0xff]  ;;  %v5016_v0 = vpop.f32.mrb[47].mxu1  ;;  %3241 = vst.msk [vmem:[%s4597_s4 + $0x168] sm:$0xf] %vm3150_vm2, %v3753_v52  ;;  %v2154_v47 = vadd.f32 %v4956_v61, %v2019_v40 }
 0x156   : > { %v2537_v13 = vsel %vm2281_vm13, %v2153_v32, %v2409_v12  ;;  %v2473_v8 = vmul.f32 0.2, %v2217_v17  ;;  %vm2279_vm15 = vcmp.ge.f32.partialorder %v2151_v4, 0.0  ;;  %v2407_v27 = vmul.f32 0.2, %v2151_v4  ;;  %v5028_v21 = vpop.f32.mrb[48].mxu0 }
 0x157   : > { %v3690_v10 = vpack.c.bf16 %v2537_v13, %v2537_v13  ;;  %3175 = vst.msk [vmem:[%s4597_s4 + $0x60] sm:$0xf] %vm3150_vm2, %v3687_v53  ;;  %3239 = vst.msk [vmem:[%s4597_s4 + $0x160] sm:$0xf] %vm3150_vm2, %v3751_v39  ;;  %v5030_v15 = vpop.f32.mrb[48].mxu1  ;;  %v2218_v23 = vadd.f32 %v4956_v61, %v2083_v14  ;;  %v2157_v38 = vadd.f32 %v4956_v61, %v2022_v25  ;;  %v5037_v1 = vpop.f32.mrb[49].mxu0 }
 0x158   : > { %v2601_v18 = vsel %vm2345_vm14, %v2217_v17, %v2473_v8  ;;  %v2535_v35 = vsel %vm2279_vm15, %v2151_v4, %v2407_v27  ;;  %v5039_v36 = vpop.f32.mrb[49].mxu1  ;;  %vm2343_vm0 = vcmp.ge.f32.partialorder %v2215_v30, 0.0  ;;  %v2471_v45 = vmul.f32 0.2, %v2215_v30  ;;  %v2086_v19 = vld [vmem:[#allocation2 + $0x2f8] sm:$0xff]  ;;  %v5041_v46 = vpop.f32.mrb[50].mxu0 }
 0x159   : > { %3178 = vst.msk [vmem:[%s4597_s4 + $0x6c] sm:$0xf] %vm3150_vm2, %v3690_v10  ;;  %v3754_v49 = vpack.c.bf16 %v2601_v18, %v2601_v18  ;;  %v3688_v50 = vpack.c.bf16 %v2535_v35, %v2535_v35  ;;  %v5043_v60 = vpop.f32.mrb[50].mxu1  ;;  %vm2284_vm3 = vcmp.ge.f32.partialorder %v2156_v34, 0.0  ;;  %v2412_v2 = vmul.f32 0.2, %v2156_v34 }
 0x15a   : > { %vm2348_vm4 = vcmp.ge.f32.partialorder %v2220_v42, 0.0  ;;  %v2476_v3 = vmul.f32 0.2, %v2220_v42  ;;  %v2599_v26 = vsel %vm2343_vm0, %v2215_v30, %v2471_v45  ;;  %vm2282_vm5 = vcmp.ge.f32.partialorder %v2154_v47, 0.0  ;;  %v5049_v63 = vpop.f32.mrb[51].mxu0  ;;  %v5051_v57 = vpop.f32.mrb[51].mxu1 }
 0x15b   : > { %3242 = vst.msk [vmem:[%s4597_s4 + $0x16c] sm:$0xf] %vm3150_vm2, %v3754_v49  ;;  %3176 = vst.msk [vmem:[%s4597_s4 + $0x64] sm:$0xf] %vm3150_vm2, %v3688_v50  ;;  %v2410_v31 = vmul.f32 0.2, %v2154_v47  ;;  %v3752_v32 = vpack.c.bf16 %v2599_v26, %v2599_v26  ;;  %v2540_v16 = vsel %vm2284_vm3, %v2156_v34, %v2412_v2  ;;  %v2221_v40 = vadd.f32 %v4956_v61, %v2086_v19 }
 0x15c   : > { %vm2346_vm6 = vcmp.ge.f32.partialorder %v2218_v23, 0.0  ;;  %v2604_v43 = vsel %vm2348_vm4, %v2220_v42, %v2476_v3  ;;  %v2474_v44 = vmul.f32 0.2, %v2218_v23  ;;  %v2020_v51 = vld [vmem:[#allocation2 + $0xe8] sm:$0xff]  ;;  %v2025_v17 = vld [vmem:[#allocation2 + $0x110] sm:$0xff]  ;;  %v3693_v24 = vpack.c.bf16 %v2540_v16, %v2540_v16  ;;  %v5057_v53 = vpop.f32.mrb[52].mxu0 }
 0x15d   : > { %v2084_v12 = vld [vmem:[#allocation2 + $0x2e8] sm:$0xff]  ;;  %v3757_v52 = vpack.c.bf16 %v2604_v43, %v2604_v43  ;;  %v2538_v55 = vsel %vm2282_vm5, %v2154_v47, %v2410_v31  ;;  %vm2285_vm7 = vcmp.ge.f32.partialorder %v2157_v38, 0.0  ;;  %v2089_v56 = vld [vmem:[#allocation2 + $0x310] sm:$0xff]  ;;  %3240 = vst.msk [vmem:[%s4597_s4 + $0x164] sm:$0xf] %vm3150_vm2, %v3752_v32  ;;  %v5059_v39 = vpop.f32.mrb[52].mxu1  ;;  %v2155_v14 = vadd.f32 %v4956_v61, %v2020_v51 }
 0x15e   : > { %v3691_v4 = vpack.c.bf16 %v2538_v55, %v2538_v55  ;;  %v2602_v22 = vsel %vm2346_vm6, %v2218_v23, %v2474_v44  ;;  %v2413_v62 = vmul.f32 0.2, %v2157_v38  ;;  %3181 = vst.msk [vmem:[%s4597_s4 + $0x78] sm:$0xf] %vm3150_vm2, %v3693_v24  ;;  %v2219_v25 = vadd.f32 %v4956_v61, %v2084_v12  ;;  %v5068_v8 = vpop.f32.mrb[53].mxu0  ;;  %v5070_v27 = vpop.f32.mrb[53].mxu1 }
 0x15f   : > { %3245 = vst.msk [vmem:[%s4597_s4 + $0x178] sm:$0xf] %vm3150_vm2, %v3757_v52  ;;  %v3755_v13 = vpack.c.bf16 %v2602_v22, %v2602_v22  ;;  %v2160_v10 = vadd.f32 %v4956_v61, %v2025_v17  ;;  %vm2349_vm8 = vcmp.ge.f32.partialorder %v2221_v40, 0.0  ;;  %v2477_v34 = vmul.f32 0.2, %v2221_v40  ;;  %v2023_v47 = vld [vmem:[#allocation2 + $0x100] sm:$0xff] }
 0x160   : > { %3179 = vst.msk [vmem:[%s4597_s4 + $0x70] sm:$0xf] %vm3150_vm2, %v3691_v4  ;;  %v2541_v30 = vsel %vm2285_vm7, %v2157_v38, %v2413_v62  ;;  %v2224_v42 = vadd.f32 %v4956_v61, %v2089_v56  ;;  %v5076_v18 = vpop.f32.mrb[54].mxu0  ;;  %v5078_v35 = vpop.f32.mrb[54].mxu1  ;;  %vm2283_vm9 = vcmp.ge.f32.partialorder %v2155_v14, 0.0  ;;  %vm2347_vm10 = vcmp.ge.f32.partialorder %v2219_v25, 0.0 }
 0x161   : > { %3243 = vst.msk [vmem:[%s4597_s4 + $0x170] sm:$0xf] %vm3150_vm2, %v3755_v13  ;;  %v3694_v23 = vpack.c.bf16 %v2541_v30, %v2541_v30  ;;  %v2411_v49 = vmul.f32 0.2, %v2155_v14  ;;  %v5082_v50 = vpop.f32.mrb[55].mxu0  ;;  %v5084_v45 = vpop.f32.mrb[55].mxu1  ;;  %v2605_v38 = vsel %vm2349_vm8, %v2221_v40, %v2477_v34  ;;  %v2158_v12 = vadd.f32 %v4956_v61, %v2023_v47 }
 0x162   : > { %v2475_v19 = vmul.f32 0.2, %v2219_v25  ;;  %vm2288_vm11 = vcmp.ge.f32.partialorder %v2160_v10, 0.0  ;;  %v2416_v2 = vmul.f32 0.2, %v2160_v10  ;;  %v2087_v3 = vld [vmem:[#allocation2 + $0x300] sm:$0xff]  ;;  %v3758_v26 = vpack.c.bf16 %v2605_v38, %v2605_v38 }
 0x163   : > { %3182 = vst.msk [vmem:[%s4597_s4 + $0x7c] sm:$0xf] %vm3150_vm2, %v3694_v23  ;;  %v2539_v31 = vsel %vm2283_vm9, %v2155_v14, %v2411_v49  ;;  %vm2352_vm12 = vcmp.ge.f32.partialorder %v2224_v42, 0.0  ;;  %v2480_v32 = vmul.f32 0.2, %v2224_v42  ;;  %v2026_v16 = vld [vmem:[#allocation2 + $0x118] sm:$0xff]  ;;  %v2222_v4 = vadd.f32 %v4956_v61, %v2087_v3 }
 0x164   : > { %v3692_v43 = vpack.c.bf16 %v2539_v31, %v2539_v31  ;;  %v2603_v44 = vsel %vm2347_vm10, %v2219_v25, %v2475_v19  ;;  %v2544_v51 = vsel %vm2288_vm11, %v2160_v10, %v2416_v2  ;;  %v2090_v17 = vld [vmem:[#allocation2 + $0x318] sm:$0xff]  ;;  %v2024_v24 = vld [vmem:[#allocation2 + $0x108] sm:$0xff]  ;;  %3246 = vst.msk [vmem:[%s4597_s4 + $0x17c] sm:$0xf] %vm3150_vm2, %v3758_v26  ;;  %vm2286_vm13 = vcmp.ge.f32.partialorder %v2158_v12, 0.0  ;;  %v5095_v14 = vpop.f32.mrb[56].mxu0 }
 0x165   : > { %v3756_v52 = vpack.c.bf16 %v2603_v44, %v2603_v44  ;;  %v3697_v55 = vpack.c.bf16 %v2544_v51, %v2544_v51  ;;  %v2608_v56 = vsel %vm2352_vm12, %v2224_v42, %v2480_v32  ;;  %v2088_v22 = vld [vmem:[#allocation2 + $0x308] sm:$0xff]  ;;  %v2414_v40 = vmul.f32 0.2, %v2158_v12  ;;  %v5097_v25 = vpop.f32.mrb[56].mxu1  ;;  %v5105_v42 = vpop.f32.mrb[57].mxu0  ;;  %v2029_v19 = vld [vmem:[#allocation2 + $0x130] sm:$0xff] }
 0x166   : > { %3180 = vst.msk [vmem:[%s4597_s4 + $0x74] sm:$0xf] %vm3150_vm2, %v3692_v43  ;;  %v3761_v62 = vpack.c.bf16 %v2608_v56, %v2608_v56  ;;  %v2161_v13 = vadd.f32 %v4956_v61, %v2026_v16  ;;  %vm2350_vm14 = vcmp.ge.f32.partialorder %v2222_v4, 0.0  ;;  %v2478_v10 = vmul.f32 0.2, %v2222_v4  ;;  %v5107_v47 = vpop.f32.mrb[57].mxu1 }
 0x167   : > { %3244 = vst.msk [vmem:[%s4597_s4 + $0x174] sm:$0xf] %vm3150_vm2, %v3756_v52  ;;  %3185 = vst.msk [vmem:[%s4597_s4 + $0x88] sm:$0xf] %vm3150_vm2, %v3697_v55  ;;  %v2225_v30 = vadd.f32 %v4956_v61, %v2090_v17  ;;  %v2159_v34 = vadd.f32 %v4956_v61, %v2024_v24  ;;  %v2542_v23 = vsel %vm2286_vm13, %v2158_v12, %v2414_v40  ;;  %v5112_v2 = vpop.f32.mrb[58].mxu0  ;;  %v5114_v3 = vpop.f32.mrb[58].mxu1 }
 0x168   : > { %5440 = vst [vmem:[#allocation3_spill] sm:$0xff] %v5107_v47  ;;  %3249 = vst.msk [vmem:[%s4597_s4 + $0x188] sm:$0xf] %vm3150_vm2, %v3761_v62  ;;  %vm2289_vm15 = vcmp.ge.f32.partialorder %v2161_v13, 0.0  ;;  %v2417_v49 = vmul.f32 0.2, %v2161_v13  ;;  %v2223_v38 = vadd.f32 %v4956_v61, %v2088_v22  ;;  %v3695_v26 = vpack.c.bf16 %v2542_v23, %v2542_v23 }
 0x169   : > { %5441 = vst [vmem:[#allocation4_spill] sm:$0xff] %v5112_v2  ;;  %5442 = vst [vmem:[#allocation5_spill] sm:$0xff] %v5114_v3  ;;  %v2606_v31 = vsel %vm2350_vm14, %v2222_v4, %v2478_v10  ;;  %vm2353_vm0 = vcmp.ge.f32.partialorder %v2225_v30, 0.0  ;;  %v2481_v32 = vmul.f32 0.2, %v2225_v30  ;;  %v2093_v16 = vld [vmem:[#allocation2 + $0x330] sm:$0xff]  ;;  %v2164_v40 = vadd.f32 %v4956_v61, %v2029_v19 }
 0x16a   : > { %v5116_v43 = vpop.f32.mrb[59].mxu0  ;;  %v5118_v44 = vpop.f32.mrb[59].mxu1  ;;  %v3759_v51 = vpack.c.bf16 %v2606_v31, %v2606_v31  ;;  %v2545_v12 = vsel %vm2289_vm15, %v2161_v13, %v2417_v49  ;;  %vm2287_vm3 = vcmp.ge.f32.partialorder %v2159_v34, 0.0  ;;  %v2415_v17 = vmul.f32 0.2, %v2159_v34  ;;  %v2027_v24 = vld [vmem:[#allocation2 + $0x120] sm:$0xff] }
 0x16b   : > { %5443 = vst [vmem:[#allocation6_spill] sm:$0xff] %v5116_v43  ;;  %5444 = vst [vmem:[#allocation7_spill] sm:$0xff] %v5118_v44  ;;  %v2091_v52 = vld [vmem:[#allocation2 + $0x320] sm:$0xff]  ;;  %v3698_v55 = vpack.c.bf16 %v2545_v12, %v2545_v12  ;;  %v2609_v56 = vsel %vm2353_vm0, %v2225_v30, %v2481_v32  ;;  %vm2351_vm4 = vcmp.ge.f32.partialorder %v2223_v38, 0.0  ;;  %v2479_v4 = vmul.f32 0.2, %v2223_v38 }
 0x16c   : > { %3183 = vst.msk [vmem:[%s4597_s4 + $0x80] sm:$0xf] %vm3150_vm2, %v3695_v26  ;;  %3247 = vst.msk [vmem:[%s4597_s4 + $0x180] sm:$0xf] %vm3150_vm2, %v3759_v51  ;;  %v3762_v22 = vpack.c.bf16 %v2609_v56, %v2609_v56  ;;  %v2543_v62 = vsel %vm2287_vm3, %v2159_v34, %v2415_v17  ;;  %v2228_v10 = vadd.f32 %v4956_v61, %v2093_v16  ;;  %v2030_v26 = vld [vmem:[#allocation2 + $0x138] sm:$0xff]  ;;  %v2028_v32 = vld [vmem:[#allocation2 + $0x128] sm:$0xff] }
 0x16d   : > { %3186 = vst.msk [vmem:[%s4597_s4 + $0x8c] sm:$0xf] %vm3150_vm2, %v3698_v55  ;;  %v3696_v13 = vpack.c.bf16 %v2543_v62, %v2543_v62  ;;  %v2607_v23 = vsel %vm2351_vm4, %v2223_v38, %v2479_v4  ;;  %v2162_v49 = vadd.f32 %v4956_v61, %v2027_v24  ;;  %v2226_v30 = vadd.f32 %v4956_v61, %v2091_v52  ;;  %v2094_v31 = vld [vmem:[#allocation2 + $0x338] sm:$0xff]  ;;  %v5132_v16 = vpop.f32.mrb[60].mxu0  ;;  %v5134_v51 = vpop.f32.mrb[60].mxu1  ;;  %v503_v43 = vld [vmem:[#allocation2 + $0x370] sm:$0xff] }
 0x16e   : > { %3250 = vst.msk [vmem:[%s4597_s4 + $0x18c] sm:$0xf] %vm3150_vm2, %v3762_v22  ;;  %v3760_v34 = vpack.c.bf16 %v2607_v23, %v2607_v23  ;;  %vm2292_vm5 = vcmp.ge.f32.partialorder %v2164_v40, 0.0  ;;  %v2420_v19 = vmul.f32 0.2, %v2164_v40  ;;  %vm2356_vm6 = vcmp.ge.f32.partialorder %v2228_v10, 0.0 }
 0x16f   : > { %5445 = vst [vmem:[#allocation8_spill] sm:$0xff] %v5132_v16  ;;  %5446 = vst [vmem:[#allocation9_spill] sm:$0xff] %v5134_v51  ;;  %v2484_v38 = vmul.f32 0.2, %v2228_v10  ;;  %vm2290_vm7 = vcmp.ge.f32.partialorder %v2162_v49, 0.0  ;;  %vm2354_vm8 = vcmp.ge.f32.partialorder %v2226_v30, 0.0  ;;  %v2165_v52 = vadd.f32 %v4956_v61, %v2030_v26 }
 0x170   : > { %3184 = vst.msk [vmem:[%s4597_s4 + $0x84] sm:$0xf] %vm3150_vm2, %v3696_v13  ;;  %v2418_v12 = vmul.f32 0.2, %v2162_v49  ;;  %3248 = vst.msk [vmem:[%s4597_s4 + $0x184] sm:$0xf] %vm3150_vm2, %v3760_v34  ;;  %v2548_v17 = vsel %vm2292_vm5, %v2164_v40, %v2420_v19  ;;  %v2229_v55 = vadd.f32 %v4956_v61, %v2094_v31  ;;  %v2163_v23 = vadd.f32 %v4956_v61, %v2028_v32 }
 0x171   : > { %v2482_v24 = vmul.f32 0.2, %v2226_v30  ;;  %v5142_v56 = vpop.f32.mrb[61].mxu0  ;;  %v5144_v4 = vpop.f32.mrb[61].mxu1  ;;  %v3701_v22 = vpack.c.bf16 %v2548_v17, %v2548_v17  ;;  %v2612_v62 = vsel %vm2356_vm6, %v2228_v10, %v2484_v38  ;;  %v2092_v51 = vld [vmem:[#allocation2 + $0x328] sm:$0xff]  ;;  %v435_v16 = vld [vmem:[#allocation2 + $0x150] sm:$0xff] }
 0x172   : > { %5447 = vst [vmem:[#allocation10_spill] sm:$0xff] %v5142_v56  ;;  %5448 = vst [vmem:[#allocation11_spill] sm:$0xff] %v5144_v4  ;;  %v2546_v13 = vsel %vm2290_vm7, %v2162_v49, %v2418_v12  ;;  %v499_v34 = vld [vmem:[#allocation2 + $0x350] sm:$0xff]  ;;  %v5148_v40 = vpop.f32.mrb[62].mxu0  ;;  %v5150_v19 = vpop.f32.mrb[62].mxu1  ;;  %v3765_v26 = vpack.c.bf16 %v2612_v62, %v2612_v62  ;;  %vm2293_vm9 = vcmp.ge.f32.partialorder %v2165_v52, 0.0 }
 0x173   : > { %5449 = vst [vmem:[#allocation12_spill] sm:$0xff] %v5148_v40  ;;  %5450 = vst [vmem:[#allocation13_spill] sm:$0xff] %v5150_v19  ;;  %v3699_v31 = vpack.c.bf16 %v2546_v13, %v2546_v13  ;;  %v2610_v4 = vsel %vm2354_vm8, %v2226_v30, %v2482_v24  ;;  %v433_v17 = vld [vmem:[#allocation2 + $0x140] sm:$0xff]  ;;  %v436_v49 = vld [vmem:[#allocation2 + $0x158] sm:$0xff]  ;;  %v5153_v38 = vpop.f32.mrb[63].mxu0  ;;  %v5155_v32 = vpop.f32.mrb[63].mxu1  ;;  %v2227_v24 = vadd.f32 %v4956_v61, %v2092_v51 }
 0x174   : > { %v497_v10 = vld [vmem:[#allocation2 + $0x340] sm:$0xff]  ;;  %5451 = vst [vmem:[#allocation14_spill] sm:$0xff] %v5153_v38  ;;  %5452 = vst [vmem:[#allocation15_spill] sm:$0xff] %v5155_v32  ;;  %v3763_v12 = vpack.c.bf16 %v2610_v4, %v2610_v4  ;;  %v2421_v40 = vmul.f32 0.2, %v2165_v52  ;;  %vm2357_vm10 = vcmp.ge.f32.partialorder %v2229_v55, 0.0  ;;  %v1773_v13 = vadd.f32 %v4925_v6, %v435_v16 }
 0x175   : > { %3189 = vst.msk [vmem:[%s4597_s4 + $0x98] sm:$0xf] %vm3150_vm2, %v3701_v22  ;;  %v2485_v19 = vmul.f32 0.2, %v2229_v55  ;;  %v500_v62 = vld [vmem:[#allocation2 + $0x358] sm:$0xff]  ;;  %vm2291_vm11 = vcmp.ge.f32.partialorder %v2163_v23, 0.0  ;;  %v1837_v44 = vadd.f32 %v4927_v11, %v499_v34  ;;  %v1835_v11 = vadd.f32 %v4939_v9, %v497_v10 }
 0x176   : > { %3253 = vst.msk [vmem:[%s4597_s4 + $0x198] sm:$0xf] %vm3150_vm2, %v3765_v26  ;;  %3187 = vst.msk [vmem:[%s4597_s4 + $0x90] sm:$0xf] %vm3150_vm2, %v3699_v31  ;;  %v2419_v30 = vmul.f32 0.2, %v2163_v23  ;;  %v2549_v4 = vsel %vm2293_vm9, %v2165_v52, %v2421_v40  ;;  %v1771_v26 = vadd.f32 %v4937_v48, %v433_v17  ;;  %v1774_v48 = vadd.f32 %v4949_v28, %v436_v49 }
 0x177   : > { %v434_v38 = vld [vmem:[#allocation2 + $0x148] sm:$0xff]  ;;  %v439_v56 = vld [vmem:[#allocation2 + $0x170] sm:$0xff]  ;;  %3251 = vst.msk [vmem:[%s4597_s4 + $0x190] sm:$0xf] %vm3150_vm2, %v3763_v12  ;;  %v2613_v22 = vsel %vm2357_vm10, %v2229_v55, %v2485_v19  ;;  %v437_v31 = vld [vmem:[#allocation2 + $0x160] sm:$0xff]  ;;  %v3702_v2 = vpack.c.bf16 %v2549_v4, %v2549_v4  ;;  %vm2355_vm12 = vcmp.ge.f32.partialorder %v2227_v24, 0.0  ;;  %v1838_v17 = vadd.f32 %v4951_v29, %v500_v62 }
 0x178   : > { %v498_v32 = vld [vmem:[#allocation2 + $0x348] sm:$0xff]  ;;  %v501_v3 = vld [vmem:[#allocation2 + $0x360] sm:$0xff]  ;;  %v3766_v47 = vpack.c.bf16 %v2613_v22, %v2613_v22  ;;  %v2547_v6 = vsel %vm2291_vm11, %v2163_v23, %v2419_v30  ;;  %1902 = vst.msk [vmem:[#allocation2 + $0x150] sm:$0xff] %vm264_vm1, %v1773_v13  ;;  %v440_v16 = vld [vmem:[#allocation2 + $0x178] sm:$0xff]  ;;  %v2483_v40 = vmul.f32 0.2, %v2227_v24  ;;  %v1772_v12 = vadd.f32 %v4966_v7, %v434_v38 }
 0x179   : > { %v504_v51 = vld [vmem:[#allocation2 + $0x378] sm:$0xff]  ;;  %v438_v52 = vld [vmem:[#allocation2 + $0x168] sm:$0xff]  ;;  %v3700_v55 = vpack.c.bf16 %v2547_v6, %v2547_v6  ;;  %1966 = vst.msk [vmem:[#allocation2 + $0x350] sm:$0xff] %vm264_vm1, %v1837_v44  ;;  %1900 = vst.msk [vmem:[#allocation2 + $0x140] sm:$0xff] %vm264_vm1, %v1771_v26  ;;  %v1836_v44 = vadd.f32 %v4968_v41, %v498_v32  ;;  %v1777_v30 = vadd.f32 %v4985_v37, %v439_v56 }
 0x17a   : > { %v502_v34 = vld [vmem:[#allocation2 + $0x368] sm:$0xff]  ;;  %v443_v23 = vld [vmem:[#allocation2 + $0x190] sm:$0xff]  ;;  %3190 = vst.msk [vmem:[%s4597_s4 + $0x9c] sm:$0xf] %vm3150_vm2, %v3702_v2  ;;  %3254 = vst.msk [vmem:[%s4597_s4 + $0x19c] sm:$0xf] %vm3150_vm2, %v3766_v47  ;;  %v2611_v28 = vsel %vm2355_vm12, %v2227_v24, %v2483_v40  ;;  %v1841_v47 = vadd.f32 %v4988_v54, %v503_v43  ;;  %v1775_v29 = vadd.f32 %v4990_v59, %v437_v31 }
 0x17b   : > { %v507_v19 = vld [vmem:[#allocation2 + $0x390] sm:$0xff]  ;;  %v441_v13 = vld [vmem:[#allocation2 + $0x180] sm:$0xff]  ;;  %v444_v9 = vld [vmem:[#allocation2 + $0x198] sm:$0xff]  ;;  %3188 = vst.msk [vmem:[%s4597_s4 + $0x94] sm:$0xf] %vm3150_vm2, %v3700_v55  ;;  %v1839_v7 = vadd.f32 %v4997_v33, %v501_v3  ;;  %v3764_v56 = vpack.c.bf16 %v2611_v28, %v2611_v28  ;;  %v1778_v10 = vadd.f32 %v4999_v58, %v440_v16  ;;  %v1842_v54 = vadd.f32 %v5012_v5, %v504_v51 }
 0x17c   : > { %v505_v4 = vld [vmem:[#allocation2 + $0x380] sm:$0xff]  ;;  %1964 = vst.msk [vmem:[#allocation2 + $0x340] sm:$0xff] %vm264_vm1, %v1835_v11  ;;  %1903 = vst.msk [vmem:[#allocation2 + $0x158] sm:$0xff] %vm264_vm1, %v1774_v48  ;;  %v508_v41 = vld [vmem:[#allocation2 + $0x398] sm:$0xff]  ;;  %v1776_v59 = vadd.f32 %v5014_v20, %v438_v52  ;;  %v1840_v49 = vadd.f32 %v5016_v0, %v502_v34  ;;  %v1781_v38 = vadd.f32 %v5028_v21, %v443_v23 }
 0x17d   : > { %v442_v2 = vld [vmem:[#allocation2 + $0x188] sm:$0xff]  ;;  %1967 = vst.msk [vmem:[#allocation2 + $0x358] sm:$0xff] %vm264_vm1, %v1838_v17  ;;  %1901 = vst.msk [vmem:[#allocation2 + $0x148] sm:$0xff] %vm264_vm1, %v1772_v12  ;;  %v447_v33 = vld [vmem:[#allocation2 + $0x1b0] sm:$0xff]  ;;  %v1845_v58 = vadd.f32 %v5030_v15, %v507_v19  ;;  %v1779_v32 = vadd.f32 %v5037_v1, %v441_v13  ;;  %v1843_v24 = vadd.f32 %v5039_v36, %v505_v4 }
 0x17e   : > { %v506_v37 = vld [vmem:[#allocation2 + $0x388] sm:$0xff]  ;;  %1965 = vst.msk [vmem:[#allocation2 + $0x348] sm:$0xff] %vm264_vm1, %v1836_v44  ;;  %1906 = vst.msk [vmem:[#allocation2 + $0x170] sm:$0xff] %vm264_vm1, %v1777_v30  ;;  %v511_v3 = vld [vmem:[#allocation2 + $0x3b0] sm:$0xff]  ;;  %v1782_v0 = vadd.f32 %v5041_v46, %v444_v9  ;;  %v1846_v21 = vadd.f32 %v5043_v60, %v508_v41  ;;  %v1780_v15 = vadd.f32 %v5049_v63, %v442_v2 }
 0x17f   : > { %v445_v43 = vld [vmem:[#allocation2 + $0x1a0] sm:$0xff]  ;;  %1970 = vst.msk [vmem:[#allocation2 + $0x370] sm:$0xff] %vm264_vm1, %v1841_v47  ;;  %1904 = vst.msk [vmem:[#allocation2 + $0x160] sm:$0xff] %vm264_vm1, %v1775_v29  ;;  %v448_v62 = vld [vmem:[#allocation2 + $0x1b8] sm:$0xff]  ;;  %v1844_v31 = vadd.f32 %v5051_v57, %v506_v37  ;;  %v1785_v36 = vadd.f32 %v5057_v53, %v447_v33  ;;  %v1849_v46 = vadd.f32 %v5059_v39, %v511_v3 }
 0x180   : > { %1968 = vst.msk [vmem:[#allocation2 + $0x360] sm:$0xff] %vm264_vm1, %v1839_v7  ;;  %v509_v5 = vld [vmem:[#allocation2 + $0x3a0] sm:$0xff]  ;;  %v512_v20 = vld [vmem:[#allocation2 + $0x3b8] sm:$0xff]  ;;  %1907 = vst.msk [vmem:[#allocation2 + $0x178] sm:$0xff] %vm264_vm1, %v1778_v10  ;;  %v1783_v60 = vadd.f32 %v5068_v8, %v445_v43  ;;  %v1786_v53 = vadd.f32 %v5076_v18, %v448_v62 }
 0x181   : > { %3252 = vst.msk [vmem:[%s4597_s4 + $0x194] sm:$0xf] %vm3150_vm2, %v3764_v56  ;;  %v446_v1 = vld [vmem:[#allocation2 + $0x1a8] sm:$0xff]  ;;  %v2033_v26 = vld [vmem:[#allocation2 + $0x150] sm:$0xff]  ;;  %v2031_v52 = vld [vmem:[#allocation2 + $0x140] sm:$0xff]  ;;  %v1847_v57 = vadd.f32 %v5070_v27, %v509_v5  ;;  %v1850_v39 = vadd.f32 %v5078_v35, %v512_v20 }
 0x182   : > { %1971 = vst.msk [vmem:[#allocation2 + $0x378] sm:$0xff] %vm264_vm1, %v1842_v54  ;;  %1905 = vst.msk [vmem:[#allocation2 + $0x168] sm:$0xff] %vm264_vm1, %v1776_v59  ;;  %v510_v22 = vld [vmem:[#allocation2 + $0x3a8] sm:$0xff]  ;;  %v451_v63 = vld [vmem:[#allocation2 + $0x1d0] sm:$0xff]  ;;  %v2168_v16 = vadd.f32 %v4956_v61, %v2033_v26  ;;  %v2166_v55 = vadd.f32 %v4956_v61, %v2031_v52  ;;  %v1784_v40 = vadd.f32 %v5082_v50, %v446_v1 }
 0x183   : > { %1969 = vst.msk [vmem:[#allocation2 + $0x368] sm:$0xff] %vm264_vm1, %v1840_v49  ;;  %1910 = vst.msk [vmem:[#allocation2 + $0x190] sm:$0xff] %vm264_vm1, %v1781_v38  ;;  %v515_v6 = vld [vmem:[#allocation2 + $0x3d0] sm:$0xff]  ;;  %v1848_v27 = vadd.f32 %v5084_v45, %v510_v22  ;;  %v449_v11 = vld [vmem:[#allocation2 + $0x1c0] sm:$0xff]  ;;  %v1789_v34 = vadd.f32 %v5095_v14, %v451_v63 }
 0x184   : > { %1974 = vst.msk [vmem:[#allocation2 + $0x390] sm:$0xff] %vm264_vm1, %v1845_v58  ;;  %1908 = vst.msk [vmem:[#allocation2 + $0x180] sm:$0xff] %vm264_vm1, %v1779_v32  ;;  %v2097_v51 = vld [vmem:[#allocation2 + $0x350] sm:$0xff]  ;;  %vm2296_vm13 = vcmp.ge.f32.partialorder %v2168_v16, 0.0  ;;  %v2424_v18 = vmul.f32 0.2, %v2168_v16  ;;  %v1853_v23 = vadd.f32 %v5097_v25, %v515_v6  ;;  %v1787_v14 = vadd.f32 %v5105_v42, %v449_v11 }
 0x185   : > { %1972 = vst.msk [vmem:[#allocation2 + $0x380] sm:$0xff] %vm264_vm1, %v1843_v24  ;;  %1911 = vst.msk [vmem:[#allocation2 + $0x198] sm:$0xff] %vm264_vm1, %v1782_v0  ;;  %v2232_v8 = vadd.f32 %v4956_v61, %v2097_v51  ;;  %v2095_v35 = vld [vmem:[#allocation2 + $0x340] sm:$0xff]  ;;  %v2034_v48 = vld [vmem:[#allocation2 + $0x158] sm:$0xff]  ;;  %vm2294_vm15 = vcmp.ge.f32.partialorder %v2166_v55, 0.0 }
 0x186   : > { %1975 = vst.msk [vmem:[#allocation2 + $0x398] sm:$0xff] %vm264_vm1, %v1846_v21  ;;  %1909 = vst.msk [vmem:[#allocation2 + $0x188] sm:$0xff] %vm264_vm1, %v1780_v15  ;;  %v2422_v50 = vmul.f32 0.2, %v2166_v55  ;;  %v2552_v45 = vsel %vm2296_vm13, %v2168_v16, %v2424_v18  ;;  %v2230_v17 = vadd.f32 %v4956_v61, %v2095_v35  ;;  %v2169_v12 = vadd.f32 %v4956_v61, %v2034_v48  ;;  %v2098_v44 = vld [vmem:[#allocation2 + $0x358] sm:$0xff]  ;;  %v2032_v9 = vld [vmem:[#allocation2 + $0x148] sm:$0xff] }
 0x187   : > { %1973 = vst.msk [vmem:[#allocation2 + $0x388] sm:$0xff] %vm264_vm1, %v1844_v31  ;;  %1914 = vst.msk [vmem:[#allocation2 + $0x1b0] sm:$0xff] %vm264_vm1, %v1785_v36  ;;  %vm2360_vm14 = vcmp.ge.f32.partialorder %v2232_v8, 0.0  ;;  %v2488_v19 = vmul.f32 0.2, %v2232_v8  ;;  %v3705_v25 = vpack.c.bf16 %v2552_v45, %v2552_v45  ;;  %v2233_v4 = vadd.f32 %v4956_v61, %v2098_v44  ;;  %v2096_v28 = vld [vmem:[#allocation2 + $0x348] sm:$0xff] }
 0x188   : > { %1978 = vst.msk [vmem:[#allocation2 + $0x3b0] sm:$0xff] %vm264_vm1, %v1849_v46  ;;  %1912 = vst.msk [vmem:[#allocation2 + $0x1a0] sm:$0xff] %vm264_vm1, %v1783_v60  ;;  %v2550_v13 = vsel %vm2294_vm15, %v2166_v55, %v2422_v50  ;;  %v2037_v47 = vld [vmem:[#allocation2 + $0x170] sm:$0xff]  ;;  %vm2358_vm0 = vcmp.ge.f32.partialorder %v2230_v17, 0.0  ;;  %v2486_v41 = vmul.f32 0.2, %v2230_v17  ;;  %v2167_v10 = vadd.f32 %v4956_v61, %v2032_v9 }
 0x189   : > { %1976 = vst.msk [vmem:[#allocation2 + $0x3a0] sm:$0xff] %vm264_vm1, %v1847_v57  ;;  %1915 = vst.msk [vmem:[#allocation2 + $0x1b8] sm:$0xff] %vm264_vm1, %v1786_v53  ;;  %v2616_v30 = vsel %vm2360_vm14, %v2232_v8, %v2488_v19  ;;  %v3703_v7 = vpack.c.bf16 %v2550_v13, %v2550_v13  ;;  %v2101_v2 = vld [vmem:[#allocation2 + $0x370] sm:$0xff]  ;;  %vm2297_vm3 = vcmp.ge.f32.partialorder %v2169_v12, 0.0  ;;  %v2425_v42 = vmul.f32 0.2, %v2169_v12 }
 0x18a   : > { %1979 = vst.msk [vmem:[#allocation2 + $0x3b8] sm:$0xff] %vm264_vm1, %v1850_v39  ;;  %1913 = vst.msk [vmem:[#allocation2 + $0x1a8] sm:$0xff] %vm264_vm1, %v1784_v40  ;;  %v3769_v29 = vpack.c.bf16 %v2616_v30, %v2616_v30  ;;  %vm2361_vm4 = vcmp.ge.f32.partialorder %v2233_v4, 0.0  ;;  %v2489_v37 = vmul.f32 0.2, %v2233_v4  ;;  %v2614_v56 = vsel %vm2358_vm0, %v2230_v17, %v2486_v41  ;;  %v2035_v38 = vld [vmem:[#allocation2 + $0x160] sm:$0xff] }
 0x18b   : > { %1977 = vst.msk [vmem:[#allocation2 + $0x3a8] sm:$0xff] %vm264_vm1, %v1848_v27  ;;  %1918 = vst.msk [vmem:[#allocation2 + $0x1d0] sm:$0xff] %vm264_vm1, %v1789_v34  ;;  %v2231_v54 = vadd.f32 %v4956_v61, %v2096_v28  ;;  %v2172_v59 = vadd.f32 %v4956_v61, %v2037_v47  ;;  %v3767_v33 = vpack.c.bf16 %v2614_v56, %v2614_v56  ;;  %vm2295_vm5 = vcmp.ge.f32.partialorder %v2167_v10, 0.0  ;;  %v2099_v62 = vld [vmem:[#allocation2 + $0x360] sm:$0xff]  ;;  %v2038_v1 = vld [vmem:[#allocation2 + $0x178] sm:$0xff] }
 0x18c   : > { %1982 = vst.msk [vmem:[#allocation2 + $0x3d0] sm:$0xff] %vm264_vm1, %v1853_v23  ;;  %1916 = vst.msk [vmem:[#allocation2 + $0x1c0] sm:$0xff] %vm264_vm1, %v1787_v14  ;;  %v2553_v3 = vsel %vm2297_vm3, %v2169_v12, %v2425_v42  ;;  %v2617_v43 = vsel %vm2361_vm4, %v2233_v4, %v2489_v37  ;;  %v2236_v49 = vadd.f32 %v4956_v61, %v2101_v2  ;;  %v2423_v5 = vmul.f32 0.2, %v2167_v10  ;;  %v2102_v46 = vld [vmem:[#allocation2 + $0x378] sm:$0xff]  ;;  %v2036_v60 = vld [vmem:[#allocation2 + $0x168] sm:$0xff] }
 0x18d   : > { %3193 = vst.msk [vmem:[%s4597_s4 + $0xa8] sm:$0xf] %vm3150_vm2, %v3705_v25  ;;  %3257 = vst.msk [vmem:[%s4597_s4 + $0x1a8] sm:$0xf] %vm3150_vm2, %v3769_v29  ;;  %v3706_v58 = vpack.c.bf16 %v2553_v3, %v2553_v3  ;;  %v3770_v32 = vpack.c.bf16 %v2617_v43, %v2617_v43  ;;  %vm2359_vm6 = vcmp.ge.f32.partialorder %v2231_v54, 0.0  ;;  %vm2300_vm7 = vcmp.ge.f32.partialorder %v2172_v59, 0.0 }
 0x18e   : > { %3191 = vst.msk [vmem:[%s4597_s4 + $0xa0] sm:$0xf] %vm3150_vm2, %v3703_v7  ;;  %3255 = vst.msk [vmem:[%s4597_s4 + $0x1a0] sm:$0xf] %vm3150_vm2, %v3767_v33  ;;  %v2487_v20 = vmul.f32 0.2, %v2231_v54  ;;  %v2551_v0 = vsel %vm2295_vm5, %v2167_v10, %v2423_v5  ;;  %v2170_v15 = vadd.f32 %v4956_v61, %v2035_v38  ;;  %v2234_v36 = vadd.f32 %v4956_v61, %v2099_v62 }
 0x18f   : > { %v2428_v24 = vmul.f32 0.2, %v2172_v59  ;;  %3194 = vst.msk [vmem:[%s4597_s4 + $0xac] sm:$0xf] %vm3150_vm2, %v3706_v58  ;;  %3258 = vst.msk [vmem:[%s4597_s4 + $0x1ac] sm:$0xf] %vm3150_vm2, %v3770_v32  ;;  %v3704_v22 = vpack.c.bf16 %v2551_v0, %v2551_v0  ;;  %v2173_v55 = vadd.f32 %v4956_v61, %v2038_v1  ;;  %v2237_v40 = vadd.f32 %v4956_v61, %v2102_v46 }
 0x190   : > { %vm2364_vm8 = vcmp.ge.f32.partialorder %v2236_v49, 0.0  ;;  %v2492_v21 = vmul.f32 0.2, %v2236_v49  ;;  %v2615_v26 = vsel %vm2359_vm6, %v2231_v54, %v2487_v20  ;;  %v2100_v63 = vld [vmem:[#allocation2 + $0x368] sm:$0xff]  ;;  %vm2298_vm9 = vcmp.ge.f32.partialorder %v2170_v15, 0.0  ;;  %v2041_v52 = vld [vmem:[#allocation2 + $0x190] sm:$0xff] }
 0x191   : > { %v2556_v31 = vsel %vm2300_vm7, %v2172_v59, %v2428_v24  ;;  %v3768_v6 = vpack.c.bf16 %v2615_v26, %v2615_v26  ;;  %v2105_v57 = vld [vmem:[#allocation2 + $0x390] sm:$0xff]  ;;  %3192 = vst.msk [vmem:[%s4597_s4 + $0xa4] sm:$0xf] %vm3150_vm2, %v3704_v22  ;;  %v2426_v39 = vmul.f32 0.2, %v2170_v15  ;;  %vm2362_vm10 = vcmp.ge.f32.partialorder %v2234_v36, 0.0 }
 0x192   : > { %v3709_v16 = vpack.c.bf16 %v2556_v31, %v2556_v31  ;;  %v2620_v51 = vsel %vm2364_vm8, %v2236_v49, %v2492_v21  ;;  %v2490_v8 = vmul.f32 0.2, %v2234_v36  ;;  %v2171_v27 = vadd.f32 %v4956_v61, %v2036_v60  ;;  %v2039_v14 = vld [vmem:[#allocation2 + $0x180] sm:$0xff]  ;;  %v2042_v9 = vld [vmem:[#allocation2 + $0x198] sm:$0xff]  ;;  %v2040_v41 = vld [vmem:[#allocation2 + $0x188] sm:$0xff] }
 0x193   : > { %v3773_v53 = vpack.c.bf16 %v2620_v51, %v2620_v51  ;;  %3256 = vst.msk [vmem:[%s4597_s4 + $0x1a4] sm:$0xf] %vm3150_vm2, %v3768_v6  ;;  %v2235_v11 = vadd.f32 %v4956_v61, %v2100_v63  ;;  %v2554_v18 = vsel %vm2298_vm9, %v2170_v15, %v2426_v39  ;;  %v2176_v48 = vadd.f32 %v4956_v61, %v2041_v52  ;;  %v2103_v4 = vld [vmem:[#allocation2 + $0x380] sm:$0xff]  ;;  %v2106_v28 = vld [vmem:[#allocation2 + $0x398] sm:$0xff]  ;;  %v2104_v5 = vld [vmem:[#allocation2 + $0x388] sm:$0xff] }
 0x194   : > { %3197 = vst.msk [vmem:[%s4597_s4 + $0xb8] sm:$0xf] %vm3150_vm2, %v3709_v16  ;;  %v2618_v35 = vsel %vm2362_vm10, %v2234_v36, %v2490_v8  ;;  %v2240_v34 = vadd.f32 %v4956_v61, %v2105_v57  ;;  %v3707_v23 = vpack.c.bf16 %v2554_v18, %v2554_v18  ;;  %vm2301_vm11 = vcmp.ge.f32.partialorder %v2173_v55, 0.0  ;;  %v5295_v56 = vld [vmem:[%s5438_s2] ss:$0 sm:$0xff]  ;;  %v2045_v0 = vld [vmem:[#allocation2 + $0x1b0] sm:$0xff] }
 0x195   : > { %3261 = vst.msk [vmem:[%s4597_s4 + $0x1b8] sm:$0xf] %vm3150_vm2, %v3773_v53  ;;  %v3771_v19 = vpack.c.bf16 %v2618_v35, %v2618_v35  ;;  %v2429_v50 = vmul.f32 0.2, %v2173_v55  ;;  %vm2365_vm12 = vcmp.ge.f32.partialorder %v2237_v40, 0.0  ;;  %vm2299_vm13 = vcmp.ge.f32.partialorder %v2171_v27, 0.0 }
 0x196   : > { %v2493_v45 = vmul.f32 0.2, %v2237_v40  ;;  %v2427_v17 = vmul.f32 0.2, %v2171_v27  ;;  %3195 = vst.msk [vmem:[%s4597_s4 + $0xb0] sm:$0xf] %vm3150_vm2, %v3707_v23  ;;  %v2174_v10 = vadd.f32 %v5295_v56, %v2039_v14  ;;  %v2238_v59 = vadd.f32 %v5295_v56, %v2103_v4 }
 0x197   : > { %3259 = vst.msk [vmem:[%s4597_s4 + $0x1b0] sm:$0xf] %vm3150_vm2, %v3771_v19  ;;  %v2557_v12 = vsel %vm2301_vm11, %v2173_v55, %v2429_v50  ;;  %vm2363_vm14 = vcmp.ge.f32.partialorder %v2235_v11, 0.0  ;;  %v2491_v44 = vmul.f32 0.2, %v2235_v11  ;;  %vm2304_vm15 = vcmp.ge.f32.partialorder %v2176_v48, 0.0 }
 0x198   : > { %v3710_v25 = vpack.c.bf16 %v2557_v12, %v2557_v12  ;;  %v2621_v61 = vsel %vm2365_vm12, %v2237_v40, %v2493_v45  ;;  %v2555_v30 = vsel %vm2299_vm13, %v2171_v27, %v2427_v17  ;;  %v2432_v13 = vmul.f32 0.2, %v2176_v48  ;;  %v2109_v22 = vld [vmem:[#allocation2 + $0x3b0] sm:$0xff]  ;;  %v2043_v60 = vld [vmem:[#allocation2 + $0x1a0] sm:$0xff]  ;;  %v2046_v57 = vld [vmem:[#allocation2 + $0x1b8] sm:$0xff] }
 0x199   : > { %v3774_v47 = vpack.c.bf16 %v2621_v61, %v2621_v61  ;;  %v3708_v29 = vpack.c.bf16 %v2555_v30, %v2555_v30  ;;  %v2619_v7 = vsel %vm2363_vm14, %v2235_v11, %v2491_v44  ;;  %vm2368_vm0 = vcmp.ge.f32.partialorder %v2240_v34, 0.0  ;;  %v2107_v63 = vld [vmem:[#allocation2 + $0x3a0] sm:$0xff]  ;;  %v2110_v19 = vld [vmem:[#allocation2 + $0x3b8] sm:$0xff]  ;;  %v2044_v50 = vld [vmem:[#allocation2 + $0x1a8] sm:$0xff] }
 0x19a   : > { %3198 = vst.msk [vmem:[%s4597_s4 + $0xbc] sm:$0xf] %vm3150_vm2, %v3710_v25  ;;  %v3772_v2 = vpack.c.bf16 %v2619_v7, %v2619_v7  ;;  %v2560_v42 = vsel %vm2304_vm15, %v2176_v48, %v2432_v13  ;;  %v2496_v37 = vmul.f32 0.2, %v2240_v34  ;;  %v2177_v33 = vadd.f32 %v5295_v56, %v2042_v9  ;;  %v2108_v44 = vld [vmem:[#allocation2 + $0x3a8] sm:$0xff]  ;;  %v2049_v14 = vld [vmem:[#allocation2 + $0x1d0] sm:$0xff] }
 0x19b   : > { %3262 = vst.msk [vmem:[%s4597_s4 + $0x1bc] sm:$0xf] %vm3150_vm2, %v3774_v47  ;;  %3196 = vst.msk [vmem:[%s4597_s4 + $0xb4] sm:$0xf] %vm3150_vm2, %v3708_v29  ;;  %v3713_v54 = vpack.c.bf16 %v2560_v42, %v2560_v42  ;;  %v2241_v3 = vadd.f32 %v5295_v56, %v2106_v28  ;;  %vm2302_vm3 = vcmp.ge.f32.partialorder %v2174_v10, 0.0  ;;  %v2175_v38 = vadd.f32 %v5295_v56, %v2040_v41  ;;  %v2047_v42 = vld [vmem:[#allocation2 + $0x1c0] sm:$0xff] }
 0x19c   : > { %3260 = vst.msk [vmem:[%s4597_s4 + $0x1b4] sm:$0xf] %vm3150_vm2, %v3772_v2  ;;  %v2624_v43 = vsel %vm2368_vm0, %v2240_v34, %v2496_v37  ;;  %v2430_v49 = vmul.f32 0.2, %v2174_v10  ;;  %vm2366_vm4 = vcmp.ge.f32.partialorder %v2238_v59, 0.0  ;;  %vm2305_vm5 = vcmp.ge.f32.partialorder %v2177_v33, 0.0 }
 0x19d   : > { %3201 = vst.msk [vmem:[%s4597_s4 + $0xc8] sm:$0xf] %vm3150_vm2, %v3713_v54  ;;  %v3777_v58 = vpack.c.bf16 %v2624_v43, %v2624_v43  ;;  %v2494_v32 = vmul.f32 0.2, %v2238_v59  ;;  %v2433_v20 = vmul.f32 0.2, %v2177_v33  ;;  %v2239_v46 = vadd.f32 %v5295_v56, %v2104_v5 }
 0x19e   : > { %v2558_v62 = vsel %vm2302_vm3, %v2174_v10, %v2430_v49  ;;  %vm2369_vm6 = vcmp.ge.f32.partialorder %v2241_v3, 0.0  ;;  %v2497_v24 = vmul.f32 0.2, %v2241_v3  ;;  %vm2303_vm7 = vcmp.ge.f32.partialorder %v2175_v38, 0.0  ;;  %v2113_v2 = vld [vmem:[#allocation2 + $0x3d0] sm:$0xff]  ;;  %v513_v54 = vld [vmem:[#allocation2 + $0x3c0] sm:$0xff] }
 0x19f   : > { %3265 = vst.msk [vmem:[%s4597_s4 + $0x1c8] sm:$0xf] %vm3150_vm2, %v3777_v58  ;;  %v3711_v21 = vpack.c.bf16 %v2558_v62, %v2558_v62  ;;  %v2622_v15 = vsel %vm2366_vm4, %v2238_v59, %v2494_v32  ;;  %v2431_v1 = vmul.f32 0.2, %v2175_v38  ;;  %v2561_v31 = vsel %vm2305_vm5, %v2177_v33, %v2433_v20  ;;  %v452_v58 = vld [vmem:[#allocation2 + $0x1d8] sm:$0xff] }
 0x1a0   : > { %v3775_v26 = vpack.c.bf16 %v2622_v15, %v2622_v15  ;;  %v2625_v36 = vsel %vm2369_vm6, %v2241_v3, %v2497_v24  ;;  %v3714_v6 = vpack.c.bf16 %v2561_v31, %v2561_v31  ;;  %v2180_v52 = vadd.f32 %v5295_v56, %v2045_v0  ;;  %v516_v32 = vld [vmem:[#allocation2 + $0x3d8] sm:$0xff]  ;;  %v5453_v24 = vld [vmem:[#allocation3_spill] sm:$0xff]  ;;  %v514_v15 = vld [vmem:[#allocation2 + $0x3c8] sm:$0xff] }
 0x1a1   : > { %3199 = vst.msk [vmem:[%s4597_s4 + $0xc0] sm:$0xf] %vm3150_vm2, %v3711_v21  ;;  %v3778_v16 = vpack.c.bf16 %v2625_v36, %v2625_v36  ;;  %v2559_v51 = vsel %vm2303_vm7, %v2175_v38, %v2431_v1  ;;  %vm2367_vm8 = vcmp.ge.f32.partialorder %v2239_v46, 0.0  ;;  %v2495_v39 = vmul.f32 0.2, %v2239_v46  ;;  %v450_v21 = vld [vmem:[#allocation2 + $0x1c8] sm:$0xff] }
 0x1a2   : > { %3263 = vst.msk [vmem:[%s4597_s4 + $0x1c0] sm:$0xf] %vm3150_vm2, %v3775_v26  ;;  %v3712_v53 = vpack.c.bf16 %v2559_v51, %v2559_v51  ;;  %v2244_v8 = vadd.f32 %v5295_v56, %v2109_v22  ;;  %3202 = vst.msk [vmem:[%s4597_s4 + $0xcc] sm:$0xf] %vm3150_vm2, %v3714_v6  ;;  %vm2308_vm9 = vcmp.ge.f32.partialorder %v2180_v52, 0.0  ;;  %v2178_v40 = vadd.f32 %v5295_v56, %v2043_v60  ;;  %v455_v1 = vld [vmem:[#allocation2 + $0x1f0] sm:$0xff] }
 0x1a3   : > { %3266 = vst.msk [vmem:[%s4597_s4 + $0x1cc] sm:$0xf] %vm3150_vm2, %v3778_v16  ;;  %v2436_v55 = vmul.f32 0.2, %v2180_v52  ;;  %v2242_v27 = vadd.f32 %v5295_v56, %v2107_v63  ;;  %v2623_v11 = vsel %vm2367_vm8, %v2239_v46, %v2495_v39  ;;  %v2181_v35 = vadd.f32 %v5295_v56, %v2046_v57  ;;  %v519_v36 = vld [vmem:[#allocation2 + $0x3f0] sm:$0xff]  ;;  %v453_v46 = vld [vmem:[#allocation2 + $0x1e0] sm:$0xff] }
 0x1a4   : > { %3200 = vst.msk [vmem:[%s4597_s4 + $0xc4] sm:$0xf] %vm3150_vm2, %v3712_v53  ;;  %vm2372_vm10 = vcmp.ge.f32.partialorder %v2244_v8, 0.0  ;;  %v2500_v18 = vmul.f32 0.2, %v2244_v8  ;;  %v3776_v48 = vpack.c.bf16 %v2623_v11, %v2623_v11  ;;  %vm2306_vm11 = vcmp.ge.f32.partialorder %v2178_v40, 0.0 }
 0x1a5   : > { %v2564_v34 = vsel %vm2308_vm9, %v2180_v52, %v2436_v55  ;;  %v2434_v23 = vmul.f32 0.2, %v2178_v40  ;;  %vm2370_vm12 = vcmp.ge.f32.partialorder %v2242_v27, 0.0  ;;  %v2498_v12 = vmul.f32 0.2, %v2242_v27  ;;  %v517_v60 = vld [vmem:[#allocation2 + $0x3e0] sm:$0xff] }
 0x1a6   : > { %v3717_v45 = vpack.c.bf16 %v2564_v34, %v2564_v34  ;;  %v2628_v17 = vsel %vm2372_vm10, %v2244_v8, %v2500_v18  ;;  %3264 = vst.msk [vmem:[%s4597_s4 + $0x1c4] sm:$0xf] %vm3150_vm2, %v3776_v48  ;;  %vm2309_vm13 = vcmp.ge.f32.partialorder %v2181_v35, 0.0  ;;  %v2437_v30 = vmul.f32 0.2, %v2181_v35  ;;  %v456_v51 = vld [vmem:[#allocation2 + $0x1f8] sm:$0xff] }
 0x1a7   : > { %v3781_v25 = vpack.c.bf16 %v2628_v17, %v2628_v17  ;;  %v2562_v61 = vsel %vm2306_vm11, %v2178_v40, %v2434_v23  ;;  %v2626_v4 = vsel %vm2370_vm12, %v2242_v27, %v2498_v12  ;;  %v2245_v9 = vadd.f32 %v5295_v56, %v2110_v19  ;;  %v5454_v52 = vld [vmem:[#allocation4_spill] sm:$0xff]  ;;  %v5455_v53 = vld [vmem:[#allocation5_spill] sm:$0xff]  ;;  %v5456_v8 = vld [vmem:[#allocation6_spill] sm:$0xff] }
 0x1a8   : > { %3205 = vst.msk [vmem:[%s4597_s4 + $0xd8] sm:$0xf] %vm3150_vm2, %v3717_v45  ;;  %v3715_v13 = vpack.c.bf16 %v2562_v61, %v2562_v61  ;;  %v2179_v28 = vadd.f32 %v5295_v56, %v2044_v50  ;;  %v3779_v47 = vpack.c.bf16 %v2626_v4, %v2626_v4  ;;  %v2565_v29 = vsel %vm2309_vm13, %v2181_v35, %v2437_v30  ;;  %v5457_v40 = vld [vmem:[#allocation7_spill] sm:$0xff]  ;;  %v520_v11 = vld [vmem:[#allocation2 + $0x3f8] sm:$0xff]  ;;  %v454_v18 = vld [vmem:[#allocation2 + $0x1e8] sm:$0xff] }
 0x1a9   : > { %3269 = vst.msk [vmem:[%s4597_s4 + $0x1d8] sm:$0xf] %vm3150_vm2, %v3781_v25  ;;  %v2243_v7 = vadd.f32 %v5295_v56, %v2108_v44  ;;  %v2184_v41 = vadd.f32 %v5295_v56, %v2049_v14  ;;  %v3718_v37 = vpack.c.bf16 %v2565_v29, %v2565_v29  ;;  %vm2373_vm14 = vcmp.ge.f32.partialorder %v2245_v9, 0.0  ;;  %v518_v35 = vld [vmem:[#allocation2 + $0x3e8] sm:$0xff]  ;;  %v5459_v50 = vld [vmem:[#allocation9_spill] sm:$0xff]  ;;  %v5460_v44 = vld [vmem:[#allocation10_spill] sm:$0xff] }
 0x1aa   : > { %3203 = vst.msk [vmem:[%s4597_s4 + $0xd0] sm:$0xf] %vm3150_vm2, %v3715_v13  ;;  %v2501_v10 = vmul.f32 0.2, %v2245_v9  ;;  %vm2307_vm15 = vcmp.ge.f32.partialorder %v2179_v28, 0.0  ;;  %v2248_v49 = vadd.f32 %v5295_v56, %v2113_v2  ;;  %v2182_v38 = vadd.f32 %v5295_v56, %v2047_v42  ;;  %v5458_v23 = vld [vmem:[#allocation8_spill] sm:$0xff] }
 0x1ab   : > { %3267 = vst.msk [vmem:[%s4597_s4 + $0x1d0] sm:$0xf] %vm3150_vm2, %v3779_v47  ;;  %v2435_v59 = vmul.f32 0.2, %v2179_v28  ;;  %vm2371_vm0 = vcmp.ge.f32.partialorder %v2243_v7, 0.0  ;;  %vm2312_vm3 = vcmp.ge.f32.partialorder %v2184_v41, 0.0  ;;  %v1851_v0 = vadd.f32 %v5453_v24, %v513_v54 }
 0x1ac   : > { %v2499_v33 = vmul.f32 0.2, %v2243_v7  ;;  %3206 = vst.msk [vmem:[%s4597_s4 + $0xdc] sm:$0xf] %vm3150_vm2, %v3718_v37  ;;  %v2629_v3 = vsel %vm2373_vm14, %v2245_v9, %v2501_v10  ;;  %v2440_v43 = vmul.f32 0.2, %v2184_v41  ;;  %v1790_v57 = vadd.f32 %v5454_v52, %v452_v58 }
 0x1ad   : > { %v3782_v5 = vpack.c.bf16 %v2629_v3, %v2629_v3  ;;  %v2563_v62 = vsel %vm2307_vm15, %v2179_v28, %v2435_v59  ;;  %vm2376_vm4 = vcmp.ge.f32.partialorder %v2248_v49, 0.0  ;;  %v2504_v6 = vmul.f32 0.2, %v2248_v49  ;;  %1980 = vst.msk [vmem:[#allocation2 + $0x3c0] sm:$0xff] %vm264_vm1, %v1851_v0  ;;  %v5461_v25 = vld [vmem:[#allocation11_spill] sm:$0xff]  ;;  %v5462_v30 = vld [vmem:[#allocation12_spill] sm:$0xff] }
 0x1ae   : > { %v2627_v20 = vsel %vm2371_vm0, %v2243_v7, %v2499_v33  ;;  %v3716_v22 = vpack.c.bf16 %v2563_v62, %v2563_v62  ;;  %v2568_v31 = vsel %vm2312_vm3, %v2184_v41, %v2440_v43  ;;  %vm2310_vm5 = vcmp.ge.f32.partialorder %v2182_v38, 0.0  ;;  %1919 = vst.msk [vmem:[#allocation2 + $0x1d8] sm:$0xff] %vm264_vm1, %v1790_v57  ;;  %v5463_v4 = vld [vmem:[#allocation13_spill] sm:$0xff]  ;;  %v5464_v28 = vld [vmem:[#allocation14_spill] sm:$0xff]  ;;  %v5465_v29 = vld [vmem:[#allocation15_spill] sm:$0xff] }
 0x1af   : > { %v3780_v26 = vpack.c.bf16 %v2627_v20, %v2627_v20  ;;  %3270 = vst.msk [vmem:[%s4597_s4 + $0x1dc] sm:$0xf] %vm3150_vm2, %v3782_v5  ;;  %v3721_v63 = vpack.c.bf16 %v2568_v31, %v2568_v31  ;;  %v2438_v16 = vmul.f32 0.2, %v2182_v38  ;;  %v1854_v39 = vadd.f32 %v5455_v53, %v516_v32 }
 0x1b0   : > { %3204 = vst.msk [vmem:[%s4597_s4 + $0xd4] sm:$0xf] %vm3150_vm2, %v3716_v22  ;;  %v1788_v55 = vadd.f32 %v5456_v8, %v450_v21  ;;  %v1852_v27 = vadd.f32 %v5457_v40, %v514_v15  ;;  %v2632_v48 = vsel %vm2376_vm4, %v2248_v49, %v2504_v6  ;;  %v1793_v19 = vadd.f32 %v5458_v23, %v455_v1 }
 0x1b1   : > { %3268 = vst.msk [vmem:[%s4597_s4 + $0x1d4] sm:$0xf] %vm3150_vm2, %v3780_v26  ;;  %3209 = vst.msk [vmem:[%s4597_s4 + $0xe8] sm:$0xf] %vm3150_vm2, %v3721_v63  ;;  %v2566_v34 = vsel %vm2310_vm5, %v2182_v38, %v2438_v16  ;;  %v1857_v45 = vadd.f32 %v5459_v50, %v519_v36  ;;  %v3785_v17 = vpack.c.bf16 %v2632_v48, %v2632_v48 }
 0x1b2   : > { %v3719_v12 = vpack.c.bf16 %v2566_v34, %v2566_v34  ;;  %1983 = vst.msk [vmem:[#allocation2 + $0x3d8] sm:$0xff] %vm264_vm1, %v1854_v39  ;;  %1917 = vst.msk [vmem:[#allocation2 + $0x1c8] sm:$0xff] %vm264_vm1, %v1788_v55  ;;  %v1791_v14 = vadd.f32 %v5460_v44, %v453_v46  ;;  %v1855_v61 = vadd.f32 %v5461_v25, %v517_v60 }
 0x1b3   : > { %1981 = vst.msk [vmem:[#allocation2 + $0x3c8] sm:$0xff] %vm264_vm1, %v1852_v27  ;;  %1922 = vst.msk [vmem:[#allocation2 + $0x1f0] sm:$0xff] %vm264_vm1, %v1793_v19  ;;  %v1794_v13 = vadd.f32 %v5462_v30, %v456_v51  ;;  %v1858_v9 = vadd.f32 %v5463_v4, %v520_v11  ;;  %v1792_v47 = vadd.f32 %v5464_v28, %v454_v18 }
 0x1b4   : > { %1986 = vst.msk [vmem:[#allocation2 + $0x3f0] sm:$0xff] %vm264_vm1, %v1857_v45  ;;  %v1856_v7 = vadd.f32 %v5465_v29, %v518_v35  ;;  %1920 = vst.msk [vmem:[#allocation2 + $0x1e0] sm:$0xff] %vm264_vm1, %v1791_v14  ;;  %v2111_v41 = vld [vmem:[#allocation2 + $0x3c0] sm:$0xff] }
 0x1b5   : > { %3273 = vst.msk [vmem:[%s4597_s4 + $0x1e8] sm:$0xf] %vm3150_vm2, %v3785_v17  ;;  %3207 = vst.msk [vmem:[%s4597_s4 + $0xe0] sm:$0xf] %vm3150_vm2, %v3719_v12  ;;  %v2246_v2 = vadd.f32 %v5295_v56, %v2111_v41  ;;  %v2050_v37 = vld [vmem:[#allocation2 + $0x1d8] sm:$0xff] }
 0x1b6   : > { %1984 = vst.msk [vmem:[#allocation2 + $0x3e0] sm:$0xff] %vm264_vm1, %v1855_v61  ;;  %1923 = vst.msk [vmem:[#allocation2 + $0x1f8] sm:$0xff] %vm264_vm1, %v1794_v13  ;;  %v2185_v59 = vadd.f32 %v5295_v56, %v2050_v37 }
 0x1b7   : > { %1987 = vst.msk [vmem:[#allocation2 + $0x3f8] sm:$0xff] %vm264_vm1, %v1858_v9  ;;  %1921 = vst.msk [vmem:[#allocation2 + $0x1e8] sm:$0xff] %vm264_vm1, %v1792_v47  ;;  %vm2374_vm6 = vcmp.ge.f32.partialorder %v2246_v2, 0.0  ;;  %v2502_v42 = vmul.f32 0.2, %v2246_v2 }
 0x1b8   : > { %1985 = vst.msk [vmem:[#allocation2 + $0x3e8] sm:$0xff] %vm264_vm1, %v1856_v7  ;;  %vm2313_vm1 = vcmp.ge.f32.partialorder %v2185_v59, 0.0  ;;  %v2441_v24 = vmul.f32 0.2, %v2185_v59 }
 0x1b9   : > { %v2114_v10 = vld [vmem:[#allocation2 + $0x3d8] sm:$0xff]  ;;  %v2048_v54 = vld [vmem:[#allocation2 + $0x1c8] sm:$0xff]  ;;  %v2630_v58 = vsel %vm2374_vm6, %v2246_v2, %v2502_v42 }
 0x1ba   : > { %v2249_v33 = vadd.f32 %v5295_v56, %v2114_v10  ;;  %v2183_v3 = vadd.f32 %v5295_v56, %v2048_v54  ;;  %v2112_v43 = vld [vmem:[#allocation2 + $0x3c8] sm:$0xff]  ;;  %v2053_v49 = vld [vmem:[#allocation2 + $0x1f0] sm:$0xff]  ;;  %v3783_v20 = vpack.c.bf16 %v2630_v58, %v2630_v58  ;;  %v2569_v1 = vsel %vm2313_vm1, %v2185_v59, %v2441_v24 }
 0x1bb   : > { %v2117_v38 = vld [vmem:[#allocation2 + $0x3f0] sm:$0xff]  ;;  %v2247_v32 = vadd.f32 %v5295_v56, %v2112_v43  ;;  %v2188_v5 = vadd.f32 %v5295_v56, %v2053_v49  ;;  %v2051_v0 = vld [vmem:[#allocation2 + $0x1e0] sm:$0xff]  ;;  %v3722_v36 = vpack.c.bf16 %v2569_v1, %v2569_v1 }
 0x1bc   : > { %v2252_v62 = vadd.f32 %v5295_v56, %v2117_v38  ;;  %vm2377_vm7 = vcmp.ge.f32.partialorder %v2249_v33, 0.0  ;;  %v2505_v21 = vmul.f32 0.2, %v2249_v33  ;;  %vm2311_vm8 = vcmp.ge.f32.partialorder %v2183_v3, 0.0  ;;  %3271 = vst.msk [vmem:[%s4597_s4 + $0x1e0] sm:$0xf] %vm3150_vm2, %v3783_v20 }
 0x1bd   : > { %v2439_v15 = vmul.f32 0.2, %v2183_v3  ;;  %vm2375_vm9 = vcmp.ge.f32.partialorder %v2247_v32, 0.0  ;;  %v2503_v22 = vmul.f32 0.2, %v2247_v32  ;;  %vm2316_vm10 = vcmp.ge.f32.partialorder %v2188_v5, 0.0 }
 0x1be   : > { %v2444_v26 = vmul.f32 0.2, %v2188_v5  ;;  %v2115_v31 = vld [vmem:[#allocation2 + $0x3e0] sm:$0xff]  ;;  %v2633_v46 = vsel %vm2377_vm7, %v2249_v33, %v2505_v21  ;;  %vm2380_vm11 = vcmp.ge.f32.partialorder %v2252_v62, 0.0  ;;  %v2054_v63 = vld [vmem:[#allocation2 + $0x1f8] sm:$0xff]  ;;  %v2052_v16 = vld [vmem:[#allocation2 + $0x1e8] sm:$0xff]  ;;  %v2186_v27 = vadd.f32 %v5295_v56, %v2051_v0 }
 0x1bf   : > { %v2567_v60 = vsel %vm2311_vm8, %v2183_v3, %v2439_v15  ;;  %v2118_v6 = vld [vmem:[#allocation2 + $0x3f8] sm:$0xff]  ;;  %v3786_v51 = vpack.c.bf16 %v2633_v46, %v2633_v46  ;;  %v2631_v57 = vsel %vm2375_vm9, %v2247_v32, %v2503_v22  ;;  %v2116_v39 = vld [vmem:[#allocation2 + $0x3e8] sm:$0xff]  ;;  %3210 = vst.msk [vmem:[%s4597_s4 + $0xec] sm:$0xf] %vm3150_vm2, %v3722_v36  ;;  %v2508_v40 = vmul.f32 0.2, %v2252_v62 }
 0x1c0   : > { %v3720_v52 = vpack.c.bf16 %v2567_v60, %v2567_v60  ;;  %v2572_v53 = vsel %vm2316_vm10, %v2188_v5, %v2444_v26  ;;  %v3784_v8 = vpack.c.bf16 %v2631_v57, %v2631_v57  ;;  %v2250_v11 = vadd.f32 %v5295_v56, %v2115_v31 }
 0x1c1   : > { %v3725_v55 = vpack.c.bf16 %v2572_v53, %v2572_v53  ;;  %3274 = vst.msk [vmem:[%s4597_s4 + $0x1ec] sm:$0xf] %vm3150_vm2, %v3786_v51  ;;  %v2189_v18 = vadd.f32 %v5295_v56, %v2054_v63  ;;  %v2253_v35 = vadd.f32 %v5295_v56, %v2118_v6  ;;  %v2187_v48 = vadd.f32 %v5295_v56, %v2052_v16 }
 0x1c2   : > { %3208 = vst.msk [vmem:[%s4597_s4 + $0xe4] sm:$0xf] %vm3150_vm2, %v3720_v52  ;;  %3272 = vst.msk [vmem:[%s4597_s4 + $0x1e4] sm:$0xf] %vm3150_vm2, %v3784_v8  ;;  %v2636_v34 = vsel %vm2380_vm11, %v2252_v62, %v2508_v40  ;;  %vm2314_vm12 = vcmp.ge.f32.partialorder %v2186_v27, 0.0  ;;  %v2251_v19 = vadd.f32 %v5295_v56, %v2116_v39  ;;  %vm2378_vm13 = vcmp.ge.f32.partialorder %v2250_v11, 0.0 }
 0x1c3   : > { %3213 = vst.msk [vmem:[%s4597_s4 + $0xf8] sm:$0xf] %vm3150_vm2, %v3725_v55  ;;  %v2442_v23 = vmul.f32 0.2, %v2186_v27  ;;  %v3789_v50 = vpack.c.bf16 %v2636_v34, %v2636_v34  ;;  %v2506_v45 = vmul.f32 0.2, %v2250_v11 }
 0x1c4   : > { %vm2317_vm14 = vcmp.ge.f32.partialorder %v2189_v18, 0.0  ;;  %v2445_v12 = vmul.f32 0.2, %v2189_v18  ;;  %vm2381_vm15 = vcmp.ge.f32.partialorder %v2253_v35, 0.0  ;;  %v2509_v44 = vmul.f32 0.2, %v2253_v35 }
 0x1c5   : > { %v2570_v17 = vsel %vm2314_vm12, %v2186_v27, %v2442_v23  ;;  %3277 = vst.msk [vmem:[%s4597_s4 + $0x1f8] sm:$0xf] %vm3150_vm2, %v3789_v50  ;;  %v2634_v25 = vsel %vm2378_vm13, %v2250_v11, %v2506_v45  ;;  %vm2315_vm0 = vcmp.ge.f32.partialorder %v2187_v48, 0.0  ;;  %v2443_v61 = vmul.f32 0.2, %v2187_v48 }
 0x1c6   : > { %v3723_v14 = vpack.c.bf16 %v2570_v17, %v2570_v17  ;;  %v3787_v56 = vpack.c.bf16 %v2634_v25, %v2634_v25  ;;  %v2573_v30 = vsel %vm2317_vm14, %v2189_v18, %v2445_v12  ;;  %v2637_v13 = vsel %vm2381_vm15, %v2253_v35, %v2509_v44 }
 0x1c7   : > { %vm2379_vm3 = vcmp.ge.f32.partialorder %v2251_v19, 0.0  ;;  %v3726_v4 = vpack.c.bf16 %v2573_v30, %v2573_v30  ;;  %v3790_v9 = vpack.c.bf16 %v2637_v13, %v2637_v13  ;;  %v2571_v28 = vsel %vm2315_vm0, %v2187_v48, %v2443_v61 }
 0x1c8   : > { %3211 = vst.msk [vmem:[%s4597_s4 + $0xf0] sm:$0xf] %vm3150_vm2, %v3723_v14  ;;  %v2507_v47 = vmul.f32 0.2, %v2251_v19  ;;  %3275 = vst.msk [vmem:[%s4597_s4 + $0x1f0] sm:$0xf] %vm3150_vm2, %v3787_v56  ;;  %v3724_v29 = vpack.c.bf16 %v2571_v28, %v2571_v28 }
 0x1c9   : > { %3214 = vst.msk [vmem:[%s4597_s4 + $0xfc] sm:$0xf] %vm3150_vm2, %v3726_v4  ;;  %3278 = vst.msk [vmem:[%s4597_s4 + $0x1fc] sm:$0xf] %vm3150_vm2, %v3790_v9 }
 0x1ca   : > { %v2635_v7 = vsel %vm2379_vm3, %v2251_v19, %v2507_v47  ;;  %3212 = vst.msk [vmem:[%s4597_s4 + $0xf4] sm:$0xf] %vm3150_vm2, %v3724_v29 }
 0x1cb   : > { %v3788_v41 = vpack.c.bf16 %v2635_v7, %v2635_v7 }
 0x1cd   : > { %3276 = vst.msk [vmem:[%s4597_s4 + $0x1f4] sm:$0xf] %vm3150_vm2, %v3788_v41 }
 0x1ce PF: > { %s13_s14 = sadd.s32 1, %s4114_s14   ;;  %s5466_s12 = smov %s4110_s13 }
 0x1cf   : > { %p10_p5 = scmp.ge.s32.totalorder %s13_s14, 4   ;;  %s5467_s13 = smov %s5469_s15 }
 0x1d1   :  { %12 = sbr.rel (!%p10_p5) target bundleno = 2 (0x2), region = 76 }

// kernel: discriminator_forward.6
= control target key start
LH: loop header
LB: loop body
LE: loop exit
PB: predicated region body
PF: predicated region fallthrough
CT: control target
= control target key end

     0   :  { %s2705_s12 = smov 0   ;;  %s2707_s13 = smov 0   ;;  %s3086_s0 = inlined_call_operand.vmem [shape: bf16[512,1024], index: 0, kind: input, shape index: {}]   ;;  %s3087_s1 = inlined_call_operand.vmem [shape: bf16[1024,128], index: 1, kind: input, shape index: {}]   ;;  %s3088_s2 = inlined_call_operand.vmem [shape: f32[1,128], index: 2, kind: input, shape index: {}]   ;;  %s3089_s3 = inlined_call_operand.vmem [shape: bf16[512,128], index: 3, kind: output, shape index: {}]  }
   0x1   :  { %s2709_s14 = smov 0   ;;  %s2711_s15 = smov 0  }
   0x2   :  { %s2713_s16 = smov 0   ;;  %s2715_s17 = smov 0  }
   0x3   :  { %s2717_s18 = smov 0  }
   0x4 LB: > { %s25_s19 = sadd.s32 1, %s2674_s16  ;;  %s32_s20 = sadd.s32 1, %s2678_s17  ;;  %s2682_s18 = sphi %s2717_s18, %s13_s18   ;;  %s2678_s17 = sphi %s2715_s17, %s3095_s17   ;;  %s2674_s16 = sphi %s2713_s16, %s3094_s16   ;;  %s2670_s15 = sphi %s2711_s15, %s3093_s15   ;;  %s2666_s14 = sphi %s2709_s14, %s3092_s14   ;;  %s2662_s13 = sphi %s2707_s13, %s3091_s13   ;;  %s2658_s12 = sphi %s2705_s12, %s3090_s12  }
   0x5   : > { %p26_p0 = scmp.ge.s32.totalorder %s25_s19, 2  ;;  %p48_p1 = scmp.ne.s32.totalorder %s2662_s13, %s2658_s12 }
   0x6   : > { %p49_p2 = scmp.eq.s32.totalorder %s2682_s18, 0  ;;  %s41_s24 = sadd.s32 1, %s2662_s13 }
   0x7   : > { %s3097_s19 = smov (%p26_p0, %s25_s19), 0  ;;  %s3099_s20 = smov (!%p26_p0, %s32_s20), %s2678_s17 }
   0x8   : > { %p50_p3 = por %p49_p2, %p48_p1  ;;  %p34_p4 = scmp.ge.s32.totalorder %s3099_s20, 2 }
   0x9   : > { %s37_s21 = ssub.s32 %s2674_s16, %s3097_s19  ;;  %p1946_p6 = scmp.ge.s32.totalorder %s2682_s18, 4 }
   0xa   : > { %s3101_s20 = smov (%p34_p4, %s3099_s20), 0 }
   0xb   : > { %s36_s22 = ssub.s32 %s2678_s17, %s3101_s20  ;;  %162 = sbr.rel (%p1946_p6) target bundleno = 57 (0x39), region = 20 }
   0xc   : > { %s38_s23 = sor.u32 %s37_s21, %s36_s22 }
   0xd   : > { %p39_p5 = scmp.eq.s32.totalorder %s38_s23, 0 }
   0xf   : > { %s2756_s25 = scalar_select %p39_p5, %s2662_s13, %s41_s24  }
  0x12   : > { %165 = sbr.rel (!%p50_p3) target bundleno = 57 (0x39), region = 24  ;;  %s167_s26 = sand.u32 (%p50_p3), 1, %s2662_s13  }
  0x13   : > { %s1949_s27 = sshll.u32 (%p50_p3), %s2674_s16, 2  ;;  %s1947_s28 = sshll.u32 (%p50_p3), %s167_s26, 9 }
  0x14   : > { %s2091_s29 = sshll.u32 (%p50_p3), %s2678_s17, 8  ;;  %s2770_s8 = scalar_lea.vmem (%p50_p3), [#allocation3], %s1947_s28 }
  0x15   : > { %s173_s30 = sadd.s32 (%p50_p3), %s2091_s29, %s1949_s27 }
  0x16   : > { %s1951_s4 = sshll.u32 (%p50_p3), %s173_s30, 2 }
  0x17   : > { %s2765_s7 = scalar_lea.vmem (%p50_p3), %s3086_s0, %s1951_s4 }
  0x18   : > { %v188_v0 = vld [vmem:[%s2765_s7] sm:$0xff] (%p50_p3)  ;;  %v190_v1 = vld [vmem:[%s2765_s7 + $0x8] sm:$0xff] (%p50_p3) }
  0x19   : > { %v192_v2 = vld [vmem:[%s2765_s7 + $0x20] sm:$0xff]  ;;  %189 = vst [vmem:[%s2770_s8] sm:$0xff] %v188_v0  ;;  %191 = vst [vmem:[%s2770_s8 + $0x8] sm:$0xff] %v190_v1  ;;  %v194_v3 = vld [vmem:[%s2765_s7 + $0x28] sm:$0xff] }
  0x1a   : > { %193 = vst [vmem:[%s2770_s8 + $0x10] sm:$0xff] %v192_v2  ;;  %v196_v4 = vld [vmem:[%s2765_s7 + $0x40] sm:$0xff]  ;;  %v198_v5 = vld [vmem:[%s2765_s7 + $0x48] sm:$0xff]  ;;  %195 = vst [vmem:[%s2770_s8 + $0x18] sm:$0xff] %v194_v3 }
  0x1b   : > { %197 = vst [vmem:[%s2770_s8 + $0x20] sm:$0xff] %v196_v4  ;;  %199 = vst [vmem:[%s2770_s8 + $0x28] sm:$0xff] %v198_v5  ;;  %v200_v6 = vld [vmem:[%s2765_s7 + $0x60] sm:$0xff]  ;;  %v202_v7 = vld [vmem:[%s2765_s7 + $0x68] sm:$0xff] }
  0x1c   : > { %v204_v8 = vld [vmem:[%s2765_s7 + $0x80] sm:$0xff]  ;;  %201 = vst [vmem:[%s2770_s8 + $0x30] sm:$0xff] %v200_v6  ;;  %203 = vst [vmem:[%s2770_s8 + $0x38] sm:$0xff] %v202_v7  ;;  %v206_v9 = vld [vmem:[%s2765_s7 + $0x88] sm:$0xff] }
  0x1d   : > { %205 = vst [vmem:[%s2770_s8 + $0x40] sm:$0xff] %v204_v8  ;;  %v208_v10 = vld [vmem:[%s2765_s7 + $0xa0] sm:$0xff]  ;;  %v210_v11 = vld [vmem:[%s2765_s7 + $0xa8] sm:$0xff]  ;;  %207 = vst [vmem:[%s2770_s8 + $0x48] sm:$0xff] %v206_v9 }
  0x1e   : > { %209 = vst [vmem:[%s2770_s8 + $0x50] sm:$0xff] %v208_v10  ;;  %211 = vst [vmem:[%s2770_s8 + $0x58] sm:$0xff] %v210_v11  ;;  %v212_v12 = vld [vmem:[%s2765_s7 + $0xc0] sm:$0xff]  ;;  %v214_v13 = vld [vmem:[%s2765_s7 + $0xc8] sm:$0xff] }
  0x1f   : > { %v216_v14 = vld [vmem:[%s2765_s7 + $0xe0] sm:$0xff]  ;;  %213 = vst [vmem:[%s2770_s8 + $0x60] sm:$0xff] %v212_v12  ;;  %215 = vst [vmem:[%s2770_s8 + $0x68] sm:$0xff] %v214_v13  ;;  %v218_v15 = vld [vmem:[%s2765_s7 + $0xe8] sm:$0xff] }
  0x20   : > { %217 = vst [vmem:[%s2770_s8 + $0x70] sm:$0xff] %v216_v14  ;;  %v220_v16 = vld [vmem:[%s2765_s7 + $0x100] sm:$0xff]  ;;  %v222_v17 = vld [vmem:[%s2765_s7 + $0x108] sm:$0xff]  ;;  %219 = vst [vmem:[%s2770_s8 + $0x78] sm:$0xff] %v218_v15 }
  0x21   : > { %221 = vst [vmem:[%s2770_s8 + $0x80] sm:$0xff] %v220_v16  ;;  %223 = vst [vmem:[%s2770_s8 + $0x88] sm:$0xff] %v222_v17  ;;  %v224_v18 = vld [vmem:[%s2765_s7 + $0x120] sm:$0xff]  ;;  %v226_v19 = vld [vmem:[%s2765_s7 + $0x128] sm:$0xff] }
  0x22   : > { %v228_v20 = vld [vmem:[%s2765_s7 + $0x140] sm:$0xff]  ;;  %225 = vst [vmem:[%s2770_s8 + $0x90] sm:$0xff] %v224_v18  ;;  %227 = vst [vmem:[%s2770_s8 + $0x98] sm:$0xff] %v226_v19  ;;  %v230_v21 = vld [vmem:[%s2765_s7 + $0x148] sm:$0xff] }
  0x23   : > { %229 = vst [vmem:[%s2770_s8 + $0xa0] sm:$0xff] %v228_v20  ;;  %v232_v22 = vld [vmem:[%s2765_s7 + $0x160] sm:$0xff]  ;;  %v234_v23 = vld [vmem:[%s2765_s7 + $0x168] sm:$0xff]  ;;  %231 = vst [vmem:[%s2770_s8 + $0xa8] sm:$0xff] %v230_v21 }
  0x24   : > { %233 = vst [vmem:[%s2770_s8 + $0xb0] sm:$0xff] %v232_v22  ;;  %235 = vst [vmem:[%s2770_s8 + $0xb8] sm:$0xff] %v234_v23  ;;  %v236_v24 = vld [vmem:[%s2765_s7 + $0x180] sm:$0xff]  ;;  %v238_v25 = vld [vmem:[%s2765_s7 + $0x188] sm:$0xff] }
  0x25   : > { %v240_v26 = vld [vmem:[%s2765_s7 + $0x1a0] sm:$0xff]  ;;  %237 = vst [vmem:[%s2770_s8 + $0xc0] sm:$0xff] %v236_v24  ;;  %239 = vst [vmem:[%s2770_s8 + $0xc8] sm:$0xff] %v238_v25  ;;  %v242_v27 = vld [vmem:[%s2765_s7 + $0x1a8] sm:$0xff] }
  0x26   : > { %241 = vst [vmem:[%s2770_s8 + $0xd0] sm:$0xff] %v240_v26  ;;  %v244_v28 = vld [vmem:[%s2765_s7 + $0x1c0] sm:$0xff]  ;;  %v246_v29 = vld [vmem:[%s2765_s7 + $0x1c8] sm:$0xff]  ;;  %243 = vst [vmem:[%s2770_s8 + $0xd8] sm:$0xff] %v242_v27 }
  0x27   : > { %245 = vst [vmem:[%s2770_s8 + $0xe0] sm:$0xff] %v244_v28  ;;  %247 = vst [vmem:[%s2770_s8 + $0xe8] sm:$0xff] %v246_v29  ;;  %v248_v30 = vld [vmem:[%s2765_s7 + $0x1e0] sm:$0xff]  ;;  %v250_v31 = vld [vmem:[%s2765_s7 + $0x1e8] sm:$0xff] }
  0x28   : > { %v252_v32 = vld [vmem:[%s2765_s7 + $0x200] sm:$0xff]  ;;  %249 = vst [vmem:[%s2770_s8 + $0xf0] sm:$0xff] %v248_v30  ;;  %251 = vst [vmem:[%s2770_s8 + $0xf8] sm:$0xff] %v250_v31  ;;  %v254_v33 = vld [vmem:[%s2765_s7 + $0x208] sm:$0xff] }
  0x29   : > { %253 = vst [vmem:[%s2770_s8 + $0x100] sm:$0xff] %v252_v32  ;;  %v256_v34 = vld [vmem:[%s2765_s7 + $0x220] sm:$0xff]  ;;  %v258_v35 = vld [vmem:[%s2765_s7 + $0x228] sm:$0xff]  ;;  %255 = vst [vmem:[%s2770_s8 + $0x108] sm:$0xff] %v254_v33 }
  0x2a   : > { %257 = vst [vmem:[%s2770_s8 + $0x110] sm:$0xff] %v256_v34  ;;  %259 = vst [vmem:[%s2770_s8 + $0x118] sm:$0xff] %v258_v35  ;;  %v260_v36 = vld [vmem:[%s2765_s7 + $0x240] sm:$0xff]  ;;  %v262_v37 = vld [vmem:[%s2765_s7 + $0x248] sm:$0xff] }
  0x2b   : > { %v264_v38 = vld [vmem:[%s2765_s7 + $0x260] sm:$0xff]  ;;  %261 = vst [vmem:[%s2770_s8 + $0x120] sm:$0xff] %v260_v36  ;;  %263 = vst [vmem:[%s2770_s8 + $0x128] sm:$0xff] %v262_v37  ;;  %v266_v39 = vld [vmem:[%s2765_s7 + $0x268] sm:$0xff] }
  0x2c   : > { %265 = vst [vmem:[%s2770_s8 + $0x130] sm:$0xff] %v264_v38  ;;  %v268_v40 = vld [vmem:[%s2765_s7 + $0x280] sm:$0xff]  ;;  %v270_v41 = vld [vmem:[%s2765_s7 + $0x288] sm:$0xff]  ;;  %267 = vst [vmem:[%s2770_s8 + $0x138] sm:$0xff] %v266_v39 }
  0x2d   : > { %269 = vst [vmem:[%s2770_s8 + $0x140] sm:$0xff] %v268_v40  ;;  %271 = vst [vmem:[%s2770_s8 + $0x148] sm:$0xff] %v270_v41  ;;  %v272_v42 = vld [vmem:[%s2765_s7 + $0x2a0] sm:$0xff]  ;;  %v274_v43 = vld [vmem:[%s2765_s7 + $0x2a8] sm:$0xff] }
  0x2e   : > { %v276_v44 = vld [vmem:[%s2765_s7 + $0x2c0] sm:$0xff]  ;;  %273 = vst [vmem:[%s2770_s8 + $0x150] sm:$0xff] %v272_v42  ;;  %275 = vst [vmem:[%s2770_s8 + $0x158] sm:$0xff] %v274_v43  ;;  %v278_v45 = vld [vmem:[%s2765_s7 + $0x2c8] sm:$0xff] }
  0x2f   : > { %277 = vst [vmem:[%s2770_s8 + $0x160] sm:$0xff] %v276_v44  ;;  %v280_v46 = vld [vmem:[%s2765_s7 + $0x2e0] sm:$0xff]  ;;  %v282_v47 = vld [vmem:[%s2765_s7 + $0x2e8] sm:$0xff]  ;;  %279 = vst [vmem:[%s2770_s8 + $0x168] sm:$0xff] %v278_v45 }
  0x30   : > { %281 = vst [vmem:[%s2770_s8 + $0x170] sm:$0xff] %v280_v46  ;;  %283 = vst [vmem:[%s2770_s8 + $0x178] sm:$0xff] %v282_v47  ;;  %v284_v48 = vld [vmem:[%s2765_s7 + $0x300] sm:$0xff]  ;;  %v286_v49 = vld [vmem:[%s2765_s7 + $0x308] sm:$0xff] }
  0x31   : > { %v288_v50 = vld [vmem:[%s2765_s7 + $0x320] sm:$0xff]  ;;  %285 = vst [vmem:[%s2770_s8 + $0x180] sm:$0xff] %v284_v48  ;;  %287 = vst [vmem:[%s2770_s8 + $0x188] sm:$0xff] %v286_v49  ;;  %v290_v51 = vld [vmem:[%s2765_s7 + $0x328] sm:$0xff] }
  0x32   : > { %289 = vst [vmem:[%s2770_s8 + $0x190] sm:$0xff] %v288_v50  ;;  %v292_v52 = vld [vmem:[%s2765_s7 + $0x340] sm:$0xff]  ;;  %v294_v53 = vld [vmem:[%s2765_s7 + $0x348] sm:$0xff]  ;;  %291 = vst [vmem:[%s2770_s8 + $0x198] sm:$0xff] %v290_v51 }
  0x33   : > { %293 = vst [vmem:[%s2770_s8 + $0x1a0] sm:$0xff] %v292_v52  ;;  %295 = vst [vmem:[%s2770_s8 + $0x1a8] sm:$0xff] %v294_v53  ;;  %v296_v54 = vld [vmem:[%s2765_s7 + $0x360] sm:$0xff]  ;;  %v298_v55 = vld [vmem:[%s2765_s7 + $0x368] sm:$0xff] }
  0x34   : > { %v300_v56 = vld [vmem:[%s2765_s7 + $0x380] sm:$0xff]  ;;  %297 = vst [vmem:[%s2770_s8 + $0x1b0] sm:$0xff] %v296_v54  ;;  %299 = vst [vmem:[%s2770_s8 + $0x1b8] sm:$0xff] %v298_v55  ;;  %v302_v57 = vld [vmem:[%s2765_s7 + $0x388] sm:$0xff] }
  0x35   : > { %301 = vst [vmem:[%s2770_s8 + $0x1c0] sm:$0xff] %v300_v56  ;;  %v304_v58 = vld [vmem:[%s2765_s7 + $0x3a0] sm:$0xff]  ;;  %v306_v59 = vld [vmem:[%s2765_s7 + $0x3a8] sm:$0xff]  ;;  %303 = vst [vmem:[%s2770_s8 + $0x1c8] sm:$0xff] %v302_v57 }
  0x36   : > { %305 = vst [vmem:[%s2770_s8 + $0x1d0] sm:$0xff] %v304_v58  ;;  %307 = vst [vmem:[%s2770_s8 + $0x1d8] sm:$0xff] %v306_v59  ;;  %v308_v60 = vld [vmem:[%s2765_s7 + $0x3c0] sm:$0xff]  ;;  %v310_v61 = vld [vmem:[%s2765_s7 + $0x3c8] sm:$0xff] }
  0x37   : > { %v312_v62 = vld [vmem:[%s2765_s7 + $0x3e0] sm:$0xff]  ;;  %309 = vst [vmem:[%s2770_s8 + $0x1e0] sm:$0xff] %v308_v60  ;;  %311 = vst [vmem:[%s2770_s8 + $0x1e8] sm:$0xff] %v310_v61  ;;  %v314_v63 = vld [vmem:[%s2765_s7 + $0x3e8] sm:$0xff] }
  0x38   : > { %313 = vst [vmem:[%s2770_s8 + $0x1f0] sm:$0xff] %v312_v62  ;;  %315 = vst [vmem:[%s2770_s8 + $0x1f8] sm:$0xff] %v314_v63 }
  0x39 PF: > { %p1952_p7 = scmp.ge.s32.totalorder %s2682_s18, 1  ;;  %p332_p8 = scmp.lt.s32.totalorder %s2682_s18, 5 }
  0x3b   : > { %p333_p9 = pnand %p1952_p7, %p332_p8 }
  0x3c   : > { %s339_s9 = sand.u32 (!%p333_p9), 1, %s2658_s12   ;;  %s1954_s10 = sshll.u32 (!%p333_p9), %s2666_s14, 6 }
  0x3d   : > { %336 = sbr.rel (%p333_p9) target bundleno = 484 (0x1e4), region = 51  ;;  %s1953_s11 = sshll.u32 (!%p333_p9), %s339_s9, 9 }
  0x3e   : > { %p379_p10 = scmp.lt.s32.totalorder (!%p333_p9), %s1954_s10, 127  ;;  %s1956_s21 = sshll.u32 (!%p333_p9), %s2670_s15, 5 }
  0x3f   : > { %p391_p11 = scmp.lt.s32.totalorder (!%p333_p9), %s1956_s21, 63  ;;  %s2912_s12 = scalar_lea.vmem (!%p333_p9), [#allocation3], %s1953_s11 }
  0x40   : > { %p1958_p12 = scmp.ne.s32.totalorder (!%p333_p9), %s2666_s14, 0 }
  0x44   : > { %s3103_s10 = smov (!%p379_p10, %s1954_s10), 127  ;;  %s3105_s21 = smov (!%p391_p11, %s1956_s21), 63 }
  0x45   : > { %s1955_s22 = sshll.u32 %s3103_s10, 2  ;;  %s1957_s27 = sshll.u32 %s3105_s21, 2  ;;  %v2684_v0 = vmov (!%p1958_p12), 0.0  }
  0x46   : > { %s2905_s26 = scalar_lea.vmem %s3087_s1, %s1955_s22  ;;  %s2910_s30 = scalar_lea.vmem %s3089_s3, %s1957_s27  ;;  %404 = vst [vmem:[#allocation2] sm:$0xff] (!%p1958_p12), %v2684_v0  ;;  %405 = vst [vmem:[#allocation2 + $0x8] sm:$0xff] (!%p1958_p12), %v2684_v0 }
  0x47   : > { %403 = sbr.rel (%p1958_p12) target bundleno = 86 (0x56), region = 59  ;;  %406 = vst [vmem:[#allocation2 + $0x10] sm:$0xff] (!%p1958_p12), %v2684_v0  ;;  %407 = vst [vmem:[#allocation2 + $0x18] sm:$0xff] (!%p1958_p12), %v2684_v0 }
  0x48   : > { %408 = vst [vmem:[#allocation2 + $0x20] sm:$0xff] (!%p1958_p12), %v2684_v0  ;;  %409 = vst [vmem:[#allocation2 + $0x28] sm:$0xff] (!%p1958_p12), %v2684_v0 }
  0x49   : > { %410 = vst [vmem:[#allocation2 + $0x30] sm:$0xff] (!%p1958_p12), %v2684_v0  ;;  %411 = vst [vmem:[#allocation2 + $0x38] sm:$0xff] (!%p1958_p12), %v2684_v0 }
  0x4a   : > { %412 = vst [vmem:[#allocation2 + $0x40] sm:$0xff] (!%p1958_p12), %v2684_v0  ;;  %413 = vst [vmem:[#allocation2 + $0x48] sm:$0xff] (!%p1958_p12), %v2684_v0 }
  0x4b   : > { %414 = vst [vmem:[#allocation2 + $0x50] sm:$0xff] (!%p1958_p12), %v2684_v0  ;;  %415 = vst [vmem:[#allocation2 + $0x58] sm:$0xff] (!%p1958_p12), %v2684_v0 }
  0x4c   : > { %416 = vst [vmem:[#allocation2 + $0x60] sm:$0xff] (!%p1958_p12), %v2684_v0  ;;  %417 = vst [vmem:[#allocation2 + $0x68] sm:$0xff] (!%p1958_p12), %v2684_v0 }
  0x4d   : > { %418 = vst [vmem:[#allocation2 + $0x70] sm:$0xff] (!%p1958_p12), %v2684_v0  ;;  %419 = vst [vmem:[#allocation2 + $0x78] sm:$0xff] (!%p1958_p12), %v2684_v0 }
  0x4e   : > { %420 = vst [vmem:[#allocation2 + $0x80] sm:$0xff] %v2684_v0  ;;  %421 = vst [vmem:[#allocation2 + $0x88] sm:$0xff] %v2684_v0 }
  0x4f   : > { %422 = vst [vmem:[#allocation2 + $0x90] sm:$0xff] %v2684_v0  ;;  %423 = vst [vmem:[#allocation2 + $0x98] sm:$0xff] %v2684_v0 }
  0x50   : > { %424 = vst [vmem:[#allocation2 + $0xa0] sm:$0xff] %v2684_v0  ;;  %425 = vst [vmem:[#allocation2 + $0xa8] sm:$0xff] %v2684_v0 }
  0x51   : > { %426 = vst [vmem:[#allocation2 + $0xb0] sm:$0xff] %v2684_v0  ;;  %427 = vst [vmem:[#allocation2 + $0xb8] sm:$0xff] %v2684_v0 }
  0x52   : > { %428 = vst [vmem:[#allocation2 + $0xc0] sm:$0xff] %v2684_v0  ;;  %429 = vst [vmem:[#allocation2 + $0xc8] sm:$0xff] %v2684_v0 }
  0x53   : > { %430 = vst [vmem:[#allocation2 + $0xd0] sm:$0xff] %v2684_v0  ;;  %431 = vst [vmem:[#allocation2 + $0xd8] sm:$0xff] %v2684_v0 }
  0x54   : > { %432 = vst [vmem:[#allocation2 + $0xe0] sm:$0xff] %v2684_v0  ;;  %433 = vst [vmem:[#allocation2 + $0xe8] sm:$0xff] %v2684_v0 }
  0x55   : > { %434 = vst [vmem:[#allocation2 + $0xf0] sm:$0xff] %v2684_v0  ;;  %435 = vst [vmem:[#allocation2 + $0xf8] sm:$0xff] %v2684_v0 }
  0x56 PF: > { %v2500_v1 = vld [vmem:[%s2905_s26 + $0x40] sm:$0xff]   ;;  %v2504_v5 = vld [vmem:[%s2905_s26 + $0x48] sm:$0xff]   ;;  %v2508_v9 = vld [vmem:[%s2905_s26 + $0x50] sm:$0xff]   ;;  %p2055_p13 = scmp.ne.s32.totalorder %s2666_s14, 1 }
  0x57   : > { %v2501_v2 = vld [vmem:[%s2905_s26 + $0xc0] sm:$0xff]   ;;  %2219 = vmatprep.subr.bf16.mxu0 %v2500_v1  ;;  %v2505_v6 = vld [vmem:[%s2905_s26 + $0xc8] sm:$0xff]   ;;  %v2509_v10 = vld [vmem:[%s2905_s26 + $0xd0] sm:$0xff]  }
  0x58   : > { %v2502_v3 = vld [vmem:[%s2905_s26] sm:$0xff]   ;;  %2331 = vmatprep.subr.bf16.mxu1 %v2501_v2  ;;  %v2506_v7 = vld [vmem:[%s2905_s26 + $0x8] sm:$0xff]   ;;  %v2510_v11 = vld [vmem:[%s2905_s26 + $0x10] sm:$0xff]  }
  0x59   : > { %v2503_v4 = vld [vmem:[%s2905_s26 + $0x80] sm:$0xff]   ;;  %2220 = vmatpush3.bf16.msra.mxu0 %v2502_v3  ;;  %v2507_v8 = vld [vmem:[%s2905_s26 + $0x88] sm:$0xff]   ;;  %v2511_v12 = vld [vmem:[%s2905_s26 + $0x90] sm:$0xff]  }
  0x5a   : > { %2332 = vmatpush3.bf16.msra.mxu1 %v2503_v4  ;;  %2221 = vmatprep.subr.bf16.mxu0 %v2504_v5  ;;  %v2512_v13 = vld [vmem:[%s2905_s26 + $0x58] sm:$0xff]   ;;  %v2516_v17 = vld [vmem:[%s2905_s26 + $0x60] sm:$0xff]   ;;  %v2520_v21 = vld [vmem:[%s2905_s26 + $0x68] sm:$0xff]  }
  0x5b   : > { %2333 = vmatprep.subr.bf16.mxu1 %v2505_v6  ;;  %v2513_v14 = vld [vmem:[%s2905_s26 + $0xd8] sm:$0xff]   ;;  %v2517_v18 = vld [vmem:[%s2905_s26 + $0xe0] sm:$0xff]   ;;  %v2521_v22 = vld [vmem:[%s2905_s26 + $0xe8] sm:$0xff]  }
  0x5c   : > { %v2514_v15 = vld [vmem:[%s2905_s26 + $0x18] sm:$0xff]   ;;  %v2518_v19 = vld [vmem:[%s2905_s26 + $0x20] sm:$0xff]   ;;  %v2522_v23 = vld [vmem:[%s2905_s26 + $0x28] sm:$0xff]  }
  0x5d   : > { %2222 = vmatpush3.bf16.msra.mxu0 %v2506_v7  ;;  %v2515_v16 = vld [vmem:[%s2905_s26 + $0x98] sm:$0xff]   ;;  %v2519_v20 = vld [vmem:[%s2905_s26 + $0xa0] sm:$0xff]   ;;  %v2523_v24 = vld [vmem:[%s2905_s26 + $0xa8] sm:$0xff]  }
  0x5e   : > { %2334 = vmatpush3.bf16.msra.mxu1 %v2507_v8  ;;  %2223 = vmatprep.subr.bf16.mxu0 %v2508_v9  ;;  %v2524_v25 = vld [vmem:[%s2905_s26 + $0x70] sm:$0xff]   ;;  %v2528_v29 = vld [vmem:[%s2905_s26 + $0x78] sm:$0xff]  }
  0x5f   : > { %2335 = vmatprep.subr.bf16.mxu1 %v2509_v10  ;;  %v2525_v26 = vld [vmem:[%s2905_s26 + $0xf0] sm:$0xff]   ;;  %v2529_v30 = vld [vmem:[%s2905_s26 + $0xf8] sm:$0xff]  }
  0x60   : > { %v2526_v27 = vld [vmem:[%s2905_s26 + $0x30] sm:$0xff]   ;;  %v2530_v31 = vld [vmem:[%s2905_s26 + $0x38] sm:$0xff]  }
  0x61   : > { %2224 = vmatpush3.bf16.msra.mxu0 %v2510_v11  ;;  %v2527_v28 = vld [vmem:[%s2905_s26 + $0xb0] sm:$0xff]   ;;  %v2531_v32 = vld [vmem:[%s2905_s26 + $0xb8] sm:$0xff]  }
  0x62   : > { %2336 = vmatpush3.bf16.msra.mxu1 %v2511_v12  ;;  %2225 = vmatprep.subr.bf16.mxu0 %v2512_v13  ;;  %v2532_v33 = vld [vmem:[%s2912_s12] ss:$16 sps:$4 sm:$0xff]   ;;  %v2534_v34 = vld [vmem:[%s2912_s12 + $0x4] ss:$16 sps:$4 sm:$0xff]   ;;  %v2535_v35 = vld [vmem:[%s2912_s12 + $0x8] ss:$16 sps:$4 sm:$0xff]  }
  0x63   : > { %2337 = vmatprep.subr.bf16.mxu1 %v2513_v14  ;;  %v2537_v36 = vld [vmem:[%s2912_s12 + $0xc] ss:$16 sps:$4 sm:$0xff]   ;;  %1140 = vmatprep.mubr.bf16.mxu0 %v2534_v34  ;;  %v2538_v37 = vld [vmem:[%s2912_s12 + $0x24] ss:$16 sps:$4 sm:$0xff]   ;;  %v2542_v39 = vld [vmem:[%s2912_s12 + $0x20] ss:$16 sps:$4 sm:$0xff]  }
  0x64   : > { %1301 = vmatprep.mubr.bf16.mxu1 %v2537_v36  ;;  %v2540_v38 = vld [vmem:[%s2912_s12 + $0x2c] ss:$16 sps:$4 sm:$0xff]   ;;  %v2543_v40 = vld [vmem:[%s2912_s12 + $0x28] ss:$16 sps:$4 sm:$0xff]   ;;  %v2544_v41 = vld [vmem:[%s2912_s12 + $0x44] ss:$16 sps:$4 sm:$0xff]  }
  0x65   : > { %2226 = vmatpush3.bf16.msra.mxu0 %v2514_v15  ;;  %v2546_v42 = vld [vmem:[%s2912_s12 + $0x4c] ss:$16 sps:$4 sm:$0xff]   ;;  %v2548_v43 = vld [vmem:[%s2912_s12 + $0x40] ss:$16 sps:$4 sm:$0xff]   ;;  %v2549_v44 = vld [vmem:[%s2912_s12 + $0x48] ss:$16 sps:$4 sm:$0xff]  }
  0x66   : > { %2338 = vmatpush3.bf16.msra.mxu1 %v2515_v16  ;;  %2227 = vmatprep.subr.bf16.mxu0 %v2516_v17  ;;  %v2550_v45 = vld [vmem:[%s2912_s12 + $0x64] ss:$16 sps:$4 sm:$0xff]   ;;  %v2552_v46 = vld [vmem:[%s2912_s12 + $0x6c] ss:$16 sps:$4 sm:$0xff]   ;;  %v2554_v47 = vld [vmem:[%s2912_s12 + $0x60] ss:$16 sps:$4 sm:$0xff]  }
  0x67   : > { %2339 = vmatprep.subr.bf16.mxu1 %v2517_v18  ;;  %v2555_v48 = vld [vmem:[%s2912_s12 + $0x68] ss:$16 sps:$4 sm:$0xff]   ;;  %v2556_v49 = vld [vmem:[%s2912_s12 + $0x84] ss:$16 sps:$4 sm:$0xff]   ;;  %v2558_v50 = vld [vmem:[%s2912_s12 + $0x8c] ss:$16 sps:$4 sm:$0xff]  }
  0x68   : > { %v2560_v51 = vld [vmem:[%s2912_s12 + $0x80] ss:$16 sps:$4 sm:$0xff]   ;;  %v2561_v52 = vld [vmem:[%s2912_s12 + $0x88] ss:$16 sps:$4 sm:$0xff]   ;;  %v2562_v53 = vld [vmem:[%s2912_s12 + $0xa4] ss:$16 sps:$4 sm:$0xff]  }
  0x69   : > { %2228 = vmatpush3.bf16.msra.mxu0 %v2518_v19  ;;  %v2564_v54 = vld [vmem:[%s2912_s12 + $0xac] ss:$16 sps:$4 sm:$0xff]   ;;  %v2566_v55 = vld [vmem:[%s2912_s12 + $0xa0] ss:$16 sps:$4 sm:$0xff]   ;;  %v2567_v56 = vld [vmem:[%s2912_s12 + $0xa8] ss:$16 sps:$4 sm:$0xff]  }
  0x6a   : > { %2340 = vmatpush3.bf16.msra.mxu1 %v2519_v20  ;;  %2229 = vmatprep.subr.bf16.mxu0 %v2520_v21  ;;  %v2568_v57 = vld [vmem:[%s2912_s12 + $0xc4] ss:$16 sps:$4 sm:$0xff]   ;;  %v2570_v58 = vld [vmem:[%s2912_s12 + $0xcc] ss:$16 sps:$4 sm:$0xff]   ;;  %v2572_v59 = vld [vmem:[%s2912_s12 + $0xc0] ss:$16 sps:$4 sm:$0xff]  }
  0x6b   : > { %2341 = vmatprep.subr.bf16.mxu1 %v2521_v22  ;;  %v2573_v60 = vld [vmem:[%s2912_s12 + $0xc8] ss:$16 sps:$4 sm:$0xff]   ;;  %v2574_v61 = vld [vmem:[%s2912_s12 + $0xe4] ss:$16 sps:$4 sm:$0xff]   ;;  %v2576_v62 = vld [vmem:[%s2912_s12 + $0xec] ss:$16 sps:$4 sm:$0xff]  }
  0x6c   : > { %v2578_v63 = vld [vmem:[%s2912_s12 + $0xe0] ss:$16 sps:$4 sm:$0xff]   ;;  %v2579_v0 = vld [vmem:[%s2912_s12 + $0xe8] ss:$16 sps:$4 sm:$0xff]   ;;  %v2580_v1 = vld [vmem:[%s2912_s12 + $0x104] ss:$16 sps:$4 sm:$0xff]  }
  0x6d   : > { %2230 = vmatpush3.bf16.msra.mxu0 %v2522_v23  ;;  %v2582_v2 = vld [vmem:[%s2912_s12 + $0x10c] ss:$16 sps:$4 sm:$0xff]   ;;  %v2584_v3 = vld [vmem:[%s2912_s12 + $0x100] ss:$16 sps:$4 sm:$0xff]   ;;  %v2585_v4 = vld [vmem:[%s2912_s12 + $0x108] ss:$16 sps:$4 sm:$0xff]  }
  0x6e   : > { %2342 = vmatpush3.bf16.msra.mxu1 %v2523_v24  ;;  %2231 = vmatprep.subr.bf16.mxu0 %v2524_v25  ;;  %v2586_v5 = vld [vmem:[%s2912_s12 + $0x124] ss:$16 sps:$4 sm:$0xff]   ;;  %v2588_v6 = vld [vmem:[%s2912_s12 + $0x12c] ss:$16 sps:$4 sm:$0xff]   ;;  %v2590_v7 = vld [vmem:[%s2912_s12 + $0x120] ss:$16 sps:$4 sm:$0xff]  }
  0x6f   : > { %2343 = vmatprep.subr.bf16.mxu1 %v2525_v26  ;;  %v2591_v8 = vld [vmem:[%s2912_s12 + $0x128] ss:$16 sps:$4 sm:$0xff]   ;;  %v2592_v9 = vld [vmem:[%s2912_s12 + $0x144] ss:$16 sps:$4 sm:$0xff]   ;;  %v2594_v10 = vld [vmem:[%s2912_s12 + $0x14c] ss:$16 sps:$4 sm:$0xff]  }
  0x70   : > { %v2596_v11 = vld [vmem:[%s2912_s12 + $0x140] ss:$16 sps:$4 sm:$0xff]   ;;  %v2597_v12 = vld [vmem:[%s2912_s12 + $0x148] ss:$16 sps:$4 sm:$0xff]   ;;  %v2598_v13 = vld [vmem:[%s2912_s12 + $0x164] ss:$16 sps:$4 sm:$0xff]  }
  0x71   : > { %2232 = vmatpush3.bf16.msra.mxu0 %v2526_v27  ;;  %v2600_v14 = vld [vmem:[%s2912_s12 + $0x16c] ss:$16 sps:$4 sm:$0xff]   ;;  %v2602_v15 = vld [vmem:[%s2912_s12 + $0x160] ss:$16 sps:$4 sm:$0xff]   ;;  %v2603_v16 = vld [vmem:[%s2912_s12 + $0x168] ss:$16 sps:$4 sm:$0xff]  }
  0x72   : > { %2344 = vmatpush3.bf16.msra.mxu1 %v2527_v28  ;;  %2233 = vmatprep.subr.bf16.mxu0 %v2528_v29  ;;  %v2604_v17 = vld [vmem:[%s2912_s12 + $0x184] ss:$16 sps:$4 sm:$0xff]   ;;  %v2606_v18 = vld [vmem:[%s2912_s12 + $0x18c] ss:$16 sps:$4 sm:$0xff]   ;;  %v2608_v19 = vld [vmem:[%s2912_s12 + $0x180] ss:$16 sps:$4 sm:$0xff]  }
  0x73   : > { %2345 = vmatprep.subr.bf16.mxu1 %v2529_v30  ;;  %v2609_v20 = vld [vmem:[%s2912_s12 + $0x188] ss:$16 sps:$4 sm:$0xff]   ;;  %v2610_v21 = vld [vmem:[%s2912_s12 + $0x1a4] ss:$16 sps:$4 sm:$0xff]   ;;  %v2612_v22 = vld [vmem:[%s2912_s12 + $0x1ac] ss:$16 sps:$4 sm:$0xff]  }
  0x74   : > { %v2614_v23 = vld [vmem:[%s2912_s12 + $0x1a0] ss:$16 sps:$4 sm:$0xff]   ;;  %v2615_v24 = vld [vmem:[%s2912_s12 + $0x1a8] ss:$16 sps:$4 sm:$0xff]   ;;  %v2616_v25 = vld [vmem:[%s2912_s12 + $0x1c4] ss:$16 sps:$4 sm:$0xff]  }
  0x75   : > { %2234 = vmatpush3.bf16.msra.mxu0 %v2530_v31  ;;  %v2618_v26 = vld [vmem:[%s2912_s12 + $0x1cc] ss:$16 sps:$4 sm:$0xff]   ;;  %v2620_v27 = vld [vmem:[%s2912_s12 + $0x1c0] ss:$16 sps:$4 sm:$0xff]   ;;  %v2621_v28 = vld [vmem:[%s2912_s12 + $0x1c8] ss:$16 sps:$4 sm:$0xff]  }
  0x76   : > { %2346 = vmatpush3.bf16.msra.mxu1 %v2531_v32  ;;  %v2622_v29 = vld [vmem:[%s2912_s12 + $0x1e4] ss:$16 sps:$4 sm:$0xff]   ;;  %v2624_v30 = vld [vmem:[%s2912_s12 + $0x1ec] ss:$16 sps:$4 sm:$0xff]   ;;  %v2626_v31 = vld [vmem:[%s2912_s12 + $0x1e0] ss:$16 sps:$4 sm:$0xff]  }
  0x77   : > { %v2627_v32 = vld [vmem:[%s2912_s12 + $0x1e8] ss:$16 sps:$4 sm:$0xff]  }
  0x78   : > { %1141 = vmatmul.mubr.bf16.vlgmr.msra.gmra.mrb[0].mxu0 %v2532_v33 }
  0x79   : > { %1302 = vmatmul.mubr.bf16.vlgmr.msra.gmra.mrb[0].mxu1 %v2535_v35  ;;  %1148 = vmatprep.mubr.bf16.mxu0 %v2538_v37 }
  0x7a   : > { %1309 = vmatprep.mubr.bf16.mxu1 %v2540_v38 }
  0x80   : > { %1149 = vmatmul.mubr.bf16.gmra.mrb[4].mxu0 %v2542_v39 }
  0x81   : > { %1310 = vmatmul.mubr.bf16.gmra.mrb[4].mxu1 %v2543_v40  ;;  %1156 = vmatprep.mubr.bf16.mxu0 %v2544_v41 }
  0x82   : > { %1317 = vmatprep.mubr.bf16.mxu1 %v2546_v42  ;;  %v436_v42 = vld [vmem:[#allocation2] sm:$0xff] }
  0x88   : > { %1157 = vmatmul.mubr.bf16.gmra.mrb[8].mxu0 %v2548_v43 }
  0x89   : > { %1318 = vmatmul.mubr.bf16.gmra.mrb[8].mxu1 %v2549_v44  ;;  %1164 = vmatprep.mubr.bf16.mxu0 %v2550_v45 }
  0x8a   : > { %1325 = vmatprep.mubr.bf16.mxu1 %v2552_v46 }
  0x90   : > { %1165 = vmatmul.mubr.bf16.gmra.mrb[12].mxu0 %v2554_v47  ;;  %v437_v47 = vld [vmem:[#allocation2 + $0x8] sm:$0xff] }
  0x91   : > { %1326 = vmatmul.mubr.bf16.gmra.mrb[12].mxu1 %v2555_v48  ;;  %1172 = vmatprep.mubr.bf16.mxu0 %v2556_v49 }
  0x92   : > { %1333 = vmatprep.mubr.bf16.mxu1 %v2558_v50 }
  0x98   : > { %1173 = vmatmul.mubr.bf16.gmra.mrb[16].mxu0 %v2560_v51 }
  0x99   : > { %1334 = vmatmul.mubr.bf16.gmra.mrb[16].mxu1 %v2561_v52  ;;  %1180 = vmatprep.mubr.bf16.mxu0 %v2562_v53 }
  0x9a   : > { %1341 = vmatprep.mubr.bf16.mxu1 %v2564_v54 }
  0xa0   : > { %1181 = vmatmul.mubr.bf16.gmra.mrb[20].mxu0 %v2566_v55 }
  0xa1   : > { %1342 = vmatmul.mubr.bf16.gmra.mrb[20].mxu1 %v2567_v56  ;;  %1188 = vmatprep.mubr.bf16.mxu0 %v2568_v57 }
  0xa2   : > { %1349 = vmatprep.mubr.bf16.mxu1 %v2570_v58 }
  0xa8   : > { %1189 = vmatmul.mubr.bf16.gmra.mrb[24].mxu0 %v2572_v59 }
  0xa9   : > { %1350 = vmatmul.mubr.bf16.gmra.mrb[24].mxu1 %v2573_v60  ;;  %1196 = vmatprep.mubr.bf16.mxu0 %v2574_v61  ;;  %v438_v60 = vld [vmem:[#allocation2 + $0x10] sm:$0xff] }
  0xaa   : > { %1357 = vmatprep.mubr.bf16.mxu1 %v2576_v62 }
  0xb0   : > { %1197 = vmatmul.mubr.bf16.gmra.mrb[28].mxu0 %v2578_v63 }
  0xb1   : > { %1358 = vmatmul.mubr.bf16.gmra.mrb[28].mxu1 %v2579_v0  ;;  %1204 = vmatprep.mubr.bf16.mxu0 %v2580_v1  ;;  %v439_v1 = vld [vmem:[#allocation2 + $0x18] sm:$0xff] }
  0xb2   : > { %1365 = vmatprep.mubr.bf16.mxu1 %v2582_v2 }
  0xb8   : > { %1205 = vmatmul.mubr.bf16.gmra.mrb[32].mxu0 %v2584_v3 }
  0xb9   : > { %1366 = vmatmul.mubr.bf16.gmra.mrb[32].mxu1 %v2585_v4  ;;  %1212 = vmatprep.mubr.bf16.mxu0 %v2586_v5 }
  0xba   : > { %1373 = vmatprep.mubr.bf16.mxu1 %v2588_v6 }
  0xc0   : > { %1213 = vmatmul.mubr.bf16.gmra.mrb[36].mxu0 %v2590_v7 }
  0xc1   : > { %1374 = vmatmul.mubr.bf16.gmra.mrb[36].mxu1 %v2591_v8  ;;  %1220 = vmatprep.mubr.bf16.mxu0 %v2592_v9 }
  0xc2   : > { %1381 = vmatprep.mubr.bf16.mxu1 %v2594_v10 }
  0xc8   : > { %1221 = vmatmul.mubr.bf16.gmra.mrb[40].mxu0 %v2596_v11 }
  0xc9   : > { %1382 = vmatmul.mubr.bf16.gmra.mrb[40].mxu1 %v2597_v12  ;;  %1228 = vmatprep.mubr.bf16.mxu0 %v2598_v13 }
  0xca   : > { %1389 = vmatprep.mubr.bf16.mxu1 %v2600_v14  ;;  %v440_v14 = vld [vmem:[#allocation2 + $0x20] sm:$0xff] }
  0xd0   : > { %1229 = vmatmul.mubr.bf16.gmra.mrb[44].mxu0 %v2602_v15 }
  0xd1   : > { %1390 = vmatmul.mubr.bf16.gmra.mrb[44].mxu1 %v2603_v16  ;;  %1236 = vmatprep.mubr.bf16.mxu0 %v2604_v17 }
  0xd2   : > { %1397 = vmatprep.mubr.bf16.mxu1 %v2606_v18 }
  0xd8   : > { %1237 = vmatmul.mubr.bf16.gmra.mrb[48].mxu0 %v2608_v19  ;;  %v441_v19 = vld [vmem:[#allocation2 + $0x28] sm:$0xff] }
  0xd9   : > { %1398 = vmatmul.mubr.bf16.gmra.mrb[48].mxu1 %v2609_v20  ;;  %1244 = vmatprep.mubr.bf16.mxu0 %v2610_v21 }
  0xda   : > { %1405 = vmatprep.mubr.bf16.mxu1 %v2612_v22 }
  0xe0   : > { %1245 = vmatmul.mubr.bf16.gmra.mrb[52].mxu0 %v2614_v23 }
  0xe1   : > { %1406 = vmatmul.mubr.bf16.gmra.mrb[52].mxu1 %v2615_v24  ;;  %1252 = vmatprep.mubr.bf16.mxu0 %v2616_v25 }
  0xe2   : > { %1413 = vmatprep.mubr.bf16.mxu1 %v2618_v26 }
  0xe8   : > { %1253 = vmatmul.mubr.bf16.gmra.mrb[56].mxu0 %v2620_v27 }
  0xe9   : > { %1414 = vmatmul.mubr.bf16.gmra.mrb[56].mxu1 %v2621_v28  ;;  %1260 = vmatprep.mubr.bf16.mxu0 %v2622_v29 }
  0xea   : > { %1421 = vmatprep.mubr.bf16.mxu1 %v2624_v30 }
  0xf0   : > { %1261 = vmatmul.mubr.bf16.gmra.mrb[60].mxu0 %v2626_v31 }
  0xf1   : > { %1422 = vmatmul.mubr.bf16.gmra.mrb[60].mxu1 %v2627_v32  ;;  %v442_v32 = vld [vmem:[#allocation2 + $0x30] sm:$0xff] }
 0x14b   : > { %v2235_v33 = vpop.f32.mrb[0].mxu0 }
 0x14c   : > { %v2347_v34 = vpop.f32.mrb[0].mxu1  ;;  %v2236_v35 = vpop.f32.mrb[1].mxu0 }
 0x14d   : > { %v2237_v36 = vadd.f32 %v2236_v35, %v2235_v33  ;;  %v2348_v37 = vpop.f32.mrb[1].mxu1  ;;  %v2238_v38 = vpop.f32.mrb[2].mxu0 }
 0x14e   : > { %v2349_v39 = vadd.f32 %v2348_v37, %v2347_v34  ;;  %v2350_v40 = vpop.f32.mrb[2].mxu1  ;;  %v2239_v41 = vpop.f32.mrb[3].mxu0  ;;  %v443_v37 = vld [vmem:[#allocation2 + $0x38] sm:$0xff] }
 0x14f   : > { %v2240_v43 = vadd.f32 %v2239_v41, %v2238_v38  ;;  %v2351_v44 = vpop.f32.mrb[3].mxu1 }
 0x150   : > { %v1304_v45 = vadd.f32 %v2349_v39, %v2237_v36  ;;  %v2352_v46 = vadd.f32 %v2351_v44, %v2350_v40 }
 0x152   : > { %v1430_v48 = vadd.f32 %v1304_v45, %v436_v42  ;;  %v1307_v49 = vadd.f32 %v2352_v46, %v2240_v43 }
 0x153   : > { %v2241_v50 = vpop.f32.mrb[4].mxu0 }
 0x154   : > { %1462 = vst [vmem:[#allocation2] sm:$0xff] %v1430_v48  ;;  %v1431_v51 = vadd.f32 %v1307_v49, %v437_v47  ;;  %v2353_v52 = vpop.f32.mrb[4].mxu1  ;;  %v2242_v53 = vpop.f32.mrb[5].mxu0 }
 0x155   : > { %v2243_v54 = vadd.f32 %v2242_v53, %v2241_v50  ;;  %v2354_v55 = vpop.f32.mrb[5].mxu1  ;;  %v2244_v56 = vpop.f32.mrb[6].mxu0  ;;  %v444_v50 = vld [vmem:[#allocation2 + $0x40] sm:$0xff] }
 0x156   : > { %1463 = vst [vmem:[#allocation2 + $0x8] sm:$0xff] %v1431_v51  ;;  %v2355_v57 = vadd.f32 %v2354_v55, %v2353_v52  ;;  %v2356_v58 = vpop.f32.mrb[6].mxu1  ;;  %v2245_v59 = vpop.f32.mrb[7].mxu0  ;;  %v445_v55 = vld [vmem:[#allocation2 + $0x48] sm:$0xff] }
 0x157   : > { %v2246_v61 = vadd.f32 %v2245_v59, %v2244_v56  ;;  %v2357_v62 = vpop.f32.mrb[7].mxu1 }
 0x158   : > { %v1312_v63 = vadd.f32 %v2355_v57, %v2243_v54  ;;  %v2358_v0 = vadd.f32 %v2357_v62, %v2356_v58 }
 0x15a   : > { %v1432_v2 = vadd.f32 %v1312_v63, %v438_v60  ;;  %v1315_v3 = vadd.f32 %v2358_v0, %v2246_v61 }
 0x15b   : > { %v2247_v4 = vpop.f32.mrb[8].mxu0 }
 0x15c   : > { %1464 = vst [vmem:[#allocation2 + $0x10] sm:$0xff] %v1432_v2  ;;  %v1433_v5 = vadd.f32 %v1315_v3, %v439_v1  ;;  %v2359_v6 = vpop.f32.mrb[8].mxu1  ;;  %v2248_v7 = vpop.f32.mrb[9].mxu0 }
 0x15d   : > { %v2249_v8 = vadd.f32 %v2248_v7, %v2247_v4  ;;  %v2360_v9 = vpop.f32.mrb[9].mxu1  ;;  %v2250_v10 = vpop.f32.mrb[10].mxu0  ;;  %v446_v4 = vld [vmem:[#allocation2 + $0x50] sm:$0xff] }
 0x15e   : > { %1465 = vst [vmem:[#allocation2 + $0x18] sm:$0xff] %v1433_v5  ;;  %v2361_v11 = vadd.f32 %v2360_v9, %v2359_v6  ;;  %v2362_v12 = vpop.f32.mrb[10].mxu1  ;;  %v2251_v13 = vpop.f32.mrb[11].mxu0  ;;  %v447_v9 = vld [vmem:[#allocation2 + $0x58] sm:$0xff] }
 0x15f   : > { %v2252_v15 = vadd.f32 %v2251_v13, %v2250_v10  ;;  %v2363_v16 = vpop.f32.mrb[11].mxu1 }
 0x160   : > { %v1320_v17 = vadd.f32 %v2361_v11, %v2249_v8  ;;  %v2364_v18 = vadd.f32 %v2363_v16, %v2362_v12 }
 0x162   : > { %v1434_v20 = vadd.f32 %v1320_v17, %v440_v14  ;;  %v1323_v21 = vadd.f32 %v2364_v18, %v2252_v15 }
 0x163   : > { %v2253_v22 = vpop.f32.mrb[12].mxu0 }
 0x164   : > { %1466 = vst [vmem:[#allocation2 + $0x20] sm:$0xff] %v1434_v20  ;;  %v1435_v23 = vadd.f32 %v1323_v21, %v441_v19  ;;  %v2365_v24 = vpop.f32.mrb[12].mxu1  ;;  %v2254_v25 = vpop.f32.mrb[13].mxu0 }
 0x165   : > { %v2255_v26 = vadd.f32 %v2254_v25, %v2253_v22  ;;  %v2366_v27 = vpop.f32.mrb[13].mxu1  ;;  %v2256_v28 = vpop.f32.mrb[14].mxu0  ;;  %v448_v22 = vld [vmem:[#allocation2 + $0x60] sm:$0xff] }
 0x166   : > { %1467 = vst [vmem:[#allocation2 + $0x28] sm:$0xff] %v1435_v23  ;;  %v2367_v29 = vadd.f32 %v2366_v27, %v2365_v24  ;;  %v2368_v30 = vpop.f32.mrb[14].mxu1  ;;  %v2257_v31 = vpop.f32.mrb[15].mxu0  ;;  %v449_v27 = vld [vmem:[#allocation2 + $0x68] sm:$0xff] }
 0x167   : > { %v2258_v33 = vadd.f32 %v2257_v31, %v2256_v28  ;;  %v2369_v34 = vpop.f32.mrb[15].mxu1 }
 0x168   : > { %v1328_v35 = vadd.f32 %v2367_v29, %v2255_v26  ;;  %v2370_v36 = vadd.f32 %v2369_v34, %v2368_v30 }
 0x16a   : > { %v1436_v38 = vadd.f32 %v1328_v35, %v442_v32  ;;  %v1331_v39 = vadd.f32 %v2370_v36, %v2258_v33 }
 0x16b   : > { %v2259_v40 = vpop.f32.mrb[16].mxu0 }
 0x16c   : > { %1468 = vst [vmem:[#allocation2 + $0x30] sm:$0xff] %v1436_v38  ;;  %v1437_v41 = vadd.f32 %v1331_v39, %v443_v37  ;;  %v2371_v42 = vpop.f32.mrb[16].mxu1  ;;  %v2260_v43 = vpop.f32.mrb[17].mxu0 }
 0x16d   : > { %v2261_v44 = vadd.f32 %v2260_v43, %v2259_v40  ;;  %v2372_v45 = vpop.f32.mrb[17].mxu1  ;;  %v2262_v46 = vpop.f32.mrb[18].mxu0  ;;  %v450_v40 = vld [vmem:[#allocation2 + $0x70] sm:$0xff] }
 0x16e   : > { %1469 = vst [vmem:[#allocation2 + $0x38] sm:$0xff] %v1437_v41  ;;  %v2373_v47 = vadd.f32 %v2372_v45, %v2371_v42  ;;  %v2374_v48 = vpop.f32.mrb[18].mxu1  ;;  %v2263_v49 = vpop.f32.mrb[19].mxu0  ;;  %v451_v45 = vld [vmem:[#allocation2 + $0x78] sm:$0xff] }
 0x16f   : > { %v2264_v51 = vadd.f32 %v2263_v49, %v2262_v46  ;;  %v2375_v52 = vpop.f32.mrb[19].mxu1 }
 0x170   : > { %v1336_v53 = vadd.f32 %v2373_v47, %v2261_v44  ;;  %v2376_v54 = vadd.f32 %v2375_v52, %v2374_v48 }
 0x172   : > { %v1438_v56 = vadd.f32 %v1336_v53, %v444_v50  ;;  %v1339_v57 = vadd.f32 %v2376_v54, %v2264_v51 }
 0x173   : > { %v2265_v58 = vpop.f32.mrb[20].mxu0 }
 0x174   : > { %1470 = vst [vmem:[#allocation2 + $0x40] sm:$0xff] %v1438_v56  ;;  %v1439_v59 = vadd.f32 %v1339_v57, %v445_v55  ;;  %v2377_v60 = vpop.f32.mrb[20].mxu1  ;;  %v2266_v61 = vpop.f32.mrb[21].mxu0 }
 0x175   : > { %v2267_v62 = vadd.f32 %v2266_v61, %v2265_v58  ;;  %v2378_v63 = vpop.f32.mrb[21].mxu1  ;;  %v2268_v0 = vpop.f32.mrb[22].mxu0  ;;  %v452_v58 = vld [vmem:[#allocation2 + $0x80] sm:$0xff] }
 0x176   : > { %1471 = vst [vmem:[#allocation2 + $0x48] sm:$0xff] %v1439_v59  ;;  %v2379_v1 = vadd.f32 %v2378_v63, %v2377_v60  ;;  %v2380_v2 = vpop.f32.mrb[22].mxu1  ;;  %v2269_v3 = vpop.f32.mrb[23].mxu0  ;;  %v453_v63 = vld [vmem:[#allocation2 + $0x88] sm:$0xff] }
 0x177   : > { %v2270_v5 = vadd.f32 %v2269_v3, %v2268_v0  ;;  %v2381_v6 = vpop.f32.mrb[23].mxu1 }
 0x178   : > { %v1344_v7 = vadd.f32 %v2379_v1, %v2267_v62  ;;  %v2382_v8 = vadd.f32 %v2381_v6, %v2380_v2 }
 0x17a   : > { %v1440_v10 = vadd.f32 %v1344_v7, %v446_v4  ;;  %v1347_v11 = vadd.f32 %v2382_v8, %v2270_v5 }
 0x17b   : > { %v2271_v12 = vpop.f32.mrb[24].mxu0 }
 0x17c   : > { %1472 = vst [vmem:[#allocation2 + $0x50] sm:$0xff] %v1440_v10  ;;  %v1441_v13 = vadd.f32 %v1347_v11, %v447_v9  ;;  %v2383_v14 = vpop.f32.mrb[24].mxu1  ;;  %v2272_v15 = vpop.f32.mrb[25].mxu0 }
 0x17d   : > { %v2273_v16 = vadd.f32 %v2272_v15, %v2271_v12  ;;  %v2384_v17 = vpop.f32.mrb[25].mxu1  ;;  %v2274_v18 = vpop.f32.mrb[26].mxu0  ;;  %v454_v12 = vld [vmem:[#allocation2 + $0x90] sm:$0xff] }
 0x17e   : > { %1473 = vst [vmem:[#allocation2 + $0x58] sm:$0xff] %v1441_v13  ;;  %v2385_v19 = vadd.f32 %v2384_v17, %v2383_v14  ;;  %v2386_v20 = vpop.f32.mrb[26].mxu1  ;;  %v2275_v21 = vpop.f32.mrb[27].mxu0  ;;  %v455_v17 = vld [vmem:[#allocation2 + $0x98] sm:$0xff] }
 0x17f   : > { %v2276_v23 = vadd.f32 %v2275_v21, %v2274_v18  ;;  %v2387_v24 = vpop.f32.mrb[27].mxu1 }
 0x180   : > { %v1352_v25 = vadd.f32 %v2385_v19, %v2273_v16  ;;  %v2388_v26 = vadd.f32 %v2387_v24, %v2386_v20 }
 0x182   : > { %v1442_v28 = vadd.f32 %v1352_v25, %v448_v22  ;;  %v1355_v29 = vadd.f32 %v2388_v26, %v2276_v23 }
 0x183   : > { %v2277_v30 = vpop.f32.mrb[28].mxu0 }
 0x184   : > { %1474 = vst [vmem:[#allocation2 + $0x60] sm:$0xff] %v1442_v28  ;;  %v1443_v31 = vadd.f32 %v1355_v29, %v449_v27  ;;  %v2389_v32 = vpop.f32.mrb[28].mxu1  ;;  %v2278_v33 = vpop.f32.mrb[29].mxu0 }
 0x185   : > { %v2279_v34 = vadd.f32 %v2278_v33, %v2277_v30  ;;  %v2390_v35 = vpop.f32.mrb[29].mxu1  ;;  %v2280_v36 = vpop.f32.mrb[30].mxu0  ;;  %v456_v30 = vld [vmem:[#allocation2 + $0xa0] sm:$0xff] }
 0x186   : > { %1475 = vst [vmem:[#allocation2 + $0x68] sm:$0xff] %v1443_v31  ;;  %v2391_v37 = vadd.f32 %v2390_v35, %v2389_v32  ;;  %v2392_v38 = vpop.f32.mrb[30].mxu1  ;;  %v2281_v39 = vpop.f32.mrb[31].mxu0  ;;  %v457_v35 = vld [vmem:[#allocation2 + $0xa8] sm:$0xff] }
 0x187   : > { %v2282_v41 = vadd.f32 %v2281_v39, %v2280_v36  ;;  %v2393_v42 = vpop.f32.mrb[31].mxu1 }
 0x188   : > { %v1360_v43 = vadd.f32 %v2391_v37, %v2279_v34  ;;  %v2394_v44 = vadd.f32 %v2393_v42, %v2392_v38 }
 0x18a   : > { %v1444_v46 = vadd.f32 %v1360_v43, %v450_v40  ;;  %v1363_v47 = vadd.f32 %v2394_v44, %v2282_v41 }
 0x18b   : > { %v2283_v48 = vpop.f32.mrb[32].mxu0 }
 0x18c   : > { %1476 = vst [vmem:[#allocation2 + $0x70] sm:$0xff] %v1444_v46  ;;  %v1445_v49 = vadd.f32 %v1363_v47, %v451_v45  ;;  %v2395_v50 = vpop.f32.mrb[32].mxu1  ;;  %v2284_v51 = vpop.f32.mrb[33].mxu0 }
 0x18d   : > { %v2285_v52 = vadd.f32 %v2284_v51, %v2283_v48  ;;  %v2396_v53 = vpop.f32.mrb[33].mxu1  ;;  %v2286_v54 = vpop.f32.mrb[34].mxu0  ;;  %v458_v48 = vld [vmem:[#allocation2 + $0xb0] sm:$0xff] }
 0x18e   : > { %1477 = vst [vmem:[#allocation2 + $0x78] sm:$0xff] %v1445_v49  ;;  %v2397_v55 = vadd.f32 %v2396_v53, %v2395_v50  ;;  %v2398_v56 = vpop.f32.mrb[34].mxu1  ;;  %v2287_v57 = vpop.f32.mrb[35].mxu0  ;;  %v459_v53 = vld [vmem:[#allocation2 + $0xb8] sm:$0xff] }
 0x18f   : > { %v2288_v59 = vadd.f32 %v2287_v57, %v2286_v54  ;;  %v2399_v60 = vpop.f32.mrb[35].mxu1 }
 0x190   : > { %v1368_v61 = vadd.f32 %v2397_v55, %v2285_v52  ;;  %v2400_v62 = vadd.f32 %v2399_v60, %v2398_v56 }
 0x192   : > { %v1446_v0 = vadd.f32 %v1368_v61, %v452_v58  ;;  %v1371_v1 = vadd.f32 %v2400_v62, %v2288_v59 }
 0x193   : > { %v2289_v2 = vpop.f32.mrb[36].mxu0 }
 0x194   : > { %1478 = vst [vmem:[#allocation2 + $0x80] sm:$0xff] %v1446_v0  ;;  %v1447_v3 = vadd.f32 %v1371_v1, %v453_v63  ;;  %v2401_v4 = vpop.f32.mrb[36].mxu1  ;;  %v2290_v5 = vpop.f32.mrb[37].mxu0 }
 0x195   : > { %v2291_v6 = vadd.f32 %v2290_v5, %v2289_v2  ;;  %v2402_v7 = vpop.f32.mrb[37].mxu1  ;;  %v2292_v8 = vpop.f32.mrb[38].mxu0  ;;  %v460_v2 = vld [vmem:[#allocation2 + $0xc0] sm:$0xff] }
 0x196   : > { %1479 = vst [vmem:[#allocation2 + $0x88] sm:$0xff] %v1447_v3  ;;  %v2403_v9 = vadd.f32 %v2402_v7, %v2401_v4  ;;  %v2404_v10 = vpop.f32.mrb[38].mxu1  ;;  %v2293_v11 = vpop.f32.mrb[39].mxu0  ;;  %v461_v7 = vld [vmem:[#allocation2 + $0xc8] sm:$0xff] }
 0x197   : > { %v2294_v13 = vadd.f32 %v2293_v11, %v2292_v8  ;;  %v2405_v14 = vpop.f32.mrb[39].mxu1 }
 0x198   : > { %v1376_v15 = vadd.f32 %v2403_v9, %v2291_v6  ;;  %v2406_v16 = vadd.f32 %v2405_v14, %v2404_v10 }
 0x19a   : > { %v1448_v18 = vadd.f32 %v1376_v15, %v454_v12  ;;  %v1379_v19 = vadd.f32 %v2406_v16, %v2294_v13 }
 0x19b   : > { %v2295_v20 = vpop.f32.mrb[40].mxu0 }
 0x19c   : > { %1480 = vst [vmem:[#allocation2 + $0x90] sm:$0xff] %v1448_v18  ;;  %v1449_v21 = vadd.f32 %v1379_v19, %v455_v17  ;;  %v2407_v22 = vpop.f32.mrb[40].mxu1  ;;  %v2296_v23 = vpop.f32.mrb[41].mxu0 }
 0x19d   : > { %v2297_v24 = vadd.f32 %v2296_v23, %v2295_v20  ;;  %v2408_v25 = vpop.f32.mrb[41].mxu1  ;;  %v2298_v26 = vpop.f32.mrb[42].mxu0  ;;  %v462_v20 = vld [vmem:[#allocation2 + $0xd0] sm:$0xff] }
 0x19e   : > { %1481 = vst [vmem:[#allocation2 + $0x98] sm:$0xff] %v1449_v21  ;;  %v2409_v27 = vadd.f32 %v2408_v25, %v2407_v22  ;;  %v2410_v28 = vpop.f32.mrb[42].mxu1  ;;  %v2299_v29 = vpop.f32.mrb[43].mxu0  ;;  %v463_v25 = vld [vmem:[#allocation2 + $0xd8] sm:$0xff] }
 0x19f   : > { %v2300_v31 = vadd.f32 %v2299_v29, %v2298_v26  ;;  %v2411_v32 = vpop.f32.mrb[43].mxu1 }
 0x1a0   : > { %v1384_v33 = vadd.f32 %v2409_v27, %v2297_v24  ;;  %v2412_v34 = vadd.f32 %v2411_v32, %v2410_v28 }
 0x1a2   : > { %v1450_v36 = vadd.f32 %v1384_v33, %v456_v30  ;;  %v1387_v37 = vadd.f32 %v2412_v34, %v2300_v31 }
 0x1a3   : > { %v2301_v38 = vpop.f32.mrb[44].mxu0 }
 0x1a4   : > { %1482 = vst [vmem:[#allocation2 + $0xa0] sm:$0xff] %v1450_v36  ;;  %v1451_v39 = vadd.f32 %v1387_v37, %v457_v35  ;;  %v2413_v40 = vpop.f32.mrb[44].mxu1  ;;  %v2302_v41 = vpop.f32.mrb[45].mxu0 }
 0x1a5   : > { %v2303_v42 = vadd.f32 %v2302_v41, %v2301_v38  ;;  %v2414_v43 = vpop.f32.mrb[45].mxu1  ;;  %v2304_v44 = vpop.f32.mrb[46].mxu0  ;;  %v464_v38 = vld [vmem:[#allocation2 + $0xe0] sm:$0xff] }
 0x1a6   : > { %1483 = vst [vmem:[#allocation2 + $0xa8] sm:$0xff] %v1451_v39  ;;  %v2415_v45 = vadd.f32 %v2414_v43, %v2413_v40  ;;  %v2416_v46 = vpop.f32.mrb[46].mxu1  ;;  %v2305_v47 = vpop.f32.mrb[47].mxu0  ;;  %v465_v43 = vld [vmem:[#allocation2 + $0xe8] sm:$0xff] }
 0x1a7   : > { %v2306_v49 = vadd.f32 %v2305_v47, %v2304_v44  ;;  %v2417_v50 = vpop.f32.mrb[47].mxu1 }
 0x1a8   : > { %v1392_v51 = vadd.f32 %v2415_v45, %v2303_v42  ;;  %v2418_v52 = vadd.f32 %v2417_v50, %v2416_v46 }
 0x1aa   : > { %v1452_v54 = vadd.f32 %v1392_v51, %v458_v48  ;;  %v1395_v55 = vadd.f32 %v2418_v52, %v2306_v49 }
 0x1ab   : > { %v2307_v56 = vpop.f32.mrb[48].mxu0 }
 0x1ac   : > { %1484 = vst [vmem:[#allocation2 + $0xb0] sm:$0xff] %v1452_v54  ;;  %v1453_v57 = vadd.f32 %v1395_v55, %v459_v53  ;;  %v2419_v58 = vpop.f32.mrb[48].mxu1  ;;  %v2308_v59 = vpop.f32.mrb[49].mxu0 }
 0x1ad   : > { %v2309_v60 = vadd.f32 %v2308_v59, %v2307_v56  ;;  %v2420_v61 = vpop.f32.mrb[49].mxu1  ;;  %v2310_v62 = vpop.f32.mrb[50].mxu0  ;;  %v466_v56 = vld [vmem:[#allocation2 + $0xf0] sm:$0xff] }
 0x1ae   : > { %1485 = vst [vmem:[#allocation2 + $0xb8] sm:$0xff] %v1453_v57  ;;  %v2421_v63 = vadd.f32 %v2420_v61, %v2419_v58  ;;  %v2422_v0 = vpop.f32.mrb[50].mxu1  ;;  %v2311_v1 = vpop.f32.mrb[51].mxu0  ;;  %v467_v61 = vld [vmem:[#allocation2 + $0xf8] sm:$0xff] }
 0x1af   : > { %v2312_v3 = vadd.f32 %v2311_v1, %v2310_v62  ;;  %v2423_v4 = vpop.f32.mrb[51].mxu1  ;;  %v1498_v1 = vld [vmem:[#allocation2] sm:$0xff] (!%p2055_p13) }
 0x1b0   : > { %v1400_v5 = vadd.f32 %v2421_v63, %v2309_v60  ;;  %v2424_v6 = vadd.f32 %v2423_v4, %v2422_v0 }
 0x1b2   : > { %v1454_v8 = vadd.f32 %v1400_v5, %v460_v2  ;;  %v1403_v9 = vadd.f32 %v2424_v6, %v2312_v3  ;;  %v1499_v2 = vld [vmem:[#allocation2 + $0x8] sm:$0xff] (!%p2055_p13)  ;;  %v3015_v3 = vld [vmem:[%s3088_s2] ss:$0 sm:$0xff] (!%p2055_p13)  ;;  %v1500_v6 = vld [vmem:[#allocation2 + $0x10] sm:$0xff] (!%p2055_p13) }
 0x1b3   : > { %v2313_v10 = vpop.f32.mrb[52].mxu0  ;;  %v1537_v4 = vadd.f32 (!%p2055_p13), %v3015_v3, %v1498_v1  ;;  %v1538_v5 = vadd.f32 (!%p2055_p13), %v3015_v3, %v1499_v2 }
 0x1b4   : > { %1486 = vst [vmem:[#allocation2 + $0xc0] sm:$0xff] %v1454_v8  ;;  %v1455_v11 = vadd.f32 %v1403_v9, %v461_v7  ;;  %v2425_v12 = vpop.f32.mrb[52].mxu1  ;;  %v2314_v13 = vpop.f32.mrb[53].mxu0  ;;  %v1501_v7 = vld [vmem:[#allocation2 + $0x18] sm:$0xff] (!%p2055_p13)  ;;  %v1502_v8 = vld [vmem:[#allocation2 + $0x20] sm:$0xff] (!%p2055_p13)  ;;  %v1539_v9 = vadd.f32 (!%p2055_p13), %v3015_v3, %v1500_v6 }
 0x1b5   : > { %v2315_v14 = vadd.f32 %v2314_v13, %v2313_v10  ;;  %v2426_v15 = vpop.f32.mrb[53].mxu1  ;;  %v2316_v16 = vpop.f32.mrb[54].mxu0  ;;  %v1540_v10 = vadd.f32 (!%p2055_p13), %v3015_v3, %v1501_v7  ;;  %v1504_v13 = vld [vmem:[#allocation2 + $0x30] sm:$0xff] (!%p2055_p13)  ;;  %vm1569_vm0 = vcmp.ge.f32.partialorder (!%p2055_p13), %v1537_v4, 0.0  ;;  %vm1570_vm1 = vcmp.ge.f32.partialorder (!%p2055_p13), %v1538_v5, 0.0 }
 0x1b6   : > { %1487 = vst [vmem:[#allocation2 + $0xc8] sm:$0xff] %v1455_v11  ;;  %v2427_v17 = vadd.f32 %v2426_v15, %v2425_v12  ;;  %v2428_v18 = vpop.f32.mrb[54].mxu1  ;;  %v2317_v19 = vpop.f32.mrb[55].mxu0  ;;  %v1503_v11 = vld [vmem:[#allocation2 + $0x28] sm:$0xff] (!%p2055_p13)  ;;  %v1541_v12 = vadd.f32 (!%p2055_p13), %v3015_v3, %v1502_v8  ;;  %v1602_v15 = vmul.f32 (!%p2055_p13), 0.2, %v1538_v5 }
 0x1b7   : > { %v2318_v21 = vadd.f32 %v2317_v19, %v2316_v16  ;;  %v2429_v22 = vpop.f32.mrb[55].mxu1  ;;  %vm1571_vm2 = vcmp.ge.f32.partialorder (!%p2055_p13), %v1539_v9, 0.0  ;;  %vm1572_vm3 = vcmp.ge.f32.partialorder (!%p2055_p13), %v1540_v10, 0.0  ;;  %v1603_v16 = vmul.f32 (!%p2055_p13), 0.2, %v1539_v9  ;;  %v1516_v8 = vld [vmem:[#allocation2 + $0x90] sm:$0xff] (!%p2055_p13) }
 0x1b8   : > { %v1408_v23 = vadd.f32 %v2427_v17, %v2315_v14  ;;  %v2430_v24 = vadd.f32 %v2429_v22, %v2428_v18  ;;  %v1601_v14 = vmul.f32 (!%p2055_p13), 0.2, %v1537_v4  ;;  %v1604_v17 = vmul.f32 (!%p2055_p13), 0.2, %v1540_v10  ;;  %v1506_v22 = vld [vmem:[#allocation2 + $0x40] sm:$0xff] (!%p2055_p13) }
 0x1b9   : > { %v1634_v19 = vsel (!%p2055_p13), %vm1570_vm1, %v1538_v5, %v1602_v15  ;;  %vm1573_vm4 = vcmp.ge.f32.partialorder (!%p2055_p13), %v1541_v12, 0.0  ;;  %v1519_v15 = vld [vmem:[#allocation2 + $0xa8] sm:$0xff] (!%p2055_p13) }
 0x1ba   : > { %v1456_v26 = vadd.f32 %v1408_v23, %v462_v20  ;;  %v1411_v27 = vadd.f32 %v2430_v24, %v2318_v21  ;;  %v1633_v18 = vsel (!%p2055_p13), %vm1569_vm0, %v1537_v4, %v1601_v14  ;;  %v1542_v20 = vadd.f32 (!%p2055_p13), %v3015_v3, %v1503_v11  ;;  %v1505_v21 = vld [vmem:[#allocation2 + $0x38] sm:$0xff] (!%p2055_p13)  ;;  %v1507_v23 = vld [vmem:[#allocation2 + $0x48] sm:$0xff] (!%p2055_p13) }
 0x1bb   : > { %v2319_v28 = vpop.f32.mrb[56].mxu0  ;;  %v2127_v24 = vpack.c.bf16 (!%p2055_p13), %v1634_v19, %v1633_v18 }
 0x1bc   : > { %1488 = vst [vmem:[#allocation2 + $0xd0] sm:$0xff] %v1456_v26  ;;  %v1457_v29 = vadd.f32 %v1411_v27, %v463_v25  ;;  %v2431_v30 = vpop.f32.mrb[56].mxu1  ;;  %v2320_v31 = vpop.f32.mrb[57].mxu0  ;;  %v1635_v25 = vsel (!%p2055_p13), %vm1571_vm2, %v1539_v9, %v1603_v16  ;;  %v1636_v26 = vsel (!%p2055_p13), %vm1572_vm3, %v1540_v10, %v1604_v17  ;;  %v1605_v27 = vmul.f32 (!%p2055_p13), 0.2, %v1541_v12  ;;  %v1517_v9 = vld [vmem:[#allocation2 + $0x98] sm:$0xff] (!%p2055_p13) }
 0x1bd   : > { %v2321_v32 = vadd.f32 %v2320_v31, %v2319_v28  ;;  %v2432_v33 = vpop.f32.mrb[57].mxu1  ;;  %v2322_v34 = vpop.f32.mrb[58].mxu0  ;;  %v1508_v28 = vld [vmem:[#allocation2 + $0x50] sm:$0xff] (!%p2055_p13)  ;;  %vm1574_vm5 = vcmp.ge.f32.partialorder (!%p2055_p13), %v1542_v20, 0.0  ;;  %v1543_v31 = vadd.f32 (!%p2055_p13), %v3015_v3, %v1504_v13  ;;  %2128 = vst [vmem:[%s2910_s30] sm:$0xff] (!%p2055_p13), %v2127_v24   ;;  %v1518_v10 = vld [vmem:[#allocation2 + $0xa0] sm:$0xff] (!%p2055_p13)  ;;  %v1556_v24 = vadd.f32 (!%p2055_p13), %v3015_v3, %v1517_v9 }
 0x1be   : > { %1489 = vst [vmem:[#allocation2 + $0xd8] sm:$0xff] %v1457_v29  ;;  %v2433_v35 = vadd.f32 %v2432_v33, %v2431_v30  ;;  %v2434_v36 = vpop.f32.mrb[58].mxu1  ;;  %v2323_v37 = vpop.f32.mrb[59].mxu0  ;;  %v2132_v29 = vpack.c.bf16 (!%p2055_p13), %v1636_v26, %v1635_v25  ;;  %v1606_v30 = vmul.f32 (!%p2055_p13), 0.2, %v1542_v20  ;;  %v1544_v33 = vadd.f32 (!%p2055_p13), %v3015_v3, %v1505_v21  ;;  %v1520_v16 = vld [vmem:[#allocation2 + $0xb0] sm:$0xff] (!%p2055_p13) }
 0x1bf   : > { %v2324_v39 = vadd.f32 %v2323_v37, %v2322_v34  ;;  %v2435_v40 = vpop.f32.mrb[59].mxu1  ;;  %v1545_v34 = vadd.f32 (!%p2055_p13), %v3015_v3, %v1506_v22  ;;  %vm1575_vm6 = vcmp.ge.f32.partialorder (!%p2055_p13), %v1543_v31, 0.0  ;;  %v1607_v37 = vmul.f32 (!%p2055_p13), 0.2, %v1543_v31 }
 0x1c0   : > { %v1416_v41 = vadd.f32 %v2433_v35, %v2321_v32  ;;  %v2436_v42 = vadd.f32 %v2435_v40, %v2434_v36  ;;  %v1637_v32 = vsel (!%p2055_p13), %vm1573_vm4, %v1541_v12, %v1605_v27  ;;  %v1546_v35 = vadd.f32 (!%p2055_p13), %v3015_v3, %v1507_v23  ;;  %2204 = vst [vmem:[%s2910_s30 + $0x8] sm:$0xff] (!%p2055_p13), %v2132_v29  }
 0x1c1   : > { %v1638_v36 = vsel (!%p2055_p13), %vm1574_vm5, %v1542_v20, %v1606_v30  ;;  %vm1576_vm7 = vcmp.ge.f32.partialorder (!%p2055_p13), %v1544_v33, 0.0  ;;  %vm1577_vm8 = vcmp.ge.f32.partialorder (!%p2055_p13), %v1545_v34, 0.0  ;;  %v1555_v23 = vadd.f32 (!%p2055_p13), %v3015_v3, %v1516_v8 }
 0x1c2   : > { %v1458_v44 = vadd.f32 %v1416_v41, %v464_v38  ;;  %v1419_v45 = vadd.f32 %v2436_v42, %v2324_v39  ;;  %v1509_v38 = vld [vmem:[#allocation2 + $0x58] sm:$0xff] (!%p2055_p13)  ;;  %v1547_v39 = vadd.f32 (!%p2055_p13), %v3015_v3, %v1508_v28  ;;  %v2137_v40 = vpack.c.bf16 (!%p2055_p13), %v1638_v36, %v1637_v32  ;;  %v1510_v42 = vld [vmem:[#allocation2 + $0x60] sm:$0xff] (!%p2055_p13) }
 0x1c3   : > { %v2325_v46 = vpop.f32.mrb[60].mxu0  ;;  %v1608_v41 = vmul.f32 (!%p2055_p13), 0.2, %v1544_v33  ;;  %vm1578_vm9 = vcmp.ge.f32.partialorder (!%p2055_p13), %v1546_v35, 0.0  ;;  %v1557_v26 = vadd.f32 (!%p2055_p13), %v3015_v3, %v1518_v10  ;;  %v1558_v27 = vadd.f32 (!%p2055_p13), %v3015_v3, %v1519_v15  ;;  %v1521_v28 = vld [vmem:[#allocation2 + $0xb8] sm:$0xff] (!%p2055_p13)  ;;  %v1522_v32 = vld [vmem:[#allocation2 + $0xc0] sm:$0xff] (!%p2055_p13) }
 0x1c4   : > { %1490 = vst [vmem:[#allocation2 + $0xe0] sm:$0xff] %v1458_v44  ;;  %v1459_v47 = vadd.f32 %v1419_v45, %v465_v43  ;;  %v2437_v48 = vpop.f32.mrb[60].mxu1  ;;  %v2326_v49 = vpop.f32.mrb[61].mxu0  ;;  %v1639_v43 = vsel (!%p2055_p13), %vm1575_vm6, %v1543_v31, %v1607_v37  ;;  %v1609_v44 = vmul.f32 (!%p2055_p13), 0.2, %v1545_v34  ;;  %2205 = vst [vmem:[%s2910_s30 + $0x10] sm:$0xff] (!%p2055_p13), %v2137_v40   ;;  %v1559_v29 = vadd.f32 (!%p2055_p13), %v3015_v3, %v1520_v16 }
 0x1c5   : > { %v2327_v50 = vadd.f32 %v2326_v49, %v2325_v46  ;;  %v2438_v51 = vpop.f32.mrb[61].mxu1  ;;  %v2328_v52 = vpop.f32.mrb[62].mxu0  ;;  %v1610_v45 = vmul.f32 (!%p2055_p13), 0.2, %v1546_v35  ;;  %v1640_v46 = vsel (!%p2055_p13), %vm1576_vm7, %v1544_v33, %v1608_v41  ;;  %vm1579_vm10 = vcmp.ge.f32.partialorder (!%p2055_p13), %v1547_v39, 0.0  ;;  %v1511_v49 = vld [vmem:[#allocation2 + $0x68] sm:$0xff] (!%p2055_p13) }
 0x1c6   : > { %1491 = vst [vmem:[#allocation2 + $0xe8] sm:$0xff] %v1459_v47  ;;  %v2439_v53 = vadd.f32 %v2438_v51, %v2437_v48  ;;  %v2440_v54 = vpop.f32.mrb[62].mxu1  ;;  %v2329_v55 = vpop.f32.mrb[63].mxu0  ;;  %v1548_v47 = vadd.f32 (!%p2055_p13), %v3015_v3, %v1509_v38  ;;  %v1611_v48 = vmul.f32 (!%p2055_p13), 0.2, %v1547_v39  ;;  %v2142_v51 = vpack.c.bf16 (!%p2055_p13), %v1640_v46, %v1639_v43  ;;  %v1523_v38 = vld [vmem:[#allocation2 + $0xc8] sm:$0xff] (!%p2055_p13) }
 0x1c7   : > { %v2330_v57 = vadd.f32 %v2329_v55, %v2328_v52  ;;  %v2441_v58 = vpop.f32.mrb[63].mxu1  ;;  %v1641_v52 = vsel (!%p2055_p13), %vm1577_vm8, %v1545_v34, %v1609_v44  ;;  %v1513_v55 = vld [vmem:[#allocation2 + $0x78] sm:$0xff] (!%p2055_p13)  ;;  %vm1587_vm2 = vcmp.ge.f32.partialorder (!%p2055_p13), %v1555_v23, 0.0  ;;  %vm1588_vm3 = vcmp.ge.f32.partialorder (!%p2055_p13), %v1556_v24, 0.0  ;;  %v1524_v43 = vld [vmem:[#allocation2 + $0xd0] sm:$0xff] (!%p2055_p13) }
 0x1c8   : > { %v1424_v59 = vadd.f32 %v2439_v53, %v2327_v50  ;;  %v2442_v60 = vadd.f32 %v2441_v58, %v2440_v54  ;;  %1497 = sbr.rel (%p2055_p13) target bundleno = 484 (0x1e4), region = 63  ;;  %v1512_v50 = vld [vmem:[#allocation2 + $0x70] sm:$0xff] (!%p2055_p13)  ;;  %v1642_v53 = vsel (!%p2055_p13), %vm1578_vm9, %v1546_v35, %v1610_v45  ;;  %v1549_v54 = vadd.f32 (!%p2055_p13), %v3015_v3, %v1510_v42  ;;  %2206 = vst [vmem:[%s2910_s30 + $0x18] sm:$0xff] (!%p2055_p13), %v2142_v51   ;;  %v1525_v44 = vld [vmem:[#allocation2 + $0xd8] sm:$0xff] (!%p2055_p13) }
 0x1c9   : > { %v2147_v58 = vpack.c.bf16 (!%p2055_p13), %v1642_v53, %v1641_v52  ;;  %vm1580_vm11 = vcmp.ge.f32.partialorder (!%p2055_p13), %v1548_v47, 0.0  ;;  %v1552_v1 = vadd.f32 (!%p2055_p13), %v3015_v3, %v1513_v55  ;;  %v1619_v31 = vmul.f32 (!%p2055_p13), 0.2, %v1555_v23 }
 0x1ca   : > { %v1460_v62 = vadd.f32 %v1424_v59, %v466_v56  ;;  %v1427_v63 = vadd.f32 %v2442_v60, %v2330_v57  ;;  %v1514_v56 = vld [vmem:[#allocation2 + $0x80] sm:$0xff] (!%p2055_p13)  ;;  %v1515_v57 = vld [vmem:[#allocation2 + $0x88] sm:$0xff] (!%p2055_p13)  ;;  %v1612_v59 = vmul.f32 (!%p2055_p13), 0.2, %v1548_v47  ;;  %v1643_v60 = vsel (!%p2055_p13), %vm1579_vm10, %v1547_v39, %v1611_v48 }
 0x1cb   : > { %vm1581_vm12 = vcmp.ge.f32.partialorder (!%p2055_p13), %v1549_v54, 0.0  ;;  %2207 = vst [vmem:[%s2910_s30 + $0x20] sm:$0xff] (!%p2055_p13), %v2147_v58   ;;  %v1553_v2 = vadd.f32 (!%p2055_p13), %v3015_v3, %v1514_v56  ;;  %v1554_v4 = vadd.f32 (!%p2055_p13), %v3015_v3, %v1515_v57  ;;  %vm1584_vm15 = vcmp.ge.f32.partialorder (!%p2055_p13), %v1552_v1, 0.0  ;;  %v1526_v48 = vld [vmem:[#allocation2 + $0xe0] sm:$0xff] (!%p2055_p13) }
 0x1cc   : > { %1492 = vst [vmem:[#allocation2 + $0xf0] sm:$0xff] %v1460_v62  ;;  %v1461_v0 = vadd.f32 %v1427_v63, %v467_v61  ;;  %v1550_v61 = vadd.f32 (!%p2055_p13), %v3015_v3, %v1511_v49  ;;  %v1613_v62 = vmul.f32 (!%p2055_p13), 0.2, %v1549_v54  ;;  %v1551_v63 = vadd.f32 (!%p2055_p13), %v3015_v3, %v1512_v50 }
 0x1cd   : > { %v1616_v12 = vmul.f32 (!%p2055_p13), 0.2, %v1552_v1  ;;  %vm1585_vm0 = vcmp.ge.f32.partialorder (!%p2055_p13), %v1553_v2, 0.0  ;;  %vm1586_vm1 = vcmp.ge.f32.partialorder (!%p2055_p13), %v1554_v4, 0.0  ;;  %v1617_v14 = vmul.f32 (!%p2055_p13), 0.2, %v1553_v2 }
 0x1ce   : > { %1493 = vst [vmem:[#allocation2 + $0xf8] sm:$0xff] %v1461_v0  ;;  %v1644_v0 = vsel (!%p2055_p13), %vm1580_vm11, %v1548_v47, %v1612_v59  ;;  %vm1582_vm13 = vcmp.ge.f32.partialorder (!%p2055_p13), %v1550_v61, 0.0  ;;  %v1614_v6 = vmul.f32 (!%p2055_p13), 0.2, %v1550_v61  ;;  %v1645_v7 = vsel (!%p2055_p13), %vm1581_vm12, %v1549_v54, %v1613_v62  ;;  %v1527_v56 = vld [vmem:[#allocation2 + $0xe8] sm:$0xff] (!%p2055_p13) }
 0x1cf   : > { %v2152_v5 = vpack.c.bf16 %v1644_v0, %v1643_v60  ;;  %vm1583_vm14 = vcmp.ge.f32.partialorder %v1551_v63, 0.0  ;;  %v1615_v11 = vmul.f32 0.2, %v1551_v63  ;;  %v1648_v19 = vsel %vm1584_vm15, %v1552_v1, %v1616_v12 }
 0x1d0   : > { %v1646_v13 = vsel %vm1582_vm13, %v1550_v61, %v1614_v6  ;;  %v1618_v20 = vmul.f32 0.2, %v1554_v4  ;;  %v1649_v22 = vsel %vm1585_vm0, %v1553_v2, %v1617_v14  ;;  %v1620_v33 = vmul.f32 0.2, %v1556_v24 }
 0x1d1   : > { %2208 = vst [vmem:[%s2910_s30 + $0x28] sm:$0xff] %v2152_v5   ;;  %v2157_v17 = vpack.c.bf16 %v1646_v13, %v1645_v7  ;;  %v1647_v18 = vsel %vm1583_vm14, %v1551_v63, %v1615_v11  ;;  %vm1589_vm4 = vcmp.ge.f32.partialorder %v1557_v26, 0.0  ;;  %vm1590_vm5 = vcmp.ge.f32.partialorder %v1558_v27, 0.0 }
 0x1d2   : > { %v2162_v21 = vpack.c.bf16 %v1648_v19, %v1647_v18  ;;  %v1650_v25 = vsel %vm1586_vm1, %v1554_v4, %v1618_v20  ;;  %v1621_v34 = vmul.f32 0.2, %v1557_v26  ;;  %v1651_v35 = vsel %vm1587_vm2, %v1555_v23, %v1619_v31 }
 0x1d3   : > { %2209 = vst [vmem:[%s2910_s30 + $0x30] sm:$0xff] %v2157_v17   ;;  %v2167_v30 = vpack.c.bf16 %v1650_v25, %v1649_v22  ;;  %v1622_v36 = vmul.f32 0.2, %v1558_v27  ;;  %v1560_v37 = vadd.f32 %v3015_v3, %v1521_v28  ;;  %vm1591_vm6 = vcmp.ge.f32.partialorder %v1559_v29, 0.0  ;;  %v1528_v60 = vld [vmem:[#allocation2 + $0xf0] sm:$0xff] }
 0x1d4   : > { %2210 = vst [vmem:[%s2910_s30 + $0x38] sm:$0xff] %v2162_v21   ;;  %v1652_v39 = vsel %vm1588_vm3, %v1556_v24, %v1620_v33  ;;  %v1653_v40 = vsel %vm1589_vm4, %v1557_v26, %v1621_v34  ;;  %v1623_v41 = vmul.f32 0.2, %v1559_v29  ;;  %v1561_v42 = vadd.f32 %v3015_v3, %v1522_v32 }
 0x1d5   : > { %2211 = vst [vmem:[%s2910_s30 + $0x40] sm:$0xff] %v2167_v30   ;;  %v2172_v45 = vpack.c.bf16 %v1652_v39, %v1651_v35  ;;  %v1654_v46 = vsel %vm1590_vm5, %v1558_v27, %v1622_v36  ;;  %vm1592_vm7 = vcmp.ge.f32.partialorder %v1560_v37, 0.0  ;;  %v1624_v47 = vmul.f32 0.2, %v1560_v37  ;;  %v1529_v63 = vld [vmem:[#allocation2 + $0xf8] sm:$0xff] }
 0x1d6   : > { %v2177_v49 = vpack.c.bf16 %v1654_v46, %v1653_v40  ;;  %v1655_v50 = vsel %vm1591_vm6, %v1559_v29, %v1623_v41  ;;  %v1562_v51 = vadd.f32 %v3015_v3, %v1523_v38  ;;  %vm1593_vm8 = vcmp.ge.f32.partialorder %v1561_v42, 0.0 }
 0x1d7   : > { %2212 = vst [vmem:[%s2910_s30 + $0x48] sm:$0xff] %v2172_v45   ;;  %v1656_v52 = vsel %vm1592_vm7, %v1560_v37, %v1624_v47  ;;  %v1625_v53 = vmul.f32 0.2, %v1561_v42  ;;  %v1563_v54 = vadd.f32 %v3015_v3, %v1524_v43  ;;  %v1564_v55 = vadd.f32 %v3015_v3, %v1525_v44 }
 0x1d8   : > { %2213 = vst [vmem:[%s2910_s30 + $0x50] sm:$0xff] %v2177_v49   ;;  %v2182_v57 = vpack.c.bf16 %v1656_v52, %v1655_v50  ;;  %vm1594_vm9 = vcmp.ge.f32.partialorder %v1562_v51, 0.0  ;;  %v1626_v58 = vmul.f32 0.2, %v1562_v51  ;;  %v1565_v59 = vadd.f32 %v3015_v3, %v1526_v48 }
 0x1d9   : > { %v1657_v61 = vsel %vm1593_vm8, %v1561_v42, %v1625_v53  ;;  %vm1595_vm10 = vcmp.ge.f32.partialorder %v1563_v54, 0.0  ;;  %vm1596_vm11 = vcmp.ge.f32.partialorder %v1564_v55, 0.0  ;;  %v1627_v62 = vmul.f32 0.2, %v1563_v54 }
 0x1da   : > { %2214 = vst [vmem:[%s2910_s30 + $0x58] sm:$0xff] %v2182_v57   ;;  %v1658_v0 = vsel %vm1594_vm9, %v1562_v51, %v1626_v58  ;;  %v1628_v1 = vmul.f32 0.2, %v1564_v55  ;;  %v1566_v2 = vadd.f32 %v3015_v3, %v1527_v56  ;;  %vm1597_vm12 = vcmp.ge.f32.partialorder %v1565_v59, 0.0 }
 0x1db   : > { %v2187_v4 = vpack.c.bf16 %v1658_v0, %v1657_v61  ;;  %v1659_v5 = vsel %vm1595_vm10, %v1563_v54, %v1627_v62  ;;  %v1629_v6 = vmul.f32 0.2, %v1565_v59  ;;  %v1567_v7 = vadd.f32 %v3015_v3, %v1528_v60 }
 0x1dc   : > { %v1660_v8 = vsel %vm1596_vm11, %v1564_v55, %v1628_v1  ;;  %vm1598_vm13 = vcmp.ge.f32.partialorder %v1566_v2, 0.0  ;;  %v1630_v9 = vmul.f32 0.2, %v1566_v2  ;;  %v1568_v10 = vadd.f32 %v3015_v3, %v1529_v63 }
 0x1dd   : > { %2215 = vst [vmem:[%s2910_s30 + $0x60] sm:$0xff] %v2187_v4   ;;  %v2192_v11 = vpack.c.bf16 %v1660_v8, %v1659_v5  ;;  %v1661_v12 = vsel %vm1597_vm12, %v1565_v59, %v1629_v6  ;;  %vm1599_vm14 = vcmp.ge.f32.partialorder %v1567_v7, 0.0  ;;  %v1631_v13 = vmul.f32 0.2, %v1567_v7 }
 0x1de   : > { %v1662_v14 = vsel %vm1598_vm13, %v1566_v2, %v1630_v9  ;;  %vm1600_vm15 = vcmp.ge.f32.partialorder %v1568_v10, 0.0  ;;  %v1632_v15 = vmul.f32 0.2, %v1568_v10 }
 0x1df   : > { %2216 = vst [vmem:[%s2910_s30 + $0x68] sm:$0xff] %v2192_v11   ;;  %v2197_v16 = vpack.c.bf16 %v1662_v14, %v1661_v12  ;;  %v1663_v17 = vsel %vm1599_vm14, %v1567_v7, %v1631_v13 }
 0x1e0   : > { %v1664_v18 = vsel %vm1600_vm15, %v1568_v10, %v1632_v15 }
 0x1e1   : > { %2217 = vst [vmem:[%s2910_s30 + $0x70] sm:$0xff] %v2197_v16   ;;  %v2202_v19 = vpack.c.bf16 %v1664_v18, %v1663_v17 }
 0x1e3   : > { %2218 = vst [vmem:[%s2910_s30 + $0x78] sm:$0xff] %v2202_v19  }
 0x1e4 PF: > { %s13_s18 = sadd.s32 1, %s2682_s18   ;;  %s3090_s12 = smov %s2662_s13 }
 0x1e5   : > { %p10_p0 = scmp.ge.s32.totalorder %s13_s18, 6   ;;  %s3091_s13 = smov %s2756_s25 }
 0x1e6   : > { %s3092_s14 = smov %s2674_s16  ;;  %s3093_s15 = smov %s2678_s17 }
 0x1e7   : > { %s3094_s16 = smov %s3097_s19  ;;  %s3095_s17 = smov %s3101_s20 }
 0x1e8   :  { %12 = sbr.rel (!%p10_p0) target bundleno = 4 (0x4), region = 104 }

// kernel: discriminator_forward.7
= control target key start
LH: loop header
LB: loop body
LE: loop exit
PB: predicated region body
PF: predicated region fallthrough
CT: control target
= control target key end

     0   :  { %s2765_s0 = inlined_call_operand.vmem [shape: bf16[128,2048], index: 0, kind: input, shape index: {}]   ;;  %s2766_s1 = inlined_call_operand.vmem [shape: bf16[2048,256], index: 1, kind: input, shape index: {}]   ;;  %s2767_s2 = inlined_call_operand.vmem [shape: f32[1,256], index: 2, kind: input, shape index: {}]   ;;  %s2768_s3 = inlined_call_operand.vmem [shape: bf16[128,256], index: 3, kind: output, shape index: {}]  }
   0x1   :  { %2770 = sst [smem:[#allocation7_spill]] %s2765_s0 }
   0x2   :  { %2771 = sst [smem:[#allocation8_spill]] %s2766_s1 }
   0x3   :  { %s2280_s12 = smov 0   ;;  %s2282_s13 = smov 0  }
   0x4   :  { %s2284_s14 = smov 0   ;;  %s2286_s15 = smov 0  }
   0x5   :  { %s2288_s16 = smov 0   ;;  %s2290_s17 = smov 0  }
   0x6   :  { %s2292_s18 = smov 0   ;;  %s2294_s19 = smov 0  }
   0x7   :  { %s2296_s20 = smov 0   ;;  %s2298_s21 = smov 0  }
   0x8   :  { %s2300_s22 = smov 0  }
   0x9 LB: > { %s1707_s23 = sadd.s32 4294967295, %s2257_s22   ;;  %s25_s24 = sadd.s32 1, %s2249_s20  ;;  %s2257_s22 = sphi %s2300_s22, %s13_s22   ;;  %s2253_s21 = sphi %s2298_s21, %s2788_s21   ;;  %s2249_s20 = sphi %s2296_s20, %s2787_s20   ;;  %s2245_s19 = sphi %s2294_s19, %s2786_s19   ;;  %s2241_s18 = sphi %s2292_s18, %s2785_s18   ;;  %s2237_s17 = sphi %s2290_s17, %s2784_s17   ;;  %s2233_s16 = sphi %s2288_s16, %s2783_s16   ;;  %s2229_s15 = sphi %s2286_s15, %s2782_s15   ;;  %s2225_s14 = sphi %s2284_s14, %s2781_s14   ;;  %s2221_s13 = sphi %s2282_s13, %s2780_s13   ;;  %s2217_s12 = sphi %s2280_s12, %s2779_s12  }
   0xa   : > { %p26_p0 = scmp.ge.s32.totalorder %s25_s24, 4  ;;  %s28_s25 = sadd.s32 1, %s2253_s21 }
   0xb   : > { %s41_s26 = sadd.s32 1, %s2237_s17  ;;  %p48_p1 = scmp.ne.s32.totalorder %s2237_s17, %s2233_s16 }
   0xc   : > { %s2790_s24 = smov (%p26_p0, %s25_s24), 0  ;;  %s2792_s25 = smov (!%p26_p0, %s28_s25), %s2253_s21 }
   0xd   : > { %s37_s27 = ssub.s32 %s2249_s20, %s2790_s24  ;;  %p49_p2 = scmp.eq.s32.totalorder %s2257_s22, 0 }
   0xe   : > { %p30_p3 = scmp.ge.s32.totalorder %s2792_s25, 2  ;;  %p39_p4 = scmp.eq.s32.totalorder %s37_s27, 0 }
   0xf   : > { %p2347_p5 = por %p49_p2, %p48_p1  ;;  %s69_s29 = sadd.s32 1, %s2229_s15 }
  0x10   : > { %s2794_s25 = smov (%p30_p3, %s2792_s25), 0  ;;  %p76_p6 = scmp.ne.s32.totalorder %s2229_s15, %s2225_s14 }
  0x11   : > { %2773 = sst [smem:[#allocation6_spill]] %s2794_s25  ;;  %s65_s4 = ssub.s32 %s2253_s21, %s2794_s25 }
  0x12   : > { %s2355_s30 = scalar_select %p39_p4, %s2237_s17, %s41_s26  }
  0x13   : > { %s66_s5 = sor.u32 %s65_s4, %s37_s27  ;;  %p121_p7 = scmp.eq.s32.totalorder %s65_s4, 0 }
  0x14   : > { %p67_p8 = scmp.eq.s32.totalorder %s66_s5, 0  ;;  %p2361_p9 = por %p76_p6, %p49_p2 }
  0x15   : > { %s123_s7 = sadd.s32 1, %s2221_s13  ;;  %p133_p10 = scmp.ne.s32.totalorder %s2221_s13, %s2217_s12 }
  0x16   : > { %s2369_s8 = scalar_select %p67_p8, %s2229_s15, %s69_s29  }
  0x17   : > { %s2372_s9 = scalar_select %p121_p7, %s2221_s13, %s123_s7  }
  0x18   : > { %p134_p11 = scmp.eq.s32.totalorder %s1707_s23, 7  ;;  %p1710_p13 = scmp.ge.s32.totalorder %s2257_s22, 8 }
  0x1a   : > { %p2374_p12 = por %p134_p11, %p133_p10  ;;  %156 = sbr.rel (%p1710_p13) target bundleno = 111 (0x6f), region = 16 }
  0x21   : > { %159 = sbr.rel (!%p2347_p5) target bundleno = 59 (0x3b), region = 20  ;;  %s161_s11 = sand.u32 (%p2347_p5), 1, %s2237_s17  }
  0x22   : > { %s1809_s26 = sshll.u32 (%p2347_p5), %s2249_s20, 4  ;;  %s1711_s27 = sshll.u32 (%p2347_p5), %s161_s11, 8 }
  0x23   : > { %s2776_s0 = sld [smem:[#allocation7_spill]] (%p2347_p5)  ;;  %s2391_s23 = scalar_lea.vmem (%p2347_p5), [#allocation3], %s1711_s27 }
  0x29   : > { %s2386_s5 = scalar_lea.vmem %s2776_s0, %s1809_s26 }
  0x2a   : > { %v182_v0 = vld [vmem:[%s2386_s5] sm:$0xff]  ;;  %v184_v1 = vld [vmem:[%s2386_s5 + $0x8] sm:$0xff] }
  0x2b   : > { %v186_v2 = vld [vmem:[%s2386_s5 + $0x40] sm:$0xff]  ;;  %183 = vst [vmem:[%s2391_s23] sm:$0xff] %v182_v0  ;;  %185 = vst [vmem:[%s2391_s23 + $0x8] sm:$0xff] %v184_v1  ;;  %v188_v3 = vld [vmem:[%s2386_s5 + $0x48] sm:$0xff] }
  0x2c   : > { %187 = vst [vmem:[%s2391_s23 + $0x10] sm:$0xff] %v186_v2  ;;  %v190_v4 = vld [vmem:[%s2386_s5 + $0x80] sm:$0xff]  ;;  %v192_v5 = vld [vmem:[%s2386_s5 + $0x88] sm:$0xff]  ;;  %189 = vst [vmem:[%s2391_s23 + $0x18] sm:$0xff] %v188_v3 }
  0x2d   : > { %191 = vst [vmem:[%s2391_s23 + $0x20] sm:$0xff] %v190_v4  ;;  %193 = vst [vmem:[%s2391_s23 + $0x28] sm:$0xff] %v192_v5  ;;  %v194_v6 = vld [vmem:[%s2386_s5 + $0xc0] sm:$0xff]  ;;  %v196_v7 = vld [vmem:[%s2386_s5 + $0xc8] sm:$0xff] }
  0x2e   : > { %v198_v8 = vld [vmem:[%s2386_s5 + $0x100] sm:$0xff]  ;;  %195 = vst [vmem:[%s2391_s23 + $0x30] sm:$0xff] %v194_v6  ;;  %197 = vst [vmem:[%s2391_s23 + $0x38] sm:$0xff] %v196_v7  ;;  %v200_v9 = vld [vmem:[%s2386_s5 + $0x108] sm:$0xff] }
  0x2f   : > { %199 = vst [vmem:[%s2391_s23 + $0x40] sm:$0xff] %v198_v8  ;;  %v202_v10 = vld [vmem:[%s2386_s5 + $0x140] sm:$0xff]  ;;  %v204_v11 = vld [vmem:[%s2386_s5 + $0x148] sm:$0xff]  ;;  %201 = vst [vmem:[%s2391_s23 + $0x48] sm:$0xff] %v200_v9 }
  0x30   : > { %203 = vst [vmem:[%s2391_s23 + $0x50] sm:$0xff] %v202_v10  ;;  %205 = vst [vmem:[%s2391_s23 + $0x58] sm:$0xff] %v204_v11  ;;  %v206_v12 = vld [vmem:[%s2386_s5 + $0x180] sm:$0xff]  ;;  %v208_v13 = vld [vmem:[%s2386_s5 + $0x188] sm:$0xff] }
  0x31   : > { %v210_v14 = vld [vmem:[%s2386_s5 + $0x1c0] sm:$0xff]  ;;  %207 = vst [vmem:[%s2391_s23 + $0x60] sm:$0xff] %v206_v12  ;;  %209 = vst [vmem:[%s2391_s23 + $0x68] sm:$0xff] %v208_v13  ;;  %v212_v15 = vld [vmem:[%s2386_s5 + $0x1c8] sm:$0xff] }
  0x32   : > { %211 = vst [vmem:[%s2391_s23 + $0x70] sm:$0xff] %v210_v14  ;;  %v214_v16 = vld [vmem:[%s2386_s5 + $0x200] sm:$0xff]  ;;  %v216_v17 = vld [vmem:[%s2386_s5 + $0x208] sm:$0xff]  ;;  %213 = vst [vmem:[%s2391_s23 + $0x78] sm:$0xff] %v212_v15 }
  0x33   : > { %215 = vst [vmem:[%s2391_s23 + $0x80] sm:$0xff] %v214_v16  ;;  %217 = vst [vmem:[%s2391_s23 + $0x88] sm:$0xff] %v216_v17  ;;  %v218_v18 = vld [vmem:[%s2386_s5 + $0x240] sm:$0xff]  ;;  %v220_v19 = vld [vmem:[%s2386_s5 + $0x248] sm:$0xff] }
  0x34   : > { %v222_v20 = vld [vmem:[%s2386_s5 + $0x280] sm:$0xff]  ;;  %219 = vst [vmem:[%s2391_s23 + $0x90] sm:$0xff] %v218_v18  ;;  %221 = vst [vmem:[%s2391_s23 + $0x98] sm:$0xff] %v220_v19  ;;  %v224_v21 = vld [vmem:[%s2386_s5 + $0x288] sm:$0xff] }
  0x35   : > { %223 = vst [vmem:[%s2391_s23 + $0xa0] sm:$0xff] %v222_v20  ;;  %v226_v22 = vld [vmem:[%s2386_s5 + $0x2c0] sm:$0xff]  ;;  %v228_v23 = vld [vmem:[%s2386_s5 + $0x2c8] sm:$0xff]  ;;  %225 = vst [vmem:[%s2391_s23 + $0xa8] sm:$0xff] %v224_v21 }
  0x36   : > { %227 = vst [vmem:[%s2391_s23 + $0xb0] sm:$0xff] %v226_v22  ;;  %229 = vst [vmem:[%s2391_s23 + $0xb8] sm:$0xff] %v228_v23  ;;  %v230_v24 = vld [vmem:[%s2386_s5 + $0x300] sm:$0xff]  ;;  %v232_v25 = vld [vmem:[%s2386_s5 + $0x308] sm:$0xff] }
  0x37   : > { %v234_v26 = vld [vmem:[%s2386_s5 + $0x340] sm:$0xff]  ;;  %231 = vst [vmem:[%s2391_s23 + $0xc0] sm:$0xff] %v230_v24  ;;  %233 = vst [vmem:[%s2391_s23 + $0xc8] sm:$0xff] %v232_v25  ;;  %v236_v27 = vld [vmem:[%s2386_s5 + $0x348] sm:$0xff] }
  0x38   : > { %235 = vst [vmem:[%s2391_s23 + $0xd0] sm:$0xff] %v234_v26  ;;  %v238_v28 = vld [vmem:[%s2386_s5 + $0x380] sm:$0xff]  ;;  %v240_v29 = vld [vmem:[%s2386_s5 + $0x388] sm:$0xff]  ;;  %237 = vst [vmem:[%s2391_s23 + $0xd8] sm:$0xff] %v236_v27 }
  0x39   : > { %239 = vst [vmem:[%s2391_s23 + $0xe0] sm:$0xff] %v238_v28  ;;  %241 = vst [vmem:[%s2391_s23 + $0xe8] sm:$0xff] %v240_v29  ;;  %v242_v30 = vld [vmem:[%s2386_s5 + $0x3c0] sm:$0xff]  ;;  %v244_v31 = vld [vmem:[%s2386_s5 + $0x3c8] sm:$0xff] }
  0x3a   : > { %243 = vst [vmem:[%s2391_s23 + $0xf0] sm:$0xff] %v242_v30  ;;  %245 = vst [vmem:[%s2391_s23 + $0xf8] sm:$0xff] %v244_v31 }
  0x3b PF: > { %251 = sbr.rel (!%p2361_p9) target bundleno = 111 (0x6f), region = 43  ;;  %s253_s28 = sand.u32 (%p2361_p9), 1, %s2229_s15  }
  0x3c   : > { %s1810_s7 = sshll.u32 (%p2361_p9), %s2249_s20, 7  ;;  %s1714_s11 = sshll.u32 (%p2361_p9), %s253_s28, 8 }
  0x3d   : > { %s258_s26 = sadd.s32 (%p2361_p9), %s2253_s21, %s1810_s7  ;;  %s2777_s1 = sld [smem:[#allocation8_spill]] (%p2361_p9) }
  0x3e   : > { %s1717_s27 = sshll.u32 (%p2361_p9), %s258_s26, 2  ;;  %s2467_s6 = scalar_lea.vmem (%p2361_p9), [#allocation4], %s1714_s11 }
  0x43   : > { %s2462_s0 = scalar_lea.vmem %s2777_s1, %s1717_s27 }
  0x44   : > { %v276_v32 = vld [vmem:[%s2462_s0] sm:$0xf]  ;;  %v278_v33 = vld [vmem:[%s2462_s0 + $0x8] sm:$0xf]  ;;  %v280_v34 = vld [vmem:[%s2462_s0 + $0x10] sm:$0xf] }
  0x45   : > { %277 = vst [vmem:[%s2467_s6] sm:$0xf] %v276_v32  ;;  %279 = vst [vmem:[%s2467_s6 + $0x4] sm:$0xf] %v278_v33  ;;  %v282_v35 = vld [vmem:[%s2462_s0 + $0x18] sm:$0xf] }
  0x46   : > { %281 = vst [vmem:[%s2467_s6 + $0x8] sm:$0xf] %v280_v34  ;;  %v284_v36 = vld [vmem:[%s2462_s0 + $0x20] sm:$0xf]  ;;  %v286_v37 = vld [vmem:[%s2462_s0 + $0x28] sm:$0xf] }
  0x47   : > { %283 = vst [vmem:[%s2467_s6 + $0xc] sm:$0xf] %v282_v35  ;;  %285 = vst [vmem:[%s2467_s6 + $0x10] sm:$0xf] %v284_v36  ;;  %v288_v38 = vld [vmem:[%s2462_s0 + $0x30] sm:$0xf] }
  0x48   : > { %287 = vst [vmem:[%s2467_s6 + $0x14] sm:$0xf] %v286_v37  ;;  %v290_v39 = vld [vmem:[%s2462_s0 + $0x38] sm:$0xf]  ;;  %v292_v40 = vld [vmem:[%s2462_s0 + $0x40] sm:$0xf] }
  0x49   : > { %289 = vst [vmem:[%s2467_s6 + $0x18] sm:$0xf] %v288_v38  ;;  %291 = vst [vmem:[%s2467_s6 + $0x1c] sm:$0xf] %v290_v39  ;;  %v294_v41 = vld [vmem:[%s2462_s0 + $0x48] sm:$0xf] }
  0x4a   : > { %293 = vst [vmem:[%s2467_s6 + $0x20] sm:$0xf] %v292_v40  ;;  %v296_v42 = vld [vmem:[%s2462_s0 + $0x50] sm:$0xf]  ;;  %v298_v43 = vld [vmem:[%s2462_s0 + $0x58] sm:$0xf] }
  0x4b   : > { %295 = vst [vmem:[%s2467_s6 + $0x24] sm:$0xf] %v294_v41  ;;  %297 = vst [vmem:[%s2467_s6 + $0x28] sm:$0xf] %v296_v42  ;;  %v300_v44 = vld [vmem:[%s2462_s0 + $0x60] sm:$0xf] }
  0x4c   : > { %299 = vst [vmem:[%s2467_s6 + $0x2c] sm:$0xf] %v298_v43  ;;  %v302_v45 = vld [vmem:[%s2462_s0 + $0x68] sm:$0xf]  ;;  %v304_v46 = vld [vmem:[%s2462_s0 + $0x70] sm:$0xf] }
  0x4d   : > { %301 = vst [vmem:[%s2467_s6 + $0x30] sm:$0xf] %v300_v44  ;;  %303 = vst [vmem:[%s2467_s6 + $0x34] sm:$0xf] %v302_v45  ;;  %v306_v47 = vld [vmem:[%s2462_s0 + $0x78] sm:$0xf] }
  0x4e   : > { %305 = vst [vmem:[%s2467_s6 + $0x38] sm:$0xf] %v304_v46  ;;  %v308_v48 = vld [vmem:[%s2462_s0 + $0x80] sm:$0xf]  ;;  %v310_v49 = vld [vmem:[%s2462_s0 + $0x88] sm:$0xf] }
  0x4f   : > { %307 = vst [vmem:[%s2467_s6 + $0x3c] sm:$0xf] %v306_v47  ;;  %309 = vst [vmem:[%s2467_s6 + $0x40] sm:$0xf] %v308_v48  ;;  %v312_v50 = vld [vmem:[%s2462_s0 + $0x90] sm:$0xf] }
  0x50   : > { %311 = vst [vmem:[%s2467_s6 + $0x44] sm:$0xf] %v310_v49  ;;  %v314_v51 = vld [vmem:[%s2462_s0 + $0x98] sm:$0xf]  ;;  %v316_v52 = vld [vmem:[%s2462_s0 + $0xa0] sm:$0xf] }
  0x51   : > { %313 = vst [vmem:[%s2467_s6 + $0x48] sm:$0xf] %v312_v50  ;;  %315 = vst [vmem:[%s2467_s6 + $0x4c] sm:$0xf] %v314_v51  ;;  %v318_v53 = vld [vmem:[%s2462_s0 + $0xa8] sm:$0xf] }
  0x52   : > { %317 = vst [vmem:[%s2467_s6 + $0x50] sm:$0xf] %v316_v52  ;;  %v320_v54 = vld [vmem:[%s2462_s0 + $0xb0] sm:$0xf]  ;;  %v322_v55 = vld [vmem:[%s2462_s0 + $0xb8] sm:$0xf] }
  0x53   : > { %319 = vst [vmem:[%s2467_s6 + $0x54] sm:$0xf] %v318_v53  ;;  %321 = vst [vmem:[%s2467_s6 + $0x58] sm:$0xf] %v320_v54  ;;  %v324_v56 = vld [vmem:[%s2462_s0 + $0xc0] sm:$0xf] }
  0x54   : > { %323 = vst [vmem:[%s2467_s6 + $0x5c] sm:$0xf] %v322_v55  ;;  %v326_v57 = vld [vmem:[%s2462_s0 + $0xc8] sm:$0xf]  ;;  %v328_v58 = vld [vmem:[%s2462_s0 + $0xd0] sm:$0xf] }
  0x55   : > { %325 = vst [vmem:[%s2467_s6 + $0x60] sm:$0xf] %v324_v56  ;;  %327 = vst [vmem:[%s2467_s6 + $0x64] sm:$0xf] %v326_v57  ;;  %v330_v59 = vld [vmem:[%s2462_s0 + $0xd8] sm:$0xf] }
  0x56   : > { %329 = vst [vmem:[%s2467_s6 + $0x68] sm:$0xf] %v328_v58  ;;  %v332_v60 = vld [vmem:[%s2462_s0 + $0xe0] sm:$0xf]  ;;  %v334_v61 = vld [vmem:[%s2462_s0 + $0xe8] sm:$0xf] }
  0x57   : > { %331 = vst [vmem:[%s2467_s6 + $0x6c] sm:$0xf] %v330_v59  ;;  %333 = vst [vmem:[%s2467_s6 + $0x70] sm:$0xf] %v332_v60  ;;  %v336_v62 = vld [vmem:[%s2462_s0 + $0xf0] sm:$0xf] }
  0x58   : > { %335 = vst [vmem:[%s2467_s6 + $0x74] sm:$0xf] %v334_v61  ;;  %v338_v63 = vld [vmem:[%s2462_s0 + $0xf8] sm:$0xf]  ;;  %v340_v0 = vld [vmem:[%s2462_s0 + $0x100] sm:$0xf] }
  0x59   : > { %337 = vst [vmem:[%s2467_s6 + $0x78] sm:$0xf] %v336_v62  ;;  %339 = vst [vmem:[%s2467_s6 + $0x7c] sm:$0xf] %v338_v63  ;;  %v342_v1 = vld [vmem:[%s2462_s0 + $0x108] sm:$0xf] }
  0x5a   : > { %341 = vst [vmem:[%s2467_s6 + $0x80] sm:$0xf] %v340_v0  ;;  %v344_v2 = vld [vmem:[%s2462_s0 + $0x110] sm:$0xf]  ;;  %v346_v3 = vld [vmem:[%s2462_s0 + $0x118] sm:$0xf] }
  0x5b   : > { %343 = vst [vmem:[%s2467_s6 + $0x84] sm:$0xf] %v342_v1  ;;  %345 = vst [vmem:[%s2467_s6 + $0x88] sm:$0xf] %v344_v2  ;;  %v348_v4 = vld [vmem:[%s2462_s0 + $0x120] sm:$0xf] }
  0x5c   : > { %347 = vst [vmem:[%s2467_s6 + $0x8c] sm:$0xf] %v346_v3  ;;  %v350_v5 = vld [vmem:[%s2462_s0 + $0x128] sm:$0xf]  ;;  %v352_v6 = vld [vmem:[%s2462_s0 + $0x130] sm:$0xf] }
  0x5d   : > { %349 = vst [vmem:[%s2467_s6 + $0x90] sm:$0xf] %v348_v4  ;;  %351 = vst [vmem:[%s2467_s6 + $0x94] sm:$0xf] %v350_v5  ;;  %v354_v7 = vld [vmem:[%s2462_s0 + $0x138] sm:$0xf] }
  0x5e   : > { %353 = vst [vmem:[%s2467_s6 + $0x98] sm:$0xf] %v352_v6  ;;  %v356_v8 = vld [vmem:[%s2462_s0 + $0x140] sm:$0xf]  ;;  %v358_v9 = vld [vmem:[%s2462_s0 + $0x148] sm:$0xf] }
  0x5f   : > { %355 = vst [vmem:[%s2467_s6 + $0x9c] sm:$0xf] %v354_v7  ;;  %357 = vst [vmem:[%s2467_s6 + $0xa0] sm:$0xf] %v356_v8  ;;  %v360_v10 = vld [vmem:[%s2462_s0 + $0x150] sm:$0xf] }
  0x60   : > { %359 = vst [vmem:[%s2467_s6 + $0xa4] sm:$0xf] %v358_v9  ;;  %v362_v11 = vld [vmem:[%s2462_s0 + $0x158] sm:$0xf]  ;;  %v364_v12 = vld [vmem:[%s2462_s0 + $0x160] sm:$0xf] }
  0x61   : > { %361 = vst [vmem:[%s2467_s6 + $0xa8] sm:$0xf] %v360_v10  ;;  %363 = vst [vmem:[%s2467_s6 + $0xac] sm:$0xf] %v362_v11  ;;  %v366_v13 = vld [vmem:[%s2462_s0 + $0x168] sm:$0xf] }
  0x62   : > { %365 = vst [vmem:[%s2467_s6 + $0xb0] sm:$0xf] %v364_v12  ;;  %v368_v14 = vld [vmem:[%s2462_s0 + $0x170] sm:$0xf]  ;;  %v370_v15 = vld [vmem:[%s2462_s0 + $0x178] sm:$0xf] }
  0x63   : > { %367 = vst [vmem:[%s2467_s6 + $0xb4] sm:$0xf] %v366_v13  ;;  %369 = vst [vmem:[%s2467_s6 + $0xb8] sm:$0xf] %v368_v14  ;;  %v372_v16 = vld [vmem:[%s2462_s0 + $0x180] sm:$0xf] }
  0x64   : > { %371 = vst [vmem:[%s2467_s6 + $0xbc] sm:$0xf] %v370_v15  ;;  %v374_v17 = vld [vmem:[%s2462_s0 + $0x188] sm:$0xf]  ;;  %v376_v18 = vld [vmem:[%s2462_s0 + $0x190] sm:$0xf] }
  0x65   : > { %373 = vst [vmem:[%s2467_s6 + $0xc0] sm:$0xf] %v372_v16  ;;  %375 = vst [vmem:[%s2467_s6 + $0xc4] sm:$0xf] %v374_v17  ;;  %v378_v19 = vld [vmem:[%s2462_s0 + $0x198] sm:$0xf] }
  0x66   : > { %377 = vst [vmem:[%s2467_s6 + $0xc8] sm:$0xf] %v376_v18  ;;  %v380_v20 = vld [vmem:[%s2462_s0 + $0x1a0] sm:$0xf]  ;;  %v382_v21 = vld [vmem:[%s2462_s0 + $0x1a8] sm:$0xf] }
  0x67   : > { %379 = vst [vmem:[%s2467_s6 + $0xcc] sm:$0xf] %v378_v19  ;;  %381 = vst [vmem:[%s2467_s6 + $0xd0] sm:$0xf] %v380_v20  ;;  %v384_v22 = vld [vmem:[%s2462_s0 + $0x1b0] sm:$0xf] }
  0x68   : > { %383 = vst [vmem:[%s2467_s6 + $0xd4] sm:$0xf] %v382_v21  ;;  %v386_v23 = vld [vmem:[%s2462_s0 + $0x1b8] sm:$0xf]  ;;  %v388_v24 = vld [vmem:[%s2462_s0 + $0x1c0] sm:$0xf] }
  0x69   : > { %385 = vst [vmem:[%s2467_s6 + $0xd8] sm:$0xf] %v384_v22  ;;  %387 = vst [vmem:[%s2467_s6 + $0xdc] sm:$0xf] %v386_v23  ;;  %v390_v25 = vld [vmem:[%s2462_s0 + $0x1c8] sm:$0xf] }
  0x6a   : > { %389 = vst [vmem:[%s2467_s6 + $0xe0] sm:$0xf] %v388_v24  ;;  %v392_v26 = vld [vmem:[%s2462_s0 + $0x1d0] sm:$0xf]  ;;  %v394_v27 = vld [vmem:[%s2462_s0 + $0x1d8] sm:$0xf] }
  0x6b   : > { %391 = vst [vmem:[%s2467_s6 + $0xe4] sm:$0xf] %v390_v25  ;;  %393 = vst [vmem:[%s2467_s6 + $0xe8] sm:$0xf] %v392_v26  ;;  %v396_v28 = vld [vmem:[%s2462_s0 + $0x1e0] sm:$0xf] }
  0x6c   : > { %395 = vst [vmem:[%s2467_s6 + $0xec] sm:$0xf] %v394_v27  ;;  %v398_v29 = vld [vmem:[%s2462_s0 + $0x1e8] sm:$0xf]  ;;  %v400_v30 = vld [vmem:[%s2462_s0 + $0x1f0] sm:$0xf] }
  0x6d   : > { %397 = vst [vmem:[%s2467_s6 + $0xf0] sm:$0xf] %v396_v28  ;;  %399 = vst [vmem:[%s2467_s6 + $0xf4] sm:$0xf] %v398_v29  ;;  %v402_v31 = vld [vmem:[%s2462_s0 + $0x1f8] sm:$0xf] }
  0x6e   : > { %401 = vst [vmem:[%s2467_s6 + $0xf8] sm:$0xf] %v400_v30  ;;  %403 = vst [vmem:[%s2467_s6 + $0xfc] sm:$0xf] %v402_v31 }
  0x6f PF: > { %p1718_p0 = scmp.ge.s32.totalorder %s2257_s22, 1  ;;  %p559_p1 = scmp.lt.s32.totalorder %s2257_s22, 9 }
  0x71   : > { %p560_p2 = pnand %p1718_p0, %p559_p1 }
  0x72   : > { %s566_s5 = sand.u32 (!%p560_p2), 1, %s2233_s16   ;;  %s573_s23 = sand.u32 (!%p560_p2), 1, %s2225_s14  }
  0x73   : > { %563 = sbr.rel (%p560_p2) target bundleno = 472 (0x1d8), region = 88  ;;  %s1719_s28 = sshll.u32 (!%p560_p2), %s566_s5, 8 }
  0x74   : > { %s1720_s7 = sshll.u32 (!%p560_p2), %s573_s23, 8  ;;  %s599_s11 = sand.u32 (!%p560_p2), 1, %s2217_s12  }
  0x75   : > { %p605_p3 = scmp.lt.s32.totalorder (!%p560_p2), %s2245_s19, 1  ;;  %s1721_s0 = sshll.u32 (!%p560_p2), %s599_s11, 6 }
  0x76   : > { %s2607_s6 = scalar_lea.vmem (!%p560_p2), [#allocation3], %s1719_s28  ;;  %s2609_s1 = scalar_lea.vmem (!%p560_p2), [#allocation4], %s1720_s7 }
  0x77   : > { %s2611_s25 = scalar_lea.vmem (!%p560_p2), [#allocation5], %s1721_s0  ;;  %p1722_p4 = scmp.ne.s32.totalorder (!%p560_p2), %s2241_s18, 0 }
  0x7a   : > { %s2601_s26 = scalar_select %p605_p3, %s2245_s19, 1 }
  0x7b   : > { %613 = sbr.rel (%p1722_p4) target bundleno = 132 (0x84), region = 100  ;;  %v2259_v32 = vmov (!%p1722_p4), 0.0  }
  0x7c   : > { %s607_s4 = scalar_lea.vmem %s2767_s2, %s2601_s26  ;;  %614 = vst [vmem:[#allocation2] sm:$0xff] (!%p1722_p4), %v2259_v32  ;;  %615 = vst [vmem:[#allocation2 + $0x8] sm:$0xff] (!%p1722_p4), %v2259_v32 }
  0x7d   : > { %616 = vst [vmem:[#allocation2 + $0x10] sm:$0xff] (!%p1722_p4), %v2259_v32  ;;  %617 = vst [vmem:[#allocation2 + $0x18] sm:$0xff] (!%p1722_p4), %v2259_v32 }
  0x7e   : > { %618 = vst [vmem:[#allocation2 + $0x20] sm:$0xff] (!%p1722_p4), %v2259_v32  ;;  %619 = vst [vmem:[#allocation2 + $0x28] sm:$0xff] (!%p1722_p4), %v2259_v32 }
  0x7f   : > { %620 = vst [vmem:[#allocation2 + $0x30] sm:$0xff] (!%p1722_p4), %v2259_v32  ;;  %621 = vst [vmem:[#allocation2 + $0x38] sm:$0xff] (!%p1722_p4), %v2259_v32 }
  0x80   : > { %622 = vst [vmem:[#allocation2 + $0x40] sm:$0xff] (!%p1722_p4), %v2259_v32  ;;  %623 = vst [vmem:[#allocation2 + $0x48] sm:$0xff] (!%p1722_p4), %v2259_v32 }
  0x81   : > { %624 = vst [vmem:[#allocation2 + $0x50] sm:$0xff] (!%p1722_p4), %v2259_v32  ;;  %625 = vst [vmem:[#allocation2 + $0x58] sm:$0xff] (!%p1722_p4), %v2259_v32 }
  0x82   : > { %626 = vst [vmem:[#allocation2 + $0x60] sm:$0xff] %v2259_v32  ;;  %627 = vst [vmem:[#allocation2 + $0x68] sm:$0xff] %v2259_v32 }
  0x83   : > { %628 = vst [vmem:[#allocation2 + $0x70] sm:$0xff] %v2259_v32  ;;  %629 = vst [vmem:[#allocation2 + $0x78] sm:$0xff] %v2259_v32 }
  0x84 PF: > { %v2091_v33 = vld [vmem:[%s2609_s1 + $0x40] sm:$0xff]   ;;  %v2095_v37 = vld [vmem:[%s2609_s1 + $0x48] sm:$0xff]   ;;  %v2099_v41 = vld [vmem:[%s2609_s1 + $0x50] sm:$0xff]   ;;  %p1787_p5 = scmp.ne.s32.totalorder %s2241_s18, 3 }
  0x85   : > { %v2092_v34 = vld [vmem:[%s2609_s1 + $0xc0] sm:$0xff]   ;;  %1874 = vmatprep.subr.bf16.mxu0 %v2091_v33  ;;  %v2096_v38 = vld [vmem:[%s2609_s1 + $0xc8] sm:$0xff]   ;;  %v2100_v42 = vld [vmem:[%s2609_s1 + $0xd0] sm:$0xff]  }
  0x86   : > { %v2093_v35 = vld [vmem:[%s2609_s1] sm:$0xff]   ;;  %1938 = vmatprep.subr.bf16.mxu1 %v2092_v34  ;;  %v2097_v39 = vld [vmem:[%s2609_s1 + $0x8] sm:$0xff]   ;;  %v2101_v43 = vld [vmem:[%s2609_s1 + $0x10] sm:$0xff]  }
  0x87   : > { %v2094_v36 = vld [vmem:[%s2609_s1 + $0x80] sm:$0xff]   ;;  %1875 = vmatpush3.bf16.msra.mxu0 %v2093_v35  ;;  %v2098_v40 = vld [vmem:[%s2609_s1 + $0x88] sm:$0xff]   ;;  %v2102_v44 = vld [vmem:[%s2609_s1 + $0x90] sm:$0xff]  }
  0x88   : > { %1939 = vmatpush3.bf16.msra.mxu1 %v2094_v36  ;;  %1876 = vmatprep.subr.bf16.mxu0 %v2095_v37  ;;  %v2103_v45 = vld [vmem:[%s2609_s1 + $0x58] sm:$0xff]   ;;  %v2107_v49 = vld [vmem:[%s2609_s1 + $0x60] sm:$0xff]   ;;  %v2111_v53 = vld [vmem:[%s2609_s1 + $0x68] sm:$0xff]  }
  0x89   : > { %1940 = vmatprep.subr.bf16.mxu1 %v2096_v38  ;;  %v2104_v46 = vld [vmem:[%s2609_s1 + $0xd8] sm:$0xff]   ;;  %v2108_v50 = vld [vmem:[%s2609_s1 + $0xe0] sm:$0xff]   ;;  %v2112_v54 = vld [vmem:[%s2609_s1 + $0xe8] sm:$0xff]  }
  0x8a   : > { %v2105_v47 = vld [vmem:[%s2609_s1 + $0x18] sm:$0xff]   ;;  %v2109_v51 = vld [vmem:[%s2609_s1 + $0x20] sm:$0xff]   ;;  %v2113_v55 = vld [vmem:[%s2609_s1 + $0x28] sm:$0xff]  }
  0x8b   : > { %1877 = vmatpush3.bf16.msra.mxu0 %v2097_v39  ;;  %v2106_v48 = vld [vmem:[%s2609_s1 + $0x98] sm:$0xff]   ;;  %v2110_v52 = vld [vmem:[%s2609_s1 + $0xa0] sm:$0xff]   ;;  %v2114_v56 = vld [vmem:[%s2609_s1 + $0xa8] sm:$0xff]  }
  0x8c   : > { %1941 = vmatpush3.bf16.msra.mxu1 %v2098_v40  ;;  %1878 = vmatprep.subr.bf16.mxu0 %v2099_v41  ;;  %v2115_v57 = vld [vmem:[%s2609_s1 + $0x70] sm:$0xff]   ;;  %v2119_v61 = vld [vmem:[%s2609_s1 + $0x78] sm:$0xff]  }
  0x8d   : > { %1942 = vmatprep.subr.bf16.mxu1 %v2100_v42  ;;  %v2116_v58 = vld [vmem:[%s2609_s1 + $0xf0] sm:$0xff]   ;;  %v2120_v62 = vld [vmem:[%s2609_s1 + $0xf8] sm:$0xff]   ;;  %v630_v42 = vld [vmem:[#allocation2] sm:$0xff] }
  0x8e   : > { %v2117_v59 = vld [vmem:[%s2609_s1 + $0x30] sm:$0xff]   ;;  %v2121_v63 = vld [vmem:[%s2609_s1 + $0x38] sm:$0xff]  }
  0x8f   : > { %1879 = vmatpush3.bf16.msra.mxu0 %v2101_v43  ;;  %v2118_v60 = vld [vmem:[%s2609_s1 + $0xb0] sm:$0xff]   ;;  %v2122_v0 = vld [vmem:[%s2609_s1 + $0xb8] sm:$0xff]  }
  0x90   : > { %1943 = vmatpush3.bf16.msra.mxu1 %v2102_v44  ;;  %1880 = vmatprep.subr.bf16.mxu0 %v2103_v45  ;;  %v2123_v1 = vld [vmem:[%s2607_s6] ss:$16 sps:$4 sm:$0xff]   ;;  %v2125_v2 = vld [vmem:[%s2607_s6 + $0x4] ss:$16 sps:$4 sm:$0xff]   ;;  %v2126_v3 = vld [vmem:[%s2607_s6 + $0x8] ss:$16 sps:$4 sm:$0xff]  }
  0x91   : > { %1944 = vmatprep.subr.bf16.mxu1 %v2104_v46  ;;  %v2128_v4 = vld [vmem:[%s2607_s6 + $0xc] ss:$16 sps:$4 sm:$0xff]   ;;  %1126 = vmatprep.mubr.bf16.mxu0 %v2125_v2  ;;  %v2129_v5 = vld [vmem:[%s2607_s6 + $0x24] ss:$16 sps:$4 sm:$0xff]   ;;  %v2133_v7 = vld [vmem:[%s2607_s6 + $0x20] ss:$16 sps:$4 sm:$0xff]  }
  0x92   : > { %1223 = vmatprep.mubr.bf16.mxu1 %v2128_v4  ;;  %v2131_v6 = vld [vmem:[%s2607_s6 + $0x2c] ss:$16 sps:$4 sm:$0xff]   ;;  %v2134_v8 = vld [vmem:[%s2607_s6 + $0x28] ss:$16 sps:$4 sm:$0xff]   ;;  %v2135_v9 = vld [vmem:[%s2607_s6 + $0x44] ss:$16 sps:$4 sm:$0xff]  }
  0x93   : > { %1881 = vmatpush3.bf16.msra.mxu0 %v2105_v47  ;;  %v2137_v10 = vld [vmem:[%s2607_s6 + $0x4c] ss:$16 sps:$4 sm:$0xff]   ;;  %v2139_v11 = vld [vmem:[%s2607_s6 + $0x40] ss:$16 sps:$4 sm:$0xff]   ;;  %v2140_v12 = vld [vmem:[%s2607_s6 + $0x48] ss:$16 sps:$4 sm:$0xff]  }
  0x94   : > { %1945 = vmatpush3.bf16.msra.mxu1 %v2106_v48  ;;  %1882 = vmatprep.subr.bf16.mxu0 %v2107_v49  ;;  %v2141_v13 = vld [vmem:[%s2607_s6 + $0x64] ss:$16 sps:$4 sm:$0xff]   ;;  %v2143_v14 = vld [vmem:[%s2607_s6 + $0x6c] ss:$16 sps:$4 sm:$0xff]   ;;  %v2145_v15 = vld [vmem:[%s2607_s6 + $0x60] ss:$16 sps:$4 sm:$0xff]  }
  0x95   : > { %1946 = vmatprep.subr.bf16.mxu1 %v2108_v50  ;;  %v2146_v16 = vld [vmem:[%s2607_s6 + $0x68] ss:$16 sps:$4 sm:$0xff]   ;;  %v2147_v17 = vld [vmem:[%s2607_s6 + $0x84] ss:$16 sps:$4 sm:$0xff]   ;;  %v2149_v18 = vld [vmem:[%s2607_s6 + $0x8c] ss:$16 sps:$4 sm:$0xff]  }
  0x96   : > { %v2151_v19 = vld [vmem:[%s2607_s6 + $0x80] ss:$16 sps:$4 sm:$0xff]   ;;  %v2152_v20 = vld [vmem:[%s2607_s6 + $0x88] ss:$16 sps:$4 sm:$0xff]   ;;  %v2153_v21 = vld [vmem:[%s2607_s6 + $0xa4] ss:$16 sps:$4 sm:$0xff]  }
  0x97   : > { %1883 = vmatpush3.bf16.msra.mxu0 %v2109_v51  ;;  %v2155_v22 = vld [vmem:[%s2607_s6 + $0xac] ss:$16 sps:$4 sm:$0xff]   ;;  %v2157_v23 = vld [vmem:[%s2607_s6 + $0xa0] ss:$16 sps:$4 sm:$0xff]   ;;  %v2158_v24 = vld [vmem:[%s2607_s6 + $0xa8] ss:$16 sps:$4 sm:$0xff]  }
  0x98   : > { %1947 = vmatpush3.bf16.msra.mxu1 %v2110_v52  ;;  %1884 = vmatprep.subr.bf16.mxu0 %v2111_v53  ;;  %v2159_v25 = vld [vmem:[%s2607_s6 + $0xc4] ss:$16 sps:$4 sm:$0xff]   ;;  %v2161_v26 = vld [vmem:[%s2607_s6 + $0xcc] ss:$16 sps:$4 sm:$0xff]   ;;  %v2163_v27 = vld [vmem:[%s2607_s6 + $0xc0] ss:$16 sps:$4 sm:$0xff]  }
  0x99   : > { %1948 = vmatprep.subr.bf16.mxu1 %v2112_v54  ;;  %v2164_v28 = vld [vmem:[%s2607_s6 + $0xc8] ss:$16 sps:$4 sm:$0xff]   ;;  %v2165_v29 = vld [vmem:[%s2607_s6 + $0xe4] ss:$16 sps:$4 sm:$0xff]   ;;  %v2167_v30 = vld [vmem:[%s2607_s6 + $0xec] ss:$16 sps:$4 sm:$0xff]  }
  0x9a   : > { %v2169_v31 = vld [vmem:[%s2607_s6 + $0xe0] ss:$16 sps:$4 sm:$0xff]   ;;  %v2170_v32 = vld [vmem:[%s2607_s6 + $0xe8] ss:$16 sps:$4 sm:$0xff]  }
  0x9b   : > { %1885 = vmatpush3.bf16.msra.mxu0 %v2113_v55  ;;  %v631_v47 = vld [vmem:[#allocation2 + $0x8] sm:$0xff] }
  0x9c   : > { %1949 = vmatpush3.bf16.msra.mxu1 %v2114_v56  ;;  %1886 = vmatprep.subr.bf16.mxu0 %v2115_v57 }
  0x9d   : > { %1950 = vmatprep.subr.bf16.mxu1 %v2116_v58 }
  0x9f   : > { %1887 = vmatpush3.bf16.msra.mxu0 %v2117_v59 }
  0xa0   : > { %1951 = vmatpush3.bf16.msra.mxu1 %v2118_v60  ;;  %1888 = vmatprep.subr.bf16.mxu0 %v2119_v61  ;;  %v632_v60 = vld [vmem:[#allocation2 + $0x10] sm:$0xff] }
  0xa1   : > { %1952 = vmatprep.subr.bf16.mxu1 %v2120_v62 }
  0xa3   : > { %1889 = vmatpush3.bf16.msra.mxu0 %v2121_v63 }
  0xa4   : > { %1953 = vmatpush3.bf16.msra.mxu1 %v2122_v0 }
  0xa6   : > { %1127 = vmatmul.mubr.bf16.vlgmr.msra.gmra.mrb[0].mxu0 %v2123_v1  ;;  %v633_v1 = vld [vmem:[#allocation2 + $0x18] sm:$0xff] }
  0xa7   : > { %1224 = vmatmul.mubr.bf16.vlgmr.msra.gmra.mrb[0].mxu1 %v2126_v3  ;;  %1134 = vmatprep.mubr.bf16.mxu0 %v2129_v5 }
  0xa8   : > { %1231 = vmatprep.mubr.bf16.mxu1 %v2131_v6 }
  0xae   : > { %1135 = vmatmul.mubr.bf16.gmra.mrb[4].mxu0 %v2133_v7 }
  0xaf   : > { %1232 = vmatmul.mubr.bf16.gmra.mrb[4].mxu1 %v2134_v8  ;;  %1142 = vmatprep.mubr.bf16.mxu0 %v2135_v9 }
  0xb0   : > { %1239 = vmatprep.mubr.bf16.mxu1 %v2137_v10 }
  0xb6   : > { %1143 = vmatmul.mubr.bf16.gmra.mrb[8].mxu0 %v2139_v11 }
  0xb7   : > { %1240 = vmatmul.mubr.bf16.gmra.mrb[8].mxu1 %v2140_v12  ;;  %1150 = vmatprep.mubr.bf16.mxu0 %v2141_v13 }
  0xb8   : > { %1247 = vmatprep.mubr.bf16.mxu1 %v2143_v14  ;;  %v634_v14 = vld [vmem:[#allocation2 + $0x20] sm:$0xff] }
  0xbe   : > { %1151 = vmatmul.mubr.bf16.gmra.mrb[12].mxu0 %v2145_v15 }
  0xbf   : > { %1248 = vmatmul.mubr.bf16.gmra.mrb[12].mxu1 %v2146_v16  ;;  %1158 = vmatprep.mubr.bf16.mxu0 %v2147_v17 }
  0xc0   : > { %1255 = vmatprep.mubr.bf16.mxu1 %v2149_v18 }
  0xc6   : > { %1159 = vmatmul.mubr.bf16.gmra.mrb[16].mxu0 %v2151_v19  ;;  %v635_v19 = vld [vmem:[#allocation2 + $0x28] sm:$0xff] }
  0xc7   : > { %1256 = vmatmul.mubr.bf16.gmra.mrb[16].mxu1 %v2152_v20  ;;  %1166 = vmatprep.mubr.bf16.mxu0 %v2153_v21 }
  0xc8   : > { %1263 = vmatprep.mubr.bf16.mxu1 %v2155_v22 }
  0xce   : > { %1167 = vmatmul.mubr.bf16.gmra.mrb[20].mxu0 %v2157_v23 }
  0xcf   : > { %1264 = vmatmul.mubr.bf16.gmra.mrb[20].mxu1 %v2158_v24  ;;  %1174 = vmatprep.mubr.bf16.mxu0 %v2159_v25 }
  0xd0   : > { %1271 = vmatprep.mubr.bf16.mxu1 %v2161_v26 }
  0xd6   : > { %1175 = vmatmul.mubr.bf16.gmra.mrb[24].mxu0 %v2163_v27 }
  0xd7   : > { %1272 = vmatmul.mubr.bf16.gmra.mrb[24].mxu1 %v2164_v28  ;;  %1182 = vmatprep.mubr.bf16.mxu0 %v2165_v29 }
  0xd8   : > { %1279 = vmatprep.mubr.bf16.mxu1 %v2167_v30 }
  0xde   : > { %1183 = vmatmul.mubr.bf16.gmra.mrb[28].mxu0 %v2169_v31 }
  0xdf   : > { %1280 = vmatmul.mubr.bf16.gmra.mrb[28].mxu1 %v2170_v32  ;;  %v636_v32 = vld [vmem:[#allocation2 + $0x30] sm:$0xff] }
 0x179   : > { %v1890_v33 = vpop.f32.mrb[0].mxu0 }
 0x17a   : > { %v1954_v34 = vpop.f32.mrb[0].mxu1  ;;  %v1891_v35 = vpop.f32.mrb[1].mxu0 }
 0x17b   : > { %v1892_v36 = vadd.f32 %v1891_v35, %v1890_v33  ;;  %v1955_v37 = vpop.f32.mrb[1].mxu1  ;;  %v1893_v38 = vpop.f32.mrb[2].mxu0 }
 0x17c   : > { %v1956_v39 = vadd.f32 %v1955_v37, %v1954_v34  ;;  %v1957_v40 = vpop.f32.mrb[2].mxu1  ;;  %v1894_v41 = vpop.f32.mrb[3].mxu0  ;;  %v637_v37 = vld [vmem:[#allocation2 + $0x38] sm:$0xff] }
 0x17d   : > { %v1895_v43 = vadd.f32 %v1894_v41, %v1893_v38  ;;  %v1958_v44 = vpop.f32.mrb[3].mxu1 }
 0x17e   : > { %v1226_v45 = vadd.f32 %v1956_v39, %v1892_v36  ;;  %v1959_v46 = vadd.f32 %v1958_v44, %v1957_v40 }
 0x180   : > { %v1288_v48 = vadd.f32 %v1226_v45, %v630_v42  ;;  %v1229_v49 = vadd.f32 %v1959_v46, %v1895_v43 }
 0x181   : > { %v1896_v50 = vpop.f32.mrb[4].mxu0 }
 0x182   : > { %1304 = vst [vmem:[#allocation2] sm:$0xff] %v1288_v48  ;;  %v1289_v51 = vadd.f32 %v1229_v49, %v631_v47  ;;  %v1960_v52 = vpop.f32.mrb[4].mxu1  ;;  %v1897_v53 = vpop.f32.mrb[5].mxu0 }
 0x183   : > { %v1898_v54 = vadd.f32 %v1897_v53, %v1896_v50  ;;  %v1961_v55 = vpop.f32.mrb[5].mxu1  ;;  %v1899_v56 = vpop.f32.mrb[6].mxu0  ;;  %v638_v50 = vld [vmem:[#allocation2 + $0x40] sm:$0xff] }
 0x184   : > { %1305 = vst [vmem:[#allocation2 + $0x8] sm:$0xff] %v1289_v51  ;;  %v1962_v57 = vadd.f32 %v1961_v55, %v1960_v52  ;;  %v1963_v58 = vpop.f32.mrb[6].mxu1  ;;  %v1900_v59 = vpop.f32.mrb[7].mxu0  ;;  %v639_v55 = vld [vmem:[#allocation2 + $0x48] sm:$0xff] }
 0x185   : > { %v1901_v61 = vadd.f32 %v1900_v59, %v1899_v56  ;;  %v1964_v62 = vpop.f32.mrb[7].mxu1 }
 0x186   : > { %v1234_v63 = vadd.f32 %v1962_v57, %v1898_v54  ;;  %v1965_v0 = vadd.f32 %v1964_v62, %v1963_v58 }
 0x188   : > { %v1290_v2 = vadd.f32 %v1234_v63, %v632_v60  ;;  %v1237_v3 = vadd.f32 %v1965_v0, %v1901_v61 }
 0x189   : > { %v1902_v4 = vpop.f32.mrb[8].mxu0 }
 0x18a   : > { %1306 = vst [vmem:[#allocation2 + $0x10] sm:$0xff] %v1290_v2  ;;  %v1291_v5 = vadd.f32 %v1237_v3, %v633_v1  ;;  %v1966_v6 = vpop.f32.mrb[8].mxu1  ;;  %v1903_v7 = vpop.f32.mrb[9].mxu0 }
 0x18b   : > { %v1904_v8 = vadd.f32 %v1903_v7, %v1902_v4  ;;  %v1967_v9 = vpop.f32.mrb[9].mxu1  ;;  %v1905_v10 = vpop.f32.mrb[10].mxu0  ;;  %v640_v4 = vld [vmem:[#allocation2 + $0x50] sm:$0xff] }
 0x18c   : > { %1307 = vst [vmem:[#allocation2 + $0x18] sm:$0xff] %v1291_v5  ;;  %v1968_v11 = vadd.f32 %v1967_v9, %v1966_v6  ;;  %v1969_v12 = vpop.f32.mrb[10].mxu1  ;;  %v1906_v13 = vpop.f32.mrb[11].mxu0  ;;  %v641_v9 = vld [vmem:[#allocation2 + $0x58] sm:$0xff] }
 0x18d   : > { %v1907_v15 = vadd.f32 %v1906_v13, %v1905_v10  ;;  %v1970_v16 = vpop.f32.mrb[11].mxu1 }
 0x18e   : > { %v1242_v17 = vadd.f32 %v1968_v11, %v1904_v8  ;;  %v1971_v18 = vadd.f32 %v1970_v16, %v1969_v12 }
 0x190   : > { %v1292_v20 = vadd.f32 %v1242_v17, %v634_v14  ;;  %v1245_v21 = vadd.f32 %v1971_v18, %v1907_v15 }
 0x191   : > { %v1908_v22 = vpop.f32.mrb[12].mxu0 }
 0x192   : > { %1308 = vst [vmem:[#allocation2 + $0x20] sm:$0xff] %v1292_v20  ;;  %v1293_v23 = vadd.f32 %v1245_v21, %v635_v19  ;;  %v1972_v24 = vpop.f32.mrb[12].mxu1  ;;  %v1909_v25 = vpop.f32.mrb[13].mxu0 }
 0x193   : > { %v1910_v26 = vadd.f32 %v1909_v25, %v1908_v22  ;;  %v1973_v27 = vpop.f32.mrb[13].mxu1  ;;  %v1911_v28 = vpop.f32.mrb[14].mxu0  ;;  %v642_v22 = vld [vmem:[#allocation2 + $0x60] sm:$0xff] }
 0x194   : > { %1309 = vst [vmem:[#allocation2 + $0x28] sm:$0xff] %v1293_v23  ;;  %v1974_v29 = vadd.f32 %v1973_v27, %v1972_v24  ;;  %v1975_v30 = vpop.f32.mrb[14].mxu1  ;;  %v1912_v31 = vpop.f32.mrb[15].mxu0  ;;  %v643_v27 = vld [vmem:[#allocation2 + $0x68] sm:$0xff] }
 0x195   : > { %v1913_v33 = vadd.f32 %v1912_v31, %v1911_v28  ;;  %v1976_v34 = vpop.f32.mrb[15].mxu1 }
 0x196   : > { %v1250_v35 = vadd.f32 %v1974_v29, %v1910_v26  ;;  %v1977_v36 = vadd.f32 %v1976_v34, %v1975_v30 }
 0x198   : > { %v1294_v38 = vadd.f32 %v1250_v35, %v636_v32  ;;  %v1253_v39 = vadd.f32 %v1977_v36, %v1913_v33 }
 0x199   : > { %v1914_v40 = vpop.f32.mrb[16].mxu0 }
 0x19a   : > { %1310 = vst [vmem:[#allocation2 + $0x30] sm:$0xff] %v1294_v38  ;;  %v1295_v41 = vadd.f32 %v1253_v39, %v637_v37  ;;  %v1978_v42 = vpop.f32.mrb[16].mxu1  ;;  %v1915_v43 = vpop.f32.mrb[17].mxu0 }
 0x19b   : > { %v1916_v44 = vadd.f32 %v1915_v43, %v1914_v40  ;;  %v1979_v45 = vpop.f32.mrb[17].mxu1  ;;  %v1917_v46 = vpop.f32.mrb[18].mxu0  ;;  %v644_v40 = vld [vmem:[#allocation2 + $0x70] sm:$0xff] }
 0x19c   : > { %1311 = vst [vmem:[#allocation2 + $0x38] sm:$0xff] %v1295_v41  ;;  %v1980_v47 = vadd.f32 %v1979_v45, %v1978_v42  ;;  %v1981_v48 = vpop.f32.mrb[18].mxu1  ;;  %v1918_v49 = vpop.f32.mrb[19].mxu0  ;;  %v645_v45 = vld [vmem:[#allocation2 + $0x78] sm:$0xff] }
 0x19d   : > { %v1919_v51 = vadd.f32 %v1918_v49, %v1917_v46  ;;  %v1982_v52 = vpop.f32.mrb[19].mxu1  ;;  %v1324_v49 = vld [vmem:[#allocation2] sm:$0xff] (!%p1787_p5) }
 0x19e   : > { %v1258_v53 = vadd.f32 %v1980_v47, %v1916_v44  ;;  %v1983_v54 = vadd.f32 %v1982_v52, %v1981_v48 }
 0x1a0   : > { %v1296_v56 = vadd.f32 %v1258_v53, %v638_v50  ;;  %v1261_v57 = vadd.f32 %v1983_v54, %v1919_v51  ;;  %v1325_v50 = vld [vmem:[#allocation2 + $0x8] sm:$0xff] (!%p1787_p5)  ;;  %v2684_v51 = vld [vmem:[%s607_s4] ss:$0 sm:$0xff] (!%p1787_p5)  ;;  %v1326_v54 = vld [vmem:[#allocation2 + $0x10] sm:$0xff] (!%p1787_p5) }
 0x1a1   : > { %v1920_v58 = vpop.f32.mrb[20].mxu0  ;;  %v1347_v52 = vadd.f32 (!%p1787_p5), %v2684_v51, %v1324_v49  ;;  %v1348_v53 = vadd.f32 (!%p1787_p5), %v2684_v51, %v1325_v50 }
 0x1a2   : > { %1312 = vst [vmem:[#allocation2 + $0x40] sm:$0xff] %v1296_v56  ;;  %v1297_v59 = vadd.f32 %v1261_v57, %v639_v55  ;;  %v1984_v60 = vpop.f32.mrb[20].mxu1  ;;  %v1921_v61 = vpop.f32.mrb[21].mxu0  ;;  %v1327_v55 = vld [vmem:[#allocation2 + $0x18] sm:$0xff] (!%p1787_p5)  ;;  %v1328_v56 = vld [vmem:[#allocation2 + $0x20] sm:$0xff] (!%p1787_p5)  ;;  %v1349_v57 = vadd.f32 (!%p1787_p5), %v2684_v51, %v1326_v54 }
 0x1a3   : > { %v1922_v62 = vadd.f32 %v1921_v61, %v1920_v58  ;;  %v1985_v63 = vpop.f32.mrb[21].mxu1  ;;  %v1923_v0 = vpop.f32.mrb[22].mxu0  ;;  %v1350_v58 = vadd.f32 (!%p1787_p5), %v2684_v51, %v1327_v55  ;;  %v1330_v61 = vld [vmem:[#allocation2 + $0x30] sm:$0xff] (!%p1787_p5)  ;;  %vm1363_vm0 = vcmp.ge.f32.partialorder (!%p1787_p5), %v1347_v52, 0.0  ;;  %vm1364_vm1 = vcmp.ge.f32.partialorder (!%p1787_p5), %v1348_v53, 0.0 }
 0x1a4   : > { %1313 = vst [vmem:[#allocation2 + $0x48] sm:$0xff] %v1297_v59  ;;  %v1986_v1 = vadd.f32 %v1985_v63, %v1984_v60  ;;  %v1987_v2 = vpop.f32.mrb[22].mxu1  ;;  %v1924_v3 = vpop.f32.mrb[23].mxu0  ;;  %v1329_v59 = vld [vmem:[#allocation2 + $0x28] sm:$0xff] (!%p1787_p5)  ;;  %v1351_v60 = vadd.f32 (!%p1787_p5), %v2684_v51, %v1328_v56  ;;  %v1380_v63 = vmul.f32 (!%p1787_p5), 0.2, %v1348_v53 }
 0x1a5   : > { %v1925_v5 = vadd.f32 %v1924_v3, %v1923_v0  ;;  %v1988_v6 = vpop.f32.mrb[23].mxu1  ;;  %vm1365_vm2 = vcmp.ge.f32.partialorder (!%p1787_p5), %v1349_v57, 0.0  ;;  %vm1366_vm3 = vcmp.ge.f32.partialorder (!%p1787_p5), %v1350_v58, 0.0  ;;  %v1381_v0 = vmul.f32 (!%p1787_p5), 0.2, %v1349_v57 }
 0x1a6   : > { %v1266_v7 = vadd.f32 %v1986_v1, %v1922_v62  ;;  %v1989_v8 = vadd.f32 %v1988_v6, %v1987_v2  ;;  %v1379_v62 = vmul.f32 (!%p1787_p5), 0.2, %v1347_v52  ;;  %v1382_v1 = vmul.f32 (!%p1787_p5), 0.2, %v1350_v58 }
 0x1a7   : > { %v1396_v3 = vsel (!%p1787_p5), %vm1364_vm1, %v1348_v53, %v1380_v63  ;;  %vm1367_vm4 = vcmp.ge.f32.partialorder (!%p1787_p5), %v1351_v60, 0.0 }
 0x1a8   : > { %v1298_v10 = vadd.f32 %v1266_v7, %v640_v4  ;;  %v1269_v11 = vadd.f32 %v1989_v8, %v1925_v5  ;;  %v1395_v2 = vsel (!%p1787_p5), %vm1363_vm0, %v1347_v52, %v1379_v62  ;;  %v1352_v4 = vadd.f32 (!%p1787_p5), %v2684_v51, %v1329_v59  ;;  %v1331_v5 = vld [vmem:[#allocation2 + $0x38] sm:$0xff] (!%p1787_p5) }
 0x1a9   : > { %v1926_v12 = vpop.f32.mrb[24].mxu0  ;;  %v1332_v6 = vld [vmem:[#allocation2 + $0x40] sm:$0xff] (!%p1787_p5)  ;;  %v1830_v8 = vpack.c.bf16 (!%p1787_p5), %v1396_v3, %v1395_v2 }
 0x1aa   : > { %1314 = vst [vmem:[#allocation2 + $0x50] sm:$0xff] %v1298_v10  ;;  %v1299_v13 = vadd.f32 %v1269_v11, %v641_v9  ;;  %v1990_v14 = vpop.f32.mrb[24].mxu1  ;;  %v1927_v15 = vpop.f32.mrb[25].mxu0  ;;  %v1397_v9 = vsel (!%p1787_p5), %vm1365_vm2, %v1349_v57, %v1381_v0  ;;  %v1398_v10 = vsel (!%p1787_p5), %vm1366_vm3, %v1350_v58, %v1382_v1  ;;  %v1383_v11 = vmul.f32 (!%p1787_p5), 0.2, %v1351_v60 }
 0x1ab   : > { %v1928_v16 = vadd.f32 %v1927_v15, %v1926_v12  ;;  %v1991_v17 = vpop.f32.mrb[25].mxu1  ;;  %v1929_v18 = vpop.f32.mrb[26].mxu0  ;;  %v1333_v7 = vld [vmem:[#allocation2 + $0x48] sm:$0xff] (!%p1787_p5)  ;;  %vm1368_vm5 = vcmp.ge.f32.partialorder (!%p1787_p5), %v1352_v4, 0.0  ;;  %v1353_v15 = vadd.f32 (!%p1787_p5), %v2684_v51, %v1330_v61  ;;  %1831 = vst [vmem:[%s2611_s25] sm:$0xff] (!%p1787_p5), %v1830_v8  }
 0x1ac   : > { %1315 = vst [vmem:[#allocation2 + $0x58] sm:$0xff] %v1299_v13  ;;  %v1992_v19 = vadd.f32 %v1991_v17, %v1990_v14  ;;  %v1993_v20 = vpop.f32.mrb[26].mxu1  ;;  %v1930_v21 = vpop.f32.mrb[27].mxu0  ;;  %v1835_v13 = vpack.c.bf16 (!%p1787_p5), %v1398_v10, %v1397_v9  ;;  %v1384_v14 = vmul.f32 (!%p1787_p5), 0.2, %v1352_v4  ;;  %v1354_v17 = vadd.f32 (!%p1787_p5), %v2684_v51, %v1331_v5 }
 0x1ad   : > { %v1931_v23 = vadd.f32 %v1930_v21, %v1929_v18  ;;  %v1994_v24 = vpop.f32.mrb[27].mxu1  ;;  %v1355_v18 = vadd.f32 (!%p1787_p5), %v2684_v51, %v1332_v6  ;;  %vm1369_vm6 = vcmp.ge.f32.partialorder (!%p1787_p5), %v1353_v15, 0.0  ;;  %v1385_v21 = vmul.f32 (!%p1787_p5), 0.2, %v1353_v15 }
 0x1ae   : > { %v1274_v25 = vadd.f32 %v1992_v19, %v1928_v16  ;;  %v1995_v26 = vadd.f32 %v1994_v24, %v1993_v20  ;;  %v1399_v16 = vsel (!%p1787_p5), %vm1367_vm4, %v1351_v60, %v1383_v11  ;;  %v1356_v19 = vadd.f32 (!%p1787_p5), %v2684_v51, %v1333_v7  ;;  %1867 = vst [vmem:[%s2611_s25 + $0x8] sm:$0xff] (!%p1787_p5), %v1835_v13  }
 0x1af   : > { %v1400_v20 = vsel (!%p1787_p5), %vm1368_vm5, %v1352_v4, %v1384_v14  ;;  %vm1370_vm7 = vcmp.ge.f32.partialorder (!%p1787_p5), %v1354_v17, 0.0  ;;  %vm1371_vm8 = vcmp.ge.f32.partialorder (!%p1787_p5), %v1355_v18, 0.0 }
 0x1b0   : > { %v1300_v28 = vadd.f32 %v1274_v25, %v642_v22  ;;  %v1277_v29 = vadd.f32 %v1995_v26, %v1931_v23  ;;  %v1840_v24 = vpack.c.bf16 (!%p1787_p5), %v1400_v20, %v1399_v16  ;;  %v1386_v25 = vmul.f32 (!%p1787_p5), 0.2, %v1354_v17 }
 0x1b1   : > { %v1932_v30 = vpop.f32.mrb[28].mxu0  ;;  %v1334_v12 = vld [vmem:[#allocation2 + $0x50] sm:$0xff] (!%p1787_p5)  ;;  %vm1372_vm9 = vcmp.ge.f32.partialorder (!%p1787_p5), %v1356_v19, 0.0 }
 0x1b2   : > { %1316 = vst [vmem:[#allocation2 + $0x60] sm:$0xff] %v1300_v28  ;;  %v1301_v31 = vadd.f32 %v1277_v29, %v643_v27  ;;  %v1996_v32 = vpop.f32.mrb[28].mxu1  ;;  %v1933_v33 = vpop.f32.mrb[29].mxu0  ;;  %v1357_v23 = vadd.f32 (!%p1787_p5), %v2684_v51, %v1334_v12  ;;  %v1401_v27 = vsel (!%p1787_p5), %vm1369_vm6, %v1353_v15, %v1385_v21  ;;  %v1387_v28 = vmul.f32 (!%p1787_p5), 0.2, %v1355_v18  ;;  %1868 = vst [vmem:[%s2611_s25 + $0x10] sm:$0xff] (!%p1787_p5), %v1840_v24  }
 0x1b3   : > { %v1934_v34 = vadd.f32 %v1933_v33, %v1932_v30  ;;  %v1997_v35 = vpop.f32.mrb[29].mxu1  ;;  %v1935_v36 = vpop.f32.mrb[30].mxu0  ;;  %v1335_v22 = vld [vmem:[#allocation2 + $0x58] sm:$0xff] (!%p1787_p5)  ;;  %v1388_v29 = vmul.f32 (!%p1787_p5), 0.2, %v1356_v19  ;;  %v1402_v30 = vsel (!%p1787_p5), %vm1370_vm7, %v1354_v17, %v1386_v25 }
 0x1b4   : > { %1317 = vst [vmem:[#allocation2 + $0x68] sm:$0xff] %v1301_v31  ;;  %v1998_v37 = vadd.f32 %v1997_v35, %v1996_v32  ;;  %v1999_v38 = vpop.f32.mrb[30].mxu1  ;;  %v1936_v39 = vpop.f32.mrb[31].mxu0  ;;  %v1358_v31 = vadd.f32 (!%p1787_p5), %v2684_v51, %v1335_v22  ;;  %vm1373_vm10 = vcmp.ge.f32.partialorder (!%p1787_p5), %v1357_v23, 0.0  ;;  %v1389_v32 = vmul.f32 (!%p1787_p5), 0.2, %v1357_v23 }
 0x1b5   : > { %v1937_v41 = vadd.f32 %v1936_v39, %v1935_v36  ;;  %v2000_v42 = vpop.f32.mrb[31].mxu1  ;;  %v1845_v35 = vpack.c.bf16 (!%p1787_p5), %v1402_v30, %v1401_v27  ;;  %v1403_v36 = vsel (!%p1787_p5), %vm1371_vm8, %v1355_v18, %v1387_v28 }
 0x1b6   : > { %v1282_v43 = vadd.f32 %v1998_v37, %v1934_v34  ;;  %v2001_v44 = vadd.f32 %v2000_v42, %v1999_v38  ;;  %1323 = sbr.rel (%p1787_p5) target bundleno = 460 (0x1cc), region = 104  ;;  %v1404_v37 = vsel (!%p1787_p5), %vm1372_vm9, %v1356_v19, %v1388_v29  ;;  %vm1374_vm11 = vcmp.ge.f32.partialorder (!%p1787_p5), %v1358_v31, 0.0 }
 0x1b7   : > { %v1405_v42 = vsel (!%p1787_p5), %vm1373_vm10, %v1357_v23, %v1389_v32  ;;  %1869 = vst [vmem:[%s2611_s25 + $0x18] sm:$0xff] (!%p1787_p5), %v1845_v35  }
 0x1b8   : > { %v1302_v46 = vadd.f32 %v1282_v43, %v644_v40  ;;  %v1285_v47 = vadd.f32 %v2001_v44, %v1937_v41  ;;  %v1850_v40 = vpack.c.bf16 (!%p1787_p5), %v1404_v37, %v1403_v36  ;;  %v1390_v41 = vmul.f32 (!%p1787_p5), 0.2, %v1358_v31 }
 0x1b9   : > { %v1336_v26 = vld [vmem:[#allocation2 + $0x60] sm:$0xff] (!%p1787_p5) }
 0x1ba   : > { %1318 = vst [vmem:[#allocation2 + $0x70] sm:$0xff] %v1302_v46  ;;  %v1303_v48 = vadd.f32 %v1285_v47, %v645_v45  ;;  %v1359_v38 = vadd.f32 (!%p1787_p5), %v2684_v51, %v1336_v26  ;;  %1870 = vst [vmem:[%s2611_s25 + $0x20] sm:$0xff] (!%p1787_p5), %v1850_v40   ;;  %v1406_v46 = vsel (!%p1787_p5), %vm1374_vm11, %v1358_v31, %v1390_v41 }
 0x1bb   : > { %v1337_v33 = vld [vmem:[#allocation2 + $0x68] sm:$0xff] (!%p1787_p5) }
 0x1bc   : > { %1319 = vst [vmem:[#allocation2 + $0x78] sm:$0xff] %v1303_v48  ;;  %v1360_v43 = vadd.f32 (!%p1787_p5), %v2684_v51, %v1337_v33  ;;  %vm1375_vm12 = vcmp.ge.f32.partialorder (!%p1787_p5), %v1359_v38, 0.0  ;;  %v1391_v44 = vmul.f32 (!%p1787_p5), 0.2, %v1359_v38  ;;  %v1855_v48 = vpack.c.bf16 (!%p1787_p5), %v1406_v46, %v1405_v42 }
 0x1be   : > { %vm1376_vm13 = vcmp.ge.f32.partialorder %v1360_v43, 0.0  ;;  %v1392_v49 = vmul.f32 0.2, %v1360_v43  ;;  %v1407_v50 = vsel %vm1375_vm12, %v1359_v38, %v1391_v44  ;;  %1871 = vst [vmem:[%s2611_s25 + $0x28] sm:$0xff] %v1855_v48  }
 0x1c0   : > { %v1408_v54 = vsel %vm1376_vm13, %v1360_v43, %v1392_v49 }
 0x1c1   : > { %v1338_v34 = vld [vmem:[#allocation2 + $0x70] sm:$0xff]  ;;  %v1860_v55 = vpack.c.bf16 %v1408_v54, %v1407_v50 }
 0x1c2   : > { %v1361_v45 = vadd.f32 %v2684_v51, %v1338_v34 }
 0x1c3   : > { %v1339_v39 = vld [vmem:[#allocation2 + $0x78] sm:$0xff]  ;;  %1872 = vst [vmem:[%s2611_s25 + $0x30] sm:$0xff] %v1860_v55  }
 0x1c4   : > { %v1362_v47 = vadd.f32 %v2684_v51, %v1339_v39  ;;  %vm1377_vm14 = vcmp.ge.f32.partialorder %v1361_v45, 0.0  ;;  %v1393_v52 = vmul.f32 0.2, %v1361_v45 }
 0x1c6   : > { %vm1378_vm15 = vcmp.ge.f32.partialorder %v1362_v47, 0.0  ;;  %v1394_v53 = vmul.f32 0.2, %v1362_v47  ;;  %v1409_v56 = vsel %vm1377_vm14, %v1361_v45, %v1393_v52 }
 0x1c8   : > { %v1410_v57 = vsel %vm1378_vm15, %v1362_v47, %v1394_v53 }
 0x1c9   : > { %v1865_v58 = vpack.c.bf16 %v1410_v57, %v1409_v56 }
 0x1cb   : > { %1873 = vst [vmem:[%s2611_s25 + $0x38] sm:$0xff] %v1865_v58  }
 0x1cc PF: > { %1497 = sbr.rel (!%p2374_p12) target bundleno = 472 (0x1d8), region = 108  ;;  %s1806_s14 = sshll.u32 (%p2374_p12), %s2245_s19, 2  ;;  %v1518_v51 = vld [vmem:[%s2611_s25] sm:$0xf] (%p2374_p12)  ;;  %v1520_v59 = vld [vmem:[%s2611_s25 + $0x4] sm:$0xf] (%p2374_p12) }
 0x1cd   : > { %s1502_s5 = scalar_lea.vmem (%p2374_p12), %s2768_s3, %s1806_s14  ;;  %v1522_v60 = vld [vmem:[%s2611_s25 + $0x8] sm:$0xf] (%p2374_p12)  ;;  %v1524_v61 = vld [vmem:[%s2611_s25 + $0xc] sm:$0xf] (%p2374_p12)  ;;  %v1526_v62 = vld [vmem:[%s2611_s25 + $0x10] sm:$0xf] (%p2374_p12) }
 0x1ce   : > { %1519 = vst [vmem:[%s1502_s5] sm:$0xf] (%p2374_p12), %v1518_v51  ;;  %1521 = vst [vmem:[%s1502_s5 + $0x8] sm:$0xf] (%p2374_p12), %v1520_v59  ;;  %v1528_v63 = vld [vmem:[%s2611_s25 + $0x14] sm:$0xf] (%p2374_p12) }
 0x1cf   : > { %1523 = vst [vmem:[%s1502_s5 + $0x10] sm:$0xf] (%p2374_p12), %v1522_v60  ;;  %1525 = vst [vmem:[%s1502_s5 + $0x18] sm:$0xf] (%p2374_p12), %v1524_v61  ;;  %v1530_v0 = vld [vmem:[%s2611_s25 + $0x18] sm:$0xf] (%p2374_p12) }
 0x1d0   : > { %1527 = vst [vmem:[%s1502_s5 + $0x20] sm:$0xf] (%p2374_p12), %v1526_v62  ;;  %v1532_v1 = vld [vmem:[%s2611_s25 + $0x1c] sm:$0xf] (%p2374_p12)  ;;  %1529 = vst [vmem:[%s1502_s5 + $0x28] sm:$0xf] (%p2374_p12), %v1528_v63 }
 0x1d1   : > { %1531 = vst [vmem:[%s1502_s5 + $0x30] sm:$0xf] (%p2374_p12), %v1530_v0  ;;  %1533 = vst [vmem:[%s1502_s5 + $0x38] sm:$0xf] (%p2374_p12), %v1532_v1  ;;  %v1534_v2 = vld [vmem:[%s2611_s25 + $0x20] sm:$0xf] (%p2374_p12) }
 0x1d2   : > { %v1536_v3 = vld [vmem:[%s2611_s25 + $0x24] sm:$0xf] (%p2374_p12)  ;;  %v1538_v4 = vld [vmem:[%s2611_s25 + $0x28] sm:$0xf] (%p2374_p12)  ;;  %1535 = vst [vmem:[%s1502_s5 + $0x40] sm:$0xf] (%p2374_p12), %v1534_v2 }
 0x1d3   : > { %1537 = vst [vmem:[%s1502_s5 + $0x48] sm:$0xf] %v1536_v3  ;;  %1539 = vst [vmem:[%s1502_s5 + $0x50] sm:$0xf] %v1538_v4  ;;  %v1540_v5 = vld [vmem:[%s2611_s25 + $0x2c] sm:$0xf] }
 0x1d4   : > { %v1542_v6 = vld [vmem:[%s2611_s25 + $0x30] sm:$0xf]  ;;  %v1544_v7 = vld [vmem:[%s2611_s25 + $0x34] sm:$0xf]  ;;  %1541 = vst [vmem:[%s1502_s5 + $0x58] sm:$0xf] %v1540_v5 }
 0x1d5   : > { %1543 = vst [vmem:[%s1502_s5 + $0x60] sm:$0xf] %v1542_v6  ;;  %1545 = vst [vmem:[%s1502_s5 + $0x68] sm:$0xf] %v1544_v7  ;;  %v1546_v8 = vld [vmem:[%s2611_s25 + $0x38] sm:$0xf] }
 0x1d6   : > { %v1548_v9 = vld [vmem:[%s2611_s25 + $0x3c] sm:$0xf]  ;;  %1547 = vst [vmem:[%s1502_s5 + $0x70] sm:$0xf] %v1546_v8 }
 0x1d7   : > { %1549 = vst [vmem:[%s1502_s5 + $0x78] sm:$0xf] %v1548_v9 }
 0x1d8 PF: > { %s13_s22 = sadd.s32 1, %s2257_s22   ;;  %s2778_s10 = sld [smem:[#allocation6_spill]] }
 0x1d9   : > { %p10_p6 = scmp.ge.s32.totalorder %s13_s22, 10   ;;  %s2779_s12 = smov %s2221_s13 }
 0x1da   : > { %s2780_s13 = smov %s2372_s9  ;;  %s2781_s14 = smov %s2229_s15 }
 0x1db   : > { %s2782_s15 = smov %s2369_s8  ;;  %s2783_s16 = smov %s2237_s17 }
 0x1dc   : > { %s2784_s17 = smov %s2355_s30  ;;  %s2785_s18 = smov %s2249_s20 }
 0x1dd   : > { %s2786_s19 = smov %s2253_s21  ;;  %s2787_s20 = smov %s2790_s24 }
 0x1de   : > { %s2788_s21 = smov %s2778_s10  ;;  %12 = sbr.rel (!%p10_p6) target bundleno = 9 (0x9), region = 191 }

// kernel: discriminator_forward.8
= control target key start
LH: loop header
LB: loop body
LE: loop exit
PB: predicated region body
PF: predicated region fallthrough
CT: control target
= control target key end

     0   :  { %s2195_s0 = inlined_call_operand.vmem [shape: bf16[32,4096], index: 0, kind: input, shape index: {}]   ;;  %s2196_s1 = inlined_call_operand.vmem [shape: bf16[4096,512], index: 1, kind: input, shape index: {}]   ;;  %s2197_s2 = inlined_call_operand.vmem [shape: f32[1,512], index: 2, kind: input, shape index: {}]   ;;  %s2198_s3 = inlined_call_operand.vmem [shape: bf16[32,512], index: 3, kind: output, shape index: {}]  }
   0x1   :  { %2200 = sst [smem:[#allocation7_spill]] %s2195_s0 }
   0x2   :  { %2201 = sst [smem:[#allocation8_spill]] %s2196_s1 }
   0x3   :  { %s1805_s12 = smov 0   ;;  %s1807_s13 = smov 0  }
   0x4   :  { %s1809_s14 = smov 0   ;;  %s1811_s15 = smov 0  }
   0x5   :  { %s1813_s16 = smov 0   ;;  %s1815_s17 = smov 0  }
   0x6   :  { %s1817_s18 = smov 0   ;;  %s1819_s19 = smov 0  }
   0x7   :  { %s1821_s20 = smov 0   ;;  %s1823_s21 = smov 0  }
   0x8   :  { %s1825_s22 = smov 0  }
   0x9 LB: > { %s1384_s23 = sadd.s32 4294967295, %s1782_s22   ;;  %s25_s24 = sadd.s32 1, %s1774_s20  ;;  %s1782_s22 = sphi %s1825_s22, %s13_s22   ;;  %s1778_s21 = sphi %s1823_s21, %s2218_s21   ;;  %s1774_s20 = sphi %s1821_s20, %s2217_s20   ;;  %s1770_s19 = sphi %s1819_s19, %s2216_s19   ;;  %s1766_s18 = sphi %s1817_s18, %s2215_s18   ;;  %s1762_s17 = sphi %s1815_s17, %s2214_s17   ;;  %s1758_s16 = sphi %s1813_s16, %s2213_s16   ;;  %s1754_s15 = sphi %s1811_s15, %s2212_s15   ;;  %s1750_s14 = sphi %s1809_s14, %s2211_s14   ;;  %s1746_s13 = sphi %s1807_s13, %s2210_s13   ;;  %s1742_s12 = sphi %s1805_s12, %s2209_s12  }
   0xa   : > { %p26_p0 = scmp.ge.s32.totalorder %s25_s24, 8  ;;  %s28_s25 = sadd.s32 1, %s1778_s21 }
   0xb   : > { %s41_s26 = sadd.s32 1, %s1762_s17  ;;  %p48_p1 = scmp.ne.s32.totalorder %s1762_s17, %s1758_s16 }
   0xc   : > { %s2220_s24 = smov (%p26_p0, %s25_s24), 0  ;;  %s2222_s25 = smov (!%p26_p0, %s28_s25), %s1778_s21 }
   0xd   : > { %s37_s27 = ssub.s32 %s1774_s20, %s2220_s24  ;;  %p49_p2 = scmp.eq.s32.totalorder %s1782_s22, 0 }
   0xe   : > { %p30_p3 = scmp.ge.s32.totalorder %s2222_s25, 2  ;;  %p39_p4 = scmp.eq.s32.totalorder %s37_s27, 0 }
   0xf   : > { %p1872_p5 = por %p49_p2, %p48_p1  ;;  %s69_s29 = sadd.s32 1, %s1754_s15 }
  0x10   : > { %s2224_s25 = smov (%p30_p3, %s2222_s25), 0  ;;  %p76_p6 = scmp.ne.s32.totalorder %s1754_s15, %s1750_s14 }
  0x11   : > { %2203 = sst [smem:[#allocation6_spill]] %s2224_s25  ;;  %s65_s4 = ssub.s32 %s1778_s21, %s2224_s25 }
  0x12   : > { %s1880_s30 = scalar_select %p39_p4, %s1762_s17, %s41_s26  }
  0x13   : > { %s66_s5 = sor.u32 %s65_s4, %s37_s27  ;;  %p121_p7 = scmp.eq.s32.totalorder %s65_s4, 0 }
  0x14   : > { %p67_p8 = scmp.eq.s32.totalorder %s66_s5, 0  ;;  %p1886_p9 = por %p76_p6, %p49_p2 }
  0x15   : > { %s123_s7 = sadd.s32 1, %s1746_s13  ;;  %p133_p10 = scmp.ne.s32.totalorder %s1746_s13, %s1742_s12 }
  0x16   : > { %s1894_s8 = scalar_select %p67_p8, %s1754_s15, %s69_s29  }
  0x17   : > { %s1897_s9 = scalar_select %p121_p7, %s1746_s13, %s123_s7  }
  0x18   : > { %p134_p11 = scmp.eq.s32.totalorder %s1384_s23, 15  ;;  %p1387_p13 = scmp.ge.s32.totalorder %s1782_s22, 16 }
  0x1a   : > { %p1899_p12 = por %p134_p11, %p133_p10  ;;  %156 = sbr.rel (%p1387_p13) target bundleno = 89 (0x59), region = 16 }
  0x21   : > { %159 = sbr.rel (!%p1872_p5) target bundleno = 47 (0x2f), region = 20  ;;  %s161_s11 = sand.u32 (%p1872_p5), 1, %s1762_s17  }
  0x22   : > { %s1484_s26 = sshll.u32 (%p1872_p5), %s1774_s20, 4  ;;  %s1388_s27 = sshll.u32 (%p1872_p5), %s161_s11, 6 }
  0x23   : > { %s2206_s0 = sld [smem:[#allocation7_spill]] (%p1872_p5)  ;;  %s163_s23 = scalar_lea.vmem (%p1872_p5), [#allocation3], %s1388_s27 }
  0x29   : > { %s169_s5 = scalar_lea.vmem %s2206_s0, %s1484_s26 }
  0x2a   : > { %v182_v0 = vld [vmem:[%s169_s5] sm:$0xff]  ;;  %v184_v1 = vld [vmem:[%s169_s5 + $0x8] sm:$0xff] }
  0x2b   : > { %v186_v2 = vld [vmem:[%s169_s5 + $0x80] sm:$0xff]  ;;  %183 = vst [vmem:[%s163_s23] sm:$0xff] %v182_v0  ;;  %185 = vst [vmem:[%s163_s23 + $0x8] sm:$0xff] %v184_v1  ;;  %v188_v3 = vld [vmem:[%s169_s5 + $0x88] sm:$0xff] }
  0x2c   : > { %187 = vst [vmem:[%s163_s23 + $0x10] sm:$0xff] %v186_v2  ;;  %v190_v4 = vld [vmem:[%s169_s5 + $0x100] sm:$0xff]  ;;  %v192_v5 = vld [vmem:[%s169_s5 + $0x108] sm:$0xff]  ;;  %189 = vst [vmem:[%s163_s23 + $0x18] sm:$0xff] %v188_v3 }
  0x2d   : > { %191 = vst [vmem:[%s163_s23 + $0x20] sm:$0xff] %v190_v4  ;;  %193 = vst [vmem:[%s163_s23 + $0x28] sm:$0xff] %v192_v5  ;;  %v194_v6 = vld [vmem:[%s169_s5 + $0x180] sm:$0xff]  ;;  %v196_v7 = vld [vmem:[%s169_s5 + $0x188] sm:$0xff] }
  0x2e   : > { %195 = vst [vmem:[%s163_s23 + $0x30] sm:$0xff] %v194_v6  ;;  %197 = vst [vmem:[%s163_s23 + $0x38] sm:$0xff] %v196_v7 }
  0x2f PF: > { %203 = sbr.rel (!%p1886_p9) target bundleno = 89 (0x59), region = 43  ;;  %s205_s28 = sand.u32 (%p1886_p9), 1, %s1754_s15  }
  0x30   : > { %s1393_s7 = sshll.u32 (%p1886_p9), %s1778_s21, 1  ;;  %s1391_s11 = sshll.u32 (%p1886_p9), %s205_s28, 9 }
  0x31   : > { %s1485_s26 = sshll.u32 (%p1886_p9), %s1774_s20, 8  ;;  %s2207_s1 = sld [smem:[#allocation8_spill]] (%p1886_p9) }
  0x32   : > { %s211_s27 = sadd.s32 (%p1886_p9), %s1485_s26, %s1393_s7  ;;  %s1924_s6 = scalar_lea.vmem (%p1886_p9), [#allocation4], %s1391_s11 }
  0x33   : > { %s1395_s29 = sshll.u32 (%p1886_p9), %s211_s27, 2 }
  0x37   : > { %s1919_s25 = scalar_lea.vmem %s2207_s1, %s1395_s29 }
  0x38   : > { %v367_v8 = vld [vmem:[%s1919_s25] sm:$0xff]  ;;  %v369_v9 = vld [vmem:[%s1919_s25 + $0x10] sm:$0xff] }
  0x39   : > { %v371_v10 = vld [vmem:[%s1919_s25 + $0x20] sm:$0xff]  ;;  %368 = vst [vmem:[%s1924_s6] sm:$0xff] %v367_v8  ;;  %370 = vst [vmem:[%s1924_s6 + $0x8] sm:$0xff] %v369_v9  ;;  %v373_v11 = vld [vmem:[%s1919_s25 + $0x30] sm:$0xff] }
  0x3a   : > { %372 = vst [vmem:[%s1924_s6 + $0x10] sm:$0xff] %v371_v10  ;;  %v375_v12 = vld [vmem:[%s1919_s25 + $0x40] sm:$0xff]  ;;  %v377_v13 = vld [vmem:[%s1919_s25 + $0x50] sm:$0xff]  ;;  %374 = vst [vmem:[%s1924_s6 + $0x18] sm:$0xff] %v373_v11 }
  0x3b   : > { %376 = vst [vmem:[%s1924_s6 + $0x20] sm:$0xff] %v375_v12  ;;  %378 = vst [vmem:[%s1924_s6 + $0x28] sm:$0xff] %v377_v13  ;;  %v379_v14 = vld [vmem:[%s1919_s25 + $0x60] sm:$0xff]  ;;  %v381_v15 = vld [vmem:[%s1919_s25 + $0x70] sm:$0xff] }
  0x3c   : > { %v383_v16 = vld [vmem:[%s1919_s25 + $0x80] sm:$0xff]  ;;  %380 = vst [vmem:[%s1924_s6 + $0x30] sm:$0xff] %v379_v14  ;;  %382 = vst [vmem:[%s1924_s6 + $0x38] sm:$0xff] %v381_v15  ;;  %v385_v17 = vld [vmem:[%s1919_s25 + $0x90] sm:$0xff] }
  0x3d   : > { %384 = vst [vmem:[%s1924_s6 + $0x40] sm:$0xff] %v383_v16  ;;  %v387_v18 = vld [vmem:[%s1919_s25 + $0xa0] sm:$0xff]  ;;  %v389_v19 = vld [vmem:[%s1919_s25 + $0xb0] sm:$0xff]  ;;  %386 = vst [vmem:[%s1924_s6 + $0x48] sm:$0xff] %v385_v17 }
  0x3e   : > { %388 = vst [vmem:[%s1924_s6 + $0x50] sm:$0xff] %v387_v18  ;;  %390 = vst [vmem:[%s1924_s6 + $0x58] sm:$0xff] %v389_v19  ;;  %v391_v20 = vld [vmem:[%s1919_s25 + $0xc0] sm:$0xff]  ;;  %v393_v21 = vld [vmem:[%s1919_s25 + $0xd0] sm:$0xff] }
  0x3f   : > { %v395_v22 = vld [vmem:[%s1919_s25 + $0xe0] sm:$0xff]  ;;  %392 = vst [vmem:[%s1924_s6 + $0x60] sm:$0xff] %v391_v20  ;;  %394 = vst [vmem:[%s1924_s6 + $0x68] sm:$0xff] %v393_v21  ;;  %v397_v23 = vld [vmem:[%s1919_s25 + $0xf0] sm:$0xff] }
  0x40   : > { %396 = vst [vmem:[%s1924_s6 + $0x70] sm:$0xff] %v395_v22  ;;  %v399_v24 = vld [vmem:[%s1919_s25 + $0x100] sm:$0xff]  ;;  %v401_v25 = vld [vmem:[%s1919_s25 + $0x110] sm:$0xff]  ;;  %398 = vst [vmem:[%s1924_s6 + $0x78] sm:$0xff] %v397_v23 }
  0x41   : > { %400 = vst [vmem:[%s1924_s6 + $0x80] sm:$0xff] %v399_v24  ;;  %402 = vst [vmem:[%s1924_s6 + $0x88] sm:$0xff] %v401_v25  ;;  %v403_v26 = vld [vmem:[%s1919_s25 + $0x120] sm:$0xff]  ;;  %v405_v27 = vld [vmem:[%s1919_s25 + $0x130] sm:$0xff] }
  0x42   : > { %v407_v28 = vld [vmem:[%s1919_s25 + $0x140] sm:$0xff]  ;;  %404 = vst [vmem:[%s1924_s6 + $0x90] sm:$0xff] %v403_v26  ;;  %406 = vst [vmem:[%s1924_s6 + $0x98] sm:$0xff] %v405_v27  ;;  %v409_v29 = vld [vmem:[%s1919_s25 + $0x150] sm:$0xff] }
  0x43   : > { %408 = vst [vmem:[%s1924_s6 + $0xa0] sm:$0xff] %v407_v28  ;;  %v411_v30 = vld [vmem:[%s1919_s25 + $0x160] sm:$0xff]  ;;  %v413_v31 = vld [vmem:[%s1919_s25 + $0x170] sm:$0xff]  ;;  %410 = vst [vmem:[%s1924_s6 + $0xa8] sm:$0xff] %v409_v29 }
  0x44   : > { %412 = vst [vmem:[%s1924_s6 + $0xb0] sm:$0xff] %v411_v30  ;;  %414 = vst [vmem:[%s1924_s6 + $0xb8] sm:$0xff] %v413_v31  ;;  %v415_v32 = vld [vmem:[%s1919_s25 + $0x180] sm:$0xff]  ;;  %v417_v33 = vld [vmem:[%s1919_s25 + $0x190] sm:$0xff] }
  0x45   : > { %v419_v34 = vld [vmem:[%s1919_s25 + $0x1a0] sm:$0xff]  ;;  %416 = vst [vmem:[%s1924_s6 + $0xc0] sm:$0xff] %v415_v32  ;;  %418 = vst [vmem:[%s1924_s6 + $0xc8] sm:$0xff] %v417_v33  ;;  %v421_v35 = vld [vmem:[%s1919_s25 + $0x1b0] sm:$0xff] }
  0x46   : > { %420 = vst [vmem:[%s1924_s6 + $0xd0] sm:$0xff] %v419_v34  ;;  %v423_v36 = vld [vmem:[%s1919_s25 + $0x1c0] sm:$0xff]  ;;  %v425_v37 = vld [vmem:[%s1919_s25 + $0x1d0] sm:$0xff]  ;;  %422 = vst [vmem:[%s1924_s6 + $0xd8] sm:$0xff] %v421_v35 }
  0x47   : > { %424 = vst [vmem:[%s1924_s6 + $0xe0] sm:$0xff] %v423_v36  ;;  %426 = vst [vmem:[%s1924_s6 + $0xe8] sm:$0xff] %v425_v37  ;;  %v427_v38 = vld [vmem:[%s1919_s25 + $0x1e0] sm:$0xff]  ;;  %v429_v39 = vld [vmem:[%s1919_s25 + $0x1f0] sm:$0xff] }
  0x48   : > { %v431_v40 = vld [vmem:[%s1919_s25 + $0x200] sm:$0xff]  ;;  %428 = vst [vmem:[%s1924_s6 + $0xf0] sm:$0xff] %v427_v38  ;;  %430 = vst [vmem:[%s1924_s6 + $0xf8] sm:$0xff] %v429_v39  ;;  %v433_v41 = vld [vmem:[%s1919_s25 + $0x210] sm:$0xff] }
  0x49   : > { %432 = vst [vmem:[%s1924_s6 + $0x100] sm:$0xff] %v431_v40  ;;  %v435_v42 = vld [vmem:[%s1919_s25 + $0x220] sm:$0xff]  ;;  %v437_v43 = vld [vmem:[%s1919_s25 + $0x230] sm:$0xff]  ;;  %434 = vst [vmem:[%s1924_s6 + $0x108] sm:$0xff] %v433_v41 }
  0x4a   : > { %436 = vst [vmem:[%s1924_s6 + $0x110] sm:$0xff] %v435_v42  ;;  %438 = vst [vmem:[%s1924_s6 + $0x118] sm:$0xff] %v437_v43  ;;  %v439_v44 = vld [vmem:[%s1919_s25 + $0x240] sm:$0xff]  ;;  %v441_v45 = vld [vmem:[%s1919_s25 + $0x250] sm:$0xff] }
  0x4b   : > { %v443_v46 = vld [vmem:[%s1919_s25 + $0x260] sm:$0xff]  ;;  %440 = vst [vmem:[%s1924_s6 + $0x120] sm:$0xff] %v439_v44  ;;  %442 = vst [vmem:[%s1924_s6 + $0x128] sm:$0xff] %v441_v45  ;;  %v445_v47 = vld [vmem:[%s1919_s25 + $0x270] sm:$0xff] }
  0x4c   : > { %444 = vst [vmem:[%s1924_s6 + $0x130] sm:$0xff] %v443_v46  ;;  %v447_v48 = vld [vmem:[%s1919_s25 + $0x280] sm:$0xff]  ;;  %v449_v49 = vld [vmem:[%s1919_s25 + $0x290] sm:$0xff]  ;;  %446 = vst [vmem:[%s1924_s6 + $0x138] sm:$0xff] %v445_v47 }
  0x4d   : > { %448 = vst [vmem:[%s1924_s6 + $0x140] sm:$0xff] %v447_v48  ;;  %450 = vst [vmem:[%s1924_s6 + $0x148] sm:$0xff] %v449_v49  ;;  %v451_v50 = vld [vmem:[%s1919_s25 + $0x2a0] sm:$0xff]  ;;  %v453_v51 = vld [vmem:[%s1919_s25 + $0x2b0] sm:$0xff] }
  0x4e   : > { %v455_v52 = vld [vmem:[%s1919_s25 + $0x2c0] sm:$0xff]  ;;  %452 = vst [vmem:[%s1924_s6 + $0x150] sm:$0xff] %v451_v50  ;;  %454 = vst [vmem:[%s1924_s6 + $0x158] sm:$0xff] %v453_v51  ;;  %v457_v53 = vld [vmem:[%s1919_s25 + $0x2d0] sm:$0xff] }
  0x4f   : > { %456 = vst [vmem:[%s1924_s6 + $0x160] sm:$0xff] %v455_v52  ;;  %v459_v54 = vld [vmem:[%s1919_s25 + $0x2e0] sm:$0xff]  ;;  %v461_v55 = vld [vmem:[%s1919_s25 + $0x2f0] sm:$0xff]  ;;  %458 = vst [vmem:[%s1924_s6 + $0x168] sm:$0xff] %v457_v53 }
  0x50   : > { %460 = vst [vmem:[%s1924_s6 + $0x170] sm:$0xff] %v459_v54  ;;  %462 = vst [vmem:[%s1924_s6 + $0x178] sm:$0xff] %v461_v55  ;;  %v463_v56 = vld [vmem:[%s1919_s25 + $0x300] sm:$0xff]  ;;  %v465_v57 = vld [vmem:[%s1919_s25 + $0x310] sm:$0xff] }
  0x51   : > { %v467_v58 = vld [vmem:[%s1919_s25 + $0x320] sm:$0xff]  ;;  %464 = vst [vmem:[%s1924_s6 + $0x180] sm:$0xff] %v463_v56  ;;  %466 = vst [vmem:[%s1924_s6 + $0x188] sm:$0xff] %v465_v57  ;;  %v469_v59 = vld [vmem:[%s1919_s25 + $0x330] sm:$0xff] }
  0x52   : > { %468 = vst [vmem:[%s1924_s6 + $0x190] sm:$0xff] %v467_v58  ;;  %v471_v60 = vld [vmem:[%s1919_s25 + $0x340] sm:$0xff]  ;;  %v473_v61 = vld [vmem:[%s1919_s25 + $0x350] sm:$0xff]  ;;  %470 = vst [vmem:[%s1924_s6 + $0x198] sm:$0xff] %v469_v59 }
  0x53   : > { %472 = vst [vmem:[%s1924_s6 + $0x1a0] sm:$0xff] %v471_v60  ;;  %474 = vst [vmem:[%s1924_s6 + $0x1a8] sm:$0xff] %v473_v61  ;;  %v475_v62 = vld [vmem:[%s1919_s25 + $0x360] sm:$0xff]  ;;  %v477_v63 = vld [vmem:[%s1919_s25 + $0x370] sm:$0xff] }
  0x54   : > { %v479_v0 = vld [vmem:[%s1919_s25 + $0x380] sm:$0xff]  ;;  %476 = vst [vmem:[%s1924_s6 + $0x1b0] sm:$0xff] %v475_v62  ;;  %478 = vst [vmem:[%s1924_s6 + $0x1b8] sm:$0xff] %v477_v63  ;;  %v481_v1 = vld [vmem:[%s1919_s25 + $0x390] sm:$0xff] }
  0x55   : > { %480 = vst [vmem:[%s1924_s6 + $0x1c0] sm:$0xff] %v479_v0  ;;  %v483_v2 = vld [vmem:[%s1919_s25 + $0x3a0] sm:$0xff]  ;;  %v485_v3 = vld [vmem:[%s1919_s25 + $0x3b0] sm:$0xff]  ;;  %482 = vst [vmem:[%s1924_s6 + $0x1c8] sm:$0xff] %v481_v1 }
  0x56   : > { %484 = vst [vmem:[%s1924_s6 + $0x1d0] sm:$0xff] %v483_v2  ;;  %486 = vst [vmem:[%s1924_s6 + $0x1d8] sm:$0xff] %v485_v3  ;;  %v487_v4 = vld [vmem:[%s1919_s25 + $0x3c0] sm:$0xff]  ;;  %v489_v5 = vld [vmem:[%s1919_s25 + $0x3d0] sm:$0xff] }
  0x57   : > { %v491_v6 = vld [vmem:[%s1919_s25 + $0x3e0] sm:$0xff]  ;;  %488 = vst [vmem:[%s1924_s6 + $0x1e0] sm:$0xff] %v487_v4  ;;  %490 = vst [vmem:[%s1924_s6 + $0x1e8] sm:$0xff] %v489_v5  ;;  %v493_v7 = vld [vmem:[%s1919_s25 + $0x3f0] sm:$0xff] }
  0x58   : > { %492 = vst [vmem:[%s1924_s6 + $0x1f0] sm:$0xff] %v491_v6  ;;  %494 = vst [vmem:[%s1924_s6 + $0x1f8] sm:$0xff] %v493_v7 }
  0x59 PF: > { %p1396_p0 = scmp.ge.s32.totalorder %s1782_s22, 1  ;;  %p507_p1 = scmp.lt.s32.totalorder %s1782_s22, 17 }
  0x5b   : > { %p508_p2 = pnand %p1396_p0, %p507_p1 }
  0x5c   : > { %s514_s0 = sand.u32 (!%p508_p2), 1, %s1758_s16   ;;  %s521_s5 = sand.u32 (!%p508_p2), 1, %s1750_s14  }
  0x5d   : > { %511 = sbr.rel (%p508_p2) target bundleno = 424 (0x1a8), region = 85  ;;  %s1397_s23 = sshll.u32 (!%p508_p2), %s514_s0, 6 }
  0x5e   : > { %s1398_s28 = sshll.u32 (!%p508_p2), %s521_s5, 9  ;;  %s548_s7 = sand.u32 (!%p508_p2), 1, %s1742_s12  }
  0x5f   : > { %s1400_s11 = sshll.u32 (!%p508_p2), %s1770_s19, 1  ;;  %s1399_s25 = sshll.u32 (!%p508_p2), %s548_s7, 5 }
  0x60   : > { %p556_p3 = scmp.lt.s32.totalorder (!%p508_p2), %s1400_s11, 3  ;;  %s2063_s4 = scalar_lea.vmem (!%p508_p2), [#allocation3], %s1397_s23 }
  0x61   : > { %s2065_s6 = scalar_lea.vmem (!%p508_p2), [#allocation4], %s1398_s28  ;;  %s2067_s1 = scalar_lea.vmem (!%p508_p2), [#allocation5], %s1399_s25 }
  0x62   : > { %p1401_p4 = scmp.ne.s32.totalorder (!%p508_p2), %s1766_s18, 0 }
  0x64   : > { %s2226_s11 = smov (!%p556_p3, %s1400_s11), 3  ;;  %565 = sbr.rel (%p1401_p4) target bundleno = 107 (0x6b), region = 97 }
  0x65   : > { %s558_s29 = scalar_lea.vmem %s2197_s2, %s2226_s11  ;;  %v1784_v8 = vmov (!%p1401_p4), 0.0  }
  0x66   : > { %566 = vst [vmem:[#allocation2] sm:$0xff] (!%p1401_p4), %v1784_v8  ;;  %567 = vst [vmem:[#allocation2 + $0x8] sm:$0xff] (!%p1401_p4), %v1784_v8 }
  0x67   : > { %568 = vst [vmem:[#allocation2 + $0x10] sm:$0xff] (!%p1401_p4), %v1784_v8  ;;  %569 = vst [vmem:[#allocation2 + $0x18] sm:$0xff] (!%p1401_p4), %v1784_v8 }
  0x68   : > { %570 = vst [vmem:[#allocation2 + $0x20] sm:$0xff] (!%p1401_p4), %v1784_v8  ;;  %571 = vst [vmem:[#allocation2 + $0x28] sm:$0xff] (!%p1401_p4), %v1784_v8 }
  0x69   : > { %572 = vst [vmem:[#allocation2 + $0x30] sm:$0xff] (!%p1401_p4), %v1784_v8  ;;  %573 = vst [vmem:[#allocation2 + $0x38] sm:$0xff] (!%p1401_p4), %v1784_v8 }
  0x6b PF: > { %v1588_v9 = vld [vmem:[%s2065_s6 + $0x4] ss:$8 sps:$4 sm:$0xff]   ;;  %v1592_v11 = vld [vmem:[%s2065_s6] ss:$8 sps:$4 sm:$0xff]   ;;  %v1594_v13 = vld [vmem:[%s2065_s6 + $0x14] ss:$8 sps:$4 sm:$0xff]  }
  0x6c   : > { %v1590_v10 = vld [vmem:[%s2065_s6 + $0x104] ss:$8 sps:$4 sm:$0xff]   ;;  %1014 = vmatprep.subr.bf16.mxu1 %v1588_v9  ;;  %v1593_v12 = vld [vmem:[%s2065_s6 + $0x100] ss:$8 sps:$4 sm:$0xff]   ;;  %v1596_v14 = vld [vmem:[%s2065_s6 + $0x114] ss:$8 sps:$4 sm:$0xff]  }
  0x6d   : > { %1067 = vmatprep.subr.bf16.mxu0 %v1590_v10  ;;  %1015 = vmatpush1.bf16.msra.mxu1 %v1592_v11  ;;  %v1598_v15 = vld [vmem:[%s2065_s6 + $0x10] ss:$8 sps:$4 sm:$0xff]   ;;  %v1600_v17 = vld [vmem:[%s2065_s6 + $0x24] ss:$8 sps:$4 sm:$0xff]   ;;  %v1604_v19 = vld [vmem:[%s2065_s6 + $0x20] ss:$8 sps:$4 sm:$0xff]  }
  0x6e   : > { %1068 = vmatpush1.bf16.msra.mxu0 %v1593_v12  ;;  %1016 = vmatprep.subr.bf16.mxu1 %v1594_v13  ;;  %v1599_v16 = vld [vmem:[%s2065_s6 + $0x110] ss:$8 sps:$4 sm:$0xff]   ;;  %v1602_v18 = vld [vmem:[%s2065_s6 + $0x124] ss:$8 sps:$4 sm:$0xff]   ;;  %v1605_v20 = vld [vmem:[%s2065_s6 + $0x120] ss:$8 sps:$4 sm:$0xff]  }
  0x6f   : > { %1069 = vmatprep.subr.bf16.mxu0 %v1596_v14  ;;  %v1606_v21 = vld [vmem:[%s2065_s6 + $0x34] ss:$8 sps:$4 sm:$0xff]   ;;  %v1610_v23 = vld [vmem:[%s2065_s6 + $0x30] ss:$8 sps:$4 sm:$0xff]   ;;  %v1612_v25 = vld [vmem:[%s2065_s6 + $0x44] ss:$8 sps:$4 sm:$0xff]  }
  0x70   : > { %v1608_v22 = vld [vmem:[%s2065_s6 + $0x134] ss:$8 sps:$4 sm:$0xff]   ;;  %v1611_v24 = vld [vmem:[%s2065_s6 + $0x130] ss:$8 sps:$4 sm:$0xff]   ;;  %v1614_v26 = vld [vmem:[%s2065_s6 + $0x144] ss:$8 sps:$4 sm:$0xff]  }
  0x71   : > { %1017 = vmatpush1.bf16.msra.mxu1 %v1598_v15  ;;  %v1616_v27 = vld [vmem:[%s2065_s6 + $0x40] ss:$8 sps:$4 sm:$0xff]   ;;  %v1618_v29 = vld [vmem:[%s2065_s6 + $0x54] ss:$8 sps:$4 sm:$0xff]   ;;  %v1622_v31 = vld [vmem:[%s2065_s6 + $0x50] ss:$8 sps:$4 sm:$0xff]  }
  0x72   : > { %1070 = vmatpush1.bf16.msra.mxu0 %v1599_v16  ;;  %1018 = vmatprep.subr.bf16.mxu1 %v1600_v17  ;;  %v1617_v28 = vld [vmem:[%s2065_s6 + $0x140] ss:$8 sps:$4 sm:$0xff]   ;;  %v1620_v30 = vld [vmem:[%s2065_s6 + $0x154] ss:$8 sps:$4 sm:$0xff]   ;;  %v1623_v32 = vld [vmem:[%s2065_s6 + $0x150] ss:$8 sps:$4 sm:$0xff]  }
  0x73   : > { %1071 = vmatprep.subr.bf16.mxu0 %v1602_v18  ;;  %v1624_v33 = vld [vmem:[%s2065_s6 + $0x64] ss:$8 sps:$4 sm:$0xff]   ;;  %v1628_v35 = vld [vmem:[%s2065_s6 + $0x60] ss:$8 sps:$4 sm:$0xff]   ;;  %v1630_v37 = vld [vmem:[%s2065_s6 + $0x74] ss:$8 sps:$4 sm:$0xff]  }
  0x74   : > { %v1626_v34 = vld [vmem:[%s2065_s6 + $0x164] ss:$8 sps:$4 sm:$0xff]   ;;  %v1629_v36 = vld [vmem:[%s2065_s6 + $0x160] ss:$8 sps:$4 sm:$0xff]   ;;  %v1632_v38 = vld [vmem:[%s2065_s6 + $0x174] ss:$8 sps:$4 sm:$0xff]  }
  0x75   : > { %1019 = vmatpush1.bf16.msra.mxu1 %v1604_v19  ;;  %v1634_v39 = vld [vmem:[%s2065_s6 + $0x70] ss:$8 sps:$4 sm:$0xff]   ;;  %v1636_v41 = vld [vmem:[%s2065_s6 + $0x84] ss:$8 sps:$4 sm:$0xff]   ;;  %v1640_v43 = vld [vmem:[%s2065_s6 + $0x80] ss:$8 sps:$4 sm:$0xff]  }
  0x76   : > { %1072 = vmatpush1.bf16.msra.mxu0 %v1605_v20  ;;  %1020 = vmatprep.subr.bf16.mxu1 %v1606_v21  ;;  %v1635_v40 = vld [vmem:[%s2065_s6 + $0x170] ss:$8 sps:$4 sm:$0xff]   ;;  %v1638_v42 = vld [vmem:[%s2065_s6 + $0x184] ss:$8 sps:$4 sm:$0xff]   ;;  %v1641_v44 = vld [vmem:[%s2065_s6 + $0x180] ss:$8 sps:$4 sm:$0xff]  }
  0x77   : > { %1073 = vmatprep.subr.bf16.mxu0 %v1608_v22  ;;  %v1642_v45 = vld [vmem:[%s2065_s6 + $0x94] ss:$8 sps:$4 sm:$0xff]   ;;  %v1646_v47 = vld [vmem:[%s2065_s6 + $0x90] ss:$8 sps:$4 sm:$0xff]   ;;  %v1648_v49 = vld [vmem:[%s2065_s6 + $0xa4] ss:$8 sps:$4 sm:$0xff]  }
  0x78   : > { %v1644_v46 = vld [vmem:[%s2065_s6 + $0x194] ss:$8 sps:$4 sm:$0xff]   ;;  %v1647_v48 = vld [vmem:[%s2065_s6 + $0x190] ss:$8 sps:$4 sm:$0xff]   ;;  %v1650_v50 = vld [vmem:[%s2065_s6 + $0x1a4] ss:$8 sps:$4 sm:$0xff]  }
  0x79   : > { %1021 = vmatpush1.bf16.msra.mxu1 %v1610_v23  ;;  %v1652_v51 = vld [vmem:[%s2065_s6 + $0xa0] ss:$8 sps:$4 sm:$0xff]   ;;  %v1654_v53 = vld [vmem:[%s2065_s6 + $0xb4] ss:$8 sps:$4 sm:$0xff]   ;;  %v1658_v55 = vld [vmem:[%s2065_s6 + $0xb0] ss:$8 sps:$4 sm:$0xff]  }
  0x7a   : > { %1074 = vmatpush1.bf16.msra.mxu0 %v1611_v24  ;;  %1022 = vmatprep.subr.bf16.mxu1 %v1612_v25  ;;  %v1653_v52 = vld [vmem:[%s2065_s6 + $0x1a0] ss:$8 sps:$4 sm:$0xff]   ;;  %v1656_v54 = vld [vmem:[%s2065_s6 + $0x1b4] ss:$8 sps:$4 sm:$0xff]   ;;  %v1659_v56 = vld [vmem:[%s2065_s6 + $0x1b0] ss:$8 sps:$4 sm:$0xff]  }
  0x7b   : > { %1075 = vmatprep.subr.bf16.mxu0 %v1614_v26  ;;  %v1660_v57 = vld [vmem:[%s2065_s6 + $0xc4] ss:$8 sps:$4 sm:$0xff]   ;;  %v1664_v61 = vld [vmem:[%s2065_s6 + $0xc0] ss:$8 sps:$4 sm:$0xff]   ;;  %v1666_v63 = vld [vmem:[%s2065_s6 + $0xd4] ss:$8 sps:$4 sm:$0xff]  }
  0x7c   : > { %v1686_v58 = vld [vmem:[%s2063_s4 + $0x4] ss:$16 sps:$4 sm:$0xff]   ;;  %v1689_v60 = vld [vmem:[%s2063_s4 + $0xc] ss:$16 sps:$4 sm:$0xff]   ;;  %v1665_v62 = vld [vmem:[%s2065_s6 + $0x1c0] ss:$8 sps:$4 sm:$0xff]  }
  0x7d   : > { %1023 = vmatpush1.bf16.msra.mxu1 %v1616_v27  ;;  %v1662_v59 = vld [vmem:[%s2065_s6 + $0x1c4] ss:$8 sps:$4 sm:$0xff]   ;;  %1046 = vmatprep.mubr.bf16.mxu1 %v1686_v58  ;;  %v1668_v0 = vld [vmem:[%s2065_s6 + $0x1d4] ss:$8 sps:$4 sm:$0xff]   ;;  %v1670_v1 = vld [vmem:[%s2065_s6 + $0xd0] ss:$8 sps:$4 sm:$0xff]  }
  0x7e   : > { %1076 = vmatpush1.bf16.msra.mxu0 %v1617_v28  ;;  %1024 = vmatprep.subr.bf16.mxu1 %v1618_v29  ;;  %v1671_v2 = vld [vmem:[%s2065_s6 + $0x1d0] ss:$8 sps:$4 sm:$0xff]   ;;  %v1672_v3 = vld [vmem:[%s2065_s6 + $0xe4] ss:$8 sps:$4 sm:$0xff]   ;;  %v1676_v5 = vld [vmem:[%s2065_s6 + $0xe0] ss:$8 sps:$4 sm:$0xff]  }
  0x7f   : > { %1077 = vmatprep.subr.bf16.mxu0 %v1620_v30  ;;  %1099 = vmatprep.mubr.bf16.mxu0 %v1689_v60  ;;  %v1674_v4 = vld [vmem:[%s2065_s6 + $0x1e4] ss:$8 sps:$4 sm:$0xff]   ;;  %v1677_v6 = vld [vmem:[%s2065_s6 + $0x1e0] ss:$8 sps:$4 sm:$0xff]   ;;  %v1678_v7 = vld [vmem:[%s2065_s6 + $0xf4] ss:$8 sps:$4 sm:$0xff]  }
  0x80   : > { %v1680_v8 = vld [vmem:[%s2065_s6 + $0x1f4] ss:$8 sps:$4 sm:$0xff]   ;;  %v1682_v9 = vld [vmem:[%s2065_s6 + $0xf0] ss:$8 sps:$4 sm:$0xff]   ;;  %v574_v18 = vld [vmem:[#allocation2] sm:$0xff]  ;;  %p1474_p5 = scmp.ne.s32.totalorder %s1766_s18, 7 }
  0x81   : > { %1025 = vmatpush1.bf16.msra.mxu1 %v1622_v31  ;;  %v1683_v10 = vld [vmem:[%s2065_s6 + $0x1f0] ss:$8 sps:$4 sm:$0xff]   ;;  %v1690_v13 = vld [vmem:[%s2063_s4 + $0x24] ss:$16 sps:$4 sm:$0xff]   ;;  %v1692_v14 = vld [vmem:[%s2063_s4 + $0x2c] ss:$16 sps:$4 sm:$0xff]  }
  0x82   : > { %1078 = vmatpush1.bf16.msra.mxu0 %v1623_v32  ;;  %1026 = vmatprep.subr.bf16.mxu1 %v1624_v33  ;;  %v1684_v11 = vld [vmem:[%s2063_s4] ss:$16 sps:$4 sm:$0xff]   ;;  %v1687_v12 = vld [vmem:[%s2063_s4 + $0x8] ss:$16 sps:$4 sm:$0xff]  }
  0x83   : > { %1079 = vmatprep.subr.bf16.mxu0 %v1626_v34  ;;  %v1694_v15 = vld [vmem:[%s2063_s4 + $0x20] ss:$16 sps:$4 sm:$0xff]   ;;  %v1695_v16 = vld [vmem:[%s2063_s4 + $0x28] ss:$16 sps:$4 sm:$0xff]  }
  0x84   : > { %v575_v22 = vld [vmem:[#allocation2 + $0x8] sm:$0xff]  ;;  %v576_v26 = vld [vmem:[#allocation2 + $0x10] sm:$0xff]  ;;  %v577_v31 = vld [vmem:[#allocation2 + $0x18] sm:$0xff] }
  0x85   : > { %1027 = vmatpush1.bf16.msra.mxu1 %v1628_v35 }
  0x86   : > { %1080 = vmatpush1.bf16.msra.mxu0 %v1629_v36  ;;  %1028 = vmatprep.subr.bf16.mxu1 %v1630_v37 }
  0x87   : > { %1081 = vmatprep.subr.bf16.mxu0 %v1632_v38  ;;  %v578_v38 = vld [vmem:[#allocation2 + $0x20] sm:$0xff] }
  0x89   : > { %1029 = vmatpush1.bf16.msra.mxu1 %v1634_v39 }
  0x8a   : > { %1082 = vmatpush1.bf16.msra.mxu0 %v1635_v40  ;;  %1030 = vmatprep.subr.bf16.mxu1 %v1636_v41 }
  0x8b   : > { %1083 = vmatprep.subr.bf16.mxu0 %v1638_v42  ;;  %v579_v42 = vld [vmem:[#allocation2 + $0x28] sm:$0xff] }
  0x8d   : > { %1031 = vmatpush1.bf16.msra.mxu1 %v1640_v43 }
  0x8e   : > { %1084 = vmatpush1.bf16.msra.mxu0 %v1641_v44  ;;  %1032 = vmatprep.subr.bf16.mxu1 %v1642_v45 }
  0x8f   : > { %1085 = vmatprep.subr.bf16.mxu0 %v1644_v46  ;;  %v580_v46 = vld [vmem:[#allocation2 + $0x30] sm:$0xff] }
  0x91   : > { %1033 = vmatpush1.bf16.msra.mxu1 %v1646_v47 }
  0x92   : > { %1086 = vmatpush1.bf16.msra.mxu0 %v1647_v48  ;;  %1034 = vmatprep.subr.bf16.mxu1 %v1648_v49 }
  0x93   : > { %1087 = vmatprep.subr.bf16.mxu0 %v1650_v50 }
  0x95   : > { %1035 = vmatpush1.bf16.msra.mxu1 %v1652_v51  ;;  %v581_v51 = vld [vmem:[#allocation2 + $0x38] sm:$0xff] }
  0x96   : > { %1088 = vmatpush1.bf16.msra.mxu0 %v1653_v52  ;;  %1036 = vmatprep.subr.bf16.mxu1 %v1654_v53 }
  0x97   : > { %1089 = vmatprep.subr.bf16.mxu0 %v1656_v54 }
  0x99   : > { %1037 = vmatpush1.bf16.msra.mxu1 %v1658_v55 }
  0x9a   : > { %1090 = vmatpush1.bf16.msra.mxu0 %v1659_v56  ;;  %1038 = vmatprep.subr.bf16.mxu1 %v1660_v57  ;;  %v1150_v57 = vlaneseq (!%p1474_p5) }
  0x9b   : > { %1091 = vmatprep.subr.bf16.mxu0 %v1662_v59  ;;  %v1148_v59 = vld [vmem:[%s558_s29] sm:$0x3] (!%p1474_p5) }
  0x9c   : > { %v1151_v58 = vshrl.u32 (!%p1474_p5), %v1150_v57, 7 }
  0x9d   : > { %1039 = vmatpush1.bf16.msra.mxu1 %v1664_v61 }
  0x9e   : > { %1092 = vmatpush1.bf16.msra.mxu0 %v1665_v62  ;;  %1040 = vmatprep.subr.bf16.mxu1 %v1666_v63  ;;  %v1152_v62 = vsub.s32 (!%p1474_p5), 0, %v1151_v58  ;;  %v1156_v63 = vsub.s32 (!%p1474_p5), 1, %v1151_v58 }
  0x9f   : > { %1093 = vmatprep.subr.bf16.mxu0 %v1668_v0 }
  0xa1   : > { %1041 = vmatpush1.bf16.msra.mxu1 %v1670_v1 }
  0xa2   : > { %1094 = vmatpush1.bf16.msra.mxu0 %v1671_v2  ;;  %1042 = vmatprep.subr.bf16.mxu1 %v1672_v3  ;;  %v1153_v3 = vrot.slane (!%p1474_p5), %v1148_v59, %v1152_v62 }
  0xa3   : > { %1095 = vmatprep.subr.bf16.mxu0 %v1674_v4  ;;  %v1157_v4 = vrot.slane (!%p1474_p5), %v1148_v59, %v1156_v63 }
  0xa5   : > { %1043 = vmatpush1.bf16.msra.mxu1 %v1676_v5 }
  0xa6   : > { %1096 = vmatpush1.bf16.msra.mxu0 %v1677_v6  ;;  %1044 = vmatprep.subr.bf16.mxu1 %v1678_v7 }
  0xa7   : > { %1097 = vmatprep.subr.bf16.mxu0 %v1680_v8 }
  0xa9   : > { %1045 = vmatpush1.bf16.msra.mxu1 %v1682_v9 }
  0xaa   : > { %1098 = vmatpush1.bf16.msra.mxu0 %v1683_v10 }
  0xac   : > { %1047 = vmatmul.mubr.bf16.vlgmr.msra.gmra.mrb[0].mxu1 %v1684_v11 }
  0xad   : > { %1100 = vmatmul.mubr.bf16.vlgmr.msra.gmra.mrb[0].mxu0 %v1687_v12  ;;  %1056 = vmatprep.mubr.bf16.mxu1 %v1690_v13 }
  0xae   : > { %1109 = vmatprep.mubr.bf16.mxu0 %v1692_v14 }
  0xb4   : > { %1057 = vmatmul.mubr.bf16.gmra.mrb[4].mxu1 %v1694_v15 }
  0xb5   : > { %1110 = vmatmul.mubr.bf16.gmra.mrb[4].mxu0 %v1695_v16 }
 0x17f   : > { %v1048_v17 = vpop.f32.mrb[0].mxu1 }
 0x180   : > { %v1101_v19 = vpop.f32.mrb[0].mxu0  ;;  %v1050_v21 = vpop.f32.mrb[1].mxu1 }
 0x181   : > { %v1102_v20 = vadd.f32 %v1101_v19, %v1048_v17  ;;  %v1103_v23 = vpop.f32.mrb[1].mxu0  ;;  %v1052_v25 = vpop.f32.mrb[2].mxu1 }
 0x182   : > { %v1104_v24 = vadd.f32 %v1103_v23, %v1050_v21  ;;  %v1105_v27 = vpop.f32.mrb[2].mxu0  ;;  %v1054_v30 = vpop.f32.mrb[3].mxu1 }
 0x183   : > { %v1120_v28 = vadd.f32 %v1102_v20, %v574_v18  ;;  %v1106_v29 = vadd.f32 %v1105_v27, %v1052_v25  ;;  %v1107_v32 = vpop.f32.mrb[3].mxu0 }
 0x184   : > { %v1121_v33 = vadd.f32 %v1104_v24, %v575_v22  ;;  %v1108_v34 = vadd.f32 %v1107_v32, %v1054_v30 }
 0x185   : > { %1128 = vst [vmem:[#allocation2] sm:$0xff] %v1120_v28  ;;  %v1122_v35 = vadd.f32 %v1106_v29, %v576_v26 }
 0x186   : > { %1129 = vst [vmem:[#allocation2 + $0x8] sm:$0xff] %v1121_v33  ;;  %v1123_v36 = vadd.f32 %v1108_v34, %v577_v31 }
 0x187   : > { %1130 = vst [vmem:[#allocation2 + $0x10] sm:$0xff] %v1122_v35  ;;  %v1058_v37 = vpop.f32.mrb[4].mxu1 }
 0x188   : > { %1131 = vst [vmem:[#allocation2 + $0x18] sm:$0xff] %v1123_v36  ;;  %v1111_v39 = vpop.f32.mrb[4].mxu0  ;;  %v1060_v41 = vpop.f32.mrb[5].mxu1 }
 0x189   : > { %v1112_v40 = vadd.f32 %v1111_v39, %v1058_v37  ;;  %v1113_v43 = vpop.f32.mrb[5].mxu0  ;;  %v1062_v45 = vpop.f32.mrb[6].mxu1 }
 0x18a   : > { %v1114_v44 = vadd.f32 %v1113_v43, %v1060_v41  ;;  %v1115_v47 = vpop.f32.mrb[6].mxu0  ;;  %v1064_v50 = vpop.f32.mrb[7].mxu1  ;;  %1139 = sbr.rel (%p1474_p5) target bundleno = 416 (0x1a0), region = 101 }
 0x18b   : > { %v1124_v48 = vadd.f32 %v1112_v40, %v578_v38  ;;  %v1116_v49 = vadd.f32 %v1115_v47, %v1062_v45  ;;  %v1117_v52 = vpop.f32.mrb[7].mxu0 }
 0x18c   : > { %v1125_v53 = vadd.f32 %v1114_v44, %v579_v42  ;;  %v1118_v54 = vadd.f32 %v1117_v52, %v1064_v50  ;;  %v1140_v60 = vld [vmem:[#allocation2] sm:$0xff] (!%p1474_p5) }
 0x18d   : > { %1132 = vst [vmem:[#allocation2 + $0x20] sm:$0xff] %v1124_v48  ;;  %v1126_v55 = vadd.f32 %v1116_v49, %v580_v46  ;;  %v1141_v61 = vld [vmem:[#allocation2 + $0x8] sm:$0xff] (!%p1474_p5)  ;;  %v1160_v8 = vadd.f32 (!%p1474_p5), %v1153_v3, %v1140_v60 }
 0x18e   : > { %1133 = vst [vmem:[#allocation2 + $0x28] sm:$0xff] %v1125_v53  ;;  %v1127_v56 = vadd.f32 %v1118_v54, %v581_v51  ;;  %v1142_v0 = vld [vmem:[#allocation2 + $0x10] sm:$0xff] (!%p1474_p5)  ;;  %v1161_v9 = vadd.f32 (!%p1474_p5), %v1157_v4, %v1141_v61 }
 0x18f   : > { %1134 = vst [vmem:[#allocation2 + $0x30] sm:$0xff] %v1126_v55  ;;  %v1143_v1 = vld [vmem:[#allocation2 + $0x18] sm:$0xff] (!%p1474_p5)  ;;  %v1162_v10 = vadd.f32 (!%p1474_p5), %v1153_v3, %v1142_v0  ;;  %vm1168_vm0 = vcmp.ge.f32.partialorder (!%p1474_p5), %v1160_v8, 0.0  ;;  %v1176_v16 = vmul.f32 (!%p1474_p5), 0.2, %v1160_v8 }
 0x190   : > { %1135 = vst [vmem:[#allocation2 + $0x38] sm:$0xff] %v1127_v56  ;;  %v1163_v11 = vadd.f32 (!%p1474_p5), %v1157_v4, %v1143_v1  ;;  %vm1169_vm1 = vcmp.ge.f32.partialorder (!%p1474_p5), %v1161_v9, 0.0  ;;  %v1177_v17 = vmul.f32 (!%p1474_p5), 0.2, %v1161_v9 }
 0x191   : > { %vm1170_vm2 = vcmp.ge.f32.partialorder %v1162_v10, 0.0  ;;  %v1178_v18 = vmul.f32 0.2, %v1162_v10  ;;  %v1184_v20 = vsel %vm1168_vm0, %v1160_v8, %v1176_v16 }
 0x192   : > { %vm1171_vm3 = vcmp.ge.f32.partialorder %v1163_v11, 0.0  ;;  %v1179_v19 = vmul.f32 0.2, %v1163_v11  ;;  %v1185_v21 = vsel %vm1169_vm1, %v1161_v9, %v1177_v17 }
 0x193   : > { %v1486_v22 = vpack.c.bf16 %v1185_v21, %v1184_v20  ;;  %v1186_v23 = vsel %vm1170_vm2, %v1162_v10, %v1178_v18 }
 0x194   : > { %v1144_v2 = vld [vmem:[#allocation2 + $0x20] sm:$0xff]  ;;  %v1187_v24 = vsel %vm1171_vm3, %v1163_v11, %v1179_v19 }
 0x195   : > { %v1145_v5 = vld [vmem:[#allocation2 + $0x28] sm:$0xff]  ;;  %v1164_v12 = vadd.f32 %v1153_v3, %v1144_v2  ;;  %v1487_v26 = vpack.c.bf16 %v1187_v24, %v1186_v23  ;;  %1216 = vst [vmem:[%s2067_s1] sm:$0xff] %v1486_v22 }
 0x196   : > { %v1146_v6 = vld [vmem:[#allocation2 + $0x30] sm:$0xff]  ;;  %v1165_v13 = vadd.f32 %v1157_v4, %v1145_v5 }
 0x197   : > { %v1147_v7 = vld [vmem:[#allocation2 + $0x38] sm:$0xff]  ;;  %v1166_v14 = vadd.f32 %v1153_v3, %v1146_v6  ;;  %vm1172_vm4 = vcmp.ge.f32.partialorder %v1164_v12, 0.0  ;;  %v1180_v25 = vmul.f32 0.2, %v1164_v12  ;;  %1217 = vst [vmem:[%s2067_s1 + $0x8] sm:$0xff] %v1487_v26 }
 0x198   : > { %v1167_v15 = vadd.f32 %v1157_v4, %v1147_v7  ;;  %vm1173_vm5 = vcmp.ge.f32.partialorder %v1165_v13, 0.0  ;;  %v1181_v27 = vmul.f32 0.2, %v1165_v13 }
 0x199   : > { %vm1174_vm6 = vcmp.ge.f32.partialorder %v1166_v14, 0.0  ;;  %v1188_v28 = vsel %vm1172_vm4, %v1164_v12, %v1180_v25  ;;  %v1182_v29 = vmul.f32 0.2, %v1166_v14 }
 0x19a   : > { %vm1175_vm7 = vcmp.ge.f32.partialorder %v1167_v15, 0.0  ;;  %v1183_v30 = vmul.f32 0.2, %v1167_v15  ;;  %v1189_v31 = vsel %vm1173_vm5, %v1165_v13, %v1181_v27 }
 0x19b   : > { %v1488_v32 = vpack.c.bf16 %v1189_v31, %v1188_v28  ;;  %v1190_v33 = vsel %vm1174_vm6, %v1166_v14, %v1182_v29 }
 0x19c   : > { %v1191_v34 = vsel %vm1175_vm7, %v1167_v15, %v1183_v30 }
 0x19d   : > { %v1489_v35 = vpack.c.bf16 %v1191_v34, %v1190_v33  ;;  %1218 = vst [vmem:[%s2067_s1 + $0x10] sm:$0xff] %v1488_v32 }
 0x19f   : > { %1219 = vst [vmem:[%s2067_s1 + $0x18] sm:$0xff] %v1489_v35 }
 0x1a0 PF: > { %1226 = sbr.rel (!%p1899_p12) target bundleno = 424 (0x1a8), region = 105  ;;  %s1490_s16 = sshll.u32 (%p1899_p12), %s1770_s19, 3  ;;  %v1266_v36 = vld [vmem:[%s2067_s1] sm:$0xff] (%p1899_p12)  ;;  %v1268_v37 = vld [vmem:[%s2067_s1 + $0x8] sm:$0xff] (%p1899_p12) }
 0x1a1   : > { %s1232_s5 = scalar_lea.vmem (%p1899_p12), %s2198_s3, %s1490_s16 }
 0x1a2   : > { %1267 = vst [vmem:[%s1232_s5] sm:$0xff] (%p1899_p12), %v1266_v36  ;;  %1269 = vst [vmem:[%s1232_s5 + $0x10] sm:$0xff] (%p1899_p12), %v1268_v37 }
 0x1a4   : > { %v1270_v38 = vld [vmem:[%s2067_s1 + $0x10] sm:$0xff] (%p1899_p12) }
 0x1a5   : > { %1271 = vst [vmem:[%s1232_s5 + $0x20] sm:$0xff] (%p1899_p12), %v1270_v38 }
 0x1a6   : > { %v1272_v39 = vld [vmem:[%s2067_s1 + $0x18] sm:$0xff] (%p1899_p12) }
 0x1a7   : > { %1273 = vst [vmem:[%s1232_s5 + $0x30] sm:$0xff] %v1272_v39 }
 0x1a8 PF: > { %s13_s22 = sadd.s32 1, %s1782_s22   ;;  %s2208_s10 = sld [smem:[#allocation6_spill]] }
 0x1a9   : > { %p10_p6 = scmp.ge.s32.totalorder %s13_s22, 18   ;;  %s2209_s12 = smov %s1746_s13 }
 0x1aa   : > { %s2210_s13 = smov %s1897_s9  ;;  %s2211_s14 = smov %s1754_s15 }
 0x1ab   : > { %s2212_s15 = smov %s1894_s8  ;;  %s2213_s16 = smov %s1762_s17 }
 0x1ac   : > { %s2214_s17 = smov %s1880_s30  ;;  %s2215_s18 = smov %s1774_s20 }
 0x1ad   : > { %s2216_s19 = smov %s1778_s21  ;;  %s2217_s20 = smov %s2220_s24 }
 0x1ae   : > { %s2218_s21 = smov %s2208_s10  ;;  %12 = sbr.rel (!%p10_p6) target bundleno = 9 (0x9), region = 185 }

// kernel: discriminator_forward.9
= control target key start
LH: loop header
LB: loop body
LE: loop exit
PB: predicated region body
PF: predicated region fallthrough
CT: control target
= control target key end

     0   :  { %s959_s14 = smov 0   ;;  %s961_s15 = smov 0   ;;  %s1043_s0 = inlined_call_operand.vmem [shape: bf16[2,8192], index: 0, kind: input, shape index: {}]   ;;  %s1044_s1 = inlined_call_operand.vmem [shape: bf16[8192,1], index: 1, kind: input, shape index: {}]   ;;  %s1045_s2 = inlined_call_operand.<no memory space> [shape: f32[1,1], index: 2, kind: input, shape index: {}]   ;;  %s1046_s3 = inlined_call_operand.vmem [shape: f32[2,1], index: 3, kind: output, shape index: {}]  }
   0x1   :  { %v8_v0 = vstv %s1045_s2  ;;  %s963_s16 = smov 0  }
   0x2   :  { %9 = vst [vmem:[#allocation3] sm:$0x1] %v8_v0 }
   0x3 LB: > { %s27_s2 = sadd.s32 1, %s928_s15  ;;  %p761_p0 = scmp.ge.s32.totalorder %s932_s16, 1  ;;  %s932_s16 = sphi %s963_s16, %s15_s16   ;;  %s928_s15 = sphi %s961_s15, %s1048_s15   ;;  %s924_s14 = sphi %s959_s14, %s1047_s14  }
   0x4   : > { %p28_p1 = scmp.ge.s32.totalorder %s27_s2, 16  ;;  %p190_p2 = scmp.lt.s32.totalorder %s932_s16, 17 }
   0x6   : > { %s1050_s2 = smov (%p28_p1, %s27_s2), 0  ;;  %p191_p3 = pnand %p761_p0, %p190_p2 }
   0x7   : > { %s762_s17 = sshll.u32 (!%p191_p3), %s924_s14, 2  ;;  %s763_s18 = sshll.u32 (!%p191_p3), %s924_s14, 6 }
   0x8   : > { %194 = sbr.rel (%p191_p3) target bundleno = 317 (0x13d), region = 32  ;;  %p233_p4 = scmp.lt.s32.totalorder (!%p191_p3), %s762_s17, 63 }
   0x9   : > { %p240_p5 = scmp.lt.s32.totalorder (!%p191_p3), %s763_s18, 1023  ;;  %p765_p6 = scmp.ne.s32.totalorder (!%p191_p3), %s924_s14, 0 }
   0xf   : > { %s1052_s17 = smov (!%p233_p4, %s762_s17), 63  ;;  %s1054_s18 = smov (!%p240_p5, %s763_s18), 1023 }
  0x10   : > { %s237_s21 = scalar_lea.vmem %s1043_s0, %s1052_s17  ;;  %s764_s22 = sshll.u32 %s1054_s18, 2  ;;  %vm263_vm0 = vcmask (!%p765_p6), 1024   ;;  %v934_v1 = vmov (!%p765_p6), 0.0  }
  0x11   : > { %s990_s25 = scalar_lea.vmem %s1044_s1, %s764_s22  ;;  %262 = sbr.rel (%p765_p6) target bundleno = 24 (0x18), region = 36  ;;  %264 = vst.msk [vmem:[#allocation2] sm:$0x3] (!%p765_p6), %vm263_vm0, %v934_v1 }
  0x18 PF: > { %v874_v2 = vld [vmem:[%s990_s25 + $0x40] sm:$0xff]   ;;  %v878_v6 = vld [vmem:[%s990_s25 + $0x48] sm:$0xff]   ;;  %v882_v10 = vld [vmem:[%s990_s25 + $0x50] sm:$0xff]   ;;  %v343_v32 = vlaneseq  ;;  %v935_v36 = vmov 1966171168   ;;  %vm633_vm1 = vcmask 1024  }
  0x19   : > { %v875_v3 = vld [vmem:[%s990_s25 + $0xc0] sm:$0xff]   ;;  %804 = vmatprep.subr.bf16.mxu0 %v874_v2  ;;  %v879_v7 = vld [vmem:[%s990_s25 + $0xc8] sm:$0xff]   ;;  %v883_v11 = vld [vmem:[%s990_s25 + $0xd0] sm:$0xff]   ;;  %v341_v37 = vunpack.c.l.s4 %v935_v36  ;;  %p799_p7 = scmp.ne.s32.totalorder %s924_s14, 15 }
  0x1a   : > { %v876_v4 = vld [vmem:[%s990_s25] sm:$0xff]   ;;  %826 = vmatprep.subr.bf16.mxu1 %v875_v3  ;;  %v880_v8 = vld [vmem:[%s990_s25 + $0x8] sm:$0xff]   ;;  %v884_v12 = vld [vmem:[%s990_s25 + $0x10] sm:$0xff]   ;;  %v344_v38 = vshrl.u32 %v343_v32, 7 }
  0x1b   : > { %v877_v5 = vld [vmem:[%s990_s25 + $0x80] sm:$0xff]   ;;  %805 = vmatpush3.bf16.msra.mxu0 %v876_v4  ;;  %v881_v9 = vld [vmem:[%s990_s25 + $0x88] sm:$0xff]   ;;  %v885_v13 = vld [vmem:[%s990_s25 + $0x90] sm:$0xff]   ;;  %v342_v40 = vunpack.c.0.s8 %v341_v37 }
  0x1c   : > { %827 = vmatpush3.bf16.msra.mxu1 %v877_v5  ;;  %806 = vmatprep.subr.bf16.mxu0 %v878_v6  ;;  %v886_v14 = vld [vmem:[%s990_s25 + $0x58] sm:$0xff]   ;;  %v890_v18 = vld [vmem:[%s990_s25 + $0x60] sm:$0xff]   ;;  %v894_v22 = vld [vmem:[%s990_s25 + $0x68] sm:$0xff]  }
  0x1d   : > { %828 = vmatprep.subr.bf16.mxu1 %v879_v7  ;;  %v887_v15 = vld [vmem:[%s990_s25 + $0xd8] sm:$0xff]   ;;  %v891_v19 = vld [vmem:[%s990_s25 + $0xe0] sm:$0xff]   ;;  %v895_v23 = vld [vmem:[%s990_s25 + $0xe8] sm:$0xff]   ;;  %v345_v41 = vsub.s32 %v342_v40, %v344_v38 }
  0x1e   : > { %v888_v16 = vld [vmem:[%s990_s25 + $0x18] sm:$0xff]   ;;  %v892_v20 = vld [vmem:[%s990_s25 + $0x20] sm:$0xff]   ;;  %v896_v24 = vld [vmem:[%s990_s25 + $0x28] sm:$0xff]  }
  0x1f   : > { %807 = vmatpush3.bf16.msra.mxu0 %v880_v8  ;;  %v889_v17 = vld [vmem:[%s990_s25 + $0x98] sm:$0xff]   ;;  %v893_v21 = vld [vmem:[%s990_s25 + $0xa0] sm:$0xff]   ;;  %v897_v25 = vld [vmem:[%s990_s25 + $0xa8] sm:$0xff]  }
  0x20   : > { %829 = vmatpush3.bf16.msra.mxu1 %v881_v9  ;;  %808 = vmatprep.subr.bf16.mxu0 %v882_v10  ;;  %v898_v26 = vld [vmem:[%s990_s25 + $0x70] sm:$0xff]   ;;  %v902_v30 = vld [vmem:[%s990_s25 + $0x78] sm:$0xff]   ;;  %v766_v35 = vld.sshfl [vmem:[%s237_s21] sm:$0x33 pattern:$0x75316420] }
  0x21   : > { %830 = vmatprep.subr.bf16.mxu1 %v883_v11  ;;  %v899_v27 = vld [vmem:[%s990_s25 + $0xf0] sm:$0xff]   ;;  %v903_v31 = vld [vmem:[%s990_s25 + $0xf8] sm:$0xff]   ;;  %v339_v39 = vcombine.high %v766_v35, %v766_v35  ;;  %v346_v43 = vrot.slane %v766_v35, %v345_v41  ;;  %v265_v55 = vld [vmem:[#allocation2] sm:$0x3] }
  0x22   : > { %v900_v28 = vld [vmem:[%s990_s25 + $0x30] sm:$0xff]   ;;  %v904_v33 = vld [vmem:[%s990_s25 + $0x38] sm:$0xff]   ;;  %v800_v60 = vld [vmem:[#allocation3] ss:$0 sm:$0xff] (!%p799_p7) }
  0x23   : > { %809 = vmatpush3.bf16.msra.mxu0 %v884_v12  ;;  %v901_v29 = vld [vmem:[%s990_s25 + $0xb0] sm:$0xff]   ;;  %v905_v34 = vld [vmem:[%s990_s25 + $0xb8] sm:$0xff]   ;;  %v353_v42 = vrot.slane %v339_v39, %v345_v41  ;;  %v354_v45 = vcombine.high %v346_v43, %v346_v43 }
  0x24   : > { %831 = vmatpush3.bf16.msra.mxu1 %v885_v13  ;;  %810 = vmatprep.subr.bf16.mxu0 %v886_v14 }
  0x25   : > { %832 = vmatprep.subr.bf16.mxu1 %v887_v15  ;;  %584 = vmatprep.mubr.bf16.mxu0 %v353_v42  ;;  %v355_v44 = vcombine.high %v353_v42, %v353_v42 }
  0x27   : > { %811 = vmatpush3.bf16.msra.mxu0 %v888_v16  ;;  %624 = vmatprep.mubr.bf16.mxu1 %v355_v44 }
  0x28   : > { %833 = vmatpush3.bf16.msra.mxu1 %v889_v17  ;;  %812 = vmatprep.subr.bf16.mxu0 %v890_v18 }
  0x29   : > { %834 = vmatprep.subr.bf16.mxu1 %v891_v19 }
  0x2b   : > { %813 = vmatpush3.bf16.msra.mxu0 %v892_v20 }
  0x2c   : > { %835 = vmatpush3.bf16.msra.mxu1 %v893_v21  ;;  %814 = vmatprep.subr.bf16.mxu0 %v894_v22 }
  0x2d   : > { %836 = vmatprep.subr.bf16.mxu1 %v895_v23 }
  0x2f   : > { %815 = vmatpush3.bf16.msra.mxu0 %v896_v24 }
  0x30   : > { %837 = vmatpush3.bf16.msra.mxu1 %v897_v25  ;;  %816 = vmatprep.subr.bf16.mxu0 %v898_v26 }
  0x31   : > { %838 = vmatprep.subr.bf16.mxu1 %v899_v27 }
  0x33   : > { %817 = vmatpush3.bf16.msra.mxu0 %v900_v28 }
  0x34   : > { %839 = vmatpush3.bf16.msra.mxu1 %v901_v29  ;;  %818 = vmatprep.subr.bf16.mxu0 %v902_v30 }
  0x35   : > { %840 = vmatprep.subr.bf16.mxu1 %v903_v31 }
  0x37   : > { %819 = vmatpush3.bf16.msra.mxu0 %v904_v33 }
  0x38   : > { %841 = vmatpush3.bf16.msra.mxu1 %v905_v34 }
  0x3a   : > { %585 = vmatmul.mubr.bf16.vlgmr.msra.gmra.mrb[0].mxu0 %v346_v43 }
  0x3b   : > { %625 = vmatmul.mubr.bf16.vlgmr.msra.gmra.mrb[0].mxu1 %v354_v45 }
 0x10d   : > { %v820_v46 = vpop.f32.mrb[0].mxu0 }
 0x10e   : > { %v821_v47 = vpop.f32.mrb[1].mxu0  ;;  %v842_v48 = vpop.f32.mrb[0].mxu1 }
 0x10f   : > { %v822_v49 = vadd.f32 %v821_v47, %v820_v46  ;;  %v823_v50 = vpop.f32.mrb[2].mxu0  ;;  %v843_v51 = vpop.f32.mrb[1].mxu1 }
 0x110   : > { %v824_v52 = vpop.f32.mrb[3].mxu0  ;;  %v844_v53 = vadd.f32 %v843_v51, %v842_v48  ;;  %v845_v54 = vpop.f32.mrb[2].mxu1  ;;  %638 = sbr.rel (%p799_p7) target bundleno = 317 (0x13d), region = 40 }
 0x111   : > { %v846_v56 = vpop.f32.mrb[3].mxu1 }
 0x112   : > { %v627_v57 = vadd.f32 %v844_v53, %v822_v49 }
 0x114   : > { %v632_v58 = vadd.f32 %v627_v57, %v265_v55 }
 0x116   : > { %634 = vst.msk [vmem:[#allocation2] sm:$0x3] %vm633_vm1, %v632_v58 }
 0x11d   : > { %v639_v59 = vld [vmem:[#allocation2] sm:$0x3] }
 0x11e   : > { %v647_v61 = vadd.f32 %v800_v60, %v639_v59 }
 0x120   : > { %v648_v62 = vsub.f32 0.0, %v647_v61 }
 0x122   : > { %v649_v63 = vmul.f32 1.442695, %v648_v62 }
 0x124   : > { %906 = vpow2.f32 %v649_v63 }
 0x12e   : > { %v907_v0 = vpop.eup %906 }
 0x12f   : > { %v651_v1 = vadd.f32 1.0, %v907_v0 }
 0x131   : > { %908 = vrcp.f32 %v651_v1 }
 0x13b   : > { %v909_v2 = vpop.eup %908 }
 0x13c   : > { %654 = vst.msk [vmem:[%s1046_s3] sm:$0x3] %vm633_vm1, %v909_v2 }
 0x13d PF: > { %s15_s16 = sadd.s32 1, %s932_s16   ;;  %s1047_s14 = smov %s928_s15 }
 0x13e   : > { %p12_p8 = scmp.ge.s32.totalorder %s15_s16, 18   ;;  %s1048_s15 = smov %s1050_s2 }
 0x140   :  { %14 = sbr.rel (!%p12_p8) target bundleno = 3 (0x3), region = 76 }

</bundles_post_ra>
